<compile_context>
chip_gen: v6e
topology: v6e:2x2x1
jax: 0.10.0
libtpu: 0.0.40
codegen_flags: <defaults>
</compile_context>

<pallas_src>
import functools
import math

import jax
import jax.numpy as jnp
from jax.experimental import pallas as pl
from jax.experimental.pallas import tpu as pltpu

NEG_SLOPE = 0.2
BN_EPS = 1e-5
F32 = jnp.float32
BF16 = jnp.bfloat16

N_PARTS = 5      # Torso, LArm, RArm, LLeg, RLeg
N_GBLK = 2       # GlobalInfo FCBlock residual blocks
N_IBLK = 1       # Integration FCBlock residual blocks
OUT_PAD = 128    # lane-dense final output width (51 columns used)
EXW = 128        # lane-dense width of the packed [in_current | extrinsic] operand


def _lrelu(v):
    return jnp.where(v >= 0, v, NEG_SLOPE * v)


def _round_up(v, m):
    return ((v + m - 1) // m) * m


def receptive_field(fw):
    pads = [fw[0] // 2]
    nd = fw[0]
    for i in range(1, len(fw)):
        pads.append((fw[i] - 1) * nd // 2)
        nd *= fw[i]
    return 1 + 2 * sum(pads)


def derive_dims(cfg):
    fw = cfg["fw"]
    T = receptive_field(fw)
    k0 = fw[0]
    L1 = (T - k0) // k0 + 1
    Lf = L1
    for f in fw[1:]:
        Lf = (Lf - f) // f + 1
    assert Lf == 1, "stage-1 feature assembly requires T == receptive_field"
    F_ = cfg["in_features"]
    local_cin = [5 * 3 * F_] + [3 * 3 * F_] * 4      # Torso, LArm, RArm, LLeg, RLeg
    angle_cin = [5, 3, 3, 3, 3]
    return dict(
        T=T, L1=L1,
        local_cin=local_cin, angle_cin=angle_cin,
        KL=_round_up(max(local_cin) * T, 128),       # local wide-input lane pad
        KA=_round_up(max(angle_cin) * T, 128),       # angle wide-input lane pad
        CPL=_round_up(cfg["channels"], 128),         # local channels padded
        CPA=_round_up(cfg["channels_angle"], 128),   # angle channels padded
    )


# ----------------------------------------------------------------------------
# The single fused kernel.
# ----------------------------------------------------------------------------
def make_fused_kernel(*, fw, L1, CPL, CPA, n_gblk, n_iblk, n_parts):
    nconv = len(fw) - 1

    def temporal_branch(x_in, w1, s1, conv, ws, bs, Cc):
        # x_in: (B, Kpad) bf16 -> activations kept as (B, L*Cc), time-blocked
        # along lanes so conv LHS / residual taps are 128-aligned lane slices.
        y = _lrelu(jnp.dot(x_in, w1, preferred_element_type=F32) + s1)   # (B, L1*Cc)
        L = L1
        for i in range(nconv):
            f = fw[i + 1]
            wc, sc, wp, sp = conv[i]
            Lo = (L - f) // f + 1
            blocks = []
            for l in range(Lo):
                lhs = y[:, l * f * Cc:(l * f + f) * Cc].astype(BF16)     # (B, f*Cc)
                res = y[:, (l * f + f // 2) * Cc:(l * f + f // 2 + 1) * Cc]
                t = _lrelu(jnp.dot(lhs, wc, preferred_element_type=F32) + sc)
                z = res + _lrelu(
                    jnp.dot(t.astype(BF16), wp, preferred_element_type=F32) + sp)
                blocks.append(z)
            y = blocks[0] if Lo == 1 else jnp.concatenate(blocks, axis=1)
            L = Lo
        # L == 1 here (asserted in derive_dims): shrink Conv1d(C, LAT, 1)
        return jnp.dot(y.astype(BF16), ws, preferred_element_type=F32) + bs

    def kernel(*refs):
        idx = 0

        def nxt():
            nonlocal idx
            r = refs[idx]
            idx += 1
            return r

        xp_loc = nxt()           # (5, B, KL) bf16
        xp_ang = nxt()           # (5, B, KA) bf16
        extras_ref = nxt()       # (B, EXW)  bf16

        def read_temporal():
            w1, s1 = nxt(), nxt()
            conv = [(nxt(), nxt(), nxt(), nxt()) for _ in range(nconv)]
            ws, bs = nxt(), nxt()
            return w1, s1, conv, ws, bs

        loc_prm = read_temporal()
        ang_prm = read_temporal()

        g_w1, g_b1 = nxt(), nxt()
        g_blocks = [(nxt(), nxt(), nxt(), nxt()) for _ in range(n_gblk)]
        g_wf, g_bf = nxt(), nxt()

        e_w, e_b = nxt(), nxt()

        i_wloc, i_wglob, i_wang, i_wext, i_b1 = nxt(), nxt(), nxt(), nxt(), nxt()
        i_blocks = [(nxt(), nxt(), nxt(), nxt()) for _ in range(n_iblk)]
        wf_all, bf_all = nxt(), nxt()

        out_ref = nxt()

        extras = extras_ref[...]                                     # (B, EXW) bf16

        # ---- Global FCBlock (in_current lives in extras[:, :J*F]) -----------
        h = _lrelu(jnp.dot(extras, g_w1[...], preferred_element_type=F32) + g_b1[...])
        for wa, ba, wb, bb in g_blocks:
            t = _lrelu(jnp.dot(h.astype(BF16), wa[...],
                               preferred_element_type=F32) + ba[...])
            t = _lrelu(jnp.dot(t.astype(BF16), wb[...],
                               preferred_element_type=F32) + bb[...])
            h = h + t
        x_global = (jnp.dot(h.astype(BF16), g_wf[...],
                            preferred_element_type=F32) + g_bf[...]).astype(BF16)

        # ---- Extrinsic camera embedding (param lives in extras[:, J*F:J*F+4])
        # TODO(synk): `Embedding` is not defined in the reference source;
        # implemented as Linear(extrinsic_dim -> embedd_dim) + ReLU.
        ext = jnp.maximum(
            jnp.dot(extras, e_w[...], preferred_element_type=F32) + e_b[...],
            0.0).astype(BF16)

        # ---- Temporal branches (fully unrolled over the 5 body parts) -------
        def branch(x_ref, prm, p, Cc):
            w1, s1, conv, ws, bs = prm
            conv_p = [(wc[p], sc[p], wp[p], sp[p]) for wc, sc, wp, sp in conv]
            return temporal_branch(x_ref[p], w1[p], s1[p], conv_p, ws[p], bs[p], Cc)

        local_feats = [branch(xp_loc, loc_prm, p, CPL) for p in range(n_parts)]
        angle_feats = [branch(xp_ang, ang_prm, p, CPA) for p in range(n_parts)]

        # ---- Integration FCBlocks: fc1 as 4 partial matmuls (no int_in) -----
        h_parts = []
        for p in range(n_parts):
            h = (jnp.dot(local_feats[p].astype(BF16), i_wloc[p],
                         preferred_element_type=F32)
                 + jnp.dot(x_global, i_wglob[p], preferred_element_type=F32)
                 + jnp.dot(angle_feats[p].astype(BF16), i_wang[p],
                           preferred_element_type=F32)
                 + jnp.dot(ext, i_wext[p], preferred_element_type=F32)
                 + i_b1[p])
            h = _lrelu(h)
            for wa, ba, wb, bb in i_blocks:
                t = _lrelu(jnp.dot(h.astype(BF16), wa[p],
                                   preferred_element_type=F32) + ba[p])
                t = _lrelu(jnp.dot(t.astype(BF16), wb[p],
                                   preferred_element_type=F32) + bb[p])
                h = h + t
            h_parts.append(h.astype(BF16))

        # One block-placed head; output columns are already in final joint order.
        hcat = jnp.concatenate(h_parts, axis=1)                      # (B, 5*LS)
        out_ref[...] = (jnp.dot(hcat, wf_all[...], preferred_element_type=F32)
                        + bf_all[...])

    return kernel


# ----------------------------------------------------------------------------
# Parameter building (deterministic, synthetic), BN pre-folded, layouts
# pre-blocked / K-stacked / channel-padded / stacked over parts, bf16 weights.
# ----------------------------------------------------------------------------
class KeyGen:
    def __init__(self, key):
        self.key = key

    def __call__(self):
        self.key, sub = jax.random.split(self.key)
        return sub


def _init_linear(kg, in_f, out_f):
    w = jax.random.normal(kg(), (in_f, out_f), F32) / math.sqrt(in_f)
    b = 0.01 * jax.random.normal(kg(), (out_f,), F32)
    return w, b


def _bn_fold(kg, n):
    gamma = 1.0 + 0.1 * jax.random.normal(kg(), (n,), F32)
    beta = 0.1 * jax.random.normal(kg(), (n,), F32)
    mean = 0.1 * jax.random.normal(kg(), (n,), F32)
    var = 1.0 + 0.1 * jax.random.uniform(kg(), (n,), F32)
    scale = gamma / jnp.sqrt(var + BN_EPS)
    shift = beta - mean * scale
    return scale, shift


def _build_temporal_group(kg, cins, C, CP, LAT, fw, T, L1, KP):
    """5 TemporalBlocks: BN folded, expand conv time-block-structured,
    conv taps K-stacked, channels zero-padded to CP, stacked over parts."""
    k0 = fw[0]
    nconv = len(fw) - 1
    parts = []
    for cin in cins:
        p = {}
        # expand conv (bias=False) + expand_bn, blocked over output time slots
        w = jax.random.normal(kg(), (C, cin, k0), F32) / math.sqrt(cin * k0)
        scale, shift = _bn_fold(kg, C)
        wt = jnp.transpose(w * scale[:, None, None], (1, 2, 0))      # (cin, k0, C)
        Wb = jnp.zeros((cin, T, L1, CP), F32)
        for l in range(L1):
            Wb = Wb.at[:, l * k0:(l + 1) * k0, l, :C].set(wt)
        Wb = Wb.reshape(cin * T, L1 * CP)
        p["w1"] = jnp.pad(Wb, ((0, KP - cin * T), (0, 0))).astype(BF16)
        p["s1"] = jnp.tile(jnp.pad(shift, (0, CP - C)), (L1,)).reshape(1, L1 * CP)
        p["conv"] = []
        for i in range(1, len(fw)):
            f = fw[i]
            w = jax.random.normal(kg(), (C, C, f), F32) / math.sqrt(C * f)
            scale, shift = _bn_fold(kg, C)
            wc = jnp.transpose(w * scale[:, None, None], (2, 1, 0))  # (f, Cin, Cout)
            wc = jnp.pad(wc, ((0, 0), (0, CP - C), (0, CP - C))).reshape(f * CP, CP)
            sc = jnp.pad(shift, (0, CP - C)).reshape(1, CP)
            w = jax.random.normal(kg(), (C, C, 1), F32) / math.sqrt(C)
            scale, shift = _bn_fold(kg, C)
            wp = jnp.pad(w[:, :, 0].T * scale[None, :], ((0, CP - C), (0, CP - C)))
            sp = jnp.pad(shift, (0, CP - C)).reshape(1, CP)
            p["conv"].append((wc.astype(BF16), sc, wp.astype(BF16), sp))
        # shrink Conv1d(C, LAT, 1) with bias, no BN
        w = jax.random.normal(kg(), (LAT, C, 1), F32) / math.sqrt(C)
        b = 0.01 * jax.random.normal(kg(), (LAT,), F32)
        p["ws"] = jnp.pad(w[:, :, 0].T, ((0, CP - C), (0, 0))).astype(BF16)
        p["bs"] = b.reshape(1, LAT)
        parts.append(p)
    g = {k: jnp.stack([p[k] for p in parts]) for k in ("w1", "s1", "ws", "bs")}
    g["conv"] = [tuple(jnp.stack([p["conv"][i][k] for p in parts]) for k in range(4))
                 for i in range(nconv)]
    return g


def _build_global_fc(kg, c_in, c_out, H, block_num, in_pad):
    w, b = _init_linear(kg, c_in, H)
    scale, shift = _bn_fold(kg, H)
    w1 = jnp.zeros((in_pad, H), F32).at[:c_in, :].set(w * scale[None, :])
    blocks = []
    for _ in range(block_num):
        wa, ba = _init_linear(kg, H, H)
        sa, ta = _bn_fold(kg, H)
        wb, bb = _init_linear(kg, H, H)
        sb, tb = _bn_fold(kg, H)
        blocks.append(((wa * sa[None, :]).astype(BF16), (ba * sa + ta).reshape(1, H),
                       (wb * sb[None, :]).astype(BF16), (bb * sb + tb).reshape(1, H)))
    wf, bf_ = _init_linear(kg, H, c_out)
    return dict(w1=w1.astype(BF16), b1=(b * scale + shift).reshape(1, H),
                blocks=blocks, wf=wf.astype(BF16), bf=bf_.reshape(1, c_out))


def _out_cols():
    # Final joint order: [Torso0, LLeg(3), RLeg(3), Torso1..4, RArm(3), LArm(3)]
    torso = list(range(0, 3)) + list(range(21, 33))
    larm = list(range(42, 51))
    rarm = list(range(33, 42))
    lleg = list(range(3, 12))
    rleg = list(range(12, 21))
    return [torso, larm, rarm, lleg, rleg]   # Integration part order


def _build_integration(kg, split_dims, c_outs, cols_list, H, block_num, out_pad):
    wloc, wglob, wang, wext, b1 = [], [], [], [], []
    blk = [[] for _ in range(block_num)]
    wf_all = jnp.zeros((len(c_outs) * H, out_pad), F32)
    bf_all = jnp.zeros((1, out_pad), F32)
    for i, (c_out, cols) in enumerate(zip(c_outs, cols_list)):
        w, b = _init_linear(kg, sum(split_dims), H)
        scale, shift = _bn_fold(kg, H)
        w = w * scale[None, :]
        o = 0
        chunks = []
        for dsz in split_dims:
            chunks.append(w[o:o + dsz].astype(BF16))
            o += dsz
        wloc.append(chunks[0]); wglob.append(chunks[1])
        wang.append(chunks[2]); wext.append(chunks[3])
        b1.append((b * scale + shift).reshape(1, H))
        for j in range(block_num):
            wa, ba = _init_linear(kg, H, H)
            sa, ta = _bn_fold(kg, H)
            wb, bb = _init_linear(kg, H, H)
            sb, tb = _bn_fold(kg, H)
            blk[j].append(((wa * sa[None, :]).astype(BF16),
                           (ba * sa + ta).reshape(1, H),
                           (wb * sb[None, :]).astype(BF16),
                           (bb * sb + tb).reshape(1, H)))
        wf, bf_ = _init_linear(kg, H, c_out)
        cols = jnp.asarray(cols, jnp.int32)
        wf_all = wf_all.at[i * H:(i + 1) * H, cols].set(wf)
        bf_all = bf_all.at[0, cols].set(bf_)
    return dict(
        wloc=jnp.stack(wloc), wglob=jnp.stack(wglob),
        wang=jnp.stack(wang), wext=jnp.stack(wext), b1=jnp.stack(b1),
        blocks=[tuple(jnp.stack([blk[j][p][k] for p in range(len(c_outs))])
                      for k in range(4)) for j in range(block_num)],
        wf_all=wf_all.astype(BF16), bf_all=bf_all)


def build_params(seed, cfg):
    kg = KeyGen(jax.random.PRNGKey(seed))
    d = derive_dims(cfg)
    fw = cfg["fw"]
    C, CA = cfg["channels"], cfg["channels_angle"]
    LAT, E, LS = cfg["latten"], cfg["embedd_dim"], cfg["linear_size"]
    J, F_ = cfg["num_joints_in"], cfg["in_features"]

    local = _build_temporal_group(kg, d["local_cin"], C, d["CPL"], LAT, fw,
                                  d["T"], d["L1"], d["KL"])
    angle = _build_temporal_group(kg, d["angle_cin"], CA, d["CPA"], E, fw,
                                  d["T"], d["L1"], d["KA"])
    glob = _build_global_fc(kg, J * F_, LAT, LS, N_GBLK, EXW)
    c_outs = [5 * 3, 3 * 3, 3 * 3, 3 * 3, 3 * 3]
    integ = _build_integration(kg, (LAT, LAT, E, E), c_outs, _out_cols(),
                               LS, N_IBLK, OUT_PAD)

    # TODO(synk): `Embedding` class undefined in the reference; modelled as
    # Linear(extrinsic_dim -> embedd_dim) + ReLU (rows placed inside `extras`).
    we, be = _init_linear(kg, cfg["extrinsic_dim"], E)
    emb_w = jnp.zeros((EXW, E), F32).at[
        J * F_:J * F_ + cfg["extrinsic_dim"], :].set(we)

    return dict(local=local, angle=angle, glob=glob, integ=integ,
                embed_w=emb_w.astype(BF16), embed_b=be.reshape(1, E))


def _flatten_params(P):
    a = []
    for grp in (P["local"], P["angle"]):
        a += [grp["w1"], grp["s1"]]
        for cv in grp["conv"]:
            a += list(cv)
        a += [grp["ws"], grp["bs"]]
    G = P["glob"]
    a += [G["w1"], G["b1"]]
    for blk in G["blocks"]:
        a += list(blk)
    a += [G["wf"], G["bf"]]
    a += [P["embed_w"], P["embed_b"]]
    I = P["integ"]
    a += [I["wloc"], I["wglob"], I["wang"], I["wext"], I["b1"]]
    for blk in I["blocks"]:
        a += list(blk)
    a += [I["wf_all"], I["bf_all"]]
    return a


# ----------------------------------------------------------------------------
# Forward pass (feature prep in XLA, the whole network in one Pallas kernel).
# ----------------------------------------------------------------------------
def _cosine_similarity(a, b, eps=1e-8):
    dot = jnp.sum(a * b, axis=-1)
    na = jnp.sqrt(jnp.sum(a * a, axis=-1))
    nb = jnp.sqrt(jnp.sum(b * b, axis=-1))
    return dot / (jnp.maximum(na, eps) * jnp.maximum(nb, eps))


def three_stage_forward(x, param, P, *, cfg):
    fw = cfg["fw"]
    d = derive_dims(cfg)
    B, T, J, F_ = x.shape
    assert T == d["T"], "stage-1 feature assembly requires T == receptive_field"
    pad = (T - 1) // 2

    in_current = x[:, T // 2:T // 2 + 1].reshape(B, J * F_)          # (B, 34)
    xf = jnp.transpose(x.reshape(B, T, J * F_), (0, 2, 1))           # (B, 34, T)
    C2 = xf.shape[1]

    diff = xf - jnp.tile(xf[:, 0:2, :], (1, C2 // 2, 1))
    diff_t = xf - xf[:, :, T // 2:T // 2 + 1]
    x_rel = x - x[:, :, 0:1, :]
    cur_rel = jnp.broadcast_to(x_rel[:, T // 2:T // 2 + 1, :, :], x_rel.shape)
    diff_cos = jnp.clip(_cosine_similarity(x_rel, cur_rel), -1.0, 1.0)
    diff_E_angle = jnp.transpose(jnp.exp(jnp.arccos(diff_cos) - jnp.pi),
                                 (0, 2, 1))                          # (B, J, T)

    def part(sl_list):
        return jnp.concatenate(
            [xf[:, a:b] for a, b in sl_list] +
            [diff[:, a:b] for a, b in sl_list] +
            [diff_t[:, a:b] for a, b in sl_list], axis=1)

    local_inputs = [part([(0, 2), (14, 22)]),   # Torso
                    part([(28, 34)]),           # LArm
                    part([(22, 28)]),           # RArm
                    part([(2, 8)]),             # LLeg
                    part([(8, 14)])]            # RLeg
    angle_inputs = [
        jnp.concatenate([diff_E_angle[:, 0:1], diff_E_angle[:, 7:11]], axis=1),
        diff_E_angle[:, 14:17],
        diff_E_angle[:, 11:14],
        diff_E_angle[:, 1:4],
        diff_E_angle[:, 4:7],
    ]

    def flat_pad(xi, kpad):
        Bq, Cin, Tq = xi.shape
        flat = xi.reshape(Bq, Cin * Tq)
        return jnp.pad(flat, ((0, 0), (0, kpad - Cin * Tq)))

    xp_local = jnp.stack([flat_pad(xi, d["KL"]) for xi in local_inputs]).astype(BF16)
    xp_angle = jnp.stack([flat_pad(xi, d["KA"]) for xi in angle_inputs]).astype(BF16)

    extras = jnp.zeros((B, EXW), F32)
    extras = extras.at[:, :J * F_].set(in_current)
    extras = extras.at[:, J * F_:J * F_ + param.shape[1]].set(param)
    extras = extras.astype(BF16)

    arrays = [xp_local, xp_angle, extras] + _flatten_params(P)
    vmem = pl.BlockSpec(memory_space=pltpu.MemorySpace.VMEM)
    out = pl.pallas_call(
        make_fused_kernel(fw=fw, L1=d["L1"], CPL=d["CPL"], CPA=d["CPA"],
                          n_gblk=N_GBLK, n_iblk=N_IBLK, n_parts=N_PARTS),
        out_shape=jax.ShapeDtypeStruct((B, OUT_PAD), F32),
        in_specs=[vmem] * len(arrays),
        out_specs=vmem,
    )(*arrays)

    out = out[:, :17 * 3].reshape(B, 17, 3)
    return out.reshape(B, T - 2 * pad, 17, 3)


# ----------------------------------------------------------------------------
if __name__ == "__main__":
    cfg = dict(
        num_joints_in=17, in_features=2, num_joints_out=17,
        fw=[3, 3],            # filter_widths
        channels=128,         # temporal conv channels (small synthetic size)
        channels_angle=64,
        latten=64,            # latten_features
        embedd_dim=32,
        linear_size=128,      # FCBlock hidden size (small synthetic size)
        extrinsic_dim=4,
    )
    rf = receptive_field(cfg["fw"])   # = 9 frames
    B = 2

    P = build_params(0, cfg)

    key = jax.random.PRNGKey(0)
    kx, kp = jax.random.split(key)
    x = jax.random.normal(kx, (B, rf, cfg["num_joints_in"], cfg["in_features"]), F32)
    param = jax.random.normal(kp, (B, cfg["extrinsic_dim"]), F32)

    fwd = jax.jit(functools.partial(three_stage_forward, cfg=cfg))
    out = jax.block_until_ready(fwd(x, param, P))

    expected = (B, rf - 2 * ((rf - 1) // 2), 17, 3)   # (2, 1, 17, 3)
    assert out.shape == expected, out.shape
    assert bool(jnp.all(jnp.isfinite(out)))
    print("KERNEL_OK")
</pallas_src>

<mosaic_0001>
module attributes {stable_mosaic.version = 11 : i64} {
  func.func @kernel(%arg0: memref<5x2x384xbf16, #tpu.memory_space<vmem>>, %arg1: memref<5x2x128xbf16, #tpu.memory_space<vmem>>, %arg2: memref<2x128xbf16, #tpu.memory_space<vmem>>, %arg3: memref<5x384x384xbf16, #tpu.memory_space<vmem>>, %arg4: memref<5x1x384xf32, #tpu.memory_space<vmem>>, %arg5: memref<5x384x128xbf16, #tpu.memory_space<vmem>>, %arg6: memref<5x1x128xf32, #tpu.memory_space<vmem>>, %arg7: memref<5x128x128xbf16, #tpu.memory_space<vmem>>, %arg8: memref<5x1x128xf32, #tpu.memory_space<vmem>>, %arg9: memref<5x128x64xbf16, #tpu.memory_space<vmem>>, %arg10: memref<5x1x64xf32, #tpu.memory_space<vmem>>, %arg11: memref<5x128x384xbf16, #tpu.memory_space<vmem>>, %arg12: memref<5x1x384xf32, #tpu.memory_space<vmem>>, %arg13: memref<5x384x128xbf16, #tpu.memory_space<vmem>>, %arg14: memref<5x1x128xf32, #tpu.memory_space<vmem>>, %arg15: memref<5x128x128xbf16, #tpu.memory_space<vmem>>, %arg16: memref<5x1x128xf32, #tpu.memory_space<vmem>>, %arg17: memref<5x128x32xbf16, #tpu.memory_space<vmem>>, %arg18: memref<5x1x32xf32, #tpu.memory_space<vmem>>, %arg19: memref<128x128xbf16, #tpu.memory_space<vmem>>, %arg20: memref<1x128xf32, #tpu.memory_space<vmem>>, %arg21: memref<128x128xbf16, #tpu.memory_space<vmem>>, %arg22: memref<1x128xf32, #tpu.memory_space<vmem>>, %arg23: memref<128x128xbf16, #tpu.memory_space<vmem>>, %arg24: memref<1x128xf32, #tpu.memory_space<vmem>>, %arg25: memref<128x128xbf16, #tpu.memory_space<vmem>>, %arg26: memref<1x128xf32, #tpu.memory_space<vmem>>, %arg27: memref<128x128xbf16, #tpu.memory_space<vmem>>, %arg28: memref<1x128xf32, #tpu.memory_space<vmem>>, %arg29: memref<128x64xbf16, #tpu.memory_space<vmem>>, %arg30: memref<1x64xf32, #tpu.memory_space<vmem>>, %arg31: memref<128x32xbf16, #tpu.memory_space<vmem>>, %arg32: memref<1x32xf32, #tpu.memory_space<vmem>>, %arg33: memref<5x64x128xbf16, #tpu.memory_space<vmem>>, %arg34: memref<5x64x128xbf16, #tpu.memory_space<vmem>>, %arg35: memref<5x32x128xbf16, #tpu.memory_space<vmem>>, %arg36: memref<5x32x128xbf16, #tpu.memory_space<vmem>>, %arg37: memref<5x1x128xf32, #tpu.memory_space<vmem>>, %arg38: memref<5x128x128xbf16, #tpu.memory_space<vmem>>, %arg39: memref<5x1x128xf32, #tpu.memory_space<vmem>>, %arg40: memref<5x128x128xbf16, #tpu.memory_space<vmem>>, %arg41: memref<5x1x128xf32, #tpu.memory_space<vmem>>, %arg42: memref<640x128xbf16, #tpu.memory_space<vmem>>, %arg43: memref<1x128xf32, #tpu.memory_space<vmem>>, %arg44: memref<2x128xf32, #tpu.memory_space<vmem>>) attributes {dimension_semantics = [], scalar_prefetch = 0 : i64, scratch_operands = 0 : i64, tpu.core_type = #tpu.core_type<tc>} {
    %c0 = arith.constant 0 : index
    %c0_0 = arith.constant 0 : index
    %0 = vector.load %arg2[%c0, %c0_0] : memref<2x128xbf16, #tpu.memory_space<vmem>>, vector<2x128xbf16>
    %c0_1 = arith.constant 0 : index
    %c0_2 = arith.constant 0 : index
    %1 = vector.load %arg19[%c0_1, %c0_2] : memref<128x128xbf16, #tpu.memory_space<vmem>>, vector<128x128xbf16>
    %cst = arith.constant dense<0.000000e+00> : vector<2x128xf32>
    %2 = tpu.matmul %0, %1, %cst {dimension_numbers = #tpu.dot_dimension_numbers<[1], [0], [0], [1], [0, 0, 1, 1], [], []>} : vector<2x128xbf16>, vector<128x128xbf16>, vector<2x128xf32> -> vector<2x128xf32>
    %c0_3 = arith.constant 0 : index
    %c0_4 = arith.constant 0 : index
    %3 = vector.load %arg20[%c0_3, %c0_4] : memref<1x128xf32, #tpu.memory_space<vmem>>, vector<1x128xf32>
    %4 = vector.broadcast %3 : vector<1x128xf32> to vector<2x128xf32>
    %5 = arith.addf %2, %4 : vector<2x128xf32>
    %cst_5 = arith.constant 0.000000e+00 : f32
    %6 = vector.broadcast %cst_5 : f32 to vector<2x128xf32>
    %7 = arith.cmpf oge, %5, %6 : vector<2x128xf32>
    %cst_6 = arith.constant 2.000000e-01 : f32
    %8 = vector.broadcast %cst_6 : f32 to vector<2x128xf32>
    %9 = arith.mulf %8, %5 : vector<2x128xf32>
    %10 = arith.select %7, %5, %9 : vector<2x128xi1>, vector<2x128xf32>
    %11 = arith.truncf %10 : vector<2x128xf32> to vector<2x128xbf16>
    %c0_7 = arith.constant 0 : index
    %c0_8 = arith.constant 0 : index
    %12 = vector.load %arg21[%c0_7, %c0_8] : memref<128x128xbf16, #tpu.memory_space<vmem>>, vector<128x128xbf16>
    %cst_9 = arith.constant dense<0.000000e+00> : vector<2x128xf32>
    %13 = tpu.matmul %11, %12, %cst_9 {dimension_numbers = #tpu.dot_dimension_numbers<[1], [0], [0], [1], [0, 0, 1, 1], [], []>} : vector<2x128xbf16>, vector<128x128xbf16>, vector<2x128xf32> -> vector<2x128xf32>
    %c0_10 = arith.constant 0 : index
    %c0_11 = arith.constant 0 : index
    %14 = vector.load %arg22[%c0_10, %c0_11] : memref<1x128xf32, #tpu.memory_space<vmem>>, vector<1x128xf32>
    %15 = vector.broadcast %14 : vector<1x128xf32> to vector<2x128xf32>
    %16 = arith.addf %13, %15 : vector<2x128xf32>
    %cst_12 = arith.constant 0.000000e+00 : f32
    %17 = vector.broadcast %cst_12 : f32 to vector<2x128xf32>
    %18 = arith.cmpf oge, %16, %17 : vector<2x128xf32>
    %cst_13 = arith.constant 2.000000e-01 : f32
    %19 = vector.broadcast %cst_13 : f32 to vector<2x128xf32>
    %20 = arith.mulf %19, %16 : vector<2x128xf32>
    %21 = arith.select %18, %16, %20 : vector<2x128xi1>, vector<2x128xf32>
    %22 = arith.truncf %21 : vector<2x128xf32> to vector<2x128xbf16>
    %c0_14 = arith.constant 0 : index
    %c0_15 = arith.constant 0 : index
    %23 = vector.load %arg23[%c0_14, %c0_15] : memref<128x128xbf16, #tpu.memory_space<vmem>>, vector<128x128xbf16>
    %cst_16 = arith.constant dense<0.000000e+00> : vector<2x128xf32>
    %24 = tpu.matmul %22, %23, %cst_16 {dimension_numbers = #tpu.dot_dimension_numbers<[1], [0], [0], [1], [0, 0, 1, 1], [], []>} : vector<2x128xbf16>, vector<128x128xbf16>, vector<2x128xf32> -> vector<2x128xf32>
    %c0_17 = arith.constant 0 : index
    %c0_18 = arith.constant 0 : index
    %25 = vector.load %arg24[%c0_17, %c0_18] : memref<1x128xf32, #tpu.memory_space<vmem>>, vector<1x128xf32>
    %26 = vector.broadcast %25 : vector<1x128xf32> to vector<2x128xf32>
    %27 = arith.addf %24, %26 : vector<2x128xf32>
    %cst_19 = arith.constant 0.000000e+00 : f32
    %28 = vector.broadcast %cst_19 : f32 to vector<2x128xf32>
    %29 = arith.cmpf oge, %27, %28 : vector<2x128xf32>
    %cst_20 = arith.constant 2.000000e-01 : f32
    %30 = vector.broadcast %cst_20 : f32 to vector<2x128xf32>
    %31 = arith.mulf %30, %27 : vector<2x128xf32>
    %32 = arith.select %29, %27, %31 : vector<2x128xi1>, vector<2x128xf32>
    %33 = arith.addf %10, %32 : vector<2x128xf32>
    %34 = arith.truncf %33 : vector<2x128xf32> to vector<2x128xbf16>
    %c0_21 = arith.constant 0 : index
    %c0_22 = arith.constant 0 : index
    %35 = vector.load %arg25[%c0_21, %c0_22] : memref<128x128xbf16, #tpu.memory_space<vmem>>, vector<128x128xbf16>
    %cst_23 = arith.constant dense<0.000000e+00> : vector<2x128xf32>
    %36 = tpu.matmul %34, %35, %cst_23 {dimension_numbers = #tpu.dot_dimension_numbers<[1], [0], [0], [1], [0, 0, 1, 1], [], []>} : vector<2x128xbf16>, vector<128x128xbf16>, vector<2x128xf32> -> vector<2x128xf32>
    %c0_24 = arith.constant 0 : index
    %c0_25 = arith.constant 0 : index
    %37 = vector.load %arg26[%c0_24, %c0_25] : memref<1x128xf32, #tpu.memory_space<vmem>>, vector<1x128xf32>
    %38 = vector.broadcast %37 : vector<1x128xf32> to vector<2x128xf32>
    %39 = arith.addf %36, %38 : vector<2x128xf32>
    %cst_26 = arith.constant 0.000000e+00 : f32
    %40 = vector.broadcast %cst_26 : f32 to vector<2x128xf32>
    %41 = arith.cmpf oge, %39, %40 : vector<2x128xf32>
    %cst_27 = arith.constant 2.000000e-01 : f32
    %42 = vector.broadcast %cst_27 : f32 to vector<2x128xf32>
    %43 = arith.mulf %42, %39 : vector<2x128xf32>
    %44 = arith.select %41, %39, %43 : vector<2x128xi1>, vector<2x128xf32>
    %45 = arith.truncf %44 : vector<2x128xf32> to vector<2x128xbf16>
    %c0_28 = arith.constant 0 : index
    %c0_29 = arith.constant 0 : index
    %46 = vector.load %arg27[%c0_28, %c0_29] : memref<128x128xbf16, #tpu.memory_space<vmem>>, vector<128x128xbf16>
    %cst_30 = arith.constant dense<0.000000e+00> : vector<2x128xf32>
    %47 = tpu.matmul %45, %46, %cst_30 {dimension_numbers = #tpu.dot_dimension_numbers<[1], [0], [0], [1], [0, 0, 1, 1], [], []>} : vector<2x128xbf16>, vector<128x128xbf16>, vector<2x128xf32> -> vector<2x128xf32>
    %c0_31 = arith.constant 0 : index
    %c0_32 = arith.constant 0 : index
    %48 = vector.load %arg28[%c0_31, %c0_32] : memref<1x128xf32, #tpu.memory_space<vmem>>, vector<1x128xf32>
    %49 = vector.broadcast %48 : vector<1x128xf32> to vector<2x128xf32>
    %50 = arith.addf %47, %49 : vector<2x128xf32>
    %cst_33 = arith.constant 0.000000e+00 : f32
    %51 = vector.broadcast %cst_33 : f32 to vector<2x128xf32>
    %52 = arith.cmpf oge, %50, %51 : vector<2x128xf32>
    %cst_34 = arith.constant 2.000000e-01 : f32
    %53 = vector.broadcast %cst_34 : f32 to vector<2x128xf32>
    %54 = arith.mulf %53, %50 : vector<2x128xf32>
    %55 = arith.select %52, %50, %54 : vector<2x128xi1>, vector<2x128xf32>
    %56 = arith.addf %33, %55 : vector<2x128xf32>
    %57 = arith.truncf %56 : vector<2x128xf32> to vector<2x128xbf16>
    %c0_35 = arith.constant 0 : index
    %c0_36 = arith.constant 0 : index
    %58 = vector.load %arg29[%c0_35, %c0_36] : memref<128x64xbf16, #tpu.memory_space<vmem>>, vector<128x64xbf16>
    %cst_37 = arith.constant dense<0.000000e+00> : vector<2x64xf32>
    %59 = tpu.matmul %57, %58, %cst_37 {dimension_numbers = #tpu.dot_dimension_numbers<[1], [0], [0], [1], [0, 0, 1, 1], [], []>} : vector<2x128xbf16>, vector<128x64xbf16>, vector<2x64xf32> -> vector<2x64xf32>
    %c0_38 = arith.constant 0 : index
    %c0_39 = arith.constant 0 : index
    %60 = vector.load %arg30[%c0_38, %c0_39] : memref<1x64xf32, #tpu.memory_space<vmem>>, vector<1x64xf32>
    %61 = vector.broadcast %60 : vector<1x64xf32> to vector<2x64xf32>
    %62 = arith.addf %59, %61 : vector<2x64xf32>
    %63 = arith.truncf %62 : vector<2x64xf32> to vector<2x64xbf16>
    %c0_40 = arith.constant 0 : index
    %c0_41 = arith.constant 0 : index
    %64 = vector.load %arg31[%c0_40, %c0_41] : memref<128x32xbf16, #tpu.memory_space<vmem>>, vector<128x32xbf16>
    %cst_42 = arith.constant dense<0.000000e+00> : vector<2x32xf32>
    %65 = tpu.matmul %0, %64, %cst_42 {dimension_numbers = #tpu.dot_dimension_numbers<[1], [0], [0], [1], [0, 0, 1, 1], [], []>} : vector<2x128xbf16>, vector<128x32xbf16>, vector<2x32xf32> -> vector<2x32xf32>
    %c0_43 = arith.constant 0 : index
    %c0_44 = arith.constant 0 : index
    %66 = vector.load %arg32[%c0_43, %c0_44] : memref<1x32xf32, #tpu.memory_space<vmem>>, vector<1x32xf32>
    %67 = vector.broadcast %66 : vector<1x32xf32> to vector<2x32xf32>
    %68 = arith.addf %65, %67 : vector<2x32xf32>
    %cst_45 = arith.constant 0.000000e+00 : f32
    %69 = vector.broadcast %cst_45 : f32 to vector<2x32xf32>
    %70 = arith.maximumf %68, %69 : vector<2x32xf32>
    %71 = arith.truncf %70 : vector<2x32xf32> to vector<2x32xbf16>
    %c0_46 = arith.constant 0 : index
    %c0_47 = arith.constant 0 : index
    %c0_48 = arith.constant 0 : index
    %72 = vector.load %arg5[%c0_46, %c0_47, %c0_48] : memref<5x384x128xbf16, #tpu.memory_space<vmem>>, vector<1x384x128xbf16>
    %73 = vector.shape_cast %72 : vector<1x384x128xbf16> to vector<384x128xbf16>
    %c0_49 = arith.constant 0 : index
    %c0_50 = arith.constant 0 : index
    %c0_51 = arith.constant 0 : index
    %74 = vector.load %arg6[%c0_49, %c0_50, %c0_51] : memref<5x1x128xf32, #tpu.memory_space<vmem>>, vector<1x1x128xf32>
    %75 = vector.shape_cast %74 : vector<1x1x128xf32> to vector<1x128xf32>
    %c0_52 = arith.constant 0 : index
    %c0_53 = arith.constant 0 : index
    %c0_54 = arith.constant 0 : index
    %76 = vector.load %arg7[%c0_52, %c0_53, %c0_54] : memref<5x128x128xbf16, #tpu.memory_space<vmem>>, vector<1x128x128xbf16>
    %77 = vector.shape_cast %76 : vector<1x128x128xbf16> to vector<128x128xbf16>
    %c0_55 = arith.constant 0 : index
    %c0_56 = arith.constant 0 : index
    %c0_57 = arith.constant 0 : index
    %78 = vector.load %arg8[%c0_55, %c0_56, %c0_57] : memref<5x1x128xf32, #tpu.memory_space<vmem>>, vector<1x1x128xf32>
    %79 = vector.shape_cast %78 : vector<1x1x128xf32> to vector<1x128xf32>
    %c0_58 = arith.constant 0 : index
    %c0_59 = arith.constant 0 : index
    %c0_60 = arith.constant 0 : index
    %80 = vector.load %arg0[%c0_58, %c0_59, %c0_60] : memref<5x2x384xbf16, #tpu.memory_space<vmem>>, vector<1x2x384xbf16>
    %81 = vector.shape_cast %80 : vector<1x2x384xbf16> to vector<2x384xbf16>
    %c0_61 = arith.constant 0 : index
    %c0_62 = arith.constant 0 : index
    %c0_63 = arith.constant 0 : index
    %82 = vector.load %arg3[%c0_61, %c0_62, %c0_63] : memref<5x384x384xbf16, #tpu.memory_space<vmem>>, vector<1x384x384xbf16>
    %83 = vector.shape_cast %82 : vector<1x384x384xbf16> to vector<384x384xbf16>
    %c0_64 = arith.constant 0 : index
    %c0_65 = arith.constant 0 : index
    %c0_66 = arith.constant 0 : index
    %84 = vector.load %arg4[%c0_64, %c0_65, %c0_66] : memref<5x1x384xf32, #tpu.memory_space<vmem>>, vector<1x1x384xf32>
    %85 = vector.shape_cast %84 : vector<1x1x384xf32> to vector<1x384xf32>
    %c0_67 = arith.constant 0 : index
    %c0_68 = arith.constant 0 : index
    %c0_69 = arith.constant 0 : index
    %86 = vector.load %arg9[%c0_67, %c0_68, %c0_69] : memref<5x128x64xbf16, #tpu.memory_space<vmem>>, vector<1x128x64xbf16>
    %87 = vector.shape_cast %86 : vector<1x128x64xbf16> to vector<128x64xbf16>
    %c0_70 = arith.constant 0 : index
    %c0_71 = arith.constant 0 : index
    %c0_72 = arith.constant 0 : index
    %88 = vector.load %arg10[%c0_70, %c0_71, %c0_72] : memref<5x1x64xf32, #tpu.memory_space<vmem>>, vector<1x1x64xf32>
    %89 = vector.shape_cast %88 : vector<1x1x64xf32> to vector<1x64xf32>
    %cst_73 = arith.constant dense<0.000000e+00> : vector<2x384xf32>
    %90 = tpu.matmul %81, %83, %cst_73 {dimension_numbers = #tpu.dot_dimension_numbers<[1], [0], [0], [1], [0, 0, 1, 1], [], []>} : vector<2x384xbf16>, vector<384x384xbf16>, vector<2x384xf32> -> vector<2x384xf32>
    %91 = vector.broadcast %85 : vector<1x384xf32> to vector<2x384xf32>
    %92 = arith.addf %90, %91 : vector<2x384xf32>
    %cst_74 = arith.constant 0.000000e+00 : f32
    %93 = vector.broadcast %cst_74 : f32 to vector<2x384xf32>
    %94 = arith.cmpf oge, %92, %93 : vector<2x384xf32>
    %cst_75 = arith.constant 2.000000e-01 : f32
    %95 = vector.broadcast %cst_75 : f32 to vector<2x384xf32>
    %96 = arith.mulf %95, %92 : vector<2x384xf32>
    %97 = arith.select %94, %92, %96 : vector<2x384xi1>, vector<2x384xf32>
    %98 = arith.truncf %97 : vector<2x384xf32> to vector<2x384xbf16>
    %99 = vector.extract_strided_slice %97 {offsets = [0, 128], sizes = [2, 128], strides = [1, 1]} : vector<2x384xf32> to vector<2x128xf32>
    %cst_76 = arith.constant dense<0.000000e+00> : vector<2x128xf32>
    %100 = tpu.matmul %98, %73, %cst_76 {dimension_numbers = #tpu.dot_dimension_numbers<[1], [0], [0], [1], [0, 0, 1, 1], [], []>} : vector<2x384xbf16>, vector<384x128xbf16>, vector<2x128xf32> -> vector<2x128xf32>
    %101 = vector.broadcast %75 : vector<1x128xf32> to vector<2x128xf32>
    %102 = arith.addf %100, %101 : vector<2x128xf32>
    %cst_77 = arith.constant 0.000000e+00 : f32
    %103 = vector.broadcast %cst_77 : f32 to vector<2x128xf32>
    %104 = arith.cmpf oge, %102, %103 : vector<2x128xf32>
    %cst_78 = arith.constant 2.000000e-01 : f32
    %105 = vector.broadcast %cst_78 : f32 to vector<2x128xf32>
    %106 = arith.mulf %105, %102 : vector<2x128xf32>
    %107 = arith.select %104, %102, %106 : vector<2x128xi1>, vector<2x128xf32>
    %108 = arith.truncf %107 : vector<2x128xf32> to vector<2x128xbf16>
    %cst_79 = arith.constant dense<0.000000e+00> : vector<2x128xf32>
    %109 = tpu.matmul %108, %77, %cst_79 {dimension_numbers = #tpu.dot_dimension_numbers<[1], [0], [0], [1], [0, 0, 1, 1], [], []>} : vector<2x128xbf16>, vector<128x128xbf16>, vector<2x128xf32> -> vector<2x128xf32>
    %110 = vector.broadcast %79 : vector<1x128xf32> to vector<2x128xf32>
    %111 = arith.addf %109, %110 : vector<2x128xf32>
    %cst_80 = arith.constant 0.000000e+00 : f32
    %112 = vector.broadcast %cst_80 : f32 to vector<2x128xf32>
    %113 = arith.cmpf oge, %111, %112 : vector<2x128xf32>
    %cst_81 = arith.constant 2.000000e-01 : f32
    %114 = vector.broadcast %cst_81 : f32 to vector<2x128xf32>
    %115 = arith.mulf %114, %111 : vector<2x128xf32>
    %116 = arith.select %113, %111, %115 : vector<2x128xi1>, vector<2x128xf32>
    %117 = arith.addf %99, %116 : vector<2x128xf32>
    %118 = arith.truncf %117 : vector<2x128xf32> to vector<2x128xbf16>
    %cst_82 = arith.constant dense<0.000000e+00> : vector<2x64xf32>
    %119 = tpu.matmul %118, %87, %cst_82 {dimension_numbers = #tpu.dot_dimension_numbers<[1], [0], [0], [1], [0, 0, 1, 1], [], []>} : vector<2x128xbf16>, vector<128x64xbf16>, vector<2x64xf32> -> vector<2x64xf32>
    %120 = vector.broadcast %89 : vector<1x64xf32> to vector<2x64xf32>
    %121 = arith.addf %119, %120 : vector<2x64xf32>
    %c1 = arith.constant 1 : index
    %c0_83 = arith.constant 0 : index
    %c0_84 = arith.constant 0 : index
    %122 = vector.load %arg5[%c1, %c0_83, %c0_84] : memref<5x384x128xbf16, #tpu.memory_space<vmem>>, vector<1x384x128xbf16>
    %123 = vector.shape_cast %122 : vector<1x384x128xbf16> to vector<384x128xbf16>
    %c1_85 = arith.constant 1 : index
    %c0_86 = arith.constant 0 : index
    %c0_87 = arith.constant 0 : index
    %124 = vector.load %arg6[%c1_85, %c0_86, %c0_87] : memref<5x1x128xf32, #tpu.memory_space<vmem>>, vector<1x1x128xf32>
    %125 = vector.shape_cast %124 : vector<1x1x128xf32> to vector<1x128xf32>
    %c1_88 = arith.constant 1 : index
    %c0_89 = arith.constant 0 : index
    %c0_90 = arith.constant 0 : index
    %126 = vector.load %arg7[%c1_88, %c0_89, %c0_90] : memref<5x128x128xbf16, #tpu.memory_space<vmem>>, vector<1x128x128xbf16>
    %127 = vector.shape_cast %126 : vector<1x128x128xbf16> to vector<128x128xbf16>
    %c1_91 = arith.constant 1 : index
    %c0_92 = arith.constant 0 : index
    %c0_93 = arith.constant 0 : index
    %128 = vector.load %arg8[%c1_91, %c0_92, %c0_93] : memref<5x1x128xf32, #tpu.memory_space<vmem>>, vector<1x1x128xf32>
    %129 = vector.shape_cast %128 : vector<1x1x128xf32> to vector<1x128xf32>
    %c1_94 = arith.constant 1 : index
    %c0_95 = arith.constant 0 : index
    %c0_96 = arith.constant 0 : index
    %130 = vector.load %arg0[%c1_94, %c0_95, %c0_96] : memref<5x2x384xbf16, #tpu.memory_space<vmem>>, vector<1x2x384xbf16>
    %131 = vector.shape_cast %130 : vector<1x2x384xbf16> to vector<2x384xbf16>
    %c1_97 = arith.constant 1 : index
    %c0_98 = arith.constant 0 : index
    %c0_99 = arith.constant 0 : index
    %132 = vector.load %arg3[%c1_97, %c0_98, %c0_99] : memref<5x384x384xbf16, #tpu.memory_space<vmem>>, vector<1x384x384xbf16>
    %133 = vector.shape_cast %132 : vector<1x384x384xbf16> to vector<384x384xbf16>
    %c1_100 = arith.constant 1 : index
    %c0_101 = arith.constant 0 : index
    %c0_102 = arith.constant 0 : index
    %134 = vector.load %arg4[%c1_100, %c0_101, %c0_102] : memref<5x1x384xf32, #tpu.memory_space<vmem>>, vector<1x1x384xf32>
    %135 = vector.shape_cast %134 : vector<1x1x384xf32> to vector<1x384xf32>
    %c1_103 = arith.constant 1 : index
    %c0_104 = arith.constant 0 : index
    %c0_105 = arith.constant 0 : index
    %136 = vector.load %arg9[%c1_103, %c0_104, %c0_105] : memref<5x128x64xbf16, #tpu.memory_space<vmem>>, vector<1x128x64xbf16>
    %137 = vector.shape_cast %136 : vector<1x128x64xbf16> to vector<128x64xbf16>
    %c1_106 = arith.constant 1 : index
    %c0_107 = arith.constant 0 : index
    %c0_108 = arith.constant 0 : index
    %138 = vector.load %arg10[%c1_106, %c0_107, %c0_108] : memref<5x1x64xf32, #tpu.memory_space<vmem>>, vector<1x1x64xf32>
    %139 = vector.shape_cast %138 : vector<1x1x64xf32> to vector<1x64xf32>
    %cst_109 = arith.constant dense<0.000000e+00> : vector<2x384xf32>
    %140 = tpu.matmul %131, %133, %cst_109 {dimension_numbers = #tpu.dot_dimension_numbers<[1], [0], [0], [1], [0, 0, 1, 1], [], []>} : vector<2x384xbf16>, vector<384x384xbf16>, vector<2x384xf32> -> vector<2x384xf32>
    %141 = vector.broadcast %135 : vector<1x384xf32> to vector<2x384xf32>
    %142 = arith.addf %140, %141 : vector<2x384xf32>
    %cst_110 = arith.constant 0.000000e+00 : f32
    %143 = vector.broadcast %cst_110 : f32 to vector<2x384xf32>
    %144 = arith.cmpf oge, %142, %143 : vector<2x384xf32>
    %cst_111 = arith.constant 2.000000e-01 : f32
    %145 = vector.broadcast %cst_111 : f32 to vector<2x384xf32>
    %146 = arith.mulf %145, %142 : vector<2x384xf32>
    %147 = arith.select %144, %142, %146 : vector<2x384xi1>, vector<2x384xf32>
    %148 = arith.truncf %147 : vector<2x384xf32> to vector<2x384xbf16>
    %149 = vector.extract_strided_slice %147 {offsets = [0, 128], sizes = [2, 128], strides = [1, 1]} : vector<2x384xf32> to vector<2x128xf32>
    %cst_112 = arith.constant dense<0.000000e+00> : vector<2x128xf32>
    %150 = tpu.matmul %148, %123, %cst_112 {dimension_numbers = #tpu.dot_dimension_numbers<[1], [0], [0], [1], [0, 0, 1, 1], [], []>} : vector<2x384xbf16>, vector<384x128xbf16>, vector<2x128xf32> -> vector<2x128xf32>
    %151 = vector.broadcast %125 : vector<1x128xf32> to vector<2x128xf32>
    %152 = arith.addf %150, %151 : vector<2x128xf32>
    %cst_113 = arith.constant 0.000000e+00 : f32
    %153 = vector.broadcast %cst_113 : f32 to vector<2x128xf32>
    %154 = arith.cmpf oge, %152, %153 : vector<2x128xf32>
    %cst_114 = arith.constant 2.000000e-01 : f32
    %155 = vector.broadcast %cst_114 : f32 to vector<2x128xf32>
    %156 = arith.mulf %155, %152 : vector<2x128xf32>
    %157 = arith.select %154, %152, %156 : vector<2x128xi1>, vector<2x128xf32>
    %158 = arith.truncf %157 : vector<2x128xf32> to vector<2x128xbf16>
    %cst_115 = arith.constant dense<0.000000e+00> : vector<2x128xf32>
    %159 = tpu.matmul %158, %127, %cst_115 {dimension_numbers = #tpu.dot_dimension_numbers<[1], [0], [0], [1], [0, 0, 1, 1], [], []>} : vector<2x128xbf16>, vector<128x128xbf16>, vector<2x128xf32> -> vector<2x128xf32>
    %160 = vector.broadcast %129 : vector<1x128xf32> to vector<2x128xf32>
    %161 = arith.addf %159, %160 : vector<2x128xf32>
    %cst_116 = arith.constant 0.000000e+00 : f32
    %162 = vector.broadcast %cst_116 : f32 to vector<2x128xf32>
    %163 = arith.cmpf oge, %161, %162 : vector<2x128xf32>
    %cst_117 = arith.constant 2.000000e-01 : f32
    %164 = vector.broadcast %cst_117 : f32 to vector<2x128xf32>
    %165 = arith.mulf %164, %161 : vector<2x128xf32>
    %166 = arith.select %163, %161, %165 : vector<2x128xi1>, vector<2x128xf32>
    %167 = arith.addf %149, %166 : vector<2x128xf32>
    %168 = arith.truncf %167 : vector<2x128xf32> to vector<2x128xbf16>
    %cst_118 = arith.constant dense<0.000000e+00> : vector<2x64xf32>
    %169 = tpu.matmul %168, %137, %cst_118 {dimension_numbers = #tpu.dot_dimension_numbers<[1], [0], [0], [1], [0, 0, 1, 1], [], []>} : vector<2x128xbf16>, vector<128x64xbf16>, vector<2x64xf32> -> vector<2x64xf32>
    %170 = vector.broadcast %139 : vector<1x64xf32> to vector<2x64xf32>
    %171 = arith.addf %169, %170 : vector<2x64xf32>
    %c2 = arith.constant 2 : index
    %c0_119 = arith.constant 0 : index
    %c0_120 = arith.constant 0 : index
    %172 = vector.load %arg5[%c2, %c0_119, %c0_120] : memref<5x384x128xbf16, #tpu.memory_space<vmem>>, vector<1x384x128xbf16>
    %173 = vector.shape_cast %172 : vector<1x384x128xbf16> to vector<384x128xbf16>
    %c2_121 = arith.constant 2 : index
    %c0_122 = arith.constant 0 : index
    %c0_123 = arith.constant 0 : index
    %174 = vector.load %arg6[%c2_121, %c0_122, %c0_123] : memref<5x1x128xf32, #tpu.memory_space<vmem>>, vector<1x1x128xf32>
    %175 = vector.shape_cast %174 : vector<1x1x128xf32> to vector<1x128xf32>
    %c2_124 = arith.constant 2 : index
    %c0_125 = arith.constant 0 : index
    %c0_126 = arith.constant 0 : index
    %176 = vector.load %arg7[%c2_124, %c0_125, %c0_126] : memref<5x128x128xbf16, #tpu.memory_space<vmem>>, vector<1x128x128xbf16>
    %177 = vector.shape_cast %176 : vector<1x128x128xbf16> to vector<128x128xbf16>
    %c2_127 = arith.constant 2 : index
    %c0_128 = arith.constant 0 : index
    %c0_129 = arith.constant 0 : index
    %178 = vector.load %arg8[%c2_127, %c0_128, %c0_129] : memref<5x1x128xf32, #tpu.memory_space<vmem>>, vector<1x1x128xf32>
    %179 = vector.shape_cast %178 : vector<1x1x128xf32> to vector<1x128xf32>
    %c2_130 = arith.constant 2 : index
    %c0_131 = arith.constant 0 : index
    %c0_132 = arith.constant 0 : index
    %180 = vector.load %arg0[%c2_130, %c0_131, %c0_132] : memref<5x2x384xbf16, #tpu.memory_space<vmem>>, vector<1x2x384xbf16>
    %181 = vector.shape_cast %180 : vector<1x2x384xbf16> to vector<2x384xbf16>
    %c2_133 = arith.constant 2 : index
    %c0_134 = arith.constant 0 : index
    %c0_135 = arith.constant 0 : index
    %182 = vector.load %arg3[%c2_133, %c0_134, %c0_135] : memref<5x384x384xbf16, #tpu.memory_space<vmem>>, vector<1x384x384xbf16>
    %183 = vector.shape_cast %182 : vector<1x384x384xbf16> to vector<384x384xbf16>
    %c2_136 = arith.constant 2 : index
    %c0_137 = arith.constant 0 : index
    %c0_138 = arith.constant 0 : index
    %184 = vector.load %arg4[%c2_136, %c0_137, %c0_138] : memref<5x1x384xf32, #tpu.memory_space<vmem>>, vector<1x1x384xf32>
    %185 = vector.shape_cast %184 : vector<1x1x384xf32> to vector<1x384xf32>
    %c2_139 = arith.constant 2 : index
    %c0_140 = arith.constant 0 : index
    %c0_141 = arith.constant 0 : index
    %186 = vector.load %arg9[%c2_139, %c0_140, %c0_141] : memref<5x128x64xbf16, #tpu.memory_space<vmem>>, vector<1x128x64xbf16>
    %187 = vector.shape_cast %186 : vector<1x128x64xbf16> to vector<128x64xbf16>
    %c2_142 = arith.constant 2 : index
    %c0_143 = arith.constant 0 : index
    %c0_144 = arith.constant 0 : index
    %188 = vector.load %arg10[%c2_142, %c0_143, %c0_144] : memref<5x1x64xf32, #tpu.memory_space<vmem>>, vector<1x1x64xf32>
    %189 = vector.shape_cast %188 : vector<1x1x64xf32> to vector<1x64xf32>
    %cst_145 = arith.constant dense<0.000000e+00> : vector<2x384xf32>
    %190 = tpu.matmul %181, %183, %cst_145 {dimension_numbers = #tpu.dot_dimension_numbers<[1], [0], [0], [1], [0, 0, 1, 1], [], []>} : vector<2x384xbf16>, vector<384x384xbf16>, vector<2x384xf32> -> vector<2x384xf32>
    %191 = vector.broadcast %185 : vector<1x384xf32> to vector<2x384xf32>
    %192 = arith.addf %190, %191 : vector<2x384xf32>
    %cst_146 = arith.constant 0.000000e+00 : f32
    %193 = vector.broadcast %cst_146 : f32 to vector<2x384xf32>
    %194 = arith.cmpf oge, %192, %193 : vector<2x384xf32>
    %cst_147 = arith.constant 2.000000e-01 : f32
    %195 = vector.broadcast %cst_147 : f32 to vector<2x384xf32>
    %196 = arith.mulf %195, %192 : vector<2x384xf32>
    %197 = arith.select %194, %192, %196 : vector<2x384xi1>, vector<2x384xf32>
    %198 = arith.truncf %197 : vector<2x384xf32> to vector<2x384xbf16>
    %199 = vector.extract_strided_slice %197 {offsets = [0, 128], sizes = [2, 128], strides = [1, 1]} : vector<2x384xf32> to vector<2x128xf32>
    %cst_148 = arith.constant dense<0.000000e+00> : vector<2x128xf32>
    %200 = tpu.matmul %198, %173, %cst_148 {dimension_numbers = #tpu.dot_dimension_numbers<[1], [0], [0], [1], [0, 0, 1, 1], [], []>} : vector<2x384xbf16>, vector<384x128xbf16>, vector<2x128xf32> -> vector<2x128xf32>
    %201 = vector.broadcast %175 : vector<1x128xf32> to vector<2x128xf32>
    %202 = arith.addf %200, %201 : vector<2x128xf32>
    %cst_149 = arith.constant 0.000000e+00 : f32
    %203 = vector.broadcast %cst_149 : f32 to vector<2x128xf32>
    %204 = arith.cmpf oge, %202, %203 : vector<2x128xf32>
    %cst_150 = arith.constant 2.000000e-01 : f32
    %205 = vector.broadcast %cst_150 : f32 to vector<2x128xf32>
    %206 = arith.mulf %205, %202 : vector<2x128xf32>
    %207 = arith.select %204, %202, %206 : vector<2x128xi1>, vector<2x128xf32>
    %208 = arith.truncf %207 : vector<2x128xf32> to vector<2x128xbf16>
    %cst_151 = arith.constant dense<0.000000e+00> : vector<2x128xf32>
    %209 = tpu.matmul %208, %177, %cst_151 {dimension_numbers = #tpu.dot_dimension_numbers<[1], [0], [0], [1], [0, 0, 1, 1], [], []>} : vector<2x128xbf16>, vector<128x128xbf16>, vector<2x128xf32> -> vector<2x128xf32>
    %210 = vector.broadcast %179 : vector<1x128xf32> to vector<2x128xf32>
    %211 = arith.addf %209, %210 : vector<2x128xf32>
    %cst_152 = arith.constant 0.000000e+00 : f32
    %212 = vector.broadcast %cst_152 : f32 to vector<2x128xf32>
    %213 = arith.cmpf oge, %211, %212 : vector<2x128xf32>
    %cst_153 = arith.constant 2.000000e-01 : f32
    %214 = vector.broadcast %cst_153 : f32 to vector<2x128xf32>
    %215 = arith.mulf %214, %211 : vector<2x128xf32>
    %216 = arith.select %213, %211, %215 : vector<2x128xi1>, vector<2x128xf32>
    %217 = arith.addf %199, %216 : vector<2x128xf32>
    %218 = arith.truncf %217 : vector<2x128xf32> to vector<2x128xbf16>
    %cst_154 = arith.constant dense<0.000000e+00> : vector<2x64xf32>
    %219 = tpu.matmul %218, %187, %cst_154 {dimension_numbers = #tpu.dot_dimension_numbers<[1], [0], [0], [1], [0, 0, 1, 1], [], []>} : vector<2x128xbf16>, vector<128x64xbf16>, vector<2x64xf32> -> vector<2x64xf32>
    %220 = vector.broadcast %189 : vector<1x64xf32> to vector<2x64xf32>
    %221 = arith.addf %219, %220 : vector<2x64xf32>
    %c3 = arith.constant 3 : index
    %c0_155 = arith.constant 0 : index
    %c0_156 = arith.constant 0 : index
    %222 = vector.load %arg5[%c3, %c0_155, %c0_156] : memref<5x384x128xbf16, #tpu.memory_space<vmem>>, vector<1x384x128xbf16>
    %223 = vector.shape_cast %222 : vector<1x384x128xbf16> to vector<384x128xbf16>
    %c3_157 = arith.constant 3 : index
    %c0_158 = arith.constant 0 : index
    %c0_159 = arith.constant 0 : index
    %224 = vector.load %arg6[%c3_157, %c0_158, %c0_159] : memref<5x1x128xf32, #tpu.memory_space<vmem>>, vector<1x1x128xf32>
    %225 = vector.shape_cast %224 : vector<1x1x128xf32> to vector<1x128xf32>
    %c3_160 = arith.constant 3 : index
    %c0_161 = arith.constant 0 : index
    %c0_162 = arith.constant 0 : index
    %226 = vector.load %arg7[%c3_160, %c0_161, %c0_162] : memref<5x128x128xbf16, #tpu.memory_space<vmem>>, vector<1x128x128xbf16>
    %227 = vector.shape_cast %226 : vector<1x128x128xbf16> to vector<128x128xbf16>
    %c3_163 = arith.constant 3 : index
    %c0_164 = arith.constant 0 : index
    %c0_165 = arith.constant 0 : index
    %228 = vector.load %arg8[%c3_163, %c0_164, %c0_165] : memref<5x1x128xf32, #tpu.memory_space<vmem>>, vector<1x1x128xf32>
    %229 = vector.shape_cast %228 : vector<1x1x128xf32> to vector<1x128xf32>
    %c3_166 = arith.constant 3 : index
    %c0_167 = arith.constant 0 : index
    %c0_168 = arith.constant 0 : index
    %230 = vector.load %arg0[%c3_166, %c0_167, %c0_168] : memref<5x2x384xbf16, #tpu.memory_space<vmem>>, vector<1x2x384xbf16>
    %231 = vector.shape_cast %230 : vector<1x2x384xbf16> to vector<2x384xbf16>
    %c3_169 = arith.constant 3 : index
    %c0_170 = arith.constant 0 : index
    %c0_171 = arith.constant 0 : index
    %232 = vector.load %arg3[%c3_169, %c0_170, %c0_171] : memref<5x384x384xbf16, #tpu.memory_space<vmem>>, vector<1x384x384xbf16>
    %233 = vector.shape_cast %232 : vector<1x384x384xbf16> to vector<384x384xbf16>
    %c3_172 = arith.constant 3 : index
    %c0_173 = arith.constant 0 : index
    %c0_174 = arith.constant 0 : index
    %234 = vector.load %arg4[%c3_172, %c0_173, %c0_174] : memref<5x1x384xf32, #tpu.memory_space<vmem>>, vector<1x1x384xf32>
    %235 = vector.shape_cast %234 : vector<1x1x384xf32> to vector<1x384xf32>
    %c3_175 = arith.constant 3 : index
    %c0_176 = arith.constant 0 : index
    %c0_177 = arith.constant 0 : index
    %236 = vector.load %arg9[%c3_175, %c0_176, %c0_177] : memref<5x128x64xbf16, #tpu.memory_space<vmem>>, vector<1x128x64xbf16>
    %237 = vector.shape_cast %236 : vector<1x128x64xbf16> to vector<128x64xbf16>
    %c3_178 = arith.constant 3 : index
    %c0_179 = arith.constant 0 : index
    %c0_180 = arith.constant 0 : index
    %238 = vector.load %arg10[%c3_178, %c0_179, %c0_180] : memref<5x1x64xf32, #tpu.memory_space<vmem>>, vector<1x1x64xf32>
    %239 = vector.shape_cast %238 : vector<1x1x64xf32> to vector<1x64xf32>
    %cst_181 = arith.constant dense<0.000000e+00> : vector<2x384xf32>
    %240 = tpu.matmul %231, %233, %cst_181 {dimension_numbers = #tpu.dot_dimension_numbers<[1], [0], [0], [1], [0, 0, 1, 1], [], []>} : vector<2x384xbf16>, vector<384x384xbf16>, vector<2x384xf32> -> vector<2x384xf32>
    %241 = vector.broadcast %235 : vector<1x384xf32> to vector<2x384xf32>
    %242 = arith.addf %240, %241 : vector<2x384xf32>
    %cst_182 = arith.constant 0.000000e+00 : f32
    %243 = vector.broadcast %cst_182 : f32 to vector<2x384xf32>
    %244 = arith.cmpf oge, %242, %243 : vector<2x384xf32>
    %cst_183 = arith.constant 2.000000e-01 : f32
    %245 = vector.broadcast %cst_183 : f32 to vector<2x384xf32>
    %246 = arith.mulf %245, %242 : vector<2x384xf32>
    %247 = arith.select %244, %242, %246 : vector<2x384xi1>, vector<2x384xf32>
    %248 = arith.truncf %247 : vector<2x384xf32> to vector<2x384xbf16>
    %249 = vector.extract_strided_slice %247 {offsets = [0, 128], sizes = [2, 128], strides = [1, 1]} : vector<2x384xf32> to vector<2x128xf32>
    %cst_184 = arith.constant dense<0.000000e+00> : vector<2x128xf32>
    %250 = tpu.matmul %248, %223, %cst_184 {dimension_numbers = #tpu.dot_dimension_numbers<[1], [0], [0], [1], [0, 0, 1, 1], [], []>} : vector<2x384xbf16>, vector<384x128xbf16>, vector<2x128xf32> -> vector<2x128xf32>
    %251 = vector.broadcast %225 : vector<1x128xf32> to vector<2x128xf32>
    %252 = arith.addf %250, %251 : vector<2x128xf32>
    %cst_185 = arith.constant 0.000000e+00 : f32
    %253 = vector.broadcast %cst_185 : f32 to vector<2x128xf32>
    %254 = arith.cmpf oge, %252, %253 : vector<2x128xf32>
    %cst_186 = arith.constant 2.000000e-01 : f32
    %255 = vector.broadcast %cst_186 : f32 to vector<2x128xf32>
    %256 = arith.mulf %255, %252 : vector<2x128xf32>
    %257 = arith.select %254, %252, %256 : vector<2x128xi1>, vector<2x128xf32>
    %258 = arith.truncf %257 : vector<2x128xf32> to vector<2x128xbf16>
    %cst_187 = arith.constant dense<0.000000e+00> : vector<2x128xf32>
    %259 = tpu.matmul %258, %227, %cst_187 {dimension_numbers = #tpu.dot_dimension_numbers<[1], [0], [0], [1], [0, 0, 1, 1], [], []>} : vector<2x128xbf16>, vector<128x128xbf16>, vector<2x128xf32> -> vector<2x128xf32>
    %260 = vector.broadcast %229 : vector<1x128xf32> to vector<2x128xf32>
    %261 = arith.addf %259, %260 : vector<2x128xf32>
    %cst_188 = arith.constant 0.000000e+00 : f32
    %262 = vector.broadcast %cst_188 : f32 to vector<2x128xf32>
    %263 = arith.cmpf oge, %261, %262 : vector<2x128xf32>
    %cst_189 = arith.constant 2.000000e-01 : f32
    %264 = vector.broadcast %cst_189 : f32 to vector<2x128xf32>
    %265 = arith.mulf %264, %261 : vector<2x128xf32>
    %266 = arith.select %263, %261, %265 : vector<2x128xi1>, vector<2x128xf32>
    %267 = arith.addf %249, %266 : vector<2x128xf32>
    %268 = arith.truncf %267 : vector<2x128xf32> to vector<2x128xbf16>
    %cst_190 = arith.constant dense<0.000000e+00> : vector<2x64xf32>
    %269 = tpu.matmul %268, %237, %cst_190 {dimension_numbers = #tpu.dot_dimension_numbers<[1], [0], [0], [1], [0, 0, 1, 1], [], []>} : vector<2x128xbf16>, vector<128x64xbf16>, vector<2x64xf32> -> vector<2x64xf32>
    %270 = vector.broadcast %239 : vector<1x64xf32> to vector<2x64xf32>
    %271 = arith.addf %269, %270 : vector<2x64xf32>
    %c4 = arith.constant 4 : index
    %c0_191 = arith.constant 0 : index
    %c0_192 = arith.constant 0 : index
    %272 = vector.load %arg5[%c4, %c0_191, %c0_192] : memref<5x384x128xbf16, #tpu.memory_space<vmem>>, vector<1x384x128xbf16>
    %273 = vector.shape_cast %272 : vector<1x384x128xbf16> to vector<384x128xbf16>
    %c4_193 = arith.constant 4 : index
    %c0_194 = arith.constant 0 : index
    %c0_195 = arith.constant 0 : index
    %274 = vector.load %arg6[%c4_193, %c0_194, %c0_195] : memref<5x1x128xf32, #tpu.memory_space<vmem>>, vector<1x1x128xf32>
    %275 = vector.shape_cast %274 : vector<1x1x128xf32> to vector<1x128xf32>
    %c4_196 = arith.constant 4 : index
    %c0_197 = arith.constant 0 : index
    %c0_198 = arith.constant 0 : index
    %276 = vector.load %arg7[%c4_196, %c0_197, %c0_198] : memref<5x128x128xbf16, #tpu.memory_space<vmem>>, vector<1x128x128xbf16>
    %277 = vector.shape_cast %276 : vector<1x128x128xbf16> to vector<128x128xbf16>
    %c4_199 = arith.constant 4 : index
    %c0_200 = arith.constant 0 : index
    %c0_201 = arith.constant 0 : index
    %278 = vector.load %arg8[%c4_199, %c0_200, %c0_201] : memref<5x1x128xf32, #tpu.memory_space<vmem>>, vector<1x1x128xf32>
    %279 = vector.shape_cast %278 : vector<1x1x128xf32> to vector<1x128xf32>
    %c4_202 = arith.constant 4 : index
    %c0_203 = arith.constant 0 : index
    %c0_204 = arith.constant 0 : index
    %280 = vector.load %arg0[%c4_202, %c0_203, %c0_204] : memref<5x2x384xbf16, #tpu.memory_space<vmem>>, vector<1x2x384xbf16>
    %281 = vector.shape_cast %280 : vector<1x2x384xbf16> to vector<2x384xbf16>
    %c4_205 = arith.constant 4 : index
    %c0_206 = arith.constant 0 : index
    %c0_207 = arith.constant 0 : index
    %282 = vector.load %arg3[%c4_205, %c0_206, %c0_207] : memref<5x384x384xbf16, #tpu.memory_space<vmem>>, vector<1x384x384xbf16>
    %283 = vector.shape_cast %282 : vector<1x384x384xbf16> to vector<384x384xbf16>
    %c4_208 = arith.constant 4 : index
    %c0_209 = arith.constant 0 : index
    %c0_210 = arith.constant 0 : index
    %284 = vector.load %arg4[%c4_208, %c0_209, %c0_210] : memref<5x1x384xf32, #tpu.memory_space<vmem>>, vector<1x1x384xf32>
    %285 = vector.shape_cast %284 : vector<1x1x384xf32> to vector<1x384xf32>
    %c4_211 = arith.constant 4 : index
    %c0_212 = arith.constant 0 : index
    %c0_213 = arith.constant 0 : index
    %286 = vector.load %arg9[%c4_211, %c0_212, %c0_213] : memref<5x128x64xbf16, #tpu.memory_space<vmem>>, vector<1x128x64xbf16>
    %287 = vector.shape_cast %286 : vector<1x128x64xbf16> to vector<128x64xbf16>
    %c4_214 = arith.constant 4 : index
    %c0_215 = arith.constant 0 : index
    %c0_216 = arith.constant 0 : index
    %288 = vector.load %arg10[%c4_214, %c0_215, %c0_216] : memref<5x1x64xf32, #tpu.memory_space<vmem>>, vector<1x1x64xf32>
    %289 = vector.shape_cast %288 : vector<1x1x64xf32> to vector<1x64xf32>
    %cst_217 = arith.constant dense<0.000000e+00> : vector<2x384xf32>
    %290 = tpu.matmul %281, %283, %cst_217 {dimension_numbers = #tpu.dot_dimension_numbers<[1], [0], [0], [1], [0, 0, 1, 1], [], []>} : vector<2x384xbf16>, vector<384x384xbf16>, vector<2x384xf32> -> vector<2x384xf32>
    %291 = vector.broadcast %285 : vector<1x384xf32> to vector<2x384xf32>
    %292 = arith.addf %290, %291 : vector<2x384xf32>
    %cst_218 = arith.constant 0.000000e+00 : f32
    %293 = vector.broadcast %cst_218 : f32 to vector<2x384xf32>
    %294 = arith.cmpf oge, %292, %293 : vector<2x384xf32>
    %cst_219 = arith.constant 2.000000e-01 : f32
    %295 = vector.broadcast %cst_219 : f32 to vector<2x384xf32>
    %296 = arith.mulf %295, %292 : vector<2x384xf32>
    %297 = arith.select %294, %292, %296 : vector<2x384xi1>, vector<2x384xf32>
    %298 = arith.truncf %297 : vector<2x384xf32> to vector<2x384xbf16>
    %299 = vector.extract_strided_slice %297 {offsets = [0, 128], sizes = [2, 128], strides = [1, 1]} : vector<2x384xf32> to vector<2x128xf32>
    %cst_220 = arith.constant dense<0.000000e+00> : vector<2x128xf32>
    %300 = tpu.matmul %298, %273, %cst_220 {dimension_numbers = #tpu.dot_dimension_numbers<[1], [0], [0], [1], [0, 0, 1, 1], [], []>} : vector<2x384xbf16>, vector<384x128xbf16>, vector<2x128xf32> -> vector<2x128xf32>
    %301 = vector.broadcast %275 : vector<1x128xf32> to vector<2x128xf32>
    %302 = arith.addf %300, %301 : vector<2x128xf32>
    %cst_221 = arith.constant 0.000000e+00 : f32
    %303 = vector.broadcast %cst_221 : f32 to vector<2x128xf32>
    %304 = arith.cmpf oge, %302, %303 : vector<2x128xf32>
    %cst_222 = arith.constant 2.000000e-01 : f32
    %305 = vector.broadcast %cst_222 : f32 to vector<2x128xf32>
    %306 = arith.mulf %305, %302 : vector<2x128xf32>
    %307 = arith.select %304, %302, %306 : vector<2x128xi1>, vector<2x128xf32>
    %308 = arith.truncf %307 : vector<2x128xf32> to vector<2x128xbf16>
    %cst_223 = arith.constant dense<0.000000e+00> : vector<2x128xf32>
    %309 = tpu.matmul %308, %277, %cst_223 {dimension_numbers = #tpu.dot_dimension_numbers<[1], [0], [0], [1], [0, 0, 1, 1], [], []>} : vector<2x128xbf16>, vector<128x128xbf16>, vector<2x128xf32> -> vector<2x128xf32>
    %310 = vector.broadcast %279 : vector<1x128xf32> to vector<2x128xf32>
    %311 = arith.addf %309, %310 : vector<2x128xf32>
    %cst_224 = arith.constant 0.000000e+00 : f32
    %312 = vector.broadcast %cst_224 : f32 to vector<2x128xf32>
    %313 = arith.cmpf oge, %311, %312 : vector<2x128xf32>
    %cst_225 = arith.constant 2.000000e-01 : f32
    %314 = vector.broadcast %cst_225 : f32 to vector<2x128xf32>
    %315 = arith.mulf %314, %311 : vector<2x128xf32>
    %316 = arith.select %313, %311, %315 : vector<2x128xi1>, vector<2x128xf32>
    %317 = arith.addf %299, %316 : vector<2x128xf32>
    %318 = arith.truncf %317 : vector<2x128xf32> to vector<2x128xbf16>
    %cst_226 = arith.constant dense<0.000000e+00> : vector<2x64xf32>
    %319 = tpu.matmul %318, %287, %cst_226 {dimension_numbers = #tpu.dot_dimension_numbers<[1], [0], [0], [1], [0, 0, 1, 1], [], []>} : vector<2x128xbf16>, vector<128x64xbf16>, vector<2x64xf32> -> vector<2x64xf32>
    %320 = vector.broadcast %289 : vector<1x64xf32> to vector<2x64xf32>
    %321 = arith.addf %319, %320 : vector<2x64xf32>
    %c0_227 = arith.constant 0 : index
    %c0_228 = arith.constant 0 : index
    %c0_229 = arith.constant 0 : index
    %322 = vector.load %arg13[%c0_227, %c0_228, %c0_229] : memref<5x384x128xbf16, #tpu.memory_space<vmem>>, vector<1x384x128xbf16>
    %323 = vector.shape_cast %322 : vector<1x384x128xbf16> to vector<384x128xbf16>
    %c0_230 = arith.constant 0 : index
    %c0_231 = arith.constant 0 : index
    %c0_232 = arith.constant 0 : index
    %324 = vector.load %arg14[%c0_230, %c0_231, %c0_232] : memref<5x1x128xf32, #tpu.memory_space<vmem>>, vector<1x1x128xf32>
    %325 = vector.shape_cast %324 : vector<1x1x128xf32> to vector<1x128xf32>
    %c0_233 = arith.constant 0 : index
    %c0_234 = arith.constant 0 : index
    %c0_235 = arith.constant 0 : index
    %326 = vector.load %arg15[%c0_233, %c0_234, %c0_235] : memref<5x128x128xbf16, #tpu.memory_space<vmem>>, vector<1x128x128xbf16>
    %327 = vector.shape_cast %326 : vector<1x128x128xbf16> to vector<128x128xbf16>
    %c0_236 = arith.constant 0 : index
    %c0_237 = arith.constant 0 : index
    %c0_238 = arith.constant 0 : index
    %328 = vector.load %arg16[%c0_236, %c0_237, %c0_238] : memref<5x1x128xf32, #tpu.memory_space<vmem>>, vector<1x1x128xf32>
    %329 = vector.shape_cast %328 : vector<1x1x128xf32> to vector<1x128xf32>
    %c0_239 = arith.constant 0 : index
    %c0_240 = arith.constant 0 : index
    %c0_241 = arith.constant 0 : index
    %330 = vector.load %arg1[%c0_239, %c0_240, %c0_241] : memref<5x2x128xbf16, #tpu.memory_space<vmem>>, vector<1x2x128xbf16>
    %331 = vector.shape_cast %330 : vector<1x2x128xbf16> to vector<2x128xbf16>
    %c0_242 = arith.constant 0 : index
    %c0_243 = arith.constant 0 : index
    %c0_244 = arith.constant 0 : index
    %332 = vector.load %arg11[%c0_242, %c0_243, %c0_244] : memref<5x128x384xbf16, #tpu.memory_space<vmem>>, vector<1x128x384xbf16>
    %333 = vector.shape_cast %332 : vector<1x128x384xbf16> to vector<128x384xbf16>
    %c0_245 = arith.constant 0 : index
    %c0_246 = arith.constant 0 : index
    %c0_247 = arith.constant 0 : index
    %334 = vector.load %arg12[%c0_245, %c0_246, %c0_247] : memref<5x1x384xf32, #tpu.memory_space<vmem>>, vector<1x1x384xf32>
    %335 = vector.shape_cast %334 : vector<1x1x384xf32> to vector<1x384xf32>
    %c0_248 = arith.constant 0 : index
    %c0_249 = arith.constant 0 : index
    %c0_250 = arith.constant 0 : index
    %336 = vector.load %arg17[%c0_248, %c0_249, %c0_250] : memref<5x128x32xbf16, #tpu.memory_space<vmem>>, vector<1x128x32xbf16>
    %337 = vector.shape_cast %336 : vector<1x128x32xbf16> to vector<128x32xbf16>
    %c0_251 = arith.constant 0 : index
    %c0_252 = arith.constant 0 : index
    %c0_253 = arith.constant 0 : index
    %338 = vector.load %arg18[%c0_251, %c0_252, %c0_253] : memref<5x1x32xf32, #tpu.memory_space<vmem>>, vector<1x1x32xf32>
    %339 = vector.shape_cast %338 : vector<1x1x32xf32> to vector<1x32xf32>
    %cst_254 = arith.constant dense<0.000000e+00> : vector<2x384xf32>
    %340 = tpu.matmul %331, %333, %cst_254 {dimension_numbers = #tpu.dot_dimension_numbers<[1], [0], [0], [1], [0, 0, 1, 1], [], []>} : vector<2x128xbf16>, vector<128x384xbf16>, vector<2x384xf32> -> vector<2x384xf32>
    %341 = vector.broadcast %335 : vector<1x384xf32> to vector<2x384xf32>
    %342 = arith.addf %340, %341 : vector<2x384xf32>
    %cst_255 = arith.constant 0.000000e+00 : f32
    %343 = vector.broadcast %cst_255 : f32 to vector<2x384xf32>
    %344 = arith.cmpf oge, %342, %343 : vector<2x384xf32>
    %cst_256 = arith.constant 2.000000e-01 : f32
    %345 = vector.broadcast %cst_256 : f32 to vector<2x384xf32>
    %346 = arith.mulf %345, %342 : vector<2x384xf32>
    %347 = arith.select %344, %342, %346 : vector<2x384xi1>, vector<2x384xf32>
    %348 = arith.truncf %347 : vector<2x384xf32> to vector<2x384xbf16>
    %349 = vector.extract_strided_slice %347 {offsets = [0, 128], sizes = [2, 128], strides = [1, 1]} : vector<2x384xf32> to vector<2x128xf32>
    %cst_257 = arith.constant dense<0.000000e+00> : vector<2x128xf32>
    %350 = tpu.matmul %348, %323, %cst_257 {dimension_numbers = #tpu.dot_dimension_numbers<[1], [0], [0], [1], [0, 0, 1, 1], [], []>} : vector<2x384xbf16>, vector<384x128xbf16>, vector<2x128xf32> -> vector<2x128xf32>
    %351 = vector.broadcast %325 : vector<1x128xf32> to vector<2x128xf32>
    %352 = arith.addf %350, %351 : vector<2x128xf32>
    %cst_258 = arith.constant 0.000000e+00 : f32
    %353 = vector.broadcast %cst_258 : f32 to vector<2x128xf32>
    %354 = arith.cmpf oge, %352, %353 : vector<2x128xf32>
    %cst_259 = arith.constant 2.000000e-01 : f32
    %355 = vector.broadcast %cst_259 : f32 to vector<2x128xf32>
    %356 = arith.mulf %355, %352 : vector<2x128xf32>
    %357 = arith.select %354, %352, %356 : vector<2x128xi1>, vector<2x128xf32>
    %358 = arith.truncf %357 : vector<2x128xf32> to vector<2x128xbf16>
    %cst_260 = arith.constant dense<0.000000e+00> : vector<2x128xf32>
    %359 = tpu.matmul %358, %327, %cst_260 {dimension_numbers = #tpu.dot_dimension_numbers<[1], [0], [0], [1], [0, 0, 1, 1], [], []>} : vector<2x128xbf16>, vector<128x128xbf16>, vector<2x128xf32> -> vector<2x128xf32>
    %360 = vector.broadcast %329 : vector<1x128xf32> to vector<2x128xf32>
    %361 = arith.addf %359, %360 : vector<2x128xf32>
    %cst_261 = arith.constant 0.000000e+00 : f32
    %362 = vector.broadcast %cst_261 : f32 to vector<2x128xf32>
    %363 = arith.cmpf oge, %361, %362 : vector<2x128xf32>
    %cst_262 = arith.constant 2.000000e-01 : f32
    %364 = vector.broadcast %cst_262 : f32 to vector<2x128xf32>
    %365 = arith.mulf %364, %361 : vector<2x128xf32>
    %366 = arith.select %363, %361, %365 : vector<2x128xi1>, vector<2x128xf32>
    %367 = arith.addf %349, %366 : vector<2x128xf32>
    %368 = arith.truncf %367 : vector<2x128xf32> to vector<2x128xbf16>
    %cst_263 = arith.constant dense<0.000000e+00> : vector<2x32xf32>
    %369 = tpu.matmul %368, %337, %cst_263 {dimension_numbers = #tpu.dot_dimension_numbers<[1], [0], [0], [1], [0, 0, 1, 1], [], []>} : vector<2x128xbf16>, vector<128x32xbf16>, vector<2x32xf32> -> vector<2x32xf32>
    %370 = vector.broadcast %339 : vector<1x32xf32> to vector<2x32xf32>
    %371 = arith.addf %369, %370 : vector<2x32xf32>
    %c1_264 = arith.constant 1 : index
    %c0_265 = arith.constant 0 : index
    %c0_266 = arith.constant 0 : index
    %372 = vector.load %arg13[%c1_264, %c0_265, %c0_266] : memref<5x384x128xbf16, #tpu.memory_space<vmem>>, vector<1x384x128xbf16>
    %373 = vector.shape_cast %372 : vector<1x384x128xbf16> to vector<384x128xbf16>
    %c1_267 = arith.constant 1 : index
    %c0_268 = arith.constant 0 : index
    %c0_269 = arith.constant 0 : index
    %374 = vector.load %arg14[%c1_267, %c0_268, %c0_269] : memref<5x1x128xf32, #tpu.memory_space<vmem>>, vector<1x1x128xf32>
    %375 = vector.shape_cast %374 : vector<1x1x128xf32> to vector<1x128xf32>
    %c1_270 = arith.constant 1 : index
    %c0_271 = arith.constant 0 : index
    %c0_272 = arith.constant 0 : index
    %376 = vector.load %arg15[%c1_270, %c0_271, %c0_272] : memref<5x128x128xbf16, #tpu.memory_space<vmem>>, vector<1x128x128xbf16>
    %377 = vector.shape_cast %376 : vector<1x128x128xbf16> to vector<128x128xbf16>
    %c1_273 = arith.constant 1 : index
    %c0_274 = arith.constant 0 : index
    %c0_275 = arith.constant 0 : index
    %378 = vector.load %arg16[%c1_273, %c0_274, %c0_275] : memref<5x1x128xf32, #tpu.memory_space<vmem>>, vector<1x1x128xf32>
    %379 = vector.shape_cast %378 : vector<1x1x128xf32> to vector<1x128xf32>
    %c1_276 = arith.constant 1 : index
    %c0_277 = arith.constant 0 : index
    %c0_278 = arith.constant 0 : index
    %380 = vector.load %arg1[%c1_276, %c0_277, %c0_278] : memref<5x2x128xbf16, #tpu.memory_space<vmem>>, vector<1x2x128xbf16>
    %381 = vector.shape_cast %380 : vector<1x2x128xbf16> to vector<2x128xbf16>
    %c1_279 = arith.constant 1 : index
    %c0_280 = arith.constant 0 : index
    %c0_281 = arith.constant 0 : index
    %382 = vector.load %arg11[%c1_279, %c0_280, %c0_281] : memref<5x128x384xbf16, #tpu.memory_space<vmem>>, vector<1x128x384xbf16>
    %383 = vector.shape_cast %382 : vector<1x128x384xbf16> to vector<128x384xbf16>
    %c1_282 = arith.constant 1 : index
    %c0_283 = arith.constant 0 : index
    %c0_284 = arith.constant 0 : index
    %384 = vector.load %arg12[%c1_282, %c0_283, %c0_284] : memref<5x1x384xf32, #tpu.memory_space<vmem>>, vector<1x1x384xf32>
    %385 = vector.shape_cast %384 : vector<1x1x384xf32> to vector<1x384xf32>
    %c1_285 = arith.constant 1 : index
    %c0_286 = arith.constant 0 : index
    %c0_287 = arith.constant 0 : index
    %386 = vector.load %arg17[%c1_285, %c0_286, %c0_287] : memref<5x128x32xbf16, #tpu.memory_space<vmem>>, vector<1x128x32xbf16>
    %387 = vector.shape_cast %386 : vector<1x128x32xbf16> to vector<128x32xbf16>
    %c1_288 = arith.constant 1 : index
    %c0_289 = arith.constant 0 : index
    %c0_290 = arith.constant 0 : index
    %388 = vector.load %arg18[%c1_288, %c0_289, %c0_290] : memref<5x1x32xf32, #tpu.memory_space<vmem>>, vector<1x1x32xf32>
    %389 = vector.shape_cast %388 : vector<1x1x32xf32> to vector<1x32xf32>
    %cst_291 = arith.constant dense<0.000000e+00> : vector<2x384xf32>
    %390 = tpu.matmul %381, %383, %cst_291 {dimension_numbers = #tpu.dot_dimension_numbers<[1], [0], [0], [1], [0, 0, 1, 1], [], []>} : vector<2x128xbf16>, vector<128x384xbf16>, vector<2x384xf32> -> vector<2x384xf32>
    %391 = vector.broadcast %385 : vector<1x384xf32> to vector<2x384xf32>
    %392 = arith.addf %390, %391 : vector<2x384xf32>
    %cst_292 = arith.constant 0.000000e+00 : f32
    %393 = vector.broadcast %cst_292 : f32 to vector<2x384xf32>
    %394 = arith.cmpf oge, %392, %393 : vector<2x384xf32>
    %cst_293 = arith.constant 2.000000e-01 : f32
    %395 = vector.broadcast %cst_293 : f32 to vector<2x384xf32>
    %396 = arith.mulf %395, %392 : vector<2x384xf32>
    %397 = arith.select %394, %392, %396 : vector<2x384xi1>, vector<2x384xf32>
    %398 = arith.truncf %397 : vector<2x384xf32> to vector<2x384xbf16>
    %399 = vector.extract_strided_slice %397 {offsets = [0, 128], sizes = [2, 128], strides = [1, 1]} : vector<2x384xf32> to vector<2x128xf32>
    %cst_294 = arith.constant dense<0.000000e+00> : vector<2x128xf32>
    %400 = tpu.matmul %398, %373, %cst_294 {dimension_numbers = #tpu.dot_dimension_numbers<[1], [0], [0], [1], [0, 0, 1, 1], [], []>} : vector<2x384xbf16>, vector<384x128xbf16>, vector<2x128xf32> -> vector<2x128xf32>
    %401 = vector.broadcast %375 : vector<1x128xf32> to vector<2x128xf32>
    %402 = arith.addf %400, %401 : vector<2x128xf32>
    %cst_295 = arith.constant 0.000000e+00 : f32
    %403 = vector.broadcast %cst_295 : f32 to vector<2x128xf32>
    %404 = arith.cmpf oge, %402, %403 : vector<2x128xf32>
    %cst_296 = arith.constant 2.000000e-01 : f32
    %405 = vector.broadcast %cst_296 : f32 to vector<2x128xf32>
    %406 = arith.mulf %405, %402 : vector<2x128xf32>
    %407 = arith.select %404, %402, %406 : vector<2x128xi1>, vector<2x128xf32>
    %408 = arith.truncf %407 : vector<2x128xf32> to vector<2x128xbf16>
    %cst_297 = arith.constant dense<0.000000e+00> : vector<2x128xf32>
    %409 = tpu.matmul %408, %377, %cst_297 {dimension_numbers = #tpu.dot_dimension_numbers<[1], [0], [0], [1], [0, 0, 1, 1], [], []>} : vector<2x128xbf16>, vector<128x128xbf16>, vector<2x128xf32> -> vector<2x128xf32>
    %410 = vector.broadcast %379 : vector<1x128xf32> to vector<2x128xf32>
    %411 = arith.addf %409, %410 : vector<2x128xf32>
    %cst_298 = arith.constant 0.000000e+00 : f32
    %412 = vector.broadcast %cst_298 : f32 to vector<2x128xf32>
    %413 = arith.cmpf oge, %411, %412 : vector<2x128xf32>
    %cst_299 = arith.constant 2.000000e-01 : f32
    %414 = vector.broadcast %cst_299 : f32 to vector<2x128xf32>
    %415 = arith.mulf %414, %411 : vector<2x128xf32>
    %416 = arith.select %413, %411, %415 : vector<2x128xi1>, vector<2x128xf32>
    %417 = arith.addf %399, %416 : vector<2x128xf32>
    %418 = arith.truncf %417 : vector<2x128xf32> to vector<2x128xbf16>
    %cst_300 = arith.constant dense<0.000000e+00> : vector<2x32xf32>
    %419 = tpu.matmul %418, %387, %cst_300 {dimension_numbers = #tpu.dot_dimension_numbers<[1], [0], [0], [1], [0, 0, 1, 1], [], []>} : vector<2x128xbf16>, vector<128x32xbf16>, vector<2x32xf32> -> vector<2x32xf32>
    %420 = vector.broadcast %389 : vector<1x32xf32> to vector<2x32xf32>
    %421 = arith.addf %419, %420 : vector<2x32xf32>
    %c2_301 = arith.constant 2 : index
    %c0_302 = arith.constant 0 : index
    %c0_303 = arith.constant 0 : index
    %422 = vector.load %arg13[%c2_301, %c0_302, %c0_303] : memref<5x384x128xbf16, #tpu.memory_space<vmem>>, vector<1x384x128xbf16>
    %423 = vector.shape_cast %422 : vector<1x384x128xbf16> to vector<384x128xbf16>
    %c2_304 = arith.constant 2 : index
    %c0_305 = arith.constant 0 : index
    %c0_306 = arith.constant 0 : index
    %424 = vector.load %arg14[%c2_304, %c0_305, %c0_306] : memref<5x1x128xf32, #tpu.memory_space<vmem>>, vector<1x1x128xf32>
    %425 = vector.shape_cast %424 : vector<1x1x128xf32> to vector<1x128xf32>
    %c2_307 = arith.constant 2 : index
    %c0_308 = arith.constant 0 : index
    %c0_309 = arith.constant 0 : index
    %426 = vector.load %arg15[%c2_307, %c0_308, %c0_309] : memref<5x128x128xbf16, #tpu.memory_space<vmem>>, vector<1x128x128xbf16>
    %427 = vector.shape_cast %426 : vector<1x128x128xbf16> to vector<128x128xbf16>
    %c2_310 = arith.constant 2 : index
    %c0_311 = arith.constant 0 : index
    %c0_312 = arith.constant 0 : index
    %428 = vector.load %arg16[%c2_310, %c0_311, %c0_312] : memref<5x1x128xf32, #tpu.memory_space<vmem>>, vector<1x1x128xf32>
    %429 = vector.shape_cast %428 : vector<1x1x128xf32> to vector<1x128xf32>
    %c2_313 = arith.constant 2 : index
    %c0_314 = arith.constant 0 : index
    %c0_315 = arith.constant 0 : index
    %430 = vector.load %arg1[%c2_313, %c0_314, %c0_315] : memref<5x2x128xbf16, #tpu.memory_space<vmem>>, vector<1x2x128xbf16>
    %431 = vector.shape_cast %430 : vector<1x2x128xbf16> to vector<2x128xbf16>
    %c2_316 = arith.constant 2 : index
    %c0_317 = arith.constant 0 : index
    %c0_318 = arith.constant 0 : index
    %432 = vector.load %arg11[%c2_316, %c0_317, %c0_318] : memref<5x128x384xbf16, #tpu.memory_space<vmem>>, vector<1x128x384xbf16>
    %433 = vector.shape_cast %432 : vector<1x128x384xbf16> to vector<128x384xbf16>
    %c2_319 = arith.constant 2 : index
    %c0_320 = arith.constant 0 : index
    %c0_321 = arith.constant 0 : index
    %434 = vector.load %arg12[%c2_319, %c0_320, %c0_321] : memref<5x1x384xf32, #tpu.memory_space<vmem>>, vector<1x1x384xf32>
    %435 = vector.shape_cast %434 : vector<1x1x384xf32> to vector<1x384xf32>
    %c2_322 = arith.constant 2 : index
    %c0_323 = arith.constant 0 : index
    %c0_324 = arith.constant 0 : index
    %436 = vector.load %arg17[%c2_322, %c0_323, %c0_324] : memref<5x128x32xbf16, #tpu.memory_space<vmem>>, vector<1x128x32xbf16>
    %437 = vector.shape_cast %436 : vector<1x128x32xbf16> to vector<128x32xbf16>
    %c2_325 = arith.constant 2 : index
    %c0_326 = arith.constant 0 : index
    %c0_327 = arith.constant 0 : index
    %438 = vector.load %arg18[%c2_325, %c0_326, %c0_327] : memref<5x1x32xf32, #tpu.memory_space<vmem>>, vector<1x1x32xf32>
    %439 = vector.shape_cast %438 : vector<1x1x32xf32> to vector<1x32xf32>
    %cst_328 = arith.constant dense<0.000000e+00> : vector<2x384xf32>
    %440 = tpu.matmul %431, %433, %cst_328 {dimension_numbers = #tpu.dot_dimension_numbers<[1], [0], [0], [1], [0, 0, 1, 1], [], []>} : vector<2x128xbf16>, vector<128x384xbf16>, vector<2x384xf32> -> vector<2x384xf32>
    %441 = vector.broadcast %435 : vector<1x384xf32> to vector<2x384xf32>
    %442 = arith.addf %440, %441 : vector<2x384xf32>
    %cst_329 = arith.constant 0.000000e+00 : f32
    %443 = vector.broadcast %cst_329 : f32 to vector<2x384xf32>
    %444 = arith.cmpf oge, %442, %443 : vector<2x384xf32>
    %cst_330 = arith.constant 2.000000e-01 : f32
    %445 = vector.broadcast %cst_330 : f32 to vector<2x384xf32>
    %446 = arith.mulf %445, %442 : vector<2x384xf32>
    %447 = arith.select %444, %442, %446 : vector<2x384xi1>, vector<2x384xf32>
    %448 = arith.truncf %447 : vector<2x384xf32> to vector<2x384xbf16>
    %449 = vector.extract_strided_slice %447 {offsets = [0, 128], sizes = [2, 128], strides = [1, 1]} : vector<2x384xf32> to vector<2x128xf32>
    %cst_331 = arith.constant dense<0.000000e+00> : vector<2x128xf32>
    %450 = tpu.matmul %448, %423, %cst_331 {dimension_numbers = #tpu.dot_dimension_numbers<[1], [0], [0], [1], [0, 0, 1, 1], [], []>} : vector<2x384xbf16>, vector<384x128xbf16>, vector<2x128xf32> -> vector<2x128xf32>
    %451 = vector.broadcast %425 : vector<1x128xf32> to vector<2x128xf32>
    %452 = arith.addf %450, %451 : vector<2x128xf32>
    %cst_332 = arith.constant 0.000000e+00 : f32
    %453 = vector.broadcast %cst_332 : f32 to vector<2x128xf32>
    %454 = arith.cmpf oge, %452, %453 : vector<2x128xf32>
    %cst_333 = arith.constant 2.000000e-01 : f32
    %455 = vector.broadcast %cst_333 : f32 to vector<2x128xf32>
    %456 = arith.mulf %455, %452 : vector<2x128xf32>
    %457 = arith.select %454, %452, %456 : vector<2x128xi1>, vector<2x128xf32>
    %458 = arith.truncf %457 : vector<2x128xf32> to vector<2x128xbf16>
    %cst_334 = arith.constant dense<0.000000e+00> : vector<2x128xf32>
    %459 = tpu.matmul %458, %427, %cst_334 {dimension_numbers = #tpu.dot_dimension_numbers<[1], [0], [0], [1], [0, 0, 1, 1], [], []>} : vector<2x128xbf16>, vector<128x128xbf16>, vector<2x128xf32> -> vector<2x128xf32>
    %460 = vector.broadcast %429 : vector<1x128xf32> to vector<2x128xf32>
    %461 = arith.addf %459, %460 : vector<2x128xf32>
    %cst_335 = arith.constant 0.000000e+00 : f32
    %462 = vector.broadcast %cst_335 : f32 to vector<2x128xf32>
    %463 = arith.cmpf oge, %461, %462 : vector<2x128xf32>
    %cst_336 = arith.constant 2.000000e-01 : f32
    %464 = vector.broadcast %cst_336 : f32 to vector<2x128xf32>
    %465 = arith.mulf %464, %461 : vector<2x128xf32>
    %466 = arith.select %463, %461, %465 : vector<2x128xi1>, vector<2x128xf32>
    %467 = arith.addf %449, %466 : vector<2x128xf32>
    %468 = arith.truncf %467 : vector<2x128xf32> to vector<2x128xbf16>
    %cst_337 = arith.constant dense<0.000000e+00> : vector<2x32xf32>
    %469 = tpu.matmul %468, %437, %cst_337 {dimension_numbers = #tpu.dot_dimension_numbers<[1], [0], [0], [1], [0, 0, 1, 1], [], []>} : vector<2x128xbf16>, vector<128x32xbf16>, vector<2x32xf32> -> vector<2x32xf32>
    %470 = vector.broadcast %439 : vector<1x32xf32> to vector<2x32xf32>
    %471 = arith.addf %469, %470 : vector<2x32xf32>
    %c3_338 = arith.constant 3 : index
    %c0_339 = arith.constant 0 : index
    %c0_340 = arith.constant 0 : index
    %472 = vector.load %arg13[%c3_338, %c0_339, %c0_340] : memref<5x384x128xbf16, #tpu.memory_space<vmem>>, vector<1x384x128xbf16>
    %473 = vector.shape_cast %472 : vector<1x384x128xbf16> to vector<384x128xbf16>
    %c3_341 = arith.constant 3 : index
    %c0_342 = arith.constant 0 : index
    %c0_343 = arith.constant 0 : index
    %474 = vector.load %arg14[%c3_341, %c0_342, %c0_343] : memref<5x1x128xf32, #tpu.memory_space<vmem>>, vector<1x1x128xf32>
    %475 = vector.shape_cast %474 : vector<1x1x128xf32> to vector<1x128xf32>
    %c3_344 = arith.constant 3 : index
    %c0_345 = arith.constant 0 : index
    %c0_346 = arith.constant 0 : index
    %476 = vector.load %arg15[%c3_344, %c0_345, %c0_346] : memref<5x128x128xbf16, #tpu.memory_space<vmem>>, vector<1x128x128xbf16>
    %477 = vector.shape_cast %476 : vector<1x128x128xbf16> to vector<128x128xbf16>
    %c3_347 = arith.constant 3 : index
    %c0_348 = arith.constant 0 : index
    %c0_349 = arith.constant 0 : index
    %478 = vector.load %arg16[%c3_347, %c0_348, %c0_349] : memref<5x1x128xf32, #tpu.memory_space<vmem>>, vector<1x1x128xf32>
    %479 = vector.shape_cast %478 : vector<1x1x128xf32> to vector<1x128xf32>
    %c3_350 = arith.constant 3 : index
    %c0_351 = arith.constant 0 : index
    %c0_352 = arith.constant 0 : index
    %480 = vector.load %arg1[%c3_350, %c0_351, %c0_352] : memref<5x2x128xbf16, #tpu.memory_space<vmem>>, vector<1x2x128xbf16>
    %481 = vector.shape_cast %480 : vector<1x2x128xbf16> to vector<2x128xbf16>
    %c3_353 = arith.constant 3 : index
    %c0_354 = arith.constant 0 : index
    %c0_355 = arith.constant 0 : index
    %482 = vector.load %arg11[%c3_353, %c0_354, %c0_355] : memref<5x128x384xbf16, #tpu.memory_space<vmem>>, vector<1x128x384xbf16>
    %483 = vector.shape_cast %482 : vector<1x128x384xbf16> to vector<128x384xbf16>
    %c3_356 = arith.constant 3 : index
    %c0_357 = arith.constant 0 : index
    %c0_358 = arith.constant 0 : index
    %484 = vector.load %arg12[%c3_356, %c0_357, %c0_358] : memref<5x1x384xf32, #tpu.memory_space<vmem>>, vector<1x1x384xf32>
    %485 = vector.shape_cast %484 : vector<1x1x384xf32> to vector<1x384xf32>
    %c3_359 = arith.constant 3 : index
    %c0_360 = arith.constant 0 : index
    %c0_361 = arith.constant 0 : index
    %486 = vector.load %arg17[%c3_359, %c0_360, %c0_361] : memref<5x128x32xbf16, #tpu.memory_space<vmem>>, vector<1x128x32xbf16>
    %487 = vector.shape_cast %486 : vector<1x128x32xbf16> to vector<128x32xbf16>
    %c3_362 = arith.constant 3 : index
    %c0_363 = arith.constant 0 : index
    %c0_364 = arith.constant 0 : index
    %488 = vector.load %arg18[%c3_362, %c0_363, %c0_364] : memref<5x1x32xf32, #tpu.memory_space<vmem>>, vector<1x1x32xf32>
    %489 = vector.shape_cast %488 : vector<1x1x32xf32> to vector<1x32xf32>
    %cst_365 = arith.constant dense<0.000000e+00> : vector<2x384xf32>
    %490 = tpu.matmul %481, %483, %cst_365 {dimension_numbers = #tpu.dot_dimension_numbers<[1], [0], [0], [1], [0, 0, 1, 1], [], []>} : vector<2x128xbf16>, vector<128x384xbf16>, vector<2x384xf32> -> vector<2x384xf32>
    %491 = vector.broadcast %485 : vector<1x384xf32> to vector<2x384xf32>
    %492 = arith.addf %490, %491 : vector<2x384xf32>
    %cst_366 = arith.constant 0.000000e+00 : f32
    %493 = vector.broadcast %cst_366 : f32 to vector<2x384xf32>
    %494 = arith.cmpf oge, %492, %493 : vector<2x384xf32>
    %cst_367 = arith.constant 2.000000e-01 : f32
    %495 = vector.broadcast %cst_367 : f32 to vector<2x384xf32>
    %496 = arith.mulf %495, %492 : vector<2x384xf32>
    %497 = arith.select %494, %492, %496 : vector<2x384xi1>, vector<2x384xf32>
    %498 = arith.truncf %497 : vector<2x384xf32> to vector<2x384xbf16>
    %499 = vector.extract_strided_slice %497 {offsets = [0, 128], sizes = [2, 128], strides = [1, 1]} : vector<2x384xf32> to vector<2x128xf32>
    %cst_368 = arith.constant dense<0.000000e+00> : vector<2x128xf32>
    %500 = tpu.matmul %498, %473, %cst_368 {dimension_numbers = #tpu.dot_dimension_numbers<[1], [0], [0], [1], [0, 0, 1, 1], [], []>} : vector<2x384xbf16>, vector<384x128xbf16>, vector<2x128xf32> -> vector<2x128xf32>
    %501 = vector.broadcast %475 : vector<1x128xf32> to vector<2x128xf32>
    %502 = arith.addf %500, %501 : vector<2x128xf32>
    %cst_369 = arith.constant 0.000000e+00 : f32
    %503 = vector.broadcast %cst_369 : f32 to vector<2x128xf32>
    %504 = arith.cmpf oge, %502, %503 : vector<2x128xf32>
    %cst_370 = arith.constant 2.000000e-01 : f32
    %505 = vector.broadcast %cst_370 : f32 to vector<2x128xf32>
    %506 = arith.mulf %505, %502 : vector<2x128xf32>
    %507 = arith.select %504, %502, %506 : vector<2x128xi1>, vector<2x128xf32>
    %508 = arith.truncf %507 : vector<2x128xf32> to vector<2x128xbf16>
    %cst_371 = arith.constant dense<0.000000e+00> : vector<2x128xf32>
    %509 = tpu.matmul %508, %477, %cst_371 {dimension_numbers = #tpu.dot_dimension_numbers<[1], [0], [0], [1], [0, 0, 1, 1], [], []>} : vector<2x128xbf16>, vector<128x128xbf16>, vector<2x128xf32> -> vector<2x128xf32>
    %510 = vector.broadcast %479 : vector<1x128xf32> to vector<2x128xf32>
    %511 = arith.addf %509, %510 : vector<2x128xf32>
    %cst_372 = arith.constant 0.000000e+00 : f32
    %512 = vector.broadcast %cst_372 : f32 to vector<2x128xf32>
    %513 = arith.cmpf oge, %511, %512 : vector<2x128xf32>
    %cst_373 = arith.constant 2.000000e-01 : f32
    %514 = vector.broadcast %cst_373 : f32 to vector<2x128xf32>
    %515 = arith.mulf %514, %511 : vector<2x128xf32>
    %516 = arith.select %513, %511, %515 : vector<2x128xi1>, vector<2x128xf32>
    %517 = arith.addf %499, %516 : vector<2x128xf32>
    %518 = arith.truncf %517 : vector<2x128xf32> to vector<2x128xbf16>
    %cst_374 = arith.constant dense<0.000000e+00> : vector<2x32xf32>
    %519 = tpu.matmul %518, %487, %cst_374 {dimension_numbers = #tpu.dot_dimension_numbers<[1], [0], [0], [1], [0, 0, 1, 1], [], []>} : vector<2x128xbf16>, vector<128x32xbf16>, vector<2x32xf32> -> vector<2x32xf32>
    %520 = vector.broadcast %489 : vector<1x32xf32> to vector<2x32xf32>
    %521 = arith.addf %519, %520 : vector<2x32xf32>
    %c4_375 = arith.constant 4 : index
    %c0_376 = arith.constant 0 : index
    %c0_377 = arith.constant 0 : index
    %522 = vector.load %arg13[%c4_375, %c0_376, %c0_377] : memref<5x384x128xbf16, #tpu.memory_space<vmem>>, vector<1x384x128xbf16>
    %523 = vector.shape_cast %522 : vector<1x384x128xbf16> to vector<384x128xbf16>
    %c4_378 = arith.constant 4 : index
    %c0_379 = arith.constant 0 : index
    %c0_380 = arith.constant 0 : index
    %524 = vector.load %arg14[%c4_378, %c0_379, %c0_380] : memref<5x1x128xf32, #tpu.memory_space<vmem>>, vector<1x1x128xf32>
    %525 = vector.shape_cast %524 : vector<1x1x128xf32> to vector<1x128xf32>
    %c4_381 = arith.constant 4 : index
    %c0_382 = arith.constant 0 : index
    %c0_383 = arith.constant 0 : index
    %526 = vector.load %arg15[%c4_381, %c0_382, %c0_383] : memref<5x128x128xbf16, #tpu.memory_space<vmem>>, vector<1x128x128xbf16>
    %527 = vector.shape_cast %526 : vector<1x128x128xbf16> to vector<128x128xbf16>
    %c4_384 = arith.constant 4 : index
    %c0_385 = arith.constant 0 : index
    %c0_386 = arith.constant 0 : index
    %528 = vector.load %arg16[%c4_384, %c0_385, %c0_386] : memref<5x1x128xf32, #tpu.memory_space<vmem>>, vector<1x1x128xf32>
    %529 = vector.shape_cast %528 : vector<1x1x128xf32> to vector<1x128xf32>
    %c4_387 = arith.constant 4 : index
    %c0_388 = arith.constant 0 : index
    %c0_389 = arith.constant 0 : index
    %530 = vector.load %arg1[%c4_387, %c0_388, %c0_389] : memref<5x2x128xbf16, #tpu.memory_space<vmem>>, vector<1x2x128xbf16>
    %531 = vector.shape_cast %530 : vector<1x2x128xbf16> to vector<2x128xbf16>
    %c4_390 = arith.constant 4 : index
    %c0_391 = arith.constant 0 : index
    %c0_392 = arith.constant 0 : index
    %532 = vector.load %arg11[%c4_390, %c0_391, %c0_392] : memref<5x128x384xbf16, #tpu.memory_space<vmem>>, vector<1x128x384xbf16>
    %533 = vector.shape_cast %532 : vector<1x128x384xbf16> to vector<128x384xbf16>
    %c4_393 = arith.constant 4 : index
    %c0_394 = arith.constant 0 : index
    %c0_395 = arith.constant 0 : index
    %534 = vector.load %arg12[%c4_393, %c0_394, %c0_395] : memref<5x1x384xf32, #tpu.memory_space<vmem>>, vector<1x1x384xf32>
    %535 = vector.shape_cast %534 : vector<1x1x384xf32> to vector<1x384xf32>
    %c4_396 = arith.constant 4 : index
    %c0_397 = arith.constant 0 : index
    %c0_398 = arith.constant 0 : index
    %536 = vector.load %arg17[%c4_396, %c0_397, %c0_398] : memref<5x128x32xbf16, #tpu.memory_space<vmem>>, vector<1x128x32xbf16>
    %537 = vector.shape_cast %536 : vector<1x128x32xbf16> to vector<128x32xbf16>
    %c4_399 = arith.constant 4 : index
    %c0_400 = arith.constant 0 : index
    %c0_401 = arith.constant 0 : index
    %538 = vector.load %arg18[%c4_399, %c0_400, %c0_401] : memref<5x1x32xf32, #tpu.memory_space<vmem>>, vector<1x1x32xf32>
    %539 = vector.shape_cast %538 : vector<1x1x32xf32> to vector<1x32xf32>
    %cst_402 = arith.constant dense<0.000000e+00> : vector<2x384xf32>
    %540 = tpu.matmul %531, %533, %cst_402 {dimension_numbers = #tpu.dot_dimension_numbers<[1], [0], [0], [1], [0, 0, 1, 1], [], []>} : vector<2x128xbf16>, vector<128x384xbf16>, vector<2x384xf32> -> vector<2x384xf32>
    %541 = vector.broadcast %535 : vector<1x384xf32> to vector<2x384xf32>
    %542 = arith.addf %540, %541 : vector<2x384xf32>
    %cst_403 = arith.constant 0.000000e+00 : f32
    %543 = vector.broadcast %cst_403 : f32 to vector<2x384xf32>
    %544 = arith.cmpf oge, %542, %543 : vector<2x384xf32>
    %cst_404 = arith.constant 2.000000e-01 : f32
    %545 = vector.broadcast %cst_404 : f32 to vector<2x384xf32>
    %546 = arith.mulf %545, %542 : vector<2x384xf32>
    %547 = arith.select %544, %542, %546 : vector<2x384xi1>, vector<2x384xf32>
    %548 = arith.truncf %547 : vector<2x384xf32> to vector<2x384xbf16>
    %549 = vector.extract_strided_slice %547 {offsets = [0, 128], sizes = [2, 128], strides = [1, 1]} : vector<2x384xf32> to vector<2x128xf32>
    %cst_405 = arith.constant dense<0.000000e+00> : vector<2x128xf32>
    %550 = tpu.matmul %548, %523, %cst_405 {dimension_numbers = #tpu.dot_dimension_numbers<[1], [0], [0], [1], [0, 0, 1, 1], [], []>} : vector<2x384xbf16>, vector<384x128xbf16>, vector<2x128xf32> -> vector<2x128xf32>
    %551 = vector.broadcast %525 : vector<1x128xf32> to vector<2x128xf32>
    %552 = arith.addf %550, %551 : vector<2x128xf32>
    %cst_406 = arith.constant 0.000000e+00 : f32
    %553 = vector.broadcast %cst_406 : f32 to vector<2x128xf32>
    %554 = arith.cmpf oge, %552, %553 : vector<2x128xf32>
    %cst_407 = arith.constant 2.000000e-01 : f32
    %555 = vector.broadcast %cst_407 : f32 to vector<2x128xf32>
    %556 = arith.mulf %555, %552 : vector<2x128xf32>
    %557 = arith.select %554, %552, %556 : vector<2x128xi1>, vector<2x128xf32>
    %558 = arith.truncf %557 : vector<2x128xf32> to vector<2x128xbf16>
    %cst_408 = arith.constant dense<0.000000e+00> : vector<2x128xf32>
    %559 = tpu.matmul %558, %527, %cst_408 {dimension_numbers = #tpu.dot_dimension_numbers<[1], [0], [0], [1], [0, 0, 1, 1], [], []>} : vector<2x128xbf16>, vector<128x128xbf16>, vector<2x128xf32> -> vector<2x128xf32>
    %560 = vector.broadcast %529 : vector<1x128xf32> to vector<2x128xf32>
    %561 = arith.addf %559, %560 : vector<2x128xf32>
    %cst_409 = arith.constant 0.000000e+00 : f32
    %562 = vector.broadcast %cst_409 : f32 to vector<2x128xf32>
    %563 = arith.cmpf oge, %561, %562 : vector<2x128xf32>
    %cst_410 = arith.constant 2.000000e-01 : f32
    %564 = vector.broadcast %cst_410 : f32 to vector<2x128xf32>
    %565 = arith.mulf %564, %561 : vector<2x128xf32>
    %566 = arith.select %563, %561, %565 : vector<2x128xi1>, vector<2x128xf32>
    %567 = arith.addf %549, %566 : vector<2x128xf32>
    %568 = arith.truncf %567 : vector<2x128xf32> to vector<2x128xbf16>
    %cst_411 = arith.constant dense<0.000000e+00> : vector<2x32xf32>
    %569 = tpu.matmul %568, %537, %cst_411 {dimension_numbers = #tpu.dot_dimension_numbers<[1], [0], [0], [1], [0, 0, 1, 1], [], []>} : vector<2x128xbf16>, vector<128x32xbf16>, vector<2x32xf32> -> vector<2x32xf32>
    %570 = vector.broadcast %539 : vector<1x32xf32> to vector<2x32xf32>
    %571 = arith.addf %569, %570 : vector<2x32xf32>
    %572 = arith.truncf %121 : vector<2x64xf32> to vector<2x64xbf16>
    %c0_412 = arith.constant 0 : index
    %c0_413 = arith.constant 0 : index
    %c0_414 = arith.constant 0 : index
    %573 = vector.load %arg33[%c0_412, %c0_413, %c0_414] : memref<5x64x128xbf16, #tpu.memory_space<vmem>>, vector<1x64x128xbf16>
    %574 = vector.shape_cast %573 : vector<1x64x128xbf16> to vector<64x128xbf16>
    %cst_415 = arith.constant dense<0.000000e+00> : vector<2x128xf32>
    %575 = tpu.matmul %572, %574, %cst_415 {dimension_numbers = #tpu.dot_dimension_numbers<[1], [0], [0], [1], [0, 0, 1, 1], [], []>} : vector<2x64xbf16>, vector<64x128xbf16>, vector<2x128xf32> -> vector<2x128xf32>
    %c0_416 = arith.constant 0 : index
    %c0_417 = arith.constant 0 : index
    %c0_418 = arith.constant 0 : index
    %576 = vector.load %arg34[%c0_416, %c0_417, %c0_418] : memref<5x64x128xbf16, #tpu.memory_space<vmem>>, vector<1x64x128xbf16>
    %577 = vector.shape_cast %576 : vector<1x64x128xbf16> to vector<64x128xbf16>
    %cst_419 = arith.constant dense<0.000000e+00> : vector<2x128xf32>
    %578 = tpu.matmul %63, %577, %cst_419 {dimension_numbers = #tpu.dot_dimension_numbers<[1], [0], [0], [1], [0, 0, 1, 1], [], []>} : vector<2x64xbf16>, vector<64x128xbf16>, vector<2x128xf32> -> vector<2x128xf32>
    %579 = arith.addf %575, %578 : vector<2x128xf32>
    %580 = arith.truncf %371 : vector<2x32xf32> to vector<2x32xbf16>
    %c0_420 = arith.constant 0 : index
    %c0_421 = arith.constant 0 : index
    %c0_422 = arith.constant 0 : index
    %581 = vector.load %arg35[%c0_420, %c0_421, %c0_422] : memref<5x32x128xbf16, #tpu.memory_space<vmem>>, vector<1x32x128xbf16>
    %582 = vector.shape_cast %581 : vector<1x32x128xbf16> to vector<32x128xbf16>
    %cst_423 = arith.constant dense<0.000000e+00> : vector<2x128xf32>
    %583 = tpu.matmul %580, %582, %cst_423 {dimension_numbers = #tpu.dot_dimension_numbers<[1], [0], [0], [1], [0, 0, 1, 1], [], []>} : vector<2x32xbf16>, vector<32x128xbf16>, vector<2x128xf32> -> vector<2x128xf32>
    %584 = arith.addf %579, %583 : vector<2x128xf32>
    %c0_424 = arith.constant 0 : index
    %c0_425 = arith.constant 0 : index
    %c0_426 = arith.constant 0 : index
    %585 = vector.load %arg36[%c0_424, %c0_425, %c0_426] : memref<5x32x128xbf16, #tpu.memory_space<vmem>>, vector<1x32x128xbf16>
    %586 = vector.shape_cast %585 : vector<1x32x128xbf16> to vector<32x128xbf16>
    %cst_427 = arith.constant dense<0.000000e+00> : vector<2x128xf32>
    %587 = tpu.matmul %71, %586, %cst_427 {dimension_numbers = #tpu.dot_dimension_numbers<[1], [0], [0], [1], [0, 0, 1, 1], [], []>} : vector<2x32xbf16>, vector<32x128xbf16>, vector<2x128xf32> -> vector<2x128xf32>
    %588 = arith.addf %584, %587 : vector<2x128xf32>
    %c0_428 = arith.constant 0 : index
    %c0_429 = arith.constant 0 : index
    %c0_430 = arith.constant 0 : index
    %589 = vector.load %arg37[%c0_428, %c0_429, %c0_430] : memref<5x1x128xf32, #tpu.memory_space<vmem>>, vector<1x1x128xf32>
    %590 = vector.shape_cast %589 : vector<1x1x128xf32> to vector<1x128xf32>
    %591 = vector.broadcast %590 : vector<1x128xf32> to vector<2x128xf32>
    %592 = arith.addf %588, %591 : vector<2x128xf32>
    %cst_431 = arith.constant 0.000000e+00 : f32
    %593 = vector.broadcast %cst_431 : f32 to vector<2x128xf32>
    %594 = arith.cmpf oge, %592, %593 : vector<2x128xf32>
    %cst_432 = arith.constant 2.000000e-01 : f32
    %595 = vector.broadcast %cst_432 : f32 to vector<2x128xf32>
    %596 = arith.mulf %595, %592 : vector<2x128xf32>
    %597 = arith.select %594, %592, %596 : vector<2x128xi1>, vector<2x128xf32>
    %598 = arith.truncf %597 : vector<2x128xf32> to vector<2x128xbf16>
    %c0_433 = arith.constant 0 : index
    %c0_434 = arith.constant 0 : index
    %c0_435 = arith.constant 0 : index
    %599 = vector.load %arg38[%c0_433, %c0_434, %c0_435] : memref<5x128x128xbf16, #tpu.memory_space<vmem>>, vector<1x128x128xbf16>
    %600 = vector.shape_cast %599 : vector<1x128x128xbf16> to vector<128x128xbf16>
    %cst_436 = arith.constant dense<0.000000e+00> : vector<2x128xf32>
    %601 = tpu.matmul %598, %600, %cst_436 {dimension_numbers = #tpu.dot_dimension_numbers<[1], [0], [0], [1], [0, 0, 1, 1], [], []>} : vector<2x128xbf16>, vector<128x128xbf16>, vector<2x128xf32> -> vector<2x128xf32>
    %c0_437 = arith.constant 0 : index
    %c0_438 = arith.constant 0 : index
    %c0_439 = arith.constant 0 : index
    %602 = vector.load %arg39[%c0_437, %c0_438, %c0_439] : memref<5x1x128xf32, #tpu.memory_space<vmem>>, vector<1x1x128xf32>
    %603 = vector.shape_cast %602 : vector<1x1x128xf32> to vector<1x128xf32>
    %604 = vector.broadcast %603 : vector<1x128xf32> to vector<2x128xf32>
    %605 = arith.addf %601, %604 : vector<2x128xf32>
    %cst_440 = arith.constant 0.000000e+00 : f32
    %606 = vector.broadcast %cst_440 : f32 to vector<2x128xf32>
    %607 = arith.cmpf oge, %605, %606 : vector<2x128xf32>
    %cst_441 = arith.constant 2.000000e-01 : f32
    %608 = vector.broadcast %cst_441 : f32 to vector<2x128xf32>
    %609 = arith.mulf %608, %605 : vector<2x128xf32>
    %610 = arith.select %607, %605, %609 : vector<2x128xi1>, vector<2x128xf32>
    %611 = arith.truncf %610 : vector<2x128xf32> to vector<2x128xbf16>
    %c0_442 = arith.constant 0 : index
    %c0_443 = arith.constant 0 : index
    %c0_444 = arith.constant 0 : index
    %612 = vector.load %arg40[%c0_442, %c0_443, %c0_444] : memref<5x128x128xbf16, #tpu.memory_space<vmem>>, vector<1x128x128xbf16>
    %613 = vector.shape_cast %612 : vector<1x128x128xbf16> to vector<128x128xbf16>
    %cst_445 = arith.constant dense<0.000000e+00> : vector<2x128xf32>
    %614 = tpu.matmul %611, %613, %cst_445 {dimension_numbers = #tpu.dot_dimension_numbers<[1], [0], [0], [1], [0, 0, 1, 1], [], []>} : vector<2x128xbf16>, vector<128x128xbf16>, vector<2x128xf32> -> vector<2x128xf32>
    %c0_446 = arith.constant 0 : index
    %c0_447 = arith.constant 0 : index
    %c0_448 = arith.constant 0 : index
    %615 = vector.load %arg41[%c0_446, %c0_447, %c0_448] : memref<5x1x128xf32, #tpu.memory_space<vmem>>, vector<1x1x128xf32>
    %616 = vector.shape_cast %615 : vector<1x1x128xf32> to vector<1x128xf32>
    %617 = vector.broadcast %616 : vector<1x128xf32> to vector<2x128xf32>
    %618 = arith.addf %614, %617 : vector<2x128xf32>
    %cst_449 = arith.constant 0.000000e+00 : f32
    %619 = vector.broadcast %cst_449 : f32 to vector<2x128xf32>
    %620 = arith.cmpf oge, %618, %619 : vector<2x128xf32>
    %cst_450 = arith.constant 2.000000e-01 : f32
    %621 = vector.broadcast %cst_450 : f32 to vector<2x128xf32>
    %622 = arith.mulf %621, %618 : vector<2x128xf32>
    %623 = arith.select %620, %618, %622 : vector<2x128xi1>, vector<2x128xf32>
    %624 = arith.addf %597, %623 : vector<2x128xf32>
    %625 = arith.truncf %624 : vector<2x128xf32> to vector<2x128xbf16>
    %626 = arith.truncf %171 : vector<2x64xf32> to vector<2x64xbf16>
    %c1_451 = arith.constant 1 : index
    %c0_452 = arith.constant 0 : index
    %c0_453 = arith.constant 0 : index
    %627 = vector.load %arg33[%c1_451, %c0_452, %c0_453] : memref<5x64x128xbf16, #tpu.memory_space<vmem>>, vector<1x64x128xbf16>
    %628 = vector.shape_cast %627 : vector<1x64x128xbf16> to vector<64x128xbf16>
    %cst_454 = arith.constant dense<0.000000e+00> : vector<2x128xf32>
    %629 = tpu.matmul %626, %628, %cst_454 {dimension_numbers = #tpu.dot_dimension_numbers<[1], [0], [0], [1], [0, 0, 1, 1], [], []>} : vector<2x64xbf16>, vector<64x128xbf16>, vector<2x128xf32> -> vector<2x128xf32>
    %c1_455 = arith.constant 1 : index
    %c0_456 = arith.constant 0 : index
    %c0_457 = arith.constant 0 : index
    %630 = vector.load %arg34[%c1_455, %c0_456, %c0_457] : memref<5x64x128xbf16, #tpu.memory_space<vmem>>, vector<1x64x128xbf16>
    %631 = vector.shape_cast %630 : vector<1x64x128xbf16> to vector<64x128xbf16>
    %cst_458 = arith.constant dense<0.000000e+00> : vector<2x128xf32>
    %632 = tpu.matmul %63, %631, %cst_458 {dimension_numbers = #tpu.dot_dimension_numbers<[1], [0], [0], [1], [0, 0, 1, 1], [], []>} : vector<2x64xbf16>, vector<64x128xbf16>, vector<2x128xf32> -> vector<2x128xf32>
    %633 = arith.addf %629, %632 : vector<2x128xf32>
    %634 = arith.truncf %421 : vector<2x32xf32> to vector<2x32xbf16>
    %c1_459 = arith.constant 1 : index
    %c0_460 = arith.constant 0 : index
    %c0_461 = arith.constant 0 : index
    %635 = vector.load %arg35[%c1_459, %c0_460, %c0_461] : memref<5x32x128xbf16, #tpu.memory_space<vmem>>, vector<1x32x128xbf16>
    %636 = vector.shape_cast %635 : vector<1x32x128xbf16> to vector<32x128xbf16>
    %cst_462 = arith.constant dense<0.000000e+00> : vector<2x128xf32>
    %637 = tpu.matmul %634, %636, %cst_462 {dimension_numbers = #tpu.dot_dimension_numbers<[1], [0], [0], [1], [0, 0, 1, 1], [], []>} : vector<2x32xbf16>, vector<32x128xbf16>, vector<2x128xf32> -> vector<2x128xf32>
    %638 = arith.addf %633, %637 : vector<2x128xf32>
    %c1_463 = arith.constant 1 : index
    %c0_464 = arith.constant 0 : index
    %c0_465 = arith.constant 0 : index
    %639 = vector.load %arg36[%c1_463, %c0_464, %c0_465] : memref<5x32x128xbf16, #tpu.memory_space<vmem>>, vector<1x32x128xbf16>
    %640 = vector.shape_cast %639 : vector<1x32x128xbf16> to vector<32x128xbf16>
    %cst_466 = arith.constant dense<0.000000e+00> : vector<2x128xf32>
    %641 = tpu.matmul %71, %640, %cst_466 {dimension_numbers = #tpu.dot_dimension_numbers<[1], [0], [0], [1], [0, 0, 1, 1], [], []>} : vector<2x32xbf16>, vector<32x128xbf16>, vector<2x128xf32> -> vector<2x128xf32>
    %642 = arith.addf %638, %641 : vector<2x128xf32>
    %c1_467 = arith.constant 1 : index
    %c0_468 = arith.constant 0 : index
    %c0_469 = arith.constant 0 : index
    %643 = vector.load %arg37[%c1_467, %c0_468, %c0_469] : memref<5x1x128xf32, #tpu.memory_space<vmem>>, vector<1x1x128xf32>
    %644 = vector.shape_cast %643 : vector<1x1x128xf32> to vector<1x128xf32>
    %645 = vector.broadcast %644 : vector<1x128xf32> to vector<2x128xf32>
    %646 = arith.addf %642, %645 : vector<2x128xf32>
    %cst_470 = arith.constant 0.000000e+00 : f32
    %647 = vector.broadcast %cst_470 : f32 to vector<2x128xf32>
    %648 = arith.cmpf oge, %646, %647 : vector<2x128xf32>
    %cst_471 = arith.constant 2.000000e-01 : f32
    %649 = vector.broadcast %cst_471 : f32 to vector<2x128xf32>
    %650 = arith.mulf %649, %646 : vector<2x128xf32>
    %651 = arith.select %648, %646, %650 : vector<2x128xi1>, vector<2x128xf32>
    %652 = arith.truncf %651 : vector<2x128xf32> to vector<2x128xbf16>
    %c1_472 = arith.constant 1 : index
    %c0_473 = arith.constant 0 : index
    %c0_474 = arith.constant 0 : index
    %653 = vector.load %arg38[%c1_472, %c0_473, %c0_474] : memref<5x128x128xbf16, #tpu.memory_space<vmem>>, vector<1x128x128xbf16>
    %654 = vector.shape_cast %653 : vector<1x128x128xbf16> to vector<128x128xbf16>
    %cst_475 = arith.constant dense<0.000000e+00> : vector<2x128xf32>
    %655 = tpu.matmul %652, %654, %cst_475 {dimension_numbers = #tpu.dot_dimension_numbers<[1], [0], [0], [1], [0, 0, 1, 1], [], []>} : vector<2x128xbf16>, vector<128x128xbf16>, vector<2x128xf32> -> vector<2x128xf32>
    %c1_476 = arith.constant 1 : index
    %c0_477 = arith.constant 0 : index
    %c0_478 = arith.constant 0 : index
    %656 = vector.load %arg39[%c1_476, %c0_477, %c0_478] : memref<5x1x128xf32, #tpu.memory_space<vmem>>, vector<1x1x128xf32>
    %657 = vector.shape_cast %656 : vector<1x1x128xf32> to vector<1x128xf32>
    %658 = vector.broadcast %657 : vector<1x128xf32> to vector<2x128xf32>
    %659 = arith.addf %655, %658 : vector<2x128xf32>
    %cst_479 = arith.constant 0.000000e+00 : f32
    %660 = vector.broadcast %cst_479 : f32 to vector<2x128xf32>
    %661 = arith.cmpf oge, %659, %660 : vector<2x128xf32>
    %cst_480 = arith.constant 2.000000e-01 : f32
    %662 = vector.broadcast %cst_480 : f32 to vector<2x128xf32>
    %663 = arith.mulf %662, %659 : vector<2x128xf32>
    %664 = arith.select %661, %659, %663 : vector<2x128xi1>, vector<2x128xf32>
    %665 = arith.truncf %664 : vector<2x128xf32> to vector<2x128xbf16>
    %c1_481 = arith.constant 1 : index
    %c0_482 = arith.constant 0 : index
    %c0_483 = arith.constant 0 : index
    %666 = vector.load %arg40[%c1_481, %c0_482, %c0_483] : memref<5x128x128xbf16, #tpu.memory_space<vmem>>, vector<1x128x128xbf16>
    %667 = vector.shape_cast %666 : vector<1x128x128xbf16> to vector<128x128xbf16>
    %cst_484 = arith.constant dense<0.000000e+00> : vector<2x128xf32>
    %668 = tpu.matmul %665, %667, %cst_484 {dimension_numbers = #tpu.dot_dimension_numbers<[1], [0], [0], [1], [0, 0, 1, 1], [], []>} : vector<2x128xbf16>, vector<128x128xbf16>, vector<2x128xf32> -> vector<2x128xf32>
    %c1_485 = arith.constant 1 : index
    %c0_486 = arith.constant 0 : index
    %c0_487 = arith.constant 0 : index
    %669 = vector.load %arg41[%c1_485, %c0_486, %c0_487] : memref<5x1x128xf32, #tpu.memory_space<vmem>>, vector<1x1x128xf32>
    %670 = vector.shape_cast %669 : vector<1x1x128xf32> to vector<1x128xf32>
    %671 = vector.broadcast %670 : vector<1x128xf32> to vector<2x128xf32>
    %672 = arith.addf %668, %671 : vector<2x128xf32>
    %cst_488 = arith.constant 0.000000e+00 : f32
    %673 = vector.broadcast %cst_488 : f32 to vector<2x128xf32>
    %674 = arith.cmpf oge, %672, %673 : vector<2x128xf32>
    %cst_489 = arith.constant 2.000000e-01 : f32
    %675 = vector.broadcast %cst_489 : f32 to vector<2x128xf32>
    %676 = arith.mulf %675, %672 : vector<2x128xf32>
    %677 = arith.select %674, %672, %676 : vector<2x128xi1>, vector<2x128xf32>
    %678 = arith.addf %651, %677 : vector<2x128xf32>
    %679 = arith.truncf %678 : vector<2x128xf32> to vector<2x128xbf16>
    %680 = arith.truncf %221 : vector<2x64xf32> to vector<2x64xbf16>
    %c2_490 = arith.constant 2 : index
    %c0_491 = arith.constant 0 : index
    %c0_492 = arith.constant 0 : index
    %681 = vector.load %arg33[%c2_490, %c0_491, %c0_492] : memref<5x64x128xbf16, #tpu.memory_space<vmem>>, vector<1x64x128xbf16>
    %682 = vector.shape_cast %681 : vector<1x64x128xbf16> to vector<64x128xbf16>
    %cst_493 = arith.constant dense<0.000000e+00> : vector<2x128xf32>
    %683 = tpu.matmul %680, %682, %cst_493 {dimension_numbers = #tpu.dot_dimension_numbers<[1], [0], [0], [1], [0, 0, 1, 1], [], []>} : vector<2x64xbf16>, vector<64x128xbf16>, vector<2x128xf32> -> vector<2x128xf32>
    %c2_494 = arith.constant 2 : index
    %c0_495 = arith.constant 0 : index
    %c0_496 = arith.constant 0 : index
    %684 = vector.load %arg34[%c2_494, %c0_495, %c0_496] : memref<5x64x128xbf16, #tpu.memory_space<vmem>>, vector<1x64x128xbf16>
    %685 = vector.shape_cast %684 : vector<1x64x128xbf16> to vector<64x128xbf16>
    %cst_497 = arith.constant dense<0.000000e+00> : vector<2x128xf32>
    %686 = tpu.matmul %63, %685, %cst_497 {dimension_numbers = #tpu.dot_dimension_numbers<[1], [0], [0], [1], [0, 0, 1, 1], [], []>} : vector<2x64xbf16>, vector<64x128xbf16>, vector<2x128xf32> -> vector<2x128xf32>
    %687 = arith.addf %683, %686 : vector<2x128xf32>
    %688 = arith.truncf %471 : vector<2x32xf32> to vector<2x32xbf16>
    %c2_498 = arith.constant 2 : index
    %c0_499 = arith.constant 0 : index
    %c0_500 = arith.constant 0 : index
    %689 = vector.load %arg35[%c2_498, %c0_499, %c0_500] : memref<5x32x128xbf16, #tpu.memory_space<vmem>>, vector<1x32x128xbf16>
    %690 = vector.shape_cast %689 : vector<1x32x128xbf16> to vector<32x128xbf16>
    %cst_501 = arith.constant dense<0.000000e+00> : vector<2x128xf32>
    %691 = tpu.matmul %688, %690, %cst_501 {dimension_numbers = #tpu.dot_dimension_numbers<[1], [0], [0], [1], [0, 0, 1, 1], [], []>} : vector<2x32xbf16>, vector<32x128xbf16>, vector<2x128xf32> -> vector<2x128xf32>
    %692 = arith.addf %687, %691 : vector<2x128xf32>
    %c2_502 = arith.constant 2 : index
    %c0_503 = arith.constant 0 : index
    %c0_504 = arith.constant 0 : index
    %693 = vector.load %arg36[%c2_502, %c0_503, %c0_504] : memref<5x32x128xbf16, #tpu.memory_space<vmem>>, vector<1x32x128xbf16>
    %694 = vector.shape_cast %693 : vector<1x32x128xbf16> to vector<32x128xbf16>
    %cst_505 = arith.constant dense<0.000000e+00> : vector<2x128xf32>
    %695 = tpu.matmul %71, %694, %cst_505 {dimension_numbers = #tpu.dot_dimension_numbers<[1], [0], [0], [1], [0, 0, 1, 1], [], []>} : vector<2x32xbf16>, vector<32x128xbf16>, vector<2x128xf32> -> vector<2x128xf32>
    %696 = arith.addf %692, %695 : vector<2x128xf32>
    %c2_506 = arith.constant 2 : index
    %c0_507 = arith.constant 0 : index
    %c0_508 = arith.constant 0 : index
    %697 = vector.load %arg37[%c2_506, %c0_507, %c0_508] : memref<5x1x128xf32, #tpu.memory_space<vmem>>, vector<1x1x128xf32>
    %698 = vector.shape_cast %697 : vector<1x1x128xf32> to vector<1x128xf32>
    %699 = vector.broadcast %698 : vector<1x128xf32> to vector<2x128xf32>
    %700 = arith.addf %696, %699 : vector<2x128xf32>
    %cst_509 = arith.constant 0.000000e+00 : f32
    %701 = vector.broadcast %cst_509 : f32 to vector<2x128xf32>
    %702 = arith.cmpf oge, %700, %701 : vector<2x128xf32>
    %cst_510 = arith.constant 2.000000e-01 : f32
    %703 = vector.broadcast %cst_510 : f32 to vector<2x128xf32>
    %704 = arith.mulf %703, %700 : vector<2x128xf32>
    %705 = arith.select %702, %700, %704 : vector<2x128xi1>, vector<2x128xf32>
    %706 = arith.truncf %705 : vector<2x128xf32> to vector<2x128xbf16>
    %c2_511 = arith.constant 2 : index
    %c0_512 = arith.constant 0 : index
    %c0_513 = arith.constant 0 : index
    %707 = vector.load %arg38[%c2_511, %c0_512, %c0_513] : memref<5x128x128xbf16, #tpu.memory_space<vmem>>, vector<1x128x128xbf16>
    %708 = vector.shape_cast %707 : vector<1x128x128xbf16> to vector<128x128xbf16>
    %cst_514 = arith.constant dense<0.000000e+00> : vector<2x128xf32>
    %709 = tpu.matmul %706, %708, %cst_514 {dimension_numbers = #tpu.dot_dimension_numbers<[1], [0], [0], [1], [0, 0, 1, 1], [], []>} : vector<2x128xbf16>, vector<128x128xbf16>, vector<2x128xf32> -> vector<2x128xf32>
    %c2_515 = arith.constant 2 : index
    %c0_516 = arith.constant 0 : index
    %c0_517 = arith.constant 0 : index
    %710 = vector.load %arg39[%c2_515, %c0_516, %c0_517] : memref<5x1x128xf32, #tpu.memory_space<vmem>>, vector<1x1x128xf32>
    %711 = vector.shape_cast %710 : vector<1x1x128xf32> to vector<1x128xf32>
    %712 = vector.broadcast %711 : vector<1x128xf32> to vector<2x128xf32>
    %713 = arith.addf %709, %712 : vector<2x128xf32>
    %cst_518 = arith.constant 0.000000e+00 : f32
    %714 = vector.broadcast %cst_518 : f32 to vector<2x128xf32>
    %715 = arith.cmpf oge, %713, %714 : vector<2x128xf32>
    %cst_519 = arith.constant 2.000000e-01 : f32
    %716 = vector.broadcast %cst_519 : f32 to vector<2x128xf32>
    %717 = arith.mulf %716, %713 : vector<2x128xf32>
    %718 = arith.select %715, %713, %717 : vector<2x128xi1>, vector<2x128xf32>
    %719 = arith.truncf %718 : vector<2x128xf32> to vector<2x128xbf16>
    %c2_520 = arith.constant 2 : index
    %c0_521 = arith.constant 0 : index
    %c0_522 = arith.constant 0 : index
    %720 = vector.load %arg40[%c2_520, %c0_521, %c0_522] : memref<5x128x128xbf16, #tpu.memory_space<vmem>>, vector<1x128x128xbf16>
    %721 = vector.shape_cast %720 : vector<1x128x128xbf16> to vector<128x128xbf16>
    %cst_523 = arith.constant dense<0.000000e+00> : vector<2x128xf32>
    %722 = tpu.matmul %719, %721, %cst_523 {dimension_numbers = #tpu.dot_dimension_numbers<[1], [0], [0], [1], [0, 0, 1, 1], [], []>} : vector<2x128xbf16>, vector<128x128xbf16>, vector<2x128xf32> -> vector<2x128xf32>
    %c2_524 = arith.constant 2 : index
    %c0_525 = arith.constant 0 : index
    %c0_526 = arith.constant 0 : index
    %723 = vector.load %arg41[%c2_524, %c0_525, %c0_526] : memref<5x1x128xf32, #tpu.memory_space<vmem>>, vector<1x1x128xf32>
    %724 = vector.shape_cast %723 : vector<1x1x128xf32> to vector<1x128xf32>
    %725 = vector.broadcast %724 : vector<1x128xf32> to vector<2x128xf32>
    %726 = arith.addf %722, %725 : vector<2x128xf32>
    %cst_527 = arith.constant 0.000000e+00 : f32
    %727 = vector.broadcast %cst_527 : f32 to vector<2x128xf32>
    %728 = arith.cmpf oge, %726, %727 : vector<2x128xf32>
    %cst_528 = arith.constant 2.000000e-01 : f32
    %729 = vector.broadcast %cst_528 : f32 to vector<2x128xf32>
    %730 = arith.mulf %729, %726 : vector<2x128xf32>
    %731 = arith.select %728, %726, %730 : vector<2x128xi1>, vector<2x128xf32>
    %732 = arith.addf %705, %731 : vector<2x128xf32>
    %733 = arith.truncf %732 : vector<2x128xf32> to vector<2x128xbf16>
    %734 = arith.truncf %271 : vector<2x64xf32> to vector<2x64xbf16>
    %c3_529 = arith.constant 3 : index
    %c0_530 = arith.constant 0 : index
    %c0_531 = arith.constant 0 : index
    %735 = vector.load %arg33[%c3_529, %c0_530, %c0_531] : memref<5x64x128xbf16, #tpu.memory_space<vmem>>, vector<1x64x128xbf16>
    %736 = vector.shape_cast %735 : vector<1x64x128xbf16> to vector<64x128xbf16>
    %cst_532 = arith.constant dense<0.000000e+00> : vector<2x128xf32>
    %737 = tpu.matmul %734, %736, %cst_532 {dimension_numbers = #tpu.dot_dimension_numbers<[1], [0], [0], [1], [0, 0, 1, 1], [], []>} : vector<2x64xbf16>, vector<64x128xbf16>, vector<2x128xf32> -> vector<2x128xf32>
    %c3_533 = arith.constant 3 : index
    %c0_534 = arith.constant 0 : index
    %c0_535 = arith.constant 0 : index
    %738 = vector.load %arg34[%c3_533, %c0_534, %c0_535] : memref<5x64x128xbf16, #tpu.memory_space<vmem>>, vector<1x64x128xbf16>
    %739 = vector.shape_cast %738 : vector<1x64x128xbf16> to vector<64x128xbf16>
    %cst_536 = arith.constant dense<0.000000e+00> : vector<2x128xf32>
    %740 = tpu.matmul %63, %739, %cst_536 {dimension_numbers = #tpu.dot_dimension_numbers<[1], [0], [0], [1], [0, 0, 1, 1], [], []>} : vector<2x64xbf16>, vector<64x128xbf16>, vector<2x128xf32> -> vector<2x128xf32>
    %741 = arith.addf %737, %740 : vector<2x128xf32>
    %742 = arith.truncf %521 : vector<2x32xf32> to vector<2x32xbf16>
    %c3_537 = arith.constant 3 : index
    %c0_538 = arith.constant 0 : index
    %c0_539 = arith.constant 0 : index
    %743 = vector.load %arg35[%c3_537, %c0_538, %c0_539] : memref<5x32x128xbf16, #tpu.memory_space<vmem>>, vector<1x32x128xbf16>
    %744 = vector.shape_cast %743 : vector<1x32x128xbf16> to vector<32x128xbf16>
    %cst_540 = arith.constant dense<0.000000e+00> : vector<2x128xf32>
    %745 = tpu.matmul %742, %744, %cst_540 {dimension_numbers = #tpu.dot_dimension_numbers<[1], [0], [0], [1], [0, 0, 1, 1], [], []>} : vector<2x32xbf16>, vector<32x128xbf16>, vector<2x128xf32> -> vector<2x128xf32>
    %746 = arith.addf %741, %745 : vector<2x128xf32>
    %c3_541 = arith.constant 3 : index
    %c0_542 = arith.constant 0 : index
    %c0_543 = arith.constant 0 : index
    %747 = vector.load %arg36[%c3_541, %c0_542, %c0_543] : memref<5x32x128xbf16, #tpu.memory_space<vmem>>, vector<1x32x128xbf16>
    %748 = vector.shape_cast %747 : vector<1x32x128xbf16> to vector<32x128xbf16>
    %cst_544 = arith.constant dense<0.000000e+00> : vector<2x128xf32>
    %749 = tpu.matmul %71, %748, %cst_544 {dimension_numbers = #tpu.dot_dimension_numbers<[1], [0], [0], [1], [0, 0, 1, 1], [], []>} : vector<2x32xbf16>, vector<32x128xbf16>, vector<2x128xf32> -> vector<2x128xf32>
    %750 = arith.addf %746, %749 : vector<2x128xf32>
    %c3_545 = arith.constant 3 : index
    %c0_546 = arith.constant 0 : index
    %c0_547 = arith.constant 0 : index
    %751 = vector.load %arg37[%c3_545, %c0_546, %c0_547] : memref<5x1x128xf32, #tpu.memory_space<vmem>>, vector<1x1x128xf32>
    %752 = vector.shape_cast %751 : vector<1x1x128xf32> to vector<1x128xf32>
    %753 = vector.broadcast %752 : vector<1x128xf32> to vector<2x128xf32>
    %754 = arith.addf %750, %753 : vector<2x128xf32>
    %cst_548 = arith.constant 0.000000e+00 : f32
    %755 = vector.broadcast %cst_548 : f32 to vector<2x128xf32>
    %756 = arith.cmpf oge, %754, %755 : vector<2x128xf32>
    %cst_549 = arith.constant 2.000000e-01 : f32
    %757 = vector.broadcast %cst_549 : f32 to vector<2x128xf32>
    %758 = arith.mulf %757, %754 : vector<2x128xf32>
    %759 = arith.select %756, %754, %758 : vector<2x128xi1>, vector<2x128xf32>
    %760 = arith.truncf %759 : vector<2x128xf32> to vector<2x128xbf16>
    %c3_550 = arith.constant 3 : index
    %c0_551 = arith.constant 0 : index
    %c0_552 = arith.constant 0 : index
    %761 = vector.load %arg38[%c3_550, %c0_551, %c0_552] : memref<5x128x128xbf16, #tpu.memory_space<vmem>>, vector<1x128x128xbf16>
    %762 = vector.shape_cast %761 : vector<1x128x128xbf16> to vector<128x128xbf16>
    %cst_553 = arith.constant dense<0.000000e+00> : vector<2x128xf32>
    %763 = tpu.matmul %760, %762, %cst_553 {dimension_numbers = #tpu.dot_dimension_numbers<[1], [0], [0], [1], [0, 0, 1, 1], [], []>} : vector<2x128xbf16>, vector<128x128xbf16>, vector<2x128xf32> -> vector<2x128xf32>
    %c3_554 = arith.constant 3 : index
    %c0_555 = arith.constant 0 : index
    %c0_556 = arith.constant 0 : index
    %764 = vector.load %arg39[%c3_554, %c0_555, %c0_556] : memref<5x1x128xf32, #tpu.memory_space<vmem>>, vector<1x1x128xf32>
    %765 = vector.shape_cast %764 : vector<1x1x128xf32> to vector<1x128xf32>
    %766 = vector.broadcast %765 : vector<1x128xf32> to vector<2x128xf32>
    %767 = arith.addf %763, %766 : vector<2x128xf32>
    %cst_557 = arith.constant 0.000000e+00 : f32
    %768 = vector.broadcast %cst_557 : f32 to vector<2x128xf32>
    %769 = arith.cmpf oge, %767, %768 : vector<2x128xf32>
    %cst_558 = arith.constant 2.000000e-01 : f32
    %770 = vector.broadcast %cst_558 : f32 to vector<2x128xf32>
    %771 = arith.mulf %770, %767 : vector<2x128xf32>
    %772 = arith.select %769, %767, %771 : vector<2x128xi1>, vector<2x128xf32>
    %773 = arith.truncf %772 : vector<2x128xf32> to vector<2x128xbf16>
    %c3_559 = arith.constant 3 : index
    %c0_560 = arith.constant 0 : index
    %c0_561 = arith.constant 0 : index
    %774 = vector.load %arg40[%c3_559, %c0_560, %c0_561] : memref<5x128x128xbf16, #tpu.memory_space<vmem>>, vector<1x128x128xbf16>
    %775 = vector.shape_cast %774 : vector<1x128x128xbf16> to vector<128x128xbf16>
    %cst_562 = arith.constant dense<0.000000e+00> : vector<2x128xf32>
    %776 = tpu.matmul %773, %775, %cst_562 {dimension_numbers = #tpu.dot_dimension_numbers<[1], [0], [0], [1], [0, 0, 1, 1], [], []>} : vector<2x128xbf16>, vector<128x128xbf16>, vector<2x128xf32> -> vector<2x128xf32>
    %c3_563 = arith.constant 3 : index
    %c0_564 = arith.constant 0 : index
    %c0_565 = arith.constant 0 : index
    %777 = vector.load %arg41[%c3_563, %c0_564, %c0_565] : memref<5x1x128xf32, #tpu.memory_space<vmem>>, vector<1x1x128xf32>
    %778 = vector.shape_cast %777 : vector<1x1x128xf32> to vector<1x128xf32>
    %779 = vector.broadcast %778 : vector<1x128xf32> to vector<2x128xf32>
    %780 = arith.addf %776, %779 : vector<2x128xf32>
    %cst_566 = arith.constant 0.000000e+00 : f32
    %781 = vector.broadcast %cst_566 : f32 to vector<2x128xf32>
    %782 = arith.cmpf oge, %780, %781 : vector<2x128xf32>
    %cst_567 = arith.constant 2.000000e-01 : f32
    %783 = vector.broadcast %cst_567 : f32 to vector<2x128xf32>
    %784 = arith.mulf %783, %780 : vector<2x128xf32>
    %785 = arith.select %782, %780, %784 : vector<2x128xi1>, vector<2x128xf32>
    %786 = arith.addf %759, %785 : vector<2x128xf32>
    %787 = arith.truncf %786 : vector<2x128xf32> to vector<2x128xbf16>
    %788 = arith.truncf %321 : vector<2x64xf32> to vector<2x64xbf16>
    %c4_568 = arith.constant 4 : index
    %c0_569 = arith.constant 0 : index
    %c0_570 = arith.constant 0 : index
    %789 = vector.load %arg33[%c4_568, %c0_569, %c0_570] : memref<5x64x128xbf16, #tpu.memory_space<vmem>>, vector<1x64x128xbf16>
    %790 = vector.shape_cast %789 : vector<1x64x128xbf16> to vector<64x128xbf16>
    %cst_571 = arith.constant dense<0.000000e+00> : vector<2x128xf32>
    %791 = tpu.matmul %788, %790, %cst_571 {dimension_numbers = #tpu.dot_dimension_numbers<[1], [0], [0], [1], [0, 0, 1, 1], [], []>} : vector<2x64xbf16>, vector<64x128xbf16>, vector<2x128xf32> -> vector<2x128xf32>
    %c4_572 = arith.constant 4 : index
    %c0_573 = arith.constant 0 : index
    %c0_574 = arith.constant 0 : index
    %792 = vector.load %arg34[%c4_572, %c0_573, %c0_574] : memref<5x64x128xbf16, #tpu.memory_space<vmem>>, vector<1x64x128xbf16>
    %793 = vector.shape_cast %792 : vector<1x64x128xbf16> to vector<64x128xbf16>
    %cst_575 = arith.constant dense<0.000000e+00> : vector<2x128xf32>
    %794 = tpu.matmul %63, %793, %cst_575 {dimension_numbers = #tpu.dot_dimension_numbers<[1], [0], [0], [1], [0, 0, 1, 1], [], []>} : vector<2x64xbf16>, vector<64x128xbf16>, vector<2x128xf32> -> vector<2x128xf32>
    %795 = arith.addf %791, %794 : vector<2x128xf32>
    %796 = arith.truncf %571 : vector<2x32xf32> to vector<2x32xbf16>
    %c4_576 = arith.constant 4 : index
    %c0_577 = arith.constant 0 : index
    %c0_578 = arith.constant 0 : index
    %797 = vector.load %arg35[%c4_576, %c0_577, %c0_578] : memref<5x32x128xbf16, #tpu.memory_space<vmem>>, vector<1x32x128xbf16>
    %798 = vector.shape_cast %797 : vector<1x32x128xbf16> to vector<32x128xbf16>
    %cst_579 = arith.constant dense<0.000000e+00> : vector<2x128xf32>
    %799 = tpu.matmul %796, %798, %cst_579 {dimension_numbers = #tpu.dot_dimension_numbers<[1], [0], [0], [1], [0, 0, 1, 1], [], []>} : vector<2x32xbf16>, vector<32x128xbf16>, vector<2x128xf32> -> vector<2x128xf32>
    %800 = arith.addf %795, %799 : vector<2x128xf32>
    %c4_580 = arith.constant 4 : index
    %c0_581 = arith.constant 0 : index
    %c0_582 = arith.constant 0 : index
    %801 = vector.load %arg36[%c4_580, %c0_581, %c0_582] : memref<5x32x128xbf16, #tpu.memory_space<vmem>>, vector<1x32x128xbf16>
    %802 = vector.shape_cast %801 : vector<1x32x128xbf16> to vector<32x128xbf16>
    %cst_583 = arith.constant dense<0.000000e+00> : vector<2x128xf32>
    %803 = tpu.matmul %71, %802, %cst_583 {dimension_numbers = #tpu.dot_dimension_numbers<[1], [0], [0], [1], [0, 0, 1, 1], [], []>} : vector<2x32xbf16>, vector<32x128xbf16>, vector<2x128xf32> -> vector<2x128xf32>
    %804 = arith.addf %800, %803 : vector<2x128xf32>
    %c4_584 = arith.constant 4 : index
    %c0_585 = arith.constant 0 : index
    %c0_586 = arith.constant 0 : index
    %805 = vector.load %arg37[%c4_584, %c0_585, %c0_586] : memref<5x1x128xf32, #tpu.memory_space<vmem>>, vector<1x1x128xf32>
    %806 = vector.shape_cast %805 : vector<1x1x128xf32> to vector<1x128xf32>
    %807 = vector.broadcast %806 : vector<1x128xf32> to vector<2x128xf32>
    %808 = arith.addf %804, %807 : vector<2x128xf32>
    %cst_587 = arith.constant 0.000000e+00 : f32
    %809 = vector.broadcast %cst_587 : f32 to vector<2x128xf32>
    %810 = arith.cmpf oge, %808, %809 : vector<2x128xf32>
    %cst_588 = arith.constant 2.000000e-01 : f32
    %811 = vector.broadcast %cst_588 : f32 to vector<2x128xf32>
    %812 = arith.mulf %811, %808 : vector<2x128xf32>
    %813 = arith.select %810, %808, %812 : vector<2x128xi1>, vector<2x128xf32>
    %814 = arith.truncf %813 : vector<2x128xf32> to vector<2x128xbf16>
    %c4_589 = arith.constant 4 : index
    %c0_590 = arith.constant 0 : index
    %c0_591 = arith.constant 0 : index
    %815 = vector.load %arg38[%c4_589, %c0_590, %c0_591] : memref<5x128x128xbf16, #tpu.memory_space<vmem>>, vector<1x128x128xbf16>
    %816 = vector.shape_cast %815 : vector<1x128x128xbf16> to vector<128x128xbf16>
    %cst_592 = arith.constant dense<0.000000e+00> : vector<2x128xf32>
    %817 = tpu.matmul %814, %816, %cst_592 {dimension_numbers = #tpu.dot_dimension_numbers<[1], [0], [0], [1], [0, 0, 1, 1], [], []>} : vector<2x128xbf16>, vector<128x128xbf16>, vector<2x128xf32> -> vector<2x128xf32>
    %c4_593 = arith.constant 4 : index
    %c0_594 = arith.constant 0 : index
    %c0_595 = arith.constant 0 : index
    %818 = vector.load %arg39[%c4_593, %c0_594, %c0_595] : memref<5x1x128xf32, #tpu.memory_space<vmem>>, vector<1x1x128xf32>
    %819 = vector.shape_cast %818 : vector<1x1x128xf32> to vector<1x128xf32>
    %820 = vector.broadcast %819 : vector<1x128xf32> to vector<2x128xf32>
    %821 = arith.addf %817, %820 : vector<2x128xf32>
    %cst_596 = arith.constant 0.000000e+00 : f32
    %822 = vector.broadcast %cst_596 : f32 to vector<2x128xf32>
    %823 = arith.cmpf oge, %821, %822 : vector<2x128xf32>
    %cst_597 = arith.constant 2.000000e-01 : f32
    %824 = vector.broadcast %cst_597 : f32 to vector<2x128xf32>
    %825 = arith.mulf %824, %821 : vector<2x128xf32>
    %826 = arith.select %823, %821, %825 : vector<2x128xi1>, vector<2x128xf32>
    %827 = arith.truncf %826 : vector<2x128xf32> to vector<2x128xbf16>
    %c4_598 = arith.constant 4 : index
    %c0_599 = arith.constant 0 : index
    %c0_600 = arith.constant 0 : index
    %828 = vector.load %arg40[%c4_598, %c0_599, %c0_600] : memref<5x128x128xbf16, #tpu.memory_space<vmem>>, vector<1x128x128xbf16>
    %829 = vector.shape_cast %828 : vector<1x128x128xbf16> to vector<128x128xbf16>
    %cst_601 = arith.constant dense<0.000000e+00> : vector<2x128xf32>
    %830 = tpu.matmul %827, %829, %cst_601 {dimension_numbers = #tpu.dot_dimension_numbers<[1], [0], [0], [1], [0, 0, 1, 1], [], []>} : vector<2x128xbf16>, vector<128x128xbf16>, vector<2x128xf32> -> vector<2x128xf32>
    %c4_602 = arith.constant 4 : index
    %c0_603 = arith.constant 0 : index
    %c0_604 = arith.constant 0 : index
    %831 = vector.load %arg41[%c4_602, %c0_603, %c0_604] : memref<5x1x128xf32, #tpu.memory_space<vmem>>, vector<1x1x128xf32>
    %832 = vector.shape_cast %831 : vector<1x1x128xf32> to vector<1x128xf32>
    %833 = vector.broadcast %832 : vector<1x128xf32> to vector<2x128xf32>
    %834 = arith.addf %830, %833 : vector<2x128xf32>
    %cst_605 = arith.constant 0.000000e+00 : f32
    %835 = vector.broadcast %cst_605 : f32 to vector<2x128xf32>
    %836 = arith.cmpf oge, %834, %835 : vector<2x128xf32>
    %cst_606 = arith.constant 2.000000e-01 : f32
    %837 = vector.broadcast %cst_606 : f32 to vector<2x128xf32>
    %838 = arith.mulf %837, %834 : vector<2x128xf32>
    %839 = arith.select %836, %834, %838 : vector<2x128xi1>, vector<2x128xf32>
    %840 = arith.addf %813, %839 : vector<2x128xf32>
    %841 = arith.truncf %840 : vector<2x128xf32> to vector<2x128xbf16>
    %842 = tpu.concatenate %625, %679, %733, %787, %841 in 1 : vector<2x128xbf16>, vector<2x128xbf16>, vector<2x128xbf16>, vector<2x128xbf16>, vector<2x128xbf16> -> vector<2x640xbf16>
    %c0_607 = arith.constant 0 : index
    %c0_608 = arith.constant 0 : index
    %843 = vector.load %arg42[%c0_607, %c0_608] : memref<640x128xbf16, #tpu.memory_space<vmem>>, vector<640x128xbf16>
    %cst_609 = arith.constant dense<0.000000e+00> : vector<2x128xf32>
    %844 = tpu.matmul %842, %843, %cst_609 {dimension_numbers = #tpu.dot_dimension_numbers<[1], [0], [0], [1], [0, 0, 1, 1], [], []>} : vector<2x640xbf16>, vector<640x128xbf16>, vector<2x128xf32> -> vector<2x128xf32>
    %c0_610 = arith.constant 0 : index
    %c0_611 = arith.constant 0 : index
    %845 = vector.load %arg43[%c0_610, %c0_611] : memref<1x128xf32, #tpu.memory_space<vmem>>, vector<1x128xf32>
    %846 = vector.broadcast %845 : vector<1x128xf32> to vector<2x128xf32>
    %847 = arith.addf %844, %846 : vector<2x128xf32>
    %c0_612 = arith.constant 0 : index
    %c0_613 = arith.constant 0 : index
    %848 = vector.load %arg44[%c0_612, %c0_613] : memref<2x128xf32, #tpu.memory_space<vmem>>, vector<2x128xf32>
    tpu.vector_store %arg44[%c0_612, %c0_613], %847 {strides = array<i32>} : memref<2x128xf32, #tpu.memory_space<vmem>>, vector<2x128xf32>,
    return
  }
}

</mosaic_0001>

<bundles_post_ra>
// kernel: three_stage_forward.1
= control target key start
LH: loop header
LB: loop body
LE: loop exit
PB: predicated region body
PF: predicated region fallthrough
CT: control target
= control target key end

     0   :  { %s20794_s6 = smov 1   ;;  %s20795_s10 = smov 2   ;;  %s22790_s0 = inlined_call_operand.smem [shape: u32[45], index: -1, kind: input, shape index: {}] }
   0x1   :  { %s20891_s5 = sld [smem:[%s22790_s0]]   ;;  %s20796_s14 = smov 3  }
   0x2   :  { %s20896_s9 = sld [smem:[%s22790_s0 + %s20794_s6]]   ;;  %s20797_s18 = smov 4  }
   0x3   :  { %s20901_s13 = sld [smem:[%s22790_s0 + %s20795_s10]]   ;;  %s20798_s22 = smov 5  }
   0x4   :  { %s20906_s17 = sld [smem:[%s22790_s0 + %s20796_s14]]   ;;  %s20799_s26 = smov 6  }
   0x5   :  { %s20911_s21 = sld [smem:[%s22790_s0 + %s20797_s18]]   ;;  %s20800_s30 = smov 7  }
   0x6   :  { %s20916_s25 = sld [smem:[%s22790_s0 + %s20798_s22]]   ;;  %s20801_s4 = smov 8  }
   0x7   :  { %22802 = sst [smem:[#allocation69_spill]] %s20891_s5  ;;  %s20802_s10 = smov 9  }
   0x8   :  { %22803 = sst [smem:[#allocation70_spill]] %s20896_s9  ;;  %s20803_s15 = smov 10  }
   0x9   :  { %22804 = sst [smem:[#allocation71_spill]] %s20901_s13  ;;  %s20804_s20 = smov 11  }
   0xa   :  { %22805 = sst [smem:[#allocation72_spill]] %s20906_s17  ;;  %s20806_s1 = smov 13  }
   0xb   :  { %22806 = sst [smem:[#allocation73_spill]] %s20911_s21  ;;  %s20807_s7 = smov 14  }
   0xc   :  { %s20921_s29 = sld [smem:[%s22790_s0 + %s20799_s26]]   ;;  %s20805_s26 = smov 12  }
   0xd   :  { %s20926_s3 = sld [smem:[%s22790_s0 + %s20800_s30]]   ;;  %s20809_s22 = smov 16  }
   0xe   :  { %s20931_s8 = sld [smem:[%s22790_s0 + %s20801_s4]]   ;;  %s20810_s28 = smov 17  }
   0xf   :  { %s20936_s14 = sld [smem:[%s22790_s0 + %s20802_s10]]  }
  0x10   :  { %s20941_s19 = sld [smem:[%s22790_s0 + %s20803_s15]]   ;;  %s20808_s15 = smov 15  }
  0x11   :  { %s20946_s24 = sld [smem:[%s22790_s0 + %s20804_s20]]  }
  0x12   :  { %22807 = sst [smem:[#allocation74_spill]] %s20921_s29 }
  0x13   :  { %22808 = sst [smem:[#allocation75_spill]] %s20926_s3 }
  0x14   :  { %s20951_s30 = sld [smem:[%s22790_s0 + %s20805_s26]]  }
  0x15   :  { %22809 = sst [smem:[#allocation76_spill]] %s20936_s14 }
  0x16   :  { %22810 = sst [smem:[#allocation77_spill]] %s20941_s19 }
  0x17   :  { %s20956_s6 = sld [smem:[%s22790_s0 + %s20806_s1]]  }
  0x18   :  { %s20961_s12 = sld [smem:[%s22790_s0 + %s20807_s7]]   ;;  %s20811_s7 = smov 18  }
  0x19   :  { %s20966_s20 = sld [smem:[%s22790_s0 + %s20808_s15]]   ;;  %s20812_s15 = smov 19  }
  0x1a   :  { %22811 = sst [smem:[#allocation78_spill]] %s20951_s30 }
  0x1b   :  { %s20971_s27 = sld [smem:[%s22790_s0 + %s20809_s22]]   ;;  %s20813_s22 = smov 20  }
  0x1c   :  { %s20976_s4 = sld [smem:[%s22790_s0 + %s20810_s28]]   ;;  %s20814_s28 = smov 21  }
  0x1d   :  { %s20981_s9 = sld [smem:[%s22790_s0 + %s20811_s7]]   ;;  %s20815_s7 = smov 22  }
  0x1e   :  { %22812 = sst [smem:[#allocation79_spill]] %s20961_s12 }
  0x1f   :  { %22813 = sst [smem:[#allocation80_spill]] %s20966_s20 }
  0x20   :  { %s20986_s20 = sld [smem:[%s22790_s0 + %s20812_s15]]   ;;  %s20816_s15 = smov 23  }
  0x21   :  { %s20991_s14 = sld [smem:[%s22790_s0 + %s20813_s22]]   ;;  %s20817_s22 = smov 24  }
  0x22   :  { %22814 = sst [smem:[#allocation81_spill]] %s20976_s4 }
  0x23   :  { %22815 = sst [smem:[#allocation82_spill]] %s20981_s9 }
  0x24   :  { %s20996_s4 = sld [smem:[%s22790_s0 + %s20814_s28]]   ;;  %s20818_s28 = smov 25  }
  0x25   :  { %s21001_s3 = sld [smem:[%s22790_s0 + %s20815_s7]]   ;;  %s20819_s7 = smov 26  }
  0x26   :  { %s21006_s5 = sld [smem:[%s22790_s0 + %s20816_s15]]   ;;  %s20820_s15 = smov 27  }
  0x27   :  { %22816 = sst [smem:[#allocation83_spill]] %s20991_s14 }
  0x28   :  { %s21011_s17 = sld [smem:[%s22790_s0 + %s20817_s22]]   ;;  %s20821_s22 = smov 28  }
  0x29   :  { %s21016_s13 = sld [smem:[%s22790_s0 + %s20818_s28]]   ;;  %s20822_s28 = smov 29  }
  0x2a   :  { %s21026_s14 = sld [smem:[%s22790_s0 + %s20820_s15]]   ;;  %s20824_s15 = smov 31  }
  0x2b   :  { %22817 = sst [smem:[#allocation84_spill]] %s21001_s3 }
  0x2c   :  { %s21021_s3 = sld [smem:[%s22790_s0 + %s20819_s7]]   ;;  %s20823_s7 = smov 30  }
  0x2d   :  { %s21036_s9 = sld [smem:[%s22790_s0 + %s20822_s28]]   ;;  %s20826_s28 = smov 33  }
  0x2e   :  { %22818 = sst [smem:[#allocation85_spill]] %s21011_s17 }
  0x2f   :  { %s21031_s17 = sld [smem:[%s22790_s0 + %s20821_s22]]   ;;  %s20825_s22 = smov 32  }
  0x30   :  { %s21046_s12 = sld [smem:[%s22790_s0 + %s20824_s15]]   ;;  %s20828_s15 = smov 35  }
  0x32   :  { %22819 = sst [smem:[#allocation86_spill]] %s21021_s3 }
  0x33   :  { %22821 = sst [smem:[#allocation88_spill]] %s21036_s9 }
  0x34   :  { %s21041_s3 = sld [smem:[%s22790_s0 + %s20823_s7]]   ;;  %s20827_s7 = smov 34  }
  0x35   :  { %22820 = sst [smem:[#allocation87_spill]] %s21031_s17 }
  0x36   :  { %22822 = sst [smem:[#allocation89_spill]] %s21046_s12 }
  0x37   :  { %s21051_s17 = sld [smem:[%s22790_s0 + %s20825_s22]]   ;;  %s20829_s22 = smov 36  }
  0x38   :  { %s21056_s9 = sld [smem:[%s22790_s0 + %s20826_s28]]   ;;  %s20830_s28 = smov 37  }
  0x39   :  { %s21061_s30 = sld [smem:[%s22790_s0 + %s20827_s7]]   ;;  %s20831_s7 = smov 38  }
  0x3a   :  { %s21066_s12 = sld [smem:[%s22790_s0 + %s20828_s15]]   ;;  %s20832_s15 = smov 39  }
  0x3b   :  { %s21076_s19 = sld [smem:[%s22790_s0 + %s20830_s28]]   ;;  %s20834_s28 = smov 41  }
  0x3d   :  { %22823 = sst [smem:[#allocation90_spill]] %s21051_s17 }
  0x3e   :  { %s21071_s17 = sld [smem:[%s22790_s0 + %s20829_s22]]   ;;  %s20833_s22 = smov 40  }
  0x3f   :  { %22824 = sst [smem:[#allocation91_spill]] %s21061_s30 }
  0x40   :  { %22825 = sst [smem:[#allocation92_spill]] %s21066_s12 }
  0x41   :  { %22826 = sst [smem:[#allocation93_spill]] %s21076_s19 }
  0x42   :  { %s21081_s30 = sld [smem:[%s22790_s0 + %s20831_s7]]   ;;  %s20835_s7 = smov 42  }
  0x43   :  { %s21086_s12 = sld [smem:[%s22790_s0 + %s20832_s15]]   ;;  %s20836_s15 = smov 43  }
  0x44   :  { %s21091_s29 = sld [smem:[%s22790_s0 + %s20833_s22]]   ;;  %s20837_s22 = smov 44  }
  0x45   :  { %s21096_s19 = sld [smem:[%s22790_s0 + %s20834_s28]]  }
  0x46   :  { %s21101_s21 = sld [smem:[%s22790_s0 + %s20835_s7]]  }
  0x49   :  { %22827 = sst [smem:[#allocation94_spill]] %s21086_s12 }
  0x4a   :  { %22828 = sst [smem:[#allocation95_spill]] %s21091_s29 }
  0x4b   :  { %s21106_s12 = sld [smem:[%s22790_s0 + %s20836_s15]]  }
  0x4c   :  { %s21111_s29 = sld [smem:[%s22790_s0 + %s20837_s22]]  }
  0x4d   :  { %94 = vsyncpa [#allocation3], 0 }
  0x4e   :  { %95 = vsyncpa [#allocation5], 0 }
  0x4f   :  { %96 = vsyncpa [#allocation8], 0 }
  0x50   :  { %97 = vsyncpa [#allocation11], 0 }
  0x51   :  { %98 = vsyncpa [#allocation14], 0 }
  0x52   :  { %99 = vsyncpa [#allocation17], 0 }
  0x53   :  { %100 = vsyncpa [#allocation20], 0 }
  0x54   :  { %101 = vsyncpa [#allocation23], 0 }
  0x55   :  { %102 = vsyncpa [#allocation26], 0 }
  0x56   :  { %103 = vsyncpa [#allocation29], 0 }
  0x57   :  { %104 = vsyncpa [#allocation32], 0 }
  0x58   :  { %105 = vsyncpa [#allocation35], 0 }
  0x59   :  { %106 = vsyncpa [#allocation38], 0 }
  0x5a   :  { %107 = vsyncpa [#allocation41], 0 }
  0x5b   :  { %108 = vsyncpa [#allocation44], 0 }
  0x5c   :  { %109 = vsyncpa [#allocation47], 0 }
  0x5d   :  { %110 = vsyncpa [#allocation50], 0  ;;  %s20838_s28 = smov [#allocation4]  }
  0x5e   :  { %s136_s0 = sshll.u32 %s20838_s28, 4  ;;  %s137_s0 = int_to_ptr.vmem [resolvable:$true] %s136_s0 }
  0x5f   :  { %s20108_s1 = scalar_lea.vmem %s137_s0, 15360  ;;  %p20113_p1 = scmp.lt.s32.totalorder %s137_s0, %s137_s0 }
  0x60   :  { %p20109_p0 = scmp.ne.s32.totalorder %s137_s0, %s20108_s1  ;;  %p20114_p2 = scmp.lt.s32.totalorder %s20108_s1, %s20108_s1 }
  0x62   :  { %p20115_p3 = por %p20114_p2, %p20113_p1 }
  0x64   :  { %p20116_p4 = pnand %p20115_p3, %p20109_p0 }
  0x66   :  { %20119 = shalt.err (!%p20116_p4)
}
  0x67   :  { %s20839_s2 = smov 64   ;;  %s20840_s7 = smov 4  }
  0x68   :  { %142 = dma.hbm_to_vmem [thread:$0]  %s20916_s25, 15360, %s137_s0, [#allocation5], %s20839_s2, %s20839_s2, %s20840_s7  }
  0x69   :  { %s20841_s10 = smov [#allocation7]   ;;  %s20842_s15 = smov [#allocation10]  }
  0x6a   :  { %s162_s11 = sshll.u32 %s20841_s10, 4  ;;  %s188_s16 = sshll.u32 %s20842_s15, 4  ;;  %s163_s11 = int_to_ptr.vmem [resolvable:$true] %s162_s11  ;;  %s189_s16 = int_to_ptr.vmem [resolvable:$true] %s188_s16 }
  0x6b   :  { %s20128_s18 = scalar_lea.vmem %s163_s11, 80  ;;  %s20132_s22 = scalar_lea.vmem %s163_s11, 96 }
  0x6c   :  { %p20129_p5 = scmp.ne.s32.totalorder %s163_s11, %s20128_s18  ;;  %p20133_p6 = scmp.lt.s32.totalorder %s163_s11, %s163_s11 }
  0x6d   :  { %p20134_p7 = scmp.lt.s32.totalorder %s20132_s22, %s20128_s18 }
  0x6f   :  { %p20135_p8 = por %p20134_p7, %p20133_p6 }
  0x71   :  { %p20136_p9 = pnand %p20135_p8, %p20129_p5 }
  0x73   :  { %20139 = shalt.err (!%p20136_p9)
}
  0x74   :  { %s20843_s23 = smov 16   ;;  %s20844_s26 = smov 1  }
  0x75   :  { %168 = dma.hbm_to_vmem [thread:$0]  %s20931_s8, 80, %s163_s11, [#allocation8], %s20843_s23, %s20843_s23, %s20844_s26  }
  0x76   :  { %s20148_s25 = scalar_lea.vmem %s189_s16, 15360  ;;  %p20153_p11 = scmp.lt.s32.totalorder %s189_s16, %s189_s16 }
  0x77   :  { %p20149_p10 = scmp.ne.s32.totalorder %s189_s16, %s20148_s25  ;;  %p20154_p12 = scmp.lt.s32.totalorder %s20148_s25, %s20148_s25 }
  0x79   :  { %p20155_p13 = por %p20154_p12, %p20153_p11 }
  0x7b   :  { %p20156_p0 = pnand %p20155_p13, %p20149_p10 }
  0x7d   :  { %20159 = shalt.err (!%p20156_p0)
}
  0x7e   :  { %s20845_s28 = smov 192   ;;  %s20846_s0 = smov 12  }
  0x7f   :  { %194 = dma.hbm_to_vmem [thread:$0]  %s20946_s24, 15360, %s189_s16, [#allocation11], %s20845_s28, %s20845_s28, %s20846_s0  }
  0x80   :  { %s20847_s1 = smov [#allocation13]   ;;  %s20848_s15 = smov [#allocation16]  }
  0x81   :  { %s212_s10 = sshll.u32 %s20847_s1, 4  ;;  %s238_s18 = sshll.u32 %s20848_s15, 4  ;;  %s213_s10 = int_to_ptr.vmem [resolvable:$true] %s212_s10  ;;  %s239_s18 = int_to_ptr.vmem [resolvable:$true] %s238_s18 }
  0x82   :  { %s20168_s22 = scalar_lea.vmem %s213_s10, 15360  ;;  %p20173_p2 = scmp.lt.s32.totalorder %s213_s10, %s213_s10 }
  0x83   :  { %p20169_p1 = scmp.ne.s32.totalorder %s213_s10, %s20168_s22  ;;  %p20174_p3 = scmp.lt.s32.totalorder %s20168_s22, %s20168_s22 }
  0x85   :  { %p20175_p4 = por %p20174_p3, %p20173_p2 }
  0x87   :  { %p20176_p5 = pnand %p20175_p4, %p20169_p1 }
  0x89   :  { %20179 = shalt.err (!%p20176_p5)
}
  0x8a   :  { %218 = dma.hbm_to_vmem [thread:$0]  %s20956_s6, 15360, %s213_s10, [#allocation14], %s20839_s2, %s20839_s2, %s20840_s7  }
  0x8b   :  { %s20188_s8 = scalar_lea.vmem %s239_s18, 80  ;;  %s20192_s24 = scalar_lea.vmem %s239_s18, 96 }
  0x8c   :  { %p20189_p6 = scmp.ne.s32.totalorder %s239_s18, %s20188_s8  ;;  %p20193_p7 = scmp.lt.s32.totalorder %s239_s18, %s239_s18 }
  0x8d   :  { %p20194_p8 = scmp.lt.s32.totalorder %s20192_s24, %s20188_s8 }
  0x8f   :  { %p20195_p9 = por %p20194_p8, %p20193_p7 }
  0x91   :  { %p20196_p10 = pnand %p20195_p9, %p20189_p6 }
  0x93   :  { %20199 = shalt.err (!%p20196_p10)
}
  0x94   :  { %244 = dma.hbm_to_vmem [thread:$0]  %s20971_s27, 80, %s239_s18, [#allocation17], %s20843_s23, %s20843_s23, %s20844_s26  }
  0x95   :  { %s20849_s11 = smov [#allocation19]   ;;  %s20850_s25 = smov [#allocation22]  }
  0x96   :  { %s264_s16 = sshll.u32 %s20849_s11, 4  ;;  %s286_s28 = sshll.u32 %s20850_s25, 4  ;;  %s265_s16 = int_to_ptr.vmem [resolvable:$true] %s264_s16  ;;  %s287_s28 = int_to_ptr.vmem [resolvable:$true] %s286_s28 }
  0x97   :  { %s20208_s6 = scalar_lea.vmem %s265_s16, 1024  ;;  %p20213_p12 = scmp.lt.s32.totalorder %s265_s16, %s265_s16 }
  0x98   :  { %p20209_p11 = scmp.ne.s32.totalorder %s265_s16, %s20208_s6  ;;  %p20214_p13 = scmp.lt.s32.totalorder %s20208_s6, %s20208_s6 }
  0x9a   :  { %p20215_p0 = por %p20214_p13, %p20213_p12 }
  0x9c   :  { %p20216_p1 = pnand %p20215_p0, %p20209_p11 }
  0x9e   :  { %20219 = shalt.err (!%p20216_p1)
}
  0x9f   :  { %270 = dma.hbm_to_vmem [thread:$0]  %s20986_s20, 1024, %s265_s16, [#allocation20], %s20839_s2, %s20839_s2, %s20840_s7  }
  0xa0   :  { %s20228_s0 = scalar_lea.vmem %s287_s28, 1024  ;;  %p20233_p3 = scmp.lt.s32.totalorder %s287_s28, %s287_s28 }
  0xa1   :  { %p20229_p2 = scmp.ne.s32.totalorder %s287_s28, %s20228_s0  ;;  %p20234_p4 = scmp.lt.s32.totalorder %s20228_s0, %s20228_s0 }
  0xa3   :  { %p20235_p5 = por %p20234_p4, %p20233_p3 }
  0xa5   :  { %p20236_p6 = pnand %p20235_p5, %p20229_p2 }
  0xa7   :  { %20239 = shalt.err (!%p20236_p6)
}
  0xa8   :  { %292 = dma.hbm_to_vmem [thread:$0]  %s20996_s4, 1024, %s287_s28, [#allocation23], %s20839_s2, %s20839_s2, %s20840_s7  }
  0xa9   :  { %s20851_s27 = smov [#allocation25]   ;;  %s20852_s10 = smov [#allocation28]  }
  0xaa   :  { %s308_s1 = sshll.u32 %s20851_s27, 4  ;;  %s330_s15 = sshll.u32 %s20852_s10, 4  ;;  %s309_s1 = int_to_ptr.vmem [resolvable:$true] %s308_s1  ;;  %s331_s15 = int_to_ptr.vmem [resolvable:$true] %s330_s15 }
  0xab   :  { %s20248_s18 = scalar_lea.vmem %s309_s1, 1024  ;;  %p20253_p8 = scmp.lt.s32.totalorder %s309_s1, %s309_s1 }
  0xac   :  { %p20249_p7 = scmp.ne.s32.totalorder %s309_s1, %s20248_s18  ;;  %p20254_p9 = scmp.lt.s32.totalorder %s20248_s18, %s20248_s18 }
  0xae   :  { %p20255_p10 = por %p20254_p9, %p20253_p8 }
  0xb0   :  { %p20256_p11 = pnand %p20255_p10, %p20249_p7 }
  0xb2   :  { %20259 = shalt.err (!%p20256_p11)
}
  0xb3   :  { %314 = dma.hbm_to_vmem [thread:$0]  %s21006_s5, 1024, %s309_s1, [#allocation26], %s20839_s2, %s20839_s2, %s20840_s7  }
  0xb4   :  { %s20268_s20 = scalar_lea.vmem %s331_s15, 1024  ;;  %p20273_p13 = scmp.lt.s32.totalorder %s331_s15, %s331_s15 }
  0xb5   :  { %p20269_p12 = scmp.ne.s32.totalorder %s331_s15, %s20268_s20  ;;  %p20274_p0 = scmp.lt.s32.totalorder %s20268_s20, %s20268_s20 }
  0xb7   :  { %p20275_p1 = por %p20274_p0, %p20273_p13 }
  0xb9   :  { %p20276_p2 = pnand %p20275_p1, %p20269_p12 }
  0xbb   :  { %20279 = shalt.err (!%p20276_p2)
}
  0xbc   :  { %336 = dma.hbm_to_vmem [thread:$0]  %s21016_s13, 1024, %s331_s15, [#allocation29], %s20839_s2, %s20839_s2, %s20840_s7  }
  0xbd   :  { %s20853_s4 = smov [#allocation31]   ;;  %s20854_s8 = smov [#allocation34]  }
  0xbe   :  { %s352_s22 = sshll.u32 %s20853_s4, 4  ;;  %s377_s24 = sshll.u32 %s20854_s8, 4  ;;  %s353_s22 = int_to_ptr.vmem [resolvable:$true] %s352_s22  ;;  %s378_s24 = int_to_ptr.vmem [resolvable:$true] %s377_s24 }
  0xbf   :  { %s20288_s11 = scalar_lea.vmem %s353_s22, 1024  ;;  %p20293_p4 = scmp.lt.s32.totalorder %s353_s22, %s353_s22 }
  0xc0   :  { %p20289_p3 = scmp.ne.s32.totalorder %s353_s22, %s20288_s11  ;;  %p20294_p5 = scmp.lt.s32.totalorder %s20288_s11, %s20288_s11 }
  0xc2   :  { %p20295_p6 = por %p20294_p5, %p20293_p4 }
  0xc4   :  { %p20296_p7 = pnand %p20295_p6, %p20289_p3 }
  0xc6   :  { %20299 = shalt.err (!%p20296_p7)
}
  0xc7   :  { %358 = dma.hbm_to_vmem [thread:$0]  %s21026_s14, 1024, %s353_s22, [#allocation32], %s20839_s2, %s20839_s2, %s20840_s7  }
  0xc8   :  { %s20308_s5 = scalar_lea.vmem %s378_s24, 16  ;;  %s20312_s13 = scalar_lea.vmem %s378_s24, 32 }
  0xc9   :  { %p20309_p8 = scmp.ne.s32.totalorder %s378_s24, %s20308_s5  ;;  %p20313_p9 = scmp.lt.s32.totalorder %s378_s24, %s378_s24 }
  0xca   :  { %p20314_p10 = scmp.lt.s32.totalorder %s20312_s13, %s20308_s5 }
  0xcc   :  { %p20315_p11 = por %p20314_p10, %p20313_p9 }
  0xce   :  { %p20316_p12 = pnand %p20315_p11, %p20309_p8 }
  0xd0   :  { %20319 = shalt.err (!%p20316_p12)
}
  0xd1   :  { %380 = dma.hbm_to_vmem [thread:$0]  %s21041_s3, 16, %s378_s24, [#allocation35]  }
  0xd2   :  { %s20855_s16 = smov [#allocation37]   ;;  %s20856_s28 = smov [#allocation40]  }
  0xd3   :  { %s398_s25 = sshll.u32 %s20855_s16, 4  ;;  %s424_s6 = sshll.u32 %s20856_s28, 4  ;;  %s399_s25 = int_to_ptr.vmem [resolvable:$true] %s398_s25  ;;  %s425_s6 = int_to_ptr.vmem [resolvable:$true] %s424_s6 }
  0xd4   :  { %s20328_s0 = scalar_lea.vmem %s399_s25, 2560  ;;  %p20333_p0 = scmp.lt.s32.totalorder %s399_s25, %s399_s25 }
  0xd5   :  { %p20329_p13 = scmp.ne.s32.totalorder %s399_s25, %s20328_s0  ;;  %p20334_p1 = scmp.lt.s32.totalorder %s20328_s0, %s20328_s0 }
  0xd7   :  { %p20335_p2 = por %p20334_p1, %p20333_p0 }
  0xd9   :  { %p20336_p3 = pnand %p20335_p2, %p20329_p13 }
  0xdb   :  { %20339 = shalt.err (!%p20336_p3)
}
  0xdc   :  { %404 = dma.hbm_to_vmem [thread:$0]  %s21056_s9, 2560, %s399_s25, [#allocation38], %s20839_s2, %s20839_s2, %s20840_s7  }
  0xdd   :  { %s20348_s14 = scalar_lea.vmem %s425_s6, 1280  ;;  %p20353_p5 = scmp.lt.s32.totalorder %s425_s6, %s425_s6 }
  0xde   :  { %p20349_p4 = scmp.ne.s32.totalorder %s425_s6, %s20348_s14  ;;  %p20354_p6 = scmp.lt.s32.totalorder %s20348_s14, %s20348_s14 }
  0xe0   :  { %p20355_p7 = por %p20354_p6, %p20353_p5 }
  0xe2   :  { %p20356_p8 = pnand %p20355_p7, %p20349_p4 }
  0xe4   :  { %20359 = shalt.err (!%p20356_p8)
}
  0xe5   :  { %430 = dma.hbm_to_vmem [thread:$0]  %s21071_s17, 1280, %s425_s6, [#allocation41], %s20839_s2, %s20839_s2, %s20840_s7  }
  0xe6   :  { %s20857_s3 = smov [#allocation43]   ;;  %s20858_s1 = smov [#allocation46]  }
  0xe7   :  { %s448_s27 = sshll.u32 %s20857_s3, 4  ;;  %s472_s10 = sshll.u32 %s20858_s1, 4  ;;  %s449_s27 = int_to_ptr.vmem [resolvable:$true] %s448_s27  ;;  %s473_s10 = int_to_ptr.vmem [resolvable:$true] %s472_s10 }
  0xe8   :  { %s20368_s15 = scalar_lea.vmem %s449_s27, 5120  ;;  %p20373_p10 = scmp.lt.s32.totalorder %s449_s27, %s449_s27 }
  0xe9   :  { %p20369_p9 = scmp.ne.s32.totalorder %s449_s27, %s20368_s15  ;;  %p20374_p11 = scmp.lt.s32.totalorder %s20368_s15, %s20368_s15 }
  0xeb   :  { %p20375_p12 = por %p20374_p11, %p20373_p10 }
  0xed   :  { %p20376_p13 = pnand %p20375_p12, %p20369_p9 }
  0xef   :  { %20379 = shalt.err (!%p20376_p13)
}
  0xf0   :  { %454 = dma.hbm_to_vmem [thread:$0]  %s21081_s30, 5120, %s449_s27, [#allocation44], %s20839_s2, %s20839_s2, %s20840_s7  }
  0xf1   :  { %s20388_s9 = scalar_lea.vmem %s473_s10, 5120  ;;  %p20393_p1 = scmp.lt.s32.totalorder %s473_s10, %s473_s10 }
  0xf2   :  { %p20389_p0 = scmp.ne.s32.totalorder %s473_s10, %s20388_s9  ;;  %p20394_p2 = scmp.lt.s32.totalorder %s20388_s9, %s20388_s9 }
  0xf4   :  { %p20395_p3 = por %p20394_p2, %p20393_p1 }
  0xf6   :  { %p20396_p4 = pnand %p20395_p3, %p20389_p0 }
  0xf8   :  { %20399 = shalt.err (!%p20396_p4)
}
  0xf9   :  { %s22829_s17 = sld [smem:[#allocation95_spill]]  ;;  %s20859_s18 = smov [#allocation49]  }
  0xfa   :  { %s496_s20 = sshll.u32 %s20859_s18, 4  ;;  %s20860_s4 = smov [#allocation2]   ;;  %s497_s20 = int_to_ptr.vmem [resolvable:$true] %s496_s20 }
  0xfb   :  { %s124_s22 = sshll.u32 %s20860_s4, 4  ;;  %s20408_s8 = scalar_lea.vmem %s497_s20, 5120  ;;  %s125_s22 = int_to_ptr.vmem [resolvable:$true] %s124_s22 }
  0xfc   :  { %p20409_p5 = scmp.ne.s32.totalorder %s497_s20, %s20408_s8  ;;  %p20413_p6 = scmp.lt.s32.totalorder %s497_s20, %s497_s20 }
  0xfd   :  { %p20414_p7 = scmp.lt.s32.totalorder %s20408_s8, %s20408_s8 }
  0xff   :  { %478 = dma.hbm_to_vmem [thread:$0]  %s22829_s17, 5120, %s473_s10, [#allocation47], %s20839_s2, %s20839_s2, %s20840_s7  }
 0x100   :  { %p20415_p8 = por %p20414_p7, %p20413_p6 }
 0x102   :  { %p20416_p9 = pnand %p20415_p8, %p20409_p5 }
 0x104   :  { %20419 = shalt.err (!%p20416_p9)
}
 0x105   :  { %502 = dma.hbm_to_vmem [thread:$0]  %s21101_s21, 5120, %s497_s20, [#allocation50], %s20839_s2, %s20839_s2, %s20840_s7  }
 0x106   :  { %s20428_s30 = scalar_lea.vmem %s125_s22, 240  ;;  %s20432_s24 = scalar_lea.vmem %s125_s22, 256 }
 0x107   :  { %p20429_p10 = scmp.ne.s32.totalorder %s125_s22, %s20428_s30  ;;  %p20433_p11 = scmp.lt.s32.totalorder %s125_s22, %s125_s22 }
 0x108   :  { %p20434_p12 = scmp.lt.s32.totalorder %s20432_s24, %s20428_s30 }
 0x10a   :  { %p20435_p13 = por %p20434_p12, %p20433_p11 }
 0x10c   :  { %p20436_p0 = pnand %p20435_p13, %p20429_p10 }
 0x10e   :  { %20439 = shalt.err (!%p20436_p0)
}
 0x10f   :  { %s20861_s11 = smov 48   ;;  %s22830_s5 = sld [smem:[#allocation73_spill]] }
 0x110   :  { %s20862_s13 = smov 3   ;;  %s20863_s16 = smov [#allocation6]  }
 0x111   :  { %s148_s25 = sshll.u32 %s20863_s16, 4  ;;  %s20864_s21 = smov [#allocation9]   ;;  %s149_s25 = int_to_ptr.vmem [resolvable:$true] %s148_s25 }
 0x112   :  { %s176_s28 = sshll.u32 %s20864_s21, 4  ;;  %s20448_s6 = scalar_lea.vmem %s149_s25, 80  ;;  %s177_s28 = int_to_ptr.vmem [resolvable:$true] %s176_s28 }
 0x113   :  { %p20449_p1 = scmp.ne.s32.totalorder %s149_s25, %s20448_s6  ;;  %s20452_s0 = scalar_lea.vmem %s149_s25, 96 }
 0x114   :  { %p20453_p2 = scmp.lt.s32.totalorder %s149_s25, %s149_s25  ;;  %p20454_p3 = scmp.lt.s32.totalorder %s20452_s0, %s20448_s6 }
 0x115   :  { %130 = dma.hbm_to_vmem [thread:$0]  %s22830_s5, 240, %s125_s22, [#allocation3], %s20861_s11, %s20861_s11, %s20862_s13  }
 0x116   :  { %p20455_p4 = por %p20454_p3, %p20453_p2 }
 0x118   :  { %p20456_p5 = pnand %p20455_p4, %p20449_p1 }
 0x11a   :  { %20459 = shalt.err (!%p20456_p5)
}
 0x11b   :  { %s22831_s14 = sld [smem:[#allocation74_spill]]  ;;  %s20468_s3 = scalar_lea.vmem %s177_s28, 80 }
 0x11c   :  { %p20469_p6 = scmp.ne.s32.totalorder %s177_s28, %s20468_s3  ;;  %s20472_s27 = scalar_lea.vmem %s177_s28, 96 }
 0x11d   :  { %p20473_p7 = scmp.lt.s32.totalorder %s177_s28, %s177_s28  ;;  %p20474_p8 = scmp.lt.s32.totalorder %s20472_s27, %s20468_s3 }
 0x11f   :  { %p20475_p9 = por %p20474_p8, %p20473_p7 }
 0x121   :  { %154 = dma.hbm_to_vmem [thread:$0]  %s22831_s14, 80, %s149_s25, [#allocation5], %s20843_s23, %s20843_s23, %s20844_s26  }
 0x122   :  { %p20476_p10 = pnand %p20475_p9, %p20469_p6 }
 0x124   :  { %20479 = shalt.err (!%p20476_p10)
}
 0x125   :  { %s22832_s1 = sld [smem:[#allocation77_spill]]  ;;  %s20865_s10 = smov [#allocation12]  }
 0x126   :  { %s200_s15 = sshll.u32 %s20865_s10, 4  ;;  %s20866_s9 = smov [#allocation15]   ;;  %s201_s15 = int_to_ptr.vmem [resolvable:$true] %s200_s15 }
 0x127   :  { %s224_s17 = sshll.u32 %s20866_s9, 4  ;;  %s20488_s18 = scalar_lea.vmem %s201_s15, 240  ;;  %s225_s17 = int_to_ptr.vmem [resolvable:$true] %s224_s17 }
 0x128   :  { %p20489_p11 = scmp.ne.s32.totalorder %s201_s15, %s20488_s18  ;;  %s20492_s20 = scalar_lea.vmem %s201_s15, 256 }
 0x129   :  { %p20493_p12 = scmp.lt.s32.totalorder %s201_s15, %s201_s15  ;;  %p20494_p13 = scmp.lt.s32.totalorder %s20492_s20, %s20488_s18 }
 0x12b   :  { %182 = dma.hbm_to_vmem [thread:$0]  %s22832_s1, 80, %s177_s28, [#allocation8], %s20843_s23, %s20843_s23, %s20844_s26  }
 0x12c   :  { %p20495_p0 = por %p20494_p13, %p20493_p12 }
 0x12e   :  { %p20496_p1 = pnand %p20495_p0, %p20489_p11 }
 0x130   :  { %20499 = shalt.err (!%p20496_p1)
}
 0x131   :  { %s22833_s4 = sld [smem:[#allocation78_spill]]  ;;  %s20508_s22 = scalar_lea.vmem %s225_s17, 80 }
 0x132   :  { %p20509_p2 = scmp.ne.s32.totalorder %s225_s17, %s20508_s22  ;;  %s20512_s8 = scalar_lea.vmem %s225_s17, 96 }
 0x133   :  { %p20513_p3 = scmp.lt.s32.totalorder %s225_s17, %s225_s17  ;;  %p20514_p4 = scmp.lt.s32.totalorder %s20512_s8, %s20508_s22 }
 0x135   :  { %p20515_p5 = por %p20514_p4, %p20513_p3 }
 0x137   :  { %206 = dma.hbm_to_vmem [thread:$0]  %s22833_s4, 240, %s201_s15, [#allocation11], %s20861_s11, %s20861_s11, %s20862_s13  }
 0x138   :  { %p20516_p6 = pnand %p20515_p5, %p20509_p2 }
 0x13a   :  { %20519 = shalt.err (!%p20516_p6)
}
 0x13b   :  { %s22834_s30 = sld [smem:[#allocation79_spill]]  ;;  %s20867_s24 = smov [#allocation18]  }
 0x13c   :  { %s252_s5 = sshll.u32 %s20867_s24, 4  ;;  %s20868_s16 = smov [#allocation21]   ;;  %s253_s5 = int_to_ptr.vmem [resolvable:$true] %s252_s5 }
 0x13d   :  { %s277_s25 = sshll.u32 %s20868_s16, 4  ;;  %s20528_s11 = scalar_lea.vmem %s253_s5, 80  ;;  %s278_s25 = int_to_ptr.vmem [resolvable:$true] %s277_s25 }
 0x13e   :  { %p20529_p7 = scmp.ne.s32.totalorder %s253_s5, %s20528_s11  ;;  %s20532_s13 = scalar_lea.vmem %s253_s5, 96 }
 0x13f   :  { %p20533_p8 = scmp.lt.s32.totalorder %s253_s5, %s253_s5  ;;  %p20534_p9 = scmp.lt.s32.totalorder %s20532_s13, %s20528_s11 }
 0x141   :  { %230 = dma.hbm_to_vmem [thread:$0]  %s22834_s30, 80, %s225_s17, [#allocation14], %s20843_s23, %s20843_s23, %s20844_s26  }
 0x142   :  { %p20535_p10 = por %p20534_p9, %p20533_p8 }
 0x144   :  { %p20536_p11 = pnand %p20535_p10, %p20529_p7 }
 0x146   :  { %20539 = shalt.err (!%p20536_p11)
}
 0x147   :  { %s22835_s21 = sld [smem:[#allocation82_spill]]  ;;  %s20548_s28 = scalar_lea.vmem %s278_s25, 16 }
 0x148   :  { %p20549_p12 = scmp.ne.s32.totalorder %s278_s25, %s20548_s28  ;;  %s20552_s6 = scalar_lea.vmem %s278_s25, 32 }
 0x149   :  { %p20553_p13 = scmp.lt.s32.totalorder %s278_s25, %s278_s25  ;;  %p20554_p0 = scmp.lt.s32.totalorder %s20552_s6, %s20548_s28 }
 0x14b   :  { %p20555_p1 = por %p20554_p0, %p20553_p13 }
 0x14d   :  { %258 = dma.hbm_to_vmem [thread:$0]  %s22835_s21, 80, %s253_s5, [#allocation17], %s20843_s23, %s20843_s23, %s20844_s26  }
 0x14e   :  { %p20556_p2 = pnand %p20555_p1, %p20549_p12 }
 0x150   :  { %20559 = shalt.err (!%p20556_p2)
}
 0x151   :  { %s22836_s0 = sld [smem:[#allocation83_spill]]  ;;  %s20869_s14 = smov [#allocation24]  }
 0x152   :  { %s299_s3 = sshll.u32 %s20869_s14, 4  ;;  %s20870_s27 = smov [#allocation27]   ;;  %s300_s3 = int_to_ptr.vmem [resolvable:$true] %s299_s3 }
 0x153   :  { %s321_s1 = sshll.u32 %s20870_s27, 4  ;;  %s20568_s10 = scalar_lea.vmem %s300_s3, 16  ;;  %s322_s1 = int_to_ptr.vmem [resolvable:$true] %s321_s1 }
 0x154   :  { %p20569_p3 = scmp.ne.s32.totalorder %s300_s3, %s20568_s10  ;;  %s20572_s15 = scalar_lea.vmem %s300_s3, 32 }
 0x155   :  { %p20573_p4 = scmp.lt.s32.totalorder %s300_s3, %s300_s3  ;;  %p20574_p5 = scmp.lt.s32.totalorder %s20572_s15, %s20568_s10 }
 0x157   :  { %280 = dma.hbm_to_vmem [thread:$0]  %s22836_s0, 16, %s278_s25, [#allocation20]  }
 0x158   :  { %p20575_p6 = por %p20574_p5, %p20573_p4 }
 0x15a   :  { %p20576_p7 = pnand %p20575_p6, %p20569_p3 }
 0x15c   :  { %20579 = shalt.err (!%p20576_p7)
}
 0x15d   :  { %s22837_s9 = sld [smem:[#allocation84_spill]]  ;;  %s20588_s17 = scalar_lea.vmem %s322_s1, 16 }
 0x15e   :  { %p20589_p8 = scmp.ne.s32.totalorder %s322_s1, %s20588_s17  ;;  %s20592_s18 = scalar_lea.vmem %s322_s1, 32 }
 0x15f   :  { %p20593_p9 = scmp.lt.s32.totalorder %s322_s1, %s322_s1  ;;  %p20594_p10 = scmp.lt.s32.totalorder %s20592_s18, %s20588_s17 }
 0x161   :  { %p20595_p11 = por %p20594_p10, %p20593_p9 }
 0x163   :  { %302 = dma.hbm_to_vmem [thread:$0]  %s22837_s9, 16, %s300_s3, [#allocation23]  }
 0x164   :  { %p20596_p12 = pnand %p20595_p11, %p20589_p8 }
 0x166   :  { %20599 = shalt.err (!%p20596_p12)
}
 0x167   :  { %s22838_s20 = sld [smem:[#allocation85_spill]]  ;;  %s20871_s4 = smov [#allocation30]  }
 0x168   :  { %s343_s22 = sshll.u32 %s20871_s4, 4  ;;  %s20872_s8 = smov [#allocation33]   ;;  %s344_s22 = int_to_ptr.vmem [resolvable:$true] %s343_s22 }
 0x169   :  { %s365_s30 = sshll.u32 %s20872_s8, 4  ;;  %s20608_s24 = scalar_lea.vmem %s344_s22, 16  ;;  %s366_s30 = int_to_ptr.vmem [resolvable:$true] %s365_s30 }
 0x16a   :  { %p20609_p13 = scmp.ne.s32.totalorder %s344_s22, %s20608_s24  ;;  %s20612_s5 = scalar_lea.vmem %s344_s22, 32 }
 0x16b   :  { %p20613_p0 = scmp.lt.s32.totalorder %s344_s22, %s344_s22  ;;  %p20614_p1 = scmp.lt.s32.totalorder %s20612_s5, %s20608_s24 }
 0x16d   :  { %324 = dma.hbm_to_vmem [thread:$0]  %s22838_s20, 16, %s322_s1, [#allocation26]  }
 0x16e   :  { %p20615_p2 = por %p20614_p1, %p20613_p0 }
 0x170   :  { %p20616_p3 = pnand %p20615_p2, %p20609_p13 }
 0x172   :  { %20619 = shalt.err (!%p20616_p3)
}
 0x173   :  { %s22839_s16 = sld [smem:[#allocation86_spill]]  ;;  %s20628_s25 = scalar_lea.vmem %s366_s30, 16 }
 0x174   :  { %p20629_p4 = scmp.ne.s32.totalorder %s366_s30, %s20628_s25  ;;  %s20632_s11 = scalar_lea.vmem %s366_s30, 32 }
 0x175   :  { %p20633_p5 = scmp.lt.s32.totalorder %s366_s30, %s366_s30  ;;  %p20634_p6 = scmp.lt.s32.totalorder %s20632_s11, %s20628_s25 }
 0x177   :  { %p20635_p7 = por %p20634_p6, %p20633_p5 }
 0x179   :  { %346 = dma.hbm_to_vmem [thread:$0]  %s22839_s16, 16, %s344_s22, [#allocation29]  }
 0x17a   :  { %p20636_p8 = pnand %p20635_p7, %p20629_p4 }
 0x17c   :  { %20639 = shalt.err (!%p20636_p8)
}
 0x17d   :  { %s22840_s13 = sld [smem:[#allocation87_spill]]  ;;  %s20873_s21 = smov [#allocation36]  }
 0x17e   :  { %s389_s28 = sshll.u32 %s20873_s21, 4  ;;  %s20874_s6 = smov [#allocation39]   ;;  %s390_s28 = int_to_ptr.vmem [resolvable:$true] %s389_s28 }
 0x17f   :  { %s410_s0 = sshll.u32 %s20874_s6, 4  ;;  %s20648_s14 = scalar_lea.vmem %s390_s28, 16  ;;  %s411_s0 = int_to_ptr.vmem [resolvable:$true] %s410_s0 }
 0x180   :  { %p20649_p9 = scmp.ne.s32.totalorder %s390_s28, %s20648_s14  ;;  %s20652_s3 = scalar_lea.vmem %s390_s28, 32 }
 0x181   :  { %p20653_p10 = scmp.lt.s32.totalorder %s390_s28, %s390_s28  ;;  %p20654_p11 = scmp.lt.s32.totalorder %s20652_s3, %s20648_s14 }
 0x183   :  { %368 = dma.hbm_to_vmem [thread:$0]  %s22840_s13, 16, %s366_s30, [#allocation32]  }
 0x184   :  { %p20655_p12 = por %p20654_p11, %p20653_p10 }
 0x186   :  { %p20656_p13 = pnand %p20655_p12, %p20649_p9 }
 0x188   :  { %20659 = shalt.err (!%p20656_p13)
}
 0x189   :  { %s22841_s27 = sld [smem:[#allocation90_spill]]  ;;  %s20668_s1 = scalar_lea.vmem %s411_s0, 2560 }
 0x18a   :  { %p20669_p0 = scmp.ne.s32.totalorder %s411_s0, %s20668_s1  ;;  %p20673_p1 = scmp.lt.s32.totalorder %s411_s0, %s411_s0 }
 0x18b   :  { %p20674_p2 = scmp.lt.s32.totalorder %s20668_s1, %s20668_s1 }
 0x18d   :  { %p20675_p3 = por %p20674_p2, %p20673_p1 }
 0x18f   :  { %392 = dma.hbm_to_vmem [thread:$0]  %s22841_s27, 16, %s390_s28, [#allocation35]  }
 0x190   :  { %p20676_p4 = pnand %p20675_p3, %p20669_p0 }
 0x192   :  { %20679 = shalt.err (!%p20676_p4)
}
 0x193   :  { %s22842_s10 = sld [smem:[#allocation91_spill]]  ;;  %s20875_s15 = smov [#allocation42]  }
 0x194   :  { %s436_s9 = sshll.u32 %s20875_s15, 4  ;;  %s20876_s17 = smov [#allocation45]   ;;  %s437_s9 = int_to_ptr.vmem [resolvable:$true] %s436_s9 }
 0x195   :  { %s460_s18 = sshll.u32 %s20876_s17, 4  ;;  %s20688_s20 = scalar_lea.vmem %s437_s9, 80  ;;  %s461_s18 = int_to_ptr.vmem [resolvable:$true] %s460_s18 }
 0x196   :  { %p20689_p5 = scmp.ne.s32.totalorder %s437_s9, %s20688_s20  ;;  %s20692_s4 = scalar_lea.vmem %s437_s9, 96 }
 0x197   :  { %p20693_p6 = scmp.lt.s32.totalorder %s437_s9, %s437_s9  ;;  %p20694_p7 = scmp.lt.s32.totalorder %s20692_s4, %s20688_s20 }
 0x199   :  { %416 = dma.hbm_to_vmem [thread:$0]  %s22842_s10, 2560, %s411_s0, [#allocation38], %s20839_s2, %s20839_s2, %s20840_s7  }
 0x19a   :  { %p20695_p8 = por %p20694_p7, %p20693_p6 }
 0x19c   :  { %p20696_p9 = pnand %p20695_p8, %p20689_p5 }
 0x19e   :  { %20699 = shalt.err (!%p20696_p9)
}
 0x19f   :  { %s22843_s22 = sld [smem:[#allocation93_spill]]  ;;  %s20708_s2 = scalar_lea.vmem %s461_s18, 80 }
 0x1a0   :  { %p20709_p10 = scmp.ne.s32.totalorder %s461_s18, %s20708_s2  ;;  %s20712_s7 = scalar_lea.vmem %s461_s18, 96 }
 0x1a1   :  { %p20713_p11 = scmp.lt.s32.totalorder %s461_s18, %s461_s18  ;;  %p20714_p12 = scmp.lt.s32.totalorder %s20712_s7, %s20708_s2 }
 0x1a3   :  { %p20715_p13 = por %p20714_p12, %p20713_p11 }
 0x1a5   :  { %442 = dma.hbm_to_vmem [thread:$0]  %s22843_s22, 80, %s437_s9, [#allocation41], %s20843_s23, %s20843_s23, %s20844_s26  }
 0x1a6   :  { %p20716_p0 = pnand %p20715_p13, %p20709_p10 }
 0x1a8   :  { %20719 = shalt.err (!%p20716_p0)
}
 0x1a9   :  { %s22844_s8 = sld [smem:[#allocation94_spill]]  ;;  %s20877_s30 = smov [#allocation48]  }
 0x1aa   :  { %s484_s24 = sshll.u32 %s20877_s30, 4  ;;  %s20878_s5 = smov [#allocation51]   ;;  %s485_s24 = int_to_ptr.vmem [resolvable:$true] %s484_s24 }
 0x1ab   :  { %s509_s16 = sshll.u32 %s20878_s5, 4  ;;  %s20728_s25 = scalar_lea.vmem %s485_s24, 80  ;;  %s510_s16 = int_to_ptr.vmem [resolvable:$true] %s509_s16 }
 0x1ac   :  { %p20729_p1 = scmp.ne.s32.totalorder %s485_s24, %s20728_s25  ;;  %s20732_s11 = scalar_lea.vmem %s485_s24, 96 }
 0x1ad   :  { %p20733_p2 = scmp.lt.s32.totalorder %s485_s24, %s485_s24  ;;  %p20734_p3 = scmp.lt.s32.totalorder %s20732_s11, %s20728_s25 }
 0x1af   :  { %466 = dma.hbm_to_vmem [thread:$0]  %s22844_s8, 80, %s461_s18, [#allocation44], %s20843_s23, %s20843_s23, %s20844_s26  }
 0x1b0   :  { %p20735_p4 = por %p20734_p3, %p20733_p2 }
 0x1b2   :  { %p20736_p5 = pnand %p20735_p4, %p20729_p1 }
 0x1b4   :  { %20739 = shalt.err (!%p20736_p5)
}
 0x1b5   :  { %490 = dma.hbm_to_vmem [thread:$0]  %s21096_s19, 80, %s485_s24, [#allocation47], %s20843_s23, %s20843_s23, %s20844_s26  }
 0x1b6   :  { %s20748_s13 = scalar_lea.vmem %s510_s16, 16  ;;  %s20752_s21 = scalar_lea.vmem %s510_s16, 32 }
 0x1b7   :  { %p20749_p6 = scmp.ne.s32.totalorder %s510_s16, %s20748_s13  ;;  %p20753_p7 = scmp.lt.s32.totalorder %s510_s16, %s510_s16 }
 0x1b8   :  { %p20754_p8 = scmp.lt.s32.totalorder %s20752_s21, %s20748_s13 }
 0x1ba   :  { %p20755_p9 = por %p20754_p8, %p20753_p7 }
 0x1bc   :  { %p20756_p10 = pnand %p20755_p9, %p20749_p6 }
 0x1be   :  { %20759 = shalt.err (!%p20756_p10)
}
 0x1bf   :  { %512 = dma.hbm_to_vmem [thread:$0]  %s21106_s12, 16, %s510_s16, [#allocation50]  }
 0x1c0   :  { %20760 = dma.done.wait [#allocation3], 240  }
 0x1c1   :  { %20761 = vsyncadd [#allocation3], 4294967056 }
 0x1c2   :  { %20762 = dma.done.wait [#allocation5], 15440  }
 0x1c3   :  { %20763 = vsyncadd [#allocation5], 4294951856 }
 0x1c4   :  { %20764 = dma.done.wait [#allocation8], 160  }
 0x1c5   :  { %20765 = vsyncadd [#allocation8], 4294967136 }
 0x1c6   :  { %20766 = dma.done.wait [#allocation11], 15600  }
 0x1c7   :  { %20767 = vsyncadd [#allocation11], 4294951696 }
 0x1c8   :  { %20768 = dma.done.wait [#allocation14], 15440  }
 0x1c9   :  { %20769 = vsyncadd [#allocation14], 4294951856 }
 0x1ca   :  { %20770 = dma.done.wait [#allocation17], 160  }
 0x1cb   :  { %20771 = vsyncadd [#allocation17], 4294967136 }
 0x1cc   :  { %20772 = dma.done.wait [#allocation20], 1040  }
 0x1cd   :  { %20773 = vsyncadd [#allocation20], 4294966256 }
 0x1ce   :  { %20774 = dma.done.wait [#allocation23], 1040  }
 0x1cf   :  { %20775 = vsyncadd [#allocation23], 4294966256 }
 0x1d0   :  { %20776 = dma.done.wait [#allocation26], 1040  }
 0x1d1   :  { %20777 = vsyncadd [#allocation26], 4294966256 }
 0x1d2   :  { %20778 = dma.done.wait [#allocation29], 1040  }
 0x1d3   :  { %20779 = vsyncadd [#allocation29], 4294966256 }
 0x1d4   :  { %20780 = dma.done.wait [#allocation32], 1040  }
 0x1d5   :  { %20781 = vsyncadd [#allocation32], 4294966256 }
 0x1d6   :  { %20782 = dma.done.wait [#allocation35], 32  }
 0x1d7   :  { %20783 = vsyncadd [#allocation35], 4294967264 }
 0x1d8   :  { %20784 = dma.done.wait [#allocation38], 5120  }
 0x1d9   :  { %20785 = vsyncadd [#allocation38], 4294962176 }
 0x1da   :  { %20786 = dma.done.wait [#allocation41], 1360  }
 0x1db   :  { %20787 = vsyncadd [#allocation41], 4294965936 }
 0x1dc   :  { %20788 = dma.done.wait [#allocation44], 5200  }
 0x1dd   :  { %20789 = vsyncadd [#allocation44], 4294962096 }
 0x1de   :  { %20790 = dma.done.wait [#allocation47], 5200  }
 0x1df   :  { %20791 = vsyncadd [#allocation47], 4294962096 }
 0x1e0   :  { %20792 = dma.done.wait [#allocation50], 5136  }
 0x1e1   :  { %20793 = vsyncadd [#allocation50], 4294962160  ;;  %v20879_v0 = vmov 0.0   ;;  %vm20880_vm0 = vmmov 0   ;;  %v18823_v1 = vld [vmem:[#allocation19 + $0x38] sm:$0xff]   ;;  %v18824_v2 = vld [vmem:[#allocation19 + $0x30] sm:$0xff]  }
 0x1e2   :  { %17374 = vmatprep.subr.bf16.mxu0 %v20879_v0  ;;  %17390 = vmatprep.mubr.msk.bf16.mxu0 %vm20880_vm0, %v20879_v0  ;;  %v18825_v3 = vld [vmem:[#allocation19 + $0x28] sm:$0xff]   ;;  %v18831_v4 = vld [vmem:[#allocation22 + $0x38] sm:$0xff]   ;;  %v18832_v6 = vld [vmem:[#allocation22 + $0x30] sm:$0xff]   ;;  %s22845_s19 = sld [smem:[#allocation71_spill]] }
 0x1e3   :  { %17394 = vmatprep.subr.bf16.mxu1 %v20879_v0  ;;  %17410 = vmatprep.mubr.msk.bf16.mxu1 %vm20880_vm0, %v20879_v0  ;;  %v18826_v5 = vld [vmem:[#allocation19 + $0x20] sm:$0xff]   ;;  %v18827_v7 = vld [vmem:[#allocation19 + $0x18] sm:$0xff]   ;;  %v18833_v8 = vld [vmem:[#allocation22 + $0x28] sm:$0xff]   ;;  %s22846_s12 = sld [smem:[#allocation88_spill]] }
 0x1e4   :  { %17375 = vmatpush3.bf16.msra.mxu0 %v18823_v1  ;;  %17395 = vmatpush3.bf16.msra.mxu1 %v18831_v4  ;;  %v18828_v9 = vld [vmem:[#allocation19 + $0x10] sm:$0xff]   ;;  %v18834_v10 = vld [vmem:[#allocation22 + $0x20] sm:$0xff]   ;;  %v18835_v12 = vld [vmem:[#allocation22 + $0x18] sm:$0xff]   ;;  %s22847_s23 = sld [smem:[#allocation89_spill]] }
 0x1e5   :  { %17376 = vmatprep.subr.bf16.mxu0 %v20879_v0  ;;  %17396 = vmatprep.subr.bf16.mxu1 %v20879_v0  ;;  %v18829_v11 = vld [vmem:[#allocation19 + $0x8] sm:$0xff]   ;;  %v18830_v13 = vld [vmem:[#allocation19] sm:$0xff]   ;;  %v18836_v14 = vld [vmem:[#allocation22 + $0x10] sm:$0xff]   ;;  %s22848_s26 = sld [smem:[#allocation72_spill]] }
 0x1e6   :  { %v18837_v16 = vld [vmem:[#allocation22 + $0x8] sm:$0xff]   ;;  %v18838_v17 = vld [vmem:[#allocation22] sm:$0xff]   ;;  %v18840_v19 = vld [vmem:[#allocation25 + $0x30] sm:$0xff]   ;;  %s22849_s28 = sld [smem:[#allocation69_spill]] }
 0x1e7   :  { %v18839_v18 = vld [vmem:[#allocation25 + $0x38] sm:$0xff]   ;;  %v18841_v20 = vld [vmem:[#allocation25 + $0x28] sm:$0xff]   ;;  %v18842_v21 = vld [vmem:[#allocation25 + $0x20] sm:$0xff]   ;;  %s22850_s6 = sld [smem:[#allocation75_spill]] }
 0x1e8   :  { %17377 = vmatpush3.bf16.msra.mxu0 %v18824_v2  ;;  %17397 = vmatpush3.bf16.msra.mxu1 %v18832_v6  ;;  %v613_v15 = vld [vmem:[%s22845_s19] sm:$0x1]  ;;  %v18844_v23 = vld [vmem:[#allocation25 + $0x10] sm:$0xff]   ;;  %v14540_v24 = vld [vmem:[#allocation21] ss:$0 sm:$0xff]  ;;  %s22851_s0 = sld [smem:[#allocation76_spill]] }
 0x1e9   :  { %17378 = vmatprep.subr.bf16.mxu0 %v20879_v0  ;;  %17398 = vmatprep.subr.bf16.mxu1 %v20879_v0  ;;  %v18843_v22 = vld [vmem:[#allocation25 + $0x18] sm:$0xff]   ;;  %v18845_v33 = vld [vmem:[#allocation25 + $0x8] sm:$0xff]   ;;  %v18846_v34 = vld [vmem:[#allocation25] sm:$0xff]   ;;  %s22852_s14 = sld [smem:[#allocation70_spill]] }
 0x1ea   :  { %v18847_v35 = vld [vmem:[#allocation28 + $0x38] sm:$0xff]   ;;  %v18848_v36 = vld [vmem:[#allocation28 + $0x30] sm:$0xff]   ;;  %v18849_v37 = vld [vmem:[#allocation28 + $0x28] sm:$0xff]   ;;  %s22853_s3 = sld [smem:[#allocation80_spill]] }
 0x1eb   :  { %v18850_v38 = vld [vmem:[#allocation28 + $0x20] sm:$0xff]   ;;  %v18851_v39 = vld [vmem:[#allocation28 + $0x18] sm:$0xff]   ;;  %v18852_v40 = vld [vmem:[#allocation28 + $0x10] sm:$0xff]   ;;  %s22854_s27 = sld [smem:[#allocation81_spill]] }
 0x1ec   :  { %17379 = vmatpush3.bf16.msra.mxu0 %v18825_v3  ;;  %17399 = vmatpush3.bf16.msra.mxu1 %v18833_v8  ;;  %v14549_v41 = vld [vmem:[#allocation24] ss:$0 sm:$0xff]  ;;  %v18853_v50 = vld [vmem:[#allocation28 + $0x8] sm:$0xff]   ;;  %v18854_v51 = vld [vmem:[#allocation28] sm:$0xff]   ;;  %s22855_s1 = sld [smem:[#allocation92_spill]] }
 0x1ed   :  { %17380 = vmatprep.subr.bf16.mxu0 %v20879_v0  ;;  %17400 = vmatprep.subr.bf16.mxu1 %v20879_v0  ;;  %v18855_v52 = vld [vmem:[#allocation31 + $0x38] sm:$0xff]   ;;  %v18856_v53 = vld [vmem:[#allocation31 + $0x30] sm:$0xff]   ;;  %v18857_v54 = vld [vmem:[#allocation31 + $0x28] sm:$0xff]  }
 0x1ee   :  { %v18858_v55 = vld [vmem:[#allocation31 + $0x20] sm:$0xff]   ;;  %v18859_v56 = vld [vmem:[#allocation31 + $0x18] sm:$0xff]   ;;  %v18860_v57 = vld [vmem:[#allocation31 + $0x10] sm:$0xff]  }
 0x1ef   :  { %v14558_v58 = vld [vmem:[#allocation27] ss:$0 sm:$0xff]  ;;  %v18862_v6 = vld [vmem:[#allocation31] sm:$0xff]  }
 0x1f0   :  { %17381 = vmatpush3.bf16.msra.mxu0 %v18826_v5  ;;  %17401 = vmatpush3.bf16.msra.mxu1 %v18834_v10  ;;  %v18861_v5 = vld [vmem:[#allocation31 + $0x8] sm:$0xff]   ;;  %v18866_v10 = vld [vmem:[%s22846_s12 + $0x20] sm:$0xff]  }
 0x1f1   :  { %17382 = vmatprep.subr.bf16.mxu0 %v20879_v0  ;;  %17402 = vmatprep.subr.bf16.mxu1 %v20879_v0  ;;  %v18864_v8 = vld [vmem:[%s22846_s12 + $0x30] sm:$0xff]  }
 0x1f4   :  { %17383 = vmatpush3.bf16.msra.mxu0 %v18827_v7  ;;  %17403 = vmatpush3.bf16.msra.mxu1 %v18835_v12  ;;  %v18863_v7 = vld [vmem:[%s22846_s12 + $0x38] sm:$0xff]   ;;  %v18868_v12 = vld [vmem:[%s22846_s12 + $0x10] sm:$0xff]  }
 0x1f5   :  { %17384 = vmatprep.subr.bf16.mxu0 %v20879_v0  ;;  %17404 = vmatprep.subr.bf16.mxu1 %v20879_v0 }
 0x1f8   :  { %17385 = vmatpush3.bf16.msra.mxu0 %v18828_v9  ;;  %17405 = vmatpush3.bf16.msra.mxu1 %v18836_v14  ;;  %v18865_v9 = vld [vmem:[%s22846_s12 + $0x28] sm:$0xff]  }
 0x1f9   :  { %17386 = vmatprep.subr.bf16.mxu0 %v20879_v0  ;;  %17406 = vmatprep.subr.bf16.mxu1 %v20879_v0 }
 0x1fc   :  { %17387 = vmatpush3.bf16.msra.mxu0 %v18829_v11  ;;  %17407 = vmatpush3.bf16.msra.mxu1 %v18837_v16  ;;  %v18867_v11 = vld [vmem:[%s22846_s12 + $0x18] sm:$0xff]  }
 0x1fd   :  { %17388 = vmatprep.subr.bf16.mxu0 %v20879_v0  ;;  %17408 = vmatprep.subr.bf16.mxu1 %v20879_v0 }
 0x200   :  { %17389 = vmatpush3.bf16.msra.mxu0 %v18830_v13  ;;  %17409 = vmatpush3.bf16.msra.mxu1 %v18838_v17  ;;  %v14567_v13 = vld [vmem:[#allocation30] ss:$0 sm:$0xff] }
 0x201   :  { %17414 = vmatprep.subr.bf16.mxu0 %v20879_v0  ;;  %17434 = vmatprep.subr.bf16.mxu1 %v20879_v0 }
 0x203   :  { %17391 = vmatmul.mubr.bf16.vlgmr.msra.gmra.mxu0 %v613_v15 }
 0x204   :  { %17430 = vmatprep.mubr.msk.bf16.mxu0 %vm20880_vm0, %v20879_v0  ;;  %17415 = vmatpush3.bf16.msra.mxu0 %v18839_v18 }
 0x205   :  { %17416 = vmatprep.subr.bf16.mxu0 %v20879_v0 }
 0x208   :  { %17417 = vmatpush3.bf16.msra.mxu0 %v18840_v19 }
 0x209   :  { %17418 = vmatprep.subr.bf16.mxu0 %v20879_v0 }
 0x20c   :  { %17419 = vmatpush3.bf16.msra.mxu0 %v18841_v20  ;;  %v18869_v20 = vld [vmem:[%s22847_s23 + $0x38] sm:$0xff]  }
 0x20d   :  { %17420 = vmatprep.subr.bf16.mxu0 %v20879_v0 }
 0x210   :  { %17421 = vmatpush3.bf16.msra.mxu0 %v18842_v21 }
 0x211   :  { %17422 = vmatprep.subr.bf16.mxu0 %v20879_v0 }
 0x214   :  { %17423 = vmatpush3.bf16.msra.mxu0 %v18843_v22 }
 0x215   :  { %17424 = vmatprep.subr.bf16.mxu0 %v20879_v0 }
 0x218   :  { %17425 = vmatpush3.bf16.msra.mxu0 %v18844_v23  ;;  %v18870_v23 = vld [vmem:[%s22846_s12 + $0x8] sm:$0xff]  }
 0x219   :  { %17426 = vmatprep.subr.bf16.mxu0 %v20879_v0 }
 0x21c   :  { %17427 = vmatpush3.bf16.msra.mxu0 %v18845_v33  ;;  %v18897_v33 = vld [vmem:[%s22848_s26 + $0x228] ss:$12 sps:$4 sm:$0xff]  }
 0x21d   :  { %17428 = vmatprep.subr.bf16.mxu0 %v20879_v0 }
 0x220   :  { %17429 = vmatpush3.bf16.msra.mxu0 %v18846_v34  ;;  %v18899_v34 = vld [vmem:[%s22848_s26 + $0x22c] ss:$12 sps:$4 sm:$0xff]  }
 0x221   :  { %17454 = vmatprep.subr.bf16.mxu0 %v20879_v0 }
 0x2c3   :  { %v719_v25 = vpop.f32.mrf.mxu0 }
 0x2c4   :  { %v720_v26 = vadd.f32 %v14540_v24, %v719_v25  ;;  %v18871_v24 = vld [vmem:[%s22847_s23 + $0x30] sm:$0xff]   ;;  %v18872_v25 = vld [vmem:[%s22846_s12] sm:$0xff]  }
 0x2c5   :  { %v17392_v27 = vpop.f32.mrf.mxu0 }
 0x2c6   :  { %vm725_vm1 = vcmp.ge.f32.partialorder %v720_v26, 0.0  ;;  %v726_v28 = vmul.f32 0.2, %v720_v26  ;;  %v18876_v27 = vld [vmem:[%s22848_s26 + $0xac] ss:$12 sps:$4 sm:$0xff]  }
 0x2c7   :  { %v722_v29 = vpop.f32.mrf.mxu0 }
 0x2c8   :  { %v21249_v30 = vsel %vm725_vm1, %v720_v26, %v726_v28  ;;  %v18873_v26 = vld [vmem:[%s22847_s23 + $0x28] sm:$0xff]   ;;  %v18877_v28 = vld [vmem:[%s22847_s23 + $0x20] sm:$0xff]   ;;  %v18881_v29 = vld [vmem:[%s22847_s23 + $0x18] sm:$0xff]  }
 0x2c9   :  { %v17393_v31 = vpop.f32.mrf.mxu0  ;;  %v728_v32 = vpack.c.bf16 %v21249_v30, %v21249_v30 }
 0x2ca   :  { %v18889_v31 = vld [vmem:[%s22847_s23 + $0x8] sm:$0xff]  }
 0x2cb   :  { %17411 = vmatmul.mubr.bf16.vlgmr.msra.gmra.mxu1 %v728_v32  ;;  %v18893_v32 = vld [vmem:[%s22847_s23] sm:$0xff]  }
 0x2cc   :  { %17450 = vmatprep.mubr.msk.bf16.mxu1 %vm20880_vm0, %v20879_v0  ;;  %17435 = vmatpush3.bf16.msra.mxu1 %v18847_v35  ;;  %v20099_v35 = vld [vmem:[%s22845_s19] sm:$0x1] }
 0x2cd   :  { %17436 = vmatprep.subr.bf16.mxu1 %v20879_v0 }
 0x2d0   :  { %17437 = vmatpush3.bf16.msra.mxu1 %v18848_v36  ;;  %v18903_v36 = vld [vmem:[%s22848_s26 + $0x210] ss:$12 sps:$4 sm:$0xff]  }
 0x2d1   :  { %17438 = vmatprep.subr.bf16.mxu1 %v20879_v0 }
 0x2d4   :  { %17439 = vmatpush3.bf16.msra.mxu1 %v18849_v37  ;;  %v18905_v37 = vld [vmem:[%s22848_s26 + $0x214] ss:$12 sps:$4 sm:$0xff]  }
 0x2d5   :  { %17440 = vmatprep.subr.bf16.mxu1 %v20879_v0 }
 0x2d8   :  { %17441 = vmatpush3.bf16.msra.mxu1 %v18850_v38  ;;  %v18909_v38 = vld [vmem:[%s22848_s26 + $0x1f8] ss:$12 sps:$4 sm:$0xff]  }
 0x2d9   :  { %17442 = vmatprep.subr.bf16.mxu1 %v20879_v0 }
 0x2dc   :  { %17443 = vmatpush3.bf16.msra.mxu1 %v18851_v39  ;;  %v18911_v39 = vld [vmem:[%s22848_s26 + $0x1fc] ss:$12 sps:$4 sm:$0xff]  }
 0x2dd   :  { %17444 = vmatprep.subr.bf16.mxu1 %v20879_v0 }
 0x2e0   :  { %17445 = vmatpush3.bf16.msra.mxu1 %v18852_v40  ;;  %v18915_v40 = vld [vmem:[%s22848_s26 + $0x1e0] ss:$12 sps:$4 sm:$0xff]  }
 0x2e1   :  { %17446 = vmatprep.subr.bf16.mxu1 %v20879_v0 }
 0x2e4   :  { %17447 = vmatpush3.bf16.msra.mxu1 %v18853_v50 }
 0x2e5   :  { %17448 = vmatprep.subr.bf16.mxu1 %v20879_v0 }
 0x2e8   :  { %17449 = vmatpush3.bf16.msra.mxu1 %v18854_v51 }
 0x2e9   :  { %17474 = vmatprep.subr.bf16.mxu1 %v20879_v0 }
 0x38b   :  { %v834_v42 = vpop.f32.mrf.mxu1 }
 0x38c   :  { %v835_v43 = vadd.f32 %v14549_v41, %v834_v42  ;;  %v18917_v41 = vld [vmem:[%s22848_s26 + $0x1e4] ss:$12 sps:$4 sm:$0xff]   ;;  %v18921_v42 = vld [vmem:[%s22848_s26 + $0x1c8] ss:$12 sps:$4 sm:$0xff]  }
 0x38d   :  { %v17412_v44 = vpop.f32.mrf.mxu1 }
 0x38e   :  { %vm840_vm2 = vcmp.ge.f32.partialorder %v835_v43, 0.0  ;;  %v841_v45 = vmul.f32 0.2, %v835_v43  ;;  %v18927_v44 = vld [vmem:[%s22848_s26 + $0x1b0] ss:$12 sps:$4 sm:$0xff]  }
 0x38f   :  { %v837_v46 = vpop.f32.mrf.mxu1 }
 0x390   :  { %v842_v47 = vsel %vm840_vm2, %v835_v43, %v841_v45  ;;  %v18923_v43 = vld [vmem:[%s22848_s26 + $0x1cc] ss:$12 sps:$4 sm:$0xff]   ;;  %v18929_v45 = vld [vmem:[%s22848_s26 + $0x1b4] ss:$12 sps:$4 sm:$0xff]  }
 0x391   :  { %v843_v48 = vpack.c.bf16 %v842_v47, %v842_v47  ;;  %v17413_v49 = vpop.f32.mrf.mxu1  ;;  %v18933_v46 = vld [vmem:[%s22848_s26 + $0x198] ss:$12 sps:$4 sm:$0xff]   ;;  %v18935_v47 = vld [vmem:[%s22848_s26 + $0x19c] ss:$12 sps:$4 sm:$0xff]  }
 0x392   :  { %v20881_v49 = vmov 1966171168  }
 0x393   :  { %17431 = vmatmul.mubr.bf16.vlgmr.msra.gmra.mxu0 %v843_v48  ;;  %v1598_v48 = vlaneseq  ;;  %v1623_v50 = vunpack.c.l.s4 %v20881_v49  ;;  %v18936_v49 = vld [vmem:[%s22848_s26 + $0x108] ss:$12 sps:$4 sm:$0xff]  }
 0x394   :  { %17470 = vmatprep.mubr.msk.bf16.mxu0 %vm20880_vm0, %v20879_v0  ;;  %17455 = vmatpush3.bf16.msra.mxu0 %v18855_v52 }
 0x395   :  { %17456 = vmatprep.subr.bf16.mxu0 %v20879_v0  ;;  %v21330_v51 = vshrl.u32 %v1598_v48, 7  ;;  %v1624_v52 = vunpack.c.0.s8 %v1623_v50  ;;  %v18938_v48 = vld [vmem:[%s22848_s26 + $0x10c] ss:$12 sps:$4 sm:$0xff]   ;;  %v18944_v50 = vld [vmem:[%s22848_s26 + $0xf4] ss:$12 sps:$4 sm:$0xff]  }
 0x398   :  { %17457 = vmatpush3.bf16.msra.mxu0 %v18856_v53  ;;  %v18939_v53 = vld [vmem:[%s22848_s26 + $0x180] ss:$12 sps:$4 sm:$0xff]  }
 0x399   :  { %17458 = vmatprep.subr.bf16.mxu0 %v20879_v0 }
 0x39c   :  { %17459 = vmatpush3.bf16.msra.mxu0 %v18857_v54  ;;  %v18941_v54 = vld [vmem:[%s22848_s26 + $0x184] ss:$12 sps:$4 sm:$0xff]  }
 0x39d   :  { %17460 = vmatprep.subr.bf16.mxu0 %v20879_v0 }
 0x3a0   :  { %17461 = vmatpush3.bf16.msra.mxu0 %v18858_v55  ;;  %v21335_v55 = vsub.s32 %v1624_v52, %v21330_v51  ;;  %v18942_v52 = vld [vmem:[%s22848_s26 + $0xf0] ss:$12 sps:$4 sm:$0xff]  }
 0x3a1   :  { %17462 = vmatprep.subr.bf16.mxu0 %v20879_v0 }
 0x3a4   :  { %17463 = vmatpush3.bf16.msra.mxu0 %v18859_v56  ;;  %v14603_v56 = vld.sshfl [vmem:[%s22849_s28] sm:$0x13 pattern:$0x75316420] }
 0x3a5   :  { %17464 = vmatprep.subr.bf16.mxu0 %v20879_v0 }
 0x3a8   :  { %17465 = vmatpush3.bf16.msra.mxu0 %v18860_v57  ;;  %v21339_v57 = vrot.slane %v14603_v56, %v21335_v55 }
 0x3a9   :  { %17466 = vmatprep.subr.bf16.mxu0 %v20879_v0 }
 0x3ac   :  { %17467 = vmatpush3.bf16.msra.mxu0 %v18861_v5 }
 0x3ad   :  { %17468 = vmatprep.subr.bf16.mxu0 %v20879_v0 }
 0x3b0   :  { %17469 = vmatpush3.bf16.msra.mxu0 %v18862_v6  ;;  %v18957_v6 = vld [vmem:[%s22848_s26 + $0x128] ss:$12 sps:$4 sm:$0xff]  }
 0x3b1   :  { %17494 = vmatprep.subr.bf16.mxu0 %v20879_v0 }
 0x453   :  { %v949_v59 = vpop.f32.mrf.mxu0 }
 0x454   :  { %v950_v60 = vadd.f32 %v14558_v58, %v949_v59  ;;  %v18945_v58 = vld [vmem:[%s22848_s26 + $0x170] ss:$12 sps:$4 sm:$0xff]   ;;  %v20882_v59 = vmov 0  }
 0x455   :  { %v17432_v61 = vpop.f32.mrf.mxu0 }
 0x456   :  { %vm955_vm3 = vcmp.ge.f32.partialorder %v950_v60, 0.0  ;;  %v956_v62 = vmul.f32 0.2, %v950_v60  ;;  %v18946_v61 = vld [vmem:[%s22848_s26 + $0xb0] ss:$12 sps:$4 sm:$0xff]  }
 0x457   :  { %v952_v63 = vpop.f32.mrf.mxu0 }
 0x458   :  { %v957_v1 = vsel %vm955_vm3, %v950_v60, %v956_v62  ;;  %v21345_v60 = vcombine.high %v21339_v57, %v21339_v57  ;;  %v18950_v62 = vld [vmem:[%s22848_s26 + $0x158] ss:$12 sps:$4 sm:$0xff]  }
 0x459   :  { %v21274_v2 = vadd.f32 %v957_v1, %v21249_v30  ;;  %v17433_v3 = vpop.f32.mrf.mxu0  ;;  %v18885_v30 = vld [vmem:[%s22847_s23 + $0x10] sm:$0xff]   ;;  %v18951_v63 = vld [vmem:[%s22848_s26 + $0x98] ss:$12 sps:$4 sm:$0xff]   ;;  %v18955_v1 = vld [vmem:[%s22848_s26 + $0x140] ss:$12 sps:$4 sm:$0xff]  }
 0x45a   :  { %v18956_v3 = vld [vmem:[%s22848_s26 + $0x80] ss:$12 sps:$4 sm:$0xff]  }
 0x45b   :  { %v959_v4 = vpack.c.bf16 %v21274_v2, %v21274_v2 }
 0x45d   :  { %17451 = vmatmul.mubr.bf16.vlgmr.msra.gmra.mxu1 %v959_v4  ;;  %v1621_v4 = vcombine.high %v14603_v56, %v14603_v56  ;;  %v18954_v56 = vld [vmem:[%s22848_s26 + $0xc4] ss:$12 sps:$4 sm:$0xff]  }
 0x45e   :  { %17490 = vmatprep.mubr.msk.bf16.mxu1 %vm20880_vm0, %v20879_v0  ;;  %17475 = vmatpush3.bf16.msra.mxu1 %v18863_v7  ;;  %v18958_v7 = vld [vmem:[%s22848_s26 + $0x68] ss:$12 sps:$4 sm:$0xff]  }
 0x45f   :  { %17476 = vmatprep.subr.bf16.mxu1 %v20879_v0  ;;  %v1635_v5 = vrot.slane %v1621_v4, %v21335_v55  ;;  %v18977_v4 = vld [vmem:[#allocation4 + $0x70] sm:$0xff]  }
 0x462   :  { %17477 = vmatpush3.bf16.msra.mxu1 %v18864_v8  ;;  %v18960_v8 = vld [vmem:[%s22848_s26 + $0x110] ss:$12 sps:$4 sm:$0xff]  }
 0x463   :  { %17478 = vmatprep.subr.bf16.mxu1 %v20879_v0 }
 0x466   :  { %17479 = vmatpush3.bf16.msra.mxu1 %v18865_v9  ;;  %v18961_v9 = vld [vmem:[%s22848_s26 + $0x50] ss:$12 sps:$4 sm:$0xff]  }
 0x467   :  { %17480 = vmatprep.subr.bf16.mxu1 %v20879_v0 }
 0x46a   :  { %17481 = vmatpush3.bf16.msra.mxu1 %v18866_v10  ;;  %v18963_v10 = vld [vmem:[%s22848_s26 + $0xf8] ss:$12 sps:$4 sm:$0xff]  }
 0x46b   :  { %17482 = vmatprep.subr.bf16.mxu1 %v20879_v0 }
 0x46e   :  { %17483 = vmatpush3.bf16.msra.mxu1 %v18867_v11  ;;  %v18964_v11 = vld [vmem:[%s22848_s26 + $0x38] ss:$12 sps:$4 sm:$0xff]  }
 0x46f   :  { %17484 = vmatprep.subr.bf16.mxu1 %v20879_v0 }
 0x472   :  { %17485 = vmatpush3.bf16.msra.mxu1 %v18868_v12  ;;  %v18966_v12 = vld [vmem:[%s22848_s26 + $0xe0] ss:$12 sps:$4 sm:$0xff]  }
 0x473   :  { %17486 = vmatprep.subr.bf16.mxu1 %v20879_v0 }
 0x476   :  { %17487 = vmatpush3.bf16.msra.mxu1 %v18870_v23 }
 0x477   :  { %17488 = vmatprep.subr.bf16.mxu1 %v20879_v0 }
 0x47a   :  { %17489 = vmatpush3.bf16.msra.mxu1 %v18872_v25  ;;  %v18874_v25 = vld [vmem:[%s22848_s26 + $0xa8] ss:$12 sps:$4 sm:$0xff]  }
 0x47b   :  { %2024 = vmatprep.subr.bf16.mxu1 %v18876_v27  ;;  %v18880_v27 = vld [vmem:[%s22848_s26 + $0x94] ss:$12 sps:$4 sm:$0xff]  }
 0x51d   :  { %v1065_v14 = vpop.f32.mrf.mxu1 }
 0x51e   :  { %v1066_v15 = vadd.f32 %v14567_v13, %v1065_v14  ;;  %v18967_v13 = vld [vmem:[%s22848_s26 + $0x20] ss:$12 sps:$4 sm:$0xff]   ;;  %v18969_v14 = vld [vmem:[%s22848_s26 + $0xc8] ss:$12 sps:$4 sm:$0xff]  }
 0x51f   :  { %v17452_v16 = vpop.f32.mrf.mxu1 }
 0x520   :  { %vm1071_vm4 = vcmp.ge.f32.partialorder %v1066_v15, 0.0  ;;  %v1072_v17 = vmul.f32 0.2, %v1066_v15  ;;  %v14576_v16 = vld [vmem:[#allocation33] ss:$0 sm:$0xff] }
 0x521   :  { %v1068_v18 = vpop.f32.mrf.mxu1 }
 0x522   :  { %v1073_v19 = vsel %vm1071_vm4, %v1066_v15, %v1072_v17  ;;  %v18970_v15 = vld [vmem:[%s22848_s26 + $0x8] ss:$12 sps:$4 sm:$0xff]  }
 0x523   :  { %v1074_v21 = vpack.c.bf16 %v1073_v19, %v1073_v19  ;;  %v17453_v22 = vpop.f32.mrf.mxu1 }
 0x525   :  { %17471 = vmatmul.mubr.bf16.vlgmr.msra.gmra.mxu0 %v1074_v21 }
 0x526   :  { %17495 = vmatpush3.bf16.msra.mxu0 %v18869_v20  ;;  %17510 = vmatprep.mubr.msk.bf16.mxu0 %vm20880_vm0, %v20879_v0 }
 0x527   :  { %17496 = vmatprep.subr.bf16.mxu0 %v20879_v0 }
 0x52a   :  { %17497 = vmatpush3.bf16.msra.mxu0 %v18871_v24 }
 0x52b   :  { %17498 = vmatprep.subr.bf16.mxu0 %v20879_v0 }
 0x52e   :  { %17499 = vmatpush3.bf16.msra.mxu0 %v18873_v26 }
 0x52f   :  { %17500 = vmatprep.subr.bf16.mxu0 %v20879_v0 }
 0x532   :  { %17501 = vmatpush3.bf16.msra.mxu0 %v18877_v28  ;;  %v18878_v28 = vld [vmem:[%s22848_s26 + $0x90] ss:$12 sps:$4 sm:$0xff]  }
 0x533   :  { %17502 = vmatprep.subr.bf16.mxu0 %v20879_v0 }
 0x536   :  { %17503 = vmatpush3.bf16.msra.mxu0 %v18881_v29  ;;  %v18884_v29 = vld [vmem:[%s22848_s26 + $0x7c] ss:$12 sps:$4 sm:$0xff]  }
 0x537   :  { %17504 = vmatprep.subr.bf16.mxu0 %v20879_v0 }
 0x53a   :  { %17505 = vmatpush3.bf16.msra.mxu0 %v18885_v30  ;;  %v18882_v30 = vld [vmem:[%s22848_s26 + $0x78] ss:$12 sps:$4 sm:$0xff]  }
 0x53b   :  { %17506 = vmatprep.subr.bf16.mxu0 %v20879_v0 }
 0x53e   :  { %17507 = vmatpush3.bf16.msra.mxu0 %v18889_v31  ;;  %v18886_v31 = vld [vmem:[%s22848_s26 + $0x60] ss:$12 sps:$4 sm:$0xff]  }
 0x53f   :  { %17508 = vmatprep.subr.bf16.mxu0 %v20879_v0 }
 0x542   :  { %17509 = vmatpush3.bf16.msra.mxu0 %v18893_v32  ;;  %v18892_v32 = vld [vmem:[%s22848_s26 + $0x4c] ss:$12 sps:$4 sm:$0xff]  }
 0x543   :  { %2065 = vmatprep.subr.bf16.mxu0 %v18899_v34  ;;  %v18896_v34 = vld [vmem:[%s22848_s26 + $0x34] ss:$12 sps:$4 sm:$0xff]  }
 0x545   :  { %17511 = vmatmul.mubr.bf16.vlgmr.msra.gmra.mxu0 %v20099_v35  ;;  %v18894_v35 = vld [vmem:[%s22848_s26 + $0x30] ss:$12 sps:$4 sm:$0xff]  }
 0x546   :  { %2066 = vmatpush1.bf16.msra.mxu0 %v18897_v33  ;;  %2097 = vmatprep.mubr.bf16.mxu0 %v20882_v59  ;;  %v18890_v33 = vld [vmem:[%s22848_s26 + $0x48] ss:$12 sps:$4 sm:$0xff]  }
 0x547   :  { %2067 = vmatprep.subr.bf16.mxu0 %v18905_v37  ;;  %v18900_v37 = vld [vmem:[%s22848_s26 + $0x18] ss:$12 sps:$4 sm:$0xff]  }
 0x54a   :  { %2068 = vmatpush1.bf16.msra.mxu0 %v18903_v36  ;;  %v18902_v36 = vld [vmem:[%s22848_s26 + $0x1c] ss:$12 sps:$4 sm:$0xff]  }
 0x54b   :  { %2069 = vmatprep.subr.bf16.mxu0 %v18911_v39  ;;  %v18906_v39 = vld [vmem:[%s22848_s26] ss:$12 sps:$4 sm:$0xff]  }
 0x54e   :  { %2070 = vmatpush1.bf16.msra.mxu0 %v18909_v38  ;;  %v18908_v38 = vld [vmem:[%s22848_s26 + $0x4] ss:$12 sps:$4 sm:$0xff]  }
 0x54f   :  { %2071 = vmatprep.subr.bf16.mxu0 %v18917_v41  ;;  %v18912_v41 = vld [vmem:[%s22848_s26 + $0x168] ss:$12 sps:$4 sm:$0xff]  }
 0x552   :  { %2072 = vmatpush1.bf16.msra.mxu0 %v18915_v40  ;;  %v18914_v40 = vld [vmem:[%s22848_s26 + $0x16c] ss:$12 sps:$4 sm:$0xff]  }
 0x553   :  { %2073 = vmatprep.subr.bf16.mxu0 %v18923_v43  ;;  %v18918_v43 = vld [vmem:[%s22848_s26 + $0x150] ss:$12 sps:$4 sm:$0xff]  }
 0x556   :  { %2074 = vmatpush1.bf16.msra.mxu0 %v18921_v42  ;;  %v18920_v42 = vld [vmem:[%s22848_s26 + $0x154] ss:$12 sps:$4 sm:$0xff]  }
 0x557   :  { %2075 = vmatprep.subr.bf16.mxu0 %v18929_v45  ;;  %v18924_v45 = vld [vmem:[%s22848_s26 + $0x138] ss:$12 sps:$4 sm:$0xff]  }
 0x55a   :  { %2076 = vmatpush1.bf16.msra.mxu0 %v18927_v44  ;;  %v18926_v44 = vld [vmem:[%s22848_s26 + $0x13c] ss:$12 sps:$4 sm:$0xff]  }
 0x55b   :  { %2077 = vmatprep.subr.bf16.mxu0 %v18935_v47  ;;  %v18930_v47 = vld [vmem:[%s22848_s26 + $0x120] ss:$12 sps:$4 sm:$0xff]  }
 0x55e   :  { %2078 = vmatpush1.bf16.msra.mxu0 %v18933_v46  ;;  %v18932_v46 = vld [vmem:[%s22848_s26 + $0x124] ss:$12 sps:$4 sm:$0xff]  }
 0x55f   :  { %2079 = vmatprep.subr.bf16.mxu0 %v18941_v54  ;;  %v18947_v54 = vld [vmem:[%s22848_s26 + $0xd8] ss:$12 sps:$4 sm:$0xff]  }
 0x562   :  { %2080 = vmatpush1.bf16.msra.mxu0 %v18939_v53  ;;  %v18949_v53 = vld [vmem:[%s22848_s26 + $0xdc] ss:$12 sps:$4 sm:$0xff]  }
 0x563   :  { %16461 = vmatprep.subr.bf16.mxu0 %v18945_v58  ;;  %v18952_v58 = vld [vmem:[%s22848_s26 + $0xc0] ss:$12 sps:$4 sm:$0xff]  }
 0x565   :  { %2098 = vmatmul.mubr.bf16.vlgmr.msra.gmra.mxu0 %v21345_v60 }
 0x566   :  { %16462 = vmatpush3.bf16.msra.mxu0 %v18946_v61  ;;  %2138 = vmatprep.mubr.bf16.mxu0 %v1635_v5  ;;  %v18959_v61 = vld [vmem:[%s22848_s26 + $0x230] ss:$12 sps:$4 sm:$0xff]  }
 0x567   :  { %16463 = vmatprep.subr.bf16.mxu0 %v18950_v62  ;;  %v18962_v62 = vld [vmem:[%s22848_s26 + $0x218] ss:$12 sps:$4 sm:$0xff]  }
 0x56a   :  { %16464 = vmatpush3.bf16.msra.mxu0 %v18951_v63  ;;  %v18965_v63 = vld [vmem:[%s22848_s26 + $0x200] ss:$12 sps:$4 sm:$0xff]  }
 0x56b   :  { %16465 = vmatprep.subr.bf16.mxu0 %v18955_v1  ;;  %v18975_v1 = vld [vmem:[#allocation4 + $0x78] sm:$0xff]  }
 0x56e   :  { %16466 = vmatpush3.bf16.msra.mxu0 %v18956_v3  ;;  %v18976_v3 = vld [vmem:[#allocation4 + $0x38] sm:$0xff]  }
 0x56f   :  { %16467 = vmatprep.subr.bf16.mxu0 %v18957_v6  ;;  %v18979_v6 = vld [vmem:[#allocation4 + $0x68] sm:$0xff]  }
 0x572   :  { %16468 = vmatpush3.bf16.msra.mxu0 %v18958_v7  ;;  %v18971_v7 = vld [vmem:[%s22848_s26 + $0x1d0] ss:$12 sps:$4 sm:$0xff]  }
 0x573   :  { %16469 = vmatprep.subr.bf16.mxu0 %v18960_v8  ;;  %v18980_v8 = vld [vmem:[#allocation4 + $0x28] sm:$0xff]  }
 0x576   :  { %16470 = vmatpush3.bf16.msra.mxu0 %v18961_v9  ;;  %v18981_v9 = vld [vmem:[#allocation4 + $0x60] sm:$0xff]  }
 0x577   :  { %16471 = vmatprep.subr.bf16.mxu0 %v18963_v10  ;;  %v18972_v10 = vld [vmem:[%s22848_s26 + $0x1b8] ss:$12 sps:$4 sm:$0xff]  }
 0x57a   :  { %16472 = vmatpush3.bf16.msra.mxu0 %v18964_v11  ;;  %v18982_v11 = vld [vmem:[#allocation4 + $0x20] sm:$0xff]  }
 0x57b   :  { %16473 = vmatprep.subr.bf16.mxu0 %v18966_v12  ;;  %v18983_v12 = vld [vmem:[#allocation4 + $0x58] sm:$0xff]  }
 0x57e   :  { %16474 = vmatpush3.bf16.msra.mxu0 %v18967_v13 }
 0x57f   :  { %16475 = vmatprep.subr.bf16.mxu0 %v18969_v14  ;;  %v18973_v14 = vld [vmem:[%s22848_s26 + $0x1a0] ss:$12 sps:$4 sm:$0xff]  }
 0x582   :  { %16476 = vmatpush3.bf16.msra.mxu0 %v18970_v15 }
 0x583   :  { %16492 = vmatprep.subr.bf16.mxu0 %v18975_v1 }
 0x585   :  { %2139 = vmatmul.mubr.bf16.vlgmr.msra.gmra.mxu0 %v21339_v57 }
 0x586   :  { %16493 = vmatpush3.bf16.msra.mxu0 %v18976_v3 }
 0x587   :  { %16494 = vmatprep.subr.bf16.mxu0 %v18977_v4 }
 0x5e5   :  { %v1180_v17 = vpop.f32.mrf.mxu0 }
 0x5e6   :  { %v1181_v18 = vadd.f32 %v14576_v16, %v1180_v17  ;;  %v18984_v16 = vld [vmem:[#allocation4 + $0x18] sm:$0xff]  }
 0x5e7   :  { %v17472_v19 = vpop.f32.mrf.mxu0 }
 0x5e8   :  { %vm1186_vm5 = vcmp.ge.f32.partialorder %v1181_v18, 0.0  ;;  %v1187_v20 = vmul.f32 0.2, %v1181_v18 }
 0x5e9   :  { %v1183_v21 = vpop.f32.mrf.mxu0 }
 0x5ea   :  { %v1188_v22 = vsel %vm1186_vm5, %v1181_v18, %v1187_v20  ;;  %v18974_v18 = vld [vmem:[%s22848_s26 + $0x188] ss:$12 sps:$4 sm:$0xff]  }
 0x5eb   :  { %v1189_v23 = vadd.f32 %v1188_v22, %v21274_v2  ;;  %v17473_v24 = vpop.f32.mrf.mxu0  ;;  %v18888_v2 = vld [vmem:[%s22848_s26 + $0x64] ss:$12 sps:$4 sm:$0xff]  }
 0x5ec   :  { %v18985_v24 = vld [vmem:[#allocation4 + $0x50] sm:$0xff]  }
 0x5ed   :  { %v1190_v26 = vpack.c.bf16 %v1189_v23, %v1189_v23 }
 0x5ef   :  { %17491 = vmatmul.mubr.bf16.vlgmr.msra.gmra.mxu1 %v1190_v26  ;;  %v18987_v26 = vld [vmem:[#allocation4 + $0x48] sm:$0xff]  }
 0x5f0   :  { %2025 = vmatpush1.bf16.msra.mxu1 %v18874_v25  ;;  %2056 = vmatprep.mubr.bf16.mxu1 %v1635_v5  ;;  %v18968_v5 = vld [vmem:[%s22848_s26 + $0x1e8] ss:$12 sps:$4 sm:$0xff]   ;;  %v18986_v25 = vld [vmem:[#allocation4 + $0x10] sm:$0xff]  }
 0x5f1   :  { %2026 = vmatprep.subr.bf16.mxu1 %v18880_v27  ;;  %v18988_v27 = vld [vmem:[#allocation4 + $0x8] sm:$0xff]  }
 0x5f4   :  { %2027 = vmatpush1.bf16.msra.mxu1 %v18878_v28  ;;  %v18989_v28 = vld [vmem:[#allocation4 + $0x40] sm:$0xff]  }
 0x5f5   :  { %2028 = vmatprep.subr.bf16.mxu1 %v18884_v29  ;;  %v18990_v29 = vld [vmem:[#allocation4 + $0xb8] sm:$0xff]  }
 0x5f8   :  { %2029 = vmatpush1.bf16.msra.mxu1 %v18882_v30  ;;  %v18991_v30 = vld [vmem:[#allocation4] sm:$0xff]  }
 0x5f9   :  { %2030 = vmatprep.subr.bf16.mxu1 %v18888_v2  ;;  %v18993_v2 = vld [vmem:[#allocation4 + $0xa8] sm:$0xff]  }
 0x5fc   :  { %2031 = vmatpush1.bf16.msra.mxu1 %v18886_v31  ;;  %v18994_v31 = vld [vmem:[#allocation4 + $0xa0] sm:$0xff]  }
 0x5fd   :  { %2032 = vmatprep.subr.bf16.mxu1 %v18892_v32 }
 0x600   :  { %2033 = vmatpush1.bf16.msra.mxu1 %v18890_v33  ;;  %v18995_v33 = vld [vmem:[#allocation4 + $0x98] sm:$0xff]  }
 0x601   :  { %2034 = vmatprep.subr.bf16.mxu1 %v18896_v34 }
 0x604   :  { %2035 = vmatpush1.bf16.msra.mxu1 %v18894_v35 }
 0x605   :  { %2036 = vmatprep.subr.bf16.mxu1 %v18902_v36  ;;  %v21412_v13 = vpop.f32.mrf.mxu0 }
 0x607   :  { %v17512_v15 = vpop.f32.mrf.mxu0 }
 0x608   :  { %2037 = vmatpush1.bf16.msra.mxu1 %v18900_v37  ;;  %v18996_v37 = vld [vmem:[#allocation4 + $0x90] sm:$0xff]  }
 0x609   :  { %2038 = vmatprep.subr.bf16.mxu1 %v18908_v38  ;;  %v1411_v17 = vpop.f32.mrf.mxu0 }
 0x60b   :  { %v17513_v19 = vpop.f32.mrf.mxu0 }
 0x60c   :  { %2039 = vmatpush1.bf16.msra.mxu1 %v18906_v39  ;;  %v18997_v39 = vld [vmem:[#allocation4 + $0x88] sm:$0xff]   ;;  %v19001_v19 = vld [vmem:[%s22850_s6 + $0x28] sm:$0xff]  }
 0x60d   :  { %2040 = vmatprep.subr.bf16.mxu1 %v18914_v40  ;;  %v18998_v40 = vld [vmem:[#allocation4 + $0x80] sm:$0xff]  }
 0x610   :  { %2041 = vmatpush2.bf16.msra.mxu1 %v18912_v41 }
 0x611   :  { %2042 = vmatprep.subr.bf16.mxu1 %v18920_v42 }
 0x614   :  { %2043 = vmatpush2.bf16.msra.mxu1 %v18918_v43 }
 0x615   :  { %2044 = vmatprep.subr.bf16.mxu1 %v18926_v44 }
 0x618   :  { %2045 = vmatpush2.bf16.msra.mxu1 %v18924_v45  ;;  %v21434_v45 = vsub.s32 0, %v21330_v51 }
 0x619   :  { %2046 = vmatprep.subr.bf16.mxu1 %v18932_v46  ;;  %v1579_v46 = vld [vmem:[#allocation2] sm:$0x7] }
 0x61c   :  { %2047 = vmatpush2.bf16.msra.mxu1 %v18930_v47  ;;  %v21437_v47 = vsub.s32 1, %v21330_v51 }
 0x61d   :  { %2048 = vmatprep.subr.bf16.mxu1 %v18938_v48  ;;  %v1601_v48 = vrot.slane %v1579_v46, %v21434_v45 }
 0x620   :  { %2049 = vmatpush2.bf16.msra.mxu1 %v18936_v49  ;;  %v1605_v49 = vrot.slane %v1579_v46, %v21437_v47 }
 0x621   :  { %2050 = vmatprep.subr.bf16.mxu1 %v18944_v50 }
 0x624   :  { %2051 = vmatpush2.bf16.msra.mxu1 %v18942_v52 }
 0x625   :  { %2052 = vmatprep.subr.bf16.mxu1 %v18949_v53  ;;  %v2099_v20 = vpop.f32.mrf.mxu0 }
 0x627   :  { %v2101_v21 = vpop.f32.mrf.mxu0 }
 0x628   :  { %2053 = vmatpush2.bf16.msra.mxu1 %v18947_v54 }
 0x629   :  { %2054 = vmatprep.subr.bf16.mxu1 %v18954_v56  ;;  %v2103_v22 = vpop.f32.mrf.mxu0 }
 0x62a   :  { %v19004_v22 = vld [vmem:[%s22850_s6 + $0x10] sm:$0xff]  }
 0x62b   :  { %v2104_v23 = vpop.f32.mrf.mxu0 }
 0x62c   :  { %2055 = vmatpush2.bf16.msra.mxu1 %v18952_v58  ;;  %v19005_v23 = vld [vmem:[%s22850_s6 + $0x8] sm:$0xff]  }
 0x62d   :  { %17514 = vmatprep.subr.bf16.mxu1 %v20879_v0 }
 0x62f   :  { %2057 = vmatmul.mubr.bf16.vlgmr.msra.gmra.mxu1 %v21339_v57  ;;  %v18978_v57 = vld [vmem:[#allocation4 + $0x30] sm:$0xff]  }
 0x630   :  { %17515 = vmatpush3.bf16.msra.mxu1 %v18959_v61  ;;  %17530 = vmatprep.mubr.msk.bf16.mxu1 %vm20880_vm0, %v20879_v0 }
 0x631   :  { %17516 = vmatprep.subr.bf16.mxu1 %v20879_v0  ;;  %16495 = vmatpush3.bf16.msra.mxu0 %v18978_v57 }
 0x632   :  { %16496 = vmatprep.subr.bf16.mxu0 %v18979_v6  ;;  %v21448_v6 = vsub.s32 2, %v21330_v51  ;;  %v18999_v51 = vld [vmem:[%s22850_s6 + $0x38] sm:$0xff]  }
 0x634   :  { %17517 = vmatpush3.bf16.msra.mxu1 %v18962_v62 }
 0x635   :  { %17518 = vmatprep.subr.bf16.mxu1 %v20879_v0  ;;  %16497 = vmatpush3.bf16.msra.mxu0 %v18980_v8 }
 0x636   :  { %16498 = vmatprep.subr.bf16.mxu0 %v18981_v9 }
 0x638   :  { %17519 = vmatpush3.bf16.msra.mxu1 %v18965_v63 }
 0x639   :  { %17520 = vmatprep.subr.bf16.mxu1 %v20879_v0  ;;  %16499 = vmatpush3.bf16.msra.mxu0 %v18982_v11 }
 0x63a   :  { %16500 = vmatprep.subr.bf16.mxu0 %v18983_v12 }
 0x63c   :  { %17521 = vmatpush3.bf16.msra.mxu1 %v18968_v5 }
 0x63d   :  { %17522 = vmatprep.subr.bf16.mxu1 %v20879_v0  ;;  %16501 = vmatpush3.bf16.msra.mxu0 %v18984_v16 }
 0x63e   :  { %16502 = vmatprep.subr.bf16.mxu0 %v18985_v24  ;;  %v19006_v24 = vld [vmem:[%s22850_s6] sm:$0xff]  }
 0x640   :  { %17523 = vmatpush3.bf16.msra.mxu1 %v18971_v7  ;;  %v1609_v7 = vrot.slane %v1579_v46, %v21448_v6 }
 0x641   :  { %17524 = vmatprep.subr.bf16.mxu1 %v20879_v0  ;;  %16503 = vmatpush3.bf16.msra.mxu0 %v18986_v25  ;;  %v19009_v25 = vld [vmem:[%s22848_s26 + $0x2ec] ss:$12 sps:$4 sm:$0xff]  }
 0x642   :  { %16504 = vmatprep.subr.bf16.mxu0 %v18987_v26  ;;  %v19010_v26 = vld [vmem:[%s22851_s0 + $0x38] sm:$0xff]  }
 0x644   :  { %17525 = vmatpush3.bf16.msra.mxu1 %v18972_v10 }
 0x645   :  { %17526 = vmatprep.subr.bf16.mxu1 %v20879_v0  ;;  %16505 = vmatpush3.bf16.msra.mxu0 %v18988_v27  ;;  %v16477_v32 = vpop.f32.mrf.mxu0  ;;  %v19014_v27 = vld [vmem:[%s22851_s0 + $0x30] sm:$0xff]  }
 0x646   :  { %16506 = vmatprep.subr.bf16.mxu0 %v18989_v28  ;;  %v19018_v28 = vld [vmem:[%s22851_s0 + $0x28] sm:$0xff]  }
 0x647   :  { %v16478_v34 = vpop.f32.mrf.mxu0 }
 0x648   :  { %17527 = vmatpush3.bf16.msra.mxu1 %v18973_v14  ;;  %v16479_v35 = vadd.f32 %v16478_v34, %v16477_v32 }
 0x649   :  { %17528 = vmatprep.subr.bf16.mxu1 %v20879_v0  ;;  %16507 = vmatpush3.bf16.msra.mxu0 %v18991_v30  ;;  %v16480_v36 = vpop.f32.mrf.mxu0  ;;  %v19026_v30 = vld [vmem:[%s22851_s0 + $0x18] sm:$0xff]  }
 0x64a   :  { %17554 = vmatprep.subr.bf16.mxu0 %v20879_v0  ;;  %v2141_v8 = vadd.f32 %v16479_v35, %v1609_v7  ;;  %v14676_v35 = vld [vmem:[#allocation6] ss:$0 sm:$0xff]  ;;  %v19035_v7 = vld [vmem:[%s22848_s26 + $0x240] ss:$12 sps:$4 sm:$0xff]  }
 0x64b   :  { %v16481_v38 = vpop.f32.mrf.mxu0 }
 0x64c   :  { %17529 = vmatpush3.bf16.msra.mxu1 %v18974_v18  ;;  %v19000_v18 = vld [vmem:[%s22850_s6 + $0x30] sm:$0xff]  }
 0x64d   :  { %17534 = vmatprep.subr.bf16.mxu1 %v20879_v0 }
 0x64f   :  { %17531 = vmatmul.mubr.bf16.vlgmr.msra.gmra.mxu1 %v21345_v60  ;;  %v18992_v60 = vld [vmem:[#allocation4 + $0xb0] sm:$0xff]  }
 0x650   :  { %17550 = vmatprep.mubr.msk.bf16.mxu1 %vm20880_vm0, %v20879_v0  ;;  %17535 = vmatpush3.bf16.msra.mxu1 %v18990_v29  ;;  %v19022_v29 = vld [vmem:[%s22851_s0 + $0x20] sm:$0xff]  }
 0x651   :  { %17536 = vmatprep.subr.bf16.mxu1 %v20879_v0 }
 0x654   :  { %17537 = vmatpush3.bf16.msra.mxu1 %v18992_v60  ;;  %v19030_v60 = vld [vmem:[%s22851_s0 + $0x10] sm:$0xff]  }
 0x655   :  { %17538 = vmatprep.subr.bf16.mxu1 %v20879_v0 }
 0x658   :  { %17539 = vmatpush3.bf16.msra.mxu1 %v18993_v2 }
 0x659   :  { %17540 = vmatprep.subr.bf16.mxu1 %v20879_v0 }
 0x65c   :  { %17541 = vmatpush3.bf16.msra.mxu1 %v18994_v31 }
 0x65d   :  { %17542 = vmatprep.subr.bf16.mxu1 %v20879_v0 }
 0x660   :  { %17543 = vmatpush3.bf16.msra.mxu1 %v18995_v33 }
 0x661   :  { %17544 = vmatprep.subr.bf16.mxu1 %v20879_v0 }
 0x664   :  { %17545 = vmatpush3.bf16.msra.mxu1 %v18996_v37 }
 0x665   :  { %17546 = vmatprep.subr.bf16.mxu1 %v20879_v0 }
 0x668   :  { %17547 = vmatpush3.bf16.msra.mxu1 %v18997_v39 }
 0x669   :  { %17548 = vmatprep.subr.bf16.mxu1 %v20879_v0 }
 0x66c   :  { %17549 = vmatpush3.bf16.msra.mxu1 %v18998_v40 }
 0x66d   :  { %17574 = vmatprep.subr.bf16.mxu1 %v20879_v0 }
 0x6af   :  { %v21431_v41 = vpop.f32.mrf.mxu1 }
 0x6b1   :  { %v17492_v42 = vpop.f32.mrf.mxu1 }
 0x6b3   :  { %v1299_v43 = vpop.f32.mrf.mxu1 }
 0x6b5   :  { %v17493_v44 = vpop.f32.mrf.mxu1 }
 0x6b6   :  { %v19007_v44 = vld [vmem:[%s22848_s26 + $0x2e8] ss:$12 sps:$4 sm:$0xff]  }
 0x6ef   :  { %v2058_v50 = vpop.f32.mrf.mxu1 }
 0x6f0   :  { %v2059_v52 = vadd.f32 %v2058_v50, %v1601_v48  ;;  %v19011_v50 = vld [vmem:[%s22848_s26 + $0x2d0] ss:$12 sps:$4 sm:$0xff]  }
 0x6f1   :  { %v2060_v53 = vpop.f32.mrf.mxu1 }
 0x6f2   :  { %v2100_v54 = vadd.f32 %v2099_v20, %v2059_v52  ;;  %v2061_v56 = vadd.f32 %v2060_v53, %v1605_v49  ;;  %v19002_v20 = vld [vmem:[%s22850_s6 + $0x20] sm:$0xff]   ;;  %v19017_v52 = vld [vmem:[%s22848_s26 + $0x2bc] ss:$12 sps:$4 sm:$0xff]  }
 0x6f3   :  { %v2062_v58 = vpop.f32.mrf.mxu1  ;;  %v19013_v49 = vld [vmem:[%s22848_s26 + $0x2d4] ss:$12 sps:$4 sm:$0xff]   ;;  %v19015_v53 = vld [vmem:[%s22848_s26 + $0x2b8] ss:$12 sps:$4 sm:$0xff]  }
 0x6f4   :  { %vm2186_vm6 = vcmp.ge.f32.partialorder %v2100_v54, 0.0  ;;  %v2189_v61 = vmul.f32 0.2, %v2100_v54  ;;  %v2102_v62 = vadd.f32 %v2101_v21, %v2061_v56  ;;  %v19003_v21 = vld [vmem:[%s22850_s6 + $0x18] sm:$0xff]   ;;  %v19019_v56 = vld [vmem:[%s22848_s26 + $0x2a0] ss:$12 sps:$4 sm:$0xff]  }
 0x6f5   :  { %v2063_v63 = vpop.f32.mrf.mxu1  ;;  %v19025_v58 = vld [vmem:[%s22848_s26 + $0x28c] ss:$12 sps:$4 sm:$0xff]  }
 0x6f6   :  { %vm2187_vm7 = vcmp.ge.f32.partialorder %v2102_v62, 0.0  ;;  %v2190_v1 = vmul.f32 0.2, %v2102_v62  ;;  %v2192_v3 = vsel %vm2186_vm6, %v2100_v54, %v2189_v61  ;;  %v19021_v54 = vld [vmem:[%s22848_s26 + $0x2a4] ss:$12 sps:$4 sm:$0xff]  }
 0x6f7   :  { %v2195_v57 = vpack.c.bf16 %v2192_v3, %v2192_v3  ;;  %v19023_v61 = vld [vmem:[%s22848_s26 + $0x288] ss:$12 sps:$4 sm:$0xff]   ;;  %v19027_v63 = vld [vmem:[%s22848_s26 + $0x270] ss:$12 sps:$4 sm:$0xff]   ;;  %v19031_v3 = vld [vmem:[%s22848_s26 + $0x258] ss:$12 sps:$4 sm:$0xff]  }
 0x6f8   :  { %v21441_v4 = vsel %vm2187_vm7, %v2102_v62, %v2190_v1  ;;  %v19029_v62 = vld [vmem:[%s22848_s26 + $0x274] ss:$12 sps:$4 sm:$0xff]   ;;  %v19033_v1 = vld [vmem:[%s22848_s26 + $0x25c] ss:$12 sps:$4 sm:$0xff]  }
 0x6f9   :  { %v2196_v5 = vpack.c.bf16 %v21441_v4, %v21441_v4 }
 0x6fb   :  { %2380 = vmatprep.mubr.bf16.mxu0 %v2196_v5  ;;  %v19034_v5 = vld [vmem:[%s22851_s0 + $0x8] sm:$0xff]  }
 0x6fc   :  { %2381 = vmatmul.mubr.bf16.vlgmr.msra.gmra.mxu0 %v2195_v57  ;;  %v19037_v57 = vld [vmem:[%s22848_s26 + $0x244] ss:$12 sps:$4 sm:$0xff]  }
 0x6fd   :  { %17570 = vmatprep.mubr.msk.bf16.mxu0 %vm20880_vm0, %v20879_v0  ;;  %17555 = vmatpush3.bf16.msra.mxu0 %v18999_v51  ;;  %v19057_v51 = vld [vmem:[%s22848_s26 + $0x360] ss:$12 sps:$4 sm:$0xff]  }
 0x6fe   :  { %17556 = vmatprep.subr.bf16.mxu0 %v20879_v0 }
 0x701   :  { %17557 = vmatpush3.bf16.msra.mxu0 %v19000_v18  ;;  %v19065_v18 = vld [vmem:[%s22848_s26 + $0x34c] ss:$12 sps:$4 sm:$0xff]  }
 0x702   :  { %17558 = vmatprep.subr.bf16.mxu0 %v20879_v0 }
 0x705   :  { %17559 = vmatpush3.bf16.msra.mxu0 %v19001_v19  ;;  %v19063_v19 = vld [vmem:[%s22848_s26 + $0x348] ss:$12 sps:$4 sm:$0xff]  }
 0x706   :  { %17560 = vmatprep.subr.bf16.mxu0 %v20879_v0 }
 0x709   :  { %17561 = vmatpush3.bf16.msra.mxu0 %v19002_v20  ;;  %v19071_v20 = vld [vmem:[%s22848_s26 + $0x334] ss:$12 sps:$4 sm:$0xff]  }
 0x70a   :  { %17562 = vmatprep.subr.bf16.mxu0 %v20879_v0 }
 0x70d   :  { %17563 = vmatpush3.bf16.msra.mxu0 %v19003_v21  ;;  %v19069_v21 = vld [vmem:[%s22848_s26 + $0x330] ss:$12 sps:$4 sm:$0xff]  }
 0x70e   :  { %17564 = vmatprep.subr.bf16.mxu0 %v20879_v0 }
 0x70f   :  { %v2180_v9 = vpop.f32.mrf.mxu1 }
 0x710   :  { %v2181_v10 = vadd.f32 %v2180_v9, %v2141_v8  ;;  %v19038_v8 = vld [vmem:[%s22851_s0] sm:$0xff]   ;;  %v19041_v9 = vld [vmem:[%s22848_s26 + $0x3ac] ss:$12 sps:$4 sm:$0xff]  }
 0x711   :  { %v17532_v11 = vpop.f32.mrf.mxu1  ;;  %17565 = vmatpush3.bf16.msra.mxu0 %v19004_v22  ;;  %v19077_v22 = vld [vmem:[%s22848_s26 + $0x31c] ss:$12 sps:$4 sm:$0xff]  }
 0x712   :  { %vm2188_vm8 = vcmp.ge.f32.partialorder %v2181_v10, 0.0  ;;  %v2191_v12 = vmul.f32 0.2, %v2181_v10  ;;  %17566 = vmatprep.subr.bf16.mxu0 %v20879_v0  ;;  %v19044_v11 = vld [vmem:[%s22848_s26 + $0x46c] ss:$12 sps:$4 sm:$0xff]  }
 0x713   :  { %v2183_v14 = vpop.f32.mrf.mxu1 }
 0x714   :  { %v2194_v15 = vsel %vm2188_vm8, %v2181_v10, %v2191_v12  ;;  %v19039_v10 = vld [vmem:[%s22848_s26 + $0x3a8] ss:$12 sps:$4 sm:$0xff]   ;;  %v19045_v14 = vld [vmem:[%s22848_s26 + $0x390] ss:$12 sps:$4 sm:$0xff]  }
 0x715   :  { %v2197_v16 = vpack.c.bf16 %v2194_v15, %v2194_v15  ;;  %v17533_v17 = vpop.f32.mrf.mxu1  ;;  %17567 = vmatpush3.bf16.msra.mxu0 %v19005_v23  ;;  %v19047_v12 = vld [vmem:[%s22848_s26 + $0x394] ss:$12 sps:$4 sm:$0xff]   ;;  %v19053_v15 = vld [vmem:[%s22848_s26 + $0x37c] ss:$12 sps:$4 sm:$0xff]   ;;  %v19075_v23 = vld [vmem:[%s22848_s26 + $0x318] ss:$12 sps:$4 sm:$0xff]  }
 0x716   :  { %17568 = vmatprep.subr.bf16.mxu0 %v20879_v0  ;;  %v19059_v17 = vld [vmem:[%s22848_s26 + $0x364] ss:$12 sps:$4 sm:$0xff]  }
 0x717   :  { %17551 = vmatmul.mubr.bf16.vlgmr.msra.gmra.mxu1 %v2197_v16  ;;  %v19051_v16 = vld [vmem:[%s22848_s26 + $0x378] ss:$12 sps:$4 sm:$0xff]  }
 0x718   :  { %17590 = vmatprep.mubr.msk.bf16.mxu1 %vm20880_vm0, %v20879_v0  ;;  %17575 = vmatpush3.bf16.msra.mxu1 %v19010_v26  ;;  %v19081_v26 = vld [vmem:[%s22848_s26 + $0x300] ss:$12 sps:$4 sm:$0xff]  }
 0x719   :  { %17569 = vmatpush3.bf16.msra.mxu0 %v19006_v24  ;;  %17576 = vmatprep.subr.bf16.mxu1 %v20879_v0  ;;  %v19083_v24 = vld [vmem:[%s22848_s26 + $0x304] ss:$12 sps:$4 sm:$0xff]  }
 0x71a   :  { %3242 = vmatprep.subr.bf16.mxu0 %v19009_v25  ;;  %v14848_v25 = vld.sshfl [vmem:[%s22849_s28 + $0x3] sm:$0x13 pattern:$0x75316420] }
 0x71c   :  { %17577 = vmatpush3.bf16.msra.mxu1 %v19014_v27  ;;  %v2839_v27 = vcombine.high %v14848_v25, %v14848_v25 }
 0x71d   :  { %17578 = vmatprep.subr.bf16.mxu1 %v20879_v0 }
 0x720   :  { %17579 = vmatpush3.bf16.msra.mxu1 %v19018_v28  ;;  %v21518_v28 = vrot.slane %v2839_v27, %v21335_v55  ;;  %v19114_v27 = vld [vmem:[#allocation4 + $0xf0] sm:$0xff]  }
 0x721   :  { %17580 = vmatprep.subr.bf16.mxu1 %v20879_v0 }
 0x724   :  { %17581 = vmatpush3.bf16.msra.mxu1 %v19022_v29  ;;  %v21521_v29 = vrot.slane %v14848_v25, %v21335_v55  ;;  %v19112_v25 = vld [vmem:[#allocation4 + $0xf8] sm:$0xff]  }
 0x725   :  { %17582 = vmatprep.subr.bf16.mxu1 %v20879_v0 }
 0x728   :  { %17583 = vmatpush3.bf16.msra.mxu1 %v19026_v30  ;;  %v19089_v30 = vld [vmem:[%s22848_s26 + $0x470] ss:$12 sps:$4 sm:$0xff]  }
 0x729   :  { %17584 = vmatprep.subr.bf16.mxu1 %v20879_v0 }
 0x72c   :  { %17585 = vmatpush3.bf16.msra.mxu1 %v19030_v60  ;;  %v19092_v60 = vld [vmem:[%s22848_s26 + $0x458] ss:$12 sps:$4 sm:$0xff]  }
 0x72d   :  { %17586 = vmatprep.subr.bf16.mxu1 %v20879_v0 }
 0x730   :  { %17587 = vmatpush3.bf16.msra.mxu1 %v19034_v5  ;;  %v19078_v5 = vld [vmem:[%s22848_s26 + $0x3d8] ss:$12 sps:$4 sm:$0xff]  }
 0x731   :  { %17588 = vmatprep.subr.bf16.mxu1 %v20879_v0 }
 0x734   :  { %17589 = vmatpush3.bf16.msra.mxu1 %v19038_v8  ;;  %v19087_v8 = vld [vmem:[%s22848_s26 + $0x3b0] ss:$12 sps:$4 sm:$0xff]  }
 0x735   :  { %3283 = vmatprep.subr.bf16.mxu1 %v19044_v11  ;;  %v19091_v11 = vld [vmem:[%s22848_s26 + $0x2d8] ss:$12 sps:$4 sm:$0xff]  }
 0x7bc   :  { %v16508_v2 = vpop.f32.mrf.mxu0 }
 0x7be   :  { %v16509_v31 = vpop.f32.mrf.mxu0 }
 0x7bf   :  { %v16510_v34 = vadd.f32 %v16509_v31, %v16508_v2  ;;  %v19095_v2 = vld [vmem:[%s22848_s26 + $0x440] ss:$12 sps:$4 sm:$0xff]   ;;  %v19098_v31 = vld [vmem:[%s22848_s26 + $0x428] ss:$12 sps:$4 sm:$0xff]  }
 0x7c0   :  { %v16511_v32 = vpop.f32.mrf.mxu0 }
 0x7c1   :  { %v2383_v36 = vadd.f32 %v16510_v34, %v14676_v35  ;;  %v19101_v32 = vld [vmem:[%s22848_s26 + $0x410] ss:$12 sps:$4 sm:$0xff]   ;;  %v19107_v34 = vld [vmem:[%s22848_s26 + $0x3e0] ss:$12 sps:$4 sm:$0xff]   ;;  %v19110_v35 = vld [vmem:[%s22848_s26 + $0x3c8] ss:$12 sps:$4 sm:$0xff]  }
 0x7c2   :  { %v16512_v33 = vpop.f32.mrf.mxu0 }
 0x7c3   :  { %v19104_v33 = vld [vmem:[%s22848_s26 + $0x3f8] ss:$12 sps:$4 sm:$0xff]  }
 0x7d7   :  { %v2422_v37 = vpop.f32.mrf.mxu1 }
 0x7d8   :  { %v2423_v38 = vadd.f32 %v2422_v37, %v2383_v36  ;;  %v2854_v36 = vcombine.high %v21521_v29, %v21521_v29  ;;  %v14701_v37 = vld [vmem:[#allocation7] ss:$0 sm:$0xff] }
 0x7d9   :  { %v17552_v39 = vpop.f32.mrf.mxu1 }
 0x7da   :  { %vm2428_vm9 = vcmp.ge.f32.partialorder %v2423_v38, 0.0  ;;  %v2429_v40 = vmul.f32 0.2, %v2423_v38 }
 0x7db   :  { %v2425_v42 = vpop.f32.mrf.mxu1 }
 0x7dc   :  { %v2430_v43 = vsel %vm2428_vm9, %v2423_v38, %v2429_v40 }
 0x7dd   :  { %v2431_v46 = vpack.c.bf16 %v2430_v43, %v2430_v43  ;;  %v17553_v48 = vpop.f32.mrf.mxu1 }
 0x7df   :  { %17571 = vmatmul.mubr.bf16.vlgmr.msra.gmra.mxu0 %v2431_v46 }
 0x7e0   :  { %3243 = vmatpush1.bf16.msra.mxu0 %v19007_v44  ;;  %3274 = vmatprep.mubr.bf16.mxu0 %v21518_v28 }
 0x7e1   :  { %3244 = vmatprep.subr.bf16.mxu0 %v19013_v49  ;;  %v19042_v49 = vld [vmem:[%s22848_s26 + $0x468] ss:$12 sps:$4 sm:$0xff]  }
 0x7e4   :  { %3245 = vmatpush1.bf16.msra.mxu0 %v19011_v50 }
 0x7e5   :  { %3246 = vmatprep.subr.bf16.mxu0 %v19017_v52  ;;  %v19050_v52 = vld [vmem:[%s22848_s26 + $0x454] ss:$12 sps:$4 sm:$0xff]  }
 0x7e8   :  { %3247 = vmatpush1.bf16.msra.mxu0 %v19015_v53  ;;  %v19048_v53 = vld [vmem:[%s22848_s26 + $0x450] ss:$12 sps:$4 sm:$0xff]  }
 0x7e9   :  { %3248 = vmatprep.subr.bf16.mxu0 %v19021_v54  ;;  %v19056_v54 = vld [vmem:[%s22848_s26 + $0x43c] ss:$12 sps:$4 sm:$0xff]  }
 0x7ec   :  { %3249 = vmatpush1.bf16.msra.mxu0 %v19019_v56  ;;  %v19054_v56 = vld [vmem:[%s22848_s26 + $0x438] ss:$12 sps:$4 sm:$0xff]  }
 0x7ed   :  { %3250 = vmatprep.subr.bf16.mxu0 %v19025_v58  ;;  %v19060_v58 = vld [vmem:[%s22848_s26 + $0x420] ss:$12 sps:$4 sm:$0xff]  }
 0x7f0   :  { %3251 = vmatpush1.bf16.msra.mxu0 %v19023_v61  ;;  %v19068_v61 = vld [vmem:[%s22848_s26 + $0x40c] ss:$12 sps:$4 sm:$0xff]  }
 0x7f1   :  { %3252 = vmatprep.subr.bf16.mxu0 %v19029_v62  ;;  %v19066_v62 = vld [vmem:[%s22848_s26 + $0x408] ss:$12 sps:$4 sm:$0xff]  }
 0x7f4   :  { %3253 = vmatpush1.bf16.msra.mxu0 %v19027_v63  ;;  %v19074_v63 = vld [vmem:[%s22848_s26 + $0x3f4] ss:$12 sps:$4 sm:$0xff]  }
 0x7f5   :  { %3254 = vmatprep.subr.bf16.mxu0 %v19033_v1  ;;  %v19072_v1 = vld [vmem:[%s22848_s26 + $0x3f0] ss:$12 sps:$4 sm:$0xff]  }
 0x7f8   :  { %3255 = vmatpush1.bf16.msra.mxu0 %v19031_v3  ;;  %v19080_v3 = vld [vmem:[%s22848_s26 + $0x3dc] ss:$12 sps:$4 sm:$0xff]  }
 0x7f9   :  { %3256 = vmatprep.subr.bf16.mxu0 %v19037_v57  ;;  %v19086_v57 = vld [vmem:[%s22848_s26 + $0x3c4] ss:$12 sps:$4 sm:$0xff]  }
 0x7fc   :  { %3257 = vmatpush1.bf16.msra.mxu0 %v19035_v7  ;;  %v19084_v7 = vld [vmem:[%s22848_s26 + $0x3c0] ss:$12 sps:$4 sm:$0xff]  }
 0x7fd   :  { %3258 = vmatprep.subr.bf16.mxu0 %v19041_v9  ;;  %v19088_v9 = vld [vmem:[%s22848_s26 + $0x2f0] ss:$12 sps:$4 sm:$0xff]  }
 0x800   :  { %3259 = vmatpush2.bf16.msra.mxu0 %v19039_v10  ;;  %v19090_v10 = vld [vmem:[%s22848_s26 + $0x398] ss:$12 sps:$4 sm:$0xff]  }
 0x801   :  { %3260 = vmatprep.subr.bf16.mxu0 %v19047_v12  ;;  %v19093_v12 = vld [vmem:[%s22848_s26 + $0x380] ss:$12 sps:$4 sm:$0xff]  }
 0x804   :  { %3261 = vmatpush2.bf16.msra.mxu0 %v19045_v14  ;;  %v19094_v14 = vld [vmem:[%s22848_s26 + $0x2c0] ss:$12 sps:$4 sm:$0xff]  }
 0x805   :  { %3262 = vmatprep.subr.bf16.mxu0 %v19053_v15  ;;  %v19096_v15 = vld [vmem:[%s22848_s26 + $0x368] ss:$12 sps:$4 sm:$0xff]  }
 0x808   :  { %3263 = vmatpush2.bf16.msra.mxu0 %v19051_v16  ;;  %v19097_v16 = vld [vmem:[%s22848_s26 + $0x2a8] ss:$12 sps:$4 sm:$0xff]  }
 0x809   :  { %3264 = vmatprep.subr.bf16.mxu0 %v19059_v17  ;;  %v19099_v17 = vld [vmem:[%s22848_s26 + $0x350] ss:$12 sps:$4 sm:$0xff]  }
 0x80c   :  { %3265 = vmatpush2.bf16.msra.mxu0 %v19057_v51  ;;  %v19100_v51 = vld [vmem:[%s22848_s26 + $0x290] ss:$12 sps:$4 sm:$0xff]  }
 0x80d   :  { %3266 = vmatprep.subr.bf16.mxu0 %v19065_v18  ;;  %v19102_v18 = vld [vmem:[%s22848_s26 + $0x338] ss:$12 sps:$4 sm:$0xff]  }
 0x810   :  { %3267 = vmatpush2.bf16.msra.mxu0 %v19063_v19  ;;  %v19103_v19 = vld [vmem:[%s22848_s26 + $0x278] ss:$12 sps:$4 sm:$0xff]  }
 0x811   :  { %3268 = vmatprep.subr.bf16.mxu0 %v19071_v20  ;;  %v19105_v20 = vld [vmem:[%s22848_s26 + $0x320] ss:$12 sps:$4 sm:$0xff]  }
 0x814   :  { %3269 = vmatpush2.bf16.msra.mxu0 %v19069_v21  ;;  %v19106_v21 = vld [vmem:[%s22848_s26 + $0x260] ss:$12 sps:$4 sm:$0xff]  }
 0x815   :  { %3270 = vmatprep.subr.bf16.mxu0 %v19077_v22  ;;  %v19108_v22 = vld [vmem:[%s22848_s26 + $0x308] ss:$12 sps:$4 sm:$0xff]  }
 0x818   :  { %3271 = vmatpush2.bf16.msra.mxu0 %v19075_v23  ;;  %v19109_v23 = vld [vmem:[%s22848_s26 + $0x248] ss:$12 sps:$4 sm:$0xff]  }
 0x819   :  { %3272 = vmatprep.subr.bf16.mxu0 %v19083_v24  ;;  %v19111_v24 = vld [vmem:[#allocation4 + $0x138] sm:$0xff]  }
 0x81c   :  { %3273 = vmatpush2.bf16.msra.mxu0 %v19081_v26  ;;  %v19113_v26 = vld [vmem:[#allocation4 + $0x130] sm:$0xff]  }
 0x81d   :  { %17594 = vmatprep.subr.bf16.mxu0 %v20879_v0 }
 0x81f   :  { %3275 = vmatmul.mubr.bf16.vlgmr.msra.gmra.mxu0 %v21521_v29 }
 0x820   :  { %17610 = vmatprep.mubr.msk.bf16.mxu0 %vm20880_vm0, %v20879_v0  ;;  %17595 = vmatpush3.bf16.msra.mxu0 %v19089_v30  ;;  %v19116_v30 = vld [vmem:[#allocation4 + $0xe8] sm:$0xff]  }
 0x821   :  { %17596 = vmatprep.subr.bf16.mxu0 %v20879_v0 }
 0x824   :  { %17597 = vmatpush3.bf16.msra.mxu0 %v19092_v60  ;;  %v19117_v60 = vld [vmem:[#allocation4 + $0x120] sm:$0xff]  }
 0x825   :  { %17598 = vmatprep.subr.bf16.mxu0 %v20879_v0 }
 0x828   :  { %17599 = vmatpush3.bf16.msra.mxu0 %v19095_v2  ;;  %v19118_v2 = vld [vmem:[#allocation4 + $0xe0] sm:$0xff]  }
 0x829   :  { %17600 = vmatprep.subr.bf16.mxu0 %v20879_v0 }
 0x82c   :  { %17601 = vmatpush3.bf16.msra.mxu0 %v19098_v31  ;;  %v19119_v31 = vld [vmem:[#allocation4 + $0x118] sm:$0xff]  }
 0x82d   :  { %17602 = vmatprep.subr.bf16.mxu0 %v20879_v0 }
 0x830   :  { %17603 = vmatpush3.bf16.msra.mxu0 %v19101_v32  ;;  %v19120_v32 = vld [vmem:[#allocation4 + $0xd8] sm:$0xff]  }
 0x831   :  { %17604 = vmatprep.subr.bf16.mxu0 %v20879_v0 }
 0x834   :  { %17605 = vmatpush3.bf16.msra.mxu0 %v19104_v33 }
 0x835   :  { %17606 = vmatprep.subr.bf16.mxu0 %v20879_v0 }
 0x838   :  { %17607 = vmatpush3.bf16.msra.mxu0 %v19107_v34  ;;  %v19122_v34 = vld [vmem:[#allocation4 + $0xd0] sm:$0xff]  }
 0x839   :  { %17608 = vmatprep.subr.bf16.mxu0 %v20879_v0 }
 0x83c   :  { %17609 = vmatpush3.bf16.msra.mxu0 %v19110_v35 }
 0x83d   :  { %17614 = vmatprep.subr.bf16.mxu0 %v20879_v0 }
 0x83f   :  { %17611 = vmatmul.mubr.bf16.vlgmr.msra.gmra.mxu0 %v2854_v36 }
 0x840   :  { %17630 = vmatprep.mubr.msk.bf16.mxu0 %vm20880_vm0, %v20879_v0 }
 0x89f   :  { %v2520_v38 = vpop.f32.mrf.mxu0 }
 0x8a0   :  { %v2521_v39 = vadd.f32 %v14701_v37, %v2520_v38  ;;  %v19124_v37 = vld [vmem:[#allocation4 + $0xc8] sm:$0xff]  }
 0x8a1   :  { %v17572_v40 = vpop.f32.mrf.mxu0 }
 0x8a2   :  { %vm2526_vm10 = vcmp.ge.f32.partialorder %v2521_v39, 0.0  ;;  %v2527_v42 = vmul.f32 0.2, %v2521_v39  ;;  %v19125_v40 = vld [vmem:[#allocation4 + $0x100] sm:$0xff]  }
 0x8a3   :  { %v2523_v43 = vpop.f32.mrf.mxu0 }
 0x8a4   :  { %v2528_v44 = vsel %vm2526_vm10, %v2521_v39, %v2527_v42  ;;  %v19126_v42 = vld [vmem:[#allocation4 + $0xc0] sm:$0xff]   ;;  %v19127_v43 = vld [vmem:[#allocation4 + $0x178] sm:$0xff]  }
 0x8a5   :  { %v2529_v46 = vadd.f32 %v2528_v44, %v21441_v4  ;;  %v17573_v48 = vpop.f32.mrf.mxu0  ;;  %v19062_v4 = vld [vmem:[%s22848_s26 + $0x424] ss:$12 sps:$4 sm:$0xff]   ;;  %17615 = vmatpush3.bf16.msra.mxu0 %v19127_v43 }
 0x8a6   :  { %v19128_v44 = vld [vmem:[#allocation4 + $0x170] sm:$0xff]   ;;  %17616 = vmatprep.subr.bf16.mxu0 %v20879_v0  ;;  %v19130_v48 = vld [vmem:[#allocation4 + $0x160] sm:$0xff]  }
 0x8a7   :  { %v2530_v50 = vpack.c.bf16 %v2529_v46, %v2529_v46  ;;  %v19129_v46 = vld [vmem:[#allocation4 + $0x168] sm:$0xff]   ;;  %v19158_v43 = vld [vmem:[%s22851_s0 + $0x60] sm:$0xff]  }
 0x8a9   :  { %17591 = vmatmul.mubr.bf16.vlgmr.msra.gmra.mxu1 %v2530_v50  ;;  %17617 = vmatpush3.bf16.msra.mxu0 %v19128_v44  ;;  %v19162_v44 = vld [vmem:[%s22851_s0 + $0x58] sm:$0xff]  }
 0x8aa   :  { %3284 = vmatpush1.bf16.msra.mxu1 %v19042_v49  ;;  %3315 = vmatprep.mubr.bf16.mxu1 %v20882_v59  ;;  %v19131_v49 = vld [vmem:[#allocation4 + $0x158] sm:$0xff]  }
 0x8ab   :  { %3285 = vmatprep.subr.bf16.mxu1 %v19050_v52  ;;  %17618 = vmatprep.subr.bf16.mxu0 %v20879_v0  ;;  %v19132_v52 = vld [vmem:[#allocation4 + $0x150] sm:$0xff]  }
 0x8ad   :  { %17619 = vmatpush3.bf16.msra.mxu0 %v19129_v46  ;;  %v19166_v46 = vld [vmem:[%s22851_s0 + $0x50] sm:$0xff]  }
 0x8ae   :  { %3286 = vmatpush1.bf16.msra.mxu1 %v19048_v53  ;;  %17620 = vmatprep.subr.bf16.mxu0 %v20879_v0 }
 0x8af   :  { %3287 = vmatprep.subr.bf16.mxu1 %v19056_v54 }
 0x8b1   :  { %17621 = vmatpush3.bf16.msra.mxu0 %v19130_v48 }
 0x8b2   :  { %3288 = vmatpush1.bf16.msra.mxu1 %v19054_v56  ;;  %17622 = vmatprep.subr.bf16.mxu0 %v20879_v0  ;;  %v19133_v56 = vld [vmem:[#allocation4 + $0x148] sm:$0xff]  }
 0x8b3   :  { %3289 = vmatprep.subr.bf16.mxu1 %v19062_v4 }
 0x8b5   :  { %17623 = vmatpush3.bf16.msra.mxu0 %v19131_v49 }
 0x8b6   :  { %3290 = vmatpush1.bf16.msra.mxu1 %v19060_v58  ;;  %17624 = vmatprep.subr.bf16.mxu0 %v20879_v0  ;;  %v19134_v58 = vld [vmem:[#allocation4 + $0x140] sm:$0xff]  }
 0x8b7   :  { %3291 = vmatprep.subr.bf16.mxu1 %v19068_v61 }
 0x8b9   :  { %17625 = vmatpush3.bf16.msra.mxu0 %v19132_v52 }
 0x8ba   :  { %3292 = vmatpush1.bf16.msra.mxu1 %v19066_v62  ;;  %17626 = vmatprep.subr.bf16.mxu0 %v20879_v0 }
 0x8bb   :  { %3293 = vmatprep.subr.bf16.mxu1 %v19074_v63 }
 0x8bd   :  { %17627 = vmatpush3.bf16.msra.mxu0 %v19133_v56 }
 0x8be   :  { %3294 = vmatpush1.bf16.msra.mxu1 %v19072_v1  ;;  %17628 = vmatprep.subr.bf16.mxu0 %v20879_v0 }
 0x8bf   :  { %3295 = vmatprep.subr.bf16.mxu1 %v19080_v3  ;;  %v2795_v3 = vld [vmem:[#allocation2 + $0x3] sm:$0x7] }
 0x8c1   :  { %17629 = vmatpush3.bf16.msra.mxu0 %v19134_v58 }
 0x8c2   :  { %3296 = vmatpush1.bf16.msra.mxu1 %v19078_v5  ;;  %17654 = vmatprep.subr.bf16.mxu0 %v20879_v0  ;;  %v2819_v5 = vrot.slane %v2795_v3, %v21434_v45 }
 0x8c3   :  { %3297 = vmatprep.subr.bf16.mxu1 %v19086_v57  ;;  %v2823_v57 = vrot.slane %v2795_v3, %v21437_v47 }
 0x8c6   :  { %3298 = vmatpush1.bf16.msra.mxu1 %v19084_v7 }
 0x8c7   :  { %16541 = vmatprep.subr.bf16.mxu1 %v19087_v8 }
 0x8c9   :  { %3316 = vmatmul.mubr.bf16.vlgmr.msra.gmra.mxu1 %v2854_v36  ;;  %v19123_v36 = vld [vmem:[#allocation4 + $0x108] sm:$0xff]  }
 0x8ca   :  { %16542 = vmatpush3.bf16.msra.mxu1 %v19088_v9  ;;  %3356 = vmatprep.mubr.bf16.mxu1 %v21518_v28  ;;  %v19115_v28 = vld [vmem:[#allocation4 + $0x128] sm:$0xff]  }
 0x8cb   :  { %16543 = vmatprep.subr.bf16.mxu1 %v19090_v10 }
 0x8ce   :  { %16544 = vmatpush3.bf16.msra.mxu1 %v19091_v11 }
 0x8cf   :  { %16545 = vmatprep.subr.bf16.mxu1 %v19093_v12 }
 0x8d2   :  { %16546 = vmatpush3.bf16.msra.mxu1 %v19094_v14 }
 0x8d3   :  { %16547 = vmatprep.subr.bf16.mxu1 %v19096_v15 }
 0x8d6   :  { %16548 = vmatpush3.bf16.msra.mxu1 %v19097_v16 }
 0x8d7   :  { %16549 = vmatprep.subr.bf16.mxu1 %v19099_v17 }
 0x8da   :  { %16550 = vmatpush3.bf16.msra.mxu1 %v19100_v51 }
 0x8db   :  { %16551 = vmatprep.subr.bf16.mxu1 %v19102_v18 }
 0x8de   :  { %16552 = vmatpush3.bf16.msra.mxu1 %v19103_v19 }
 0x8df   :  { %16553 = vmatprep.subr.bf16.mxu1 %v19105_v20  ;;  %v3276_v33 = vpop.f32.mrf.mxu0 }
 0x8e0   :  { %v3277_v7 = vadd.f32 %v3276_v33, %v2819_v5  ;;  %v19138_v33 = vld [vmem:[%s22850_s6 + $0x60] sm:$0xff]   ;;  %v19143_v5 = vld [vmem:[%s22848_s26 + $0x528] ss:$12 sps:$4 sm:$0xff]  }
 0x8e1   :  { %v3278_v35 = vpop.f32.mrf.mxu0 }
 0x8e2   :  { %16554 = vmatpush3.bf16.msra.mxu1 %v19106_v21  ;;  %v3279_v8 = vadd.f32 %v3278_v35, %v2823_v57  ;;  %v19140_v35 = vld [vmem:[%s22850_s6 + $0x50] sm:$0xff]  }
 0x8e3   :  { %16555 = vmatprep.subr.bf16.mxu1 %v19108_v22  ;;  %v3280_v38 = vpop.f32.mrf.mxu0  ;;  %v2827_v22 = vrot.slane %v2795_v3, %v21448_v6 }
 0x8e4   :  { %v19145_v38 = vld [vmem:[%s22848_s26 + $0x52c] ss:$12 sps:$4 sm:$0xff]  }
 0x8e5   :  { %v3281_v39 = vpop.f32.mrf.mxu0 }
 0x8e6   :  { %16556 = vmatpush3.bf16.msra.mxu1 %v19109_v23  ;;  %v19146_v39 = vld [vmem:[%s22851_s0 + $0x78] sm:$0xff]  }
 0x8e7   :  { %16572 = vmatprep.subr.bf16.mxu1 %v19111_v24 }
 0x8e9   :  { %3357 = vmatmul.mubr.bf16.vlgmr.msra.gmra.mxu1 %v21521_v29  ;;  %v19121_v29 = vld [vmem:[#allocation4 + $0x110] sm:$0xff]  }
 0x8ea   :  { %16573 = vmatpush3.bf16.msra.mxu1 %v19112_v25 }
 0x8eb   :  { %16574 = vmatprep.subr.bf16.mxu1 %v19113_v26 }
 0x8ee   :  { %16575 = vmatpush3.bf16.msra.mxu1 %v19114_v27 }
 0x8ef   :  { %16576 = vmatprep.subr.bf16.mxu1 %v19115_v28 }
 0x8f2   :  { %16577 = vmatpush3.bf16.msra.mxu1 %v19116_v30 }
 0x8f3   :  { %16578 = vmatprep.subr.bf16.mxu1 %v19117_v60 }
 0x8f6   :  { %16579 = vmatpush3.bf16.msra.mxu1 %v19118_v2 }
 0x8f7   :  { %16580 = vmatprep.subr.bf16.mxu1 %v19119_v31  ;;  %v19135_v31 = vld [vmem:[%s22850_s6 + $0x78] sm:$0xff]  }
 0x8fa   :  { %16581 = vmatpush3.bf16.msra.mxu1 %v19120_v32  ;;  %v19136_v32 = vld [vmem:[%s22850_s6 + $0x70] sm:$0xff]  }
 0x8fb   :  { %16582 = vmatprep.subr.bf16.mxu1 %v19121_v29  ;;  %v19137_v29 = vld [vmem:[%s22850_s6 + $0x68] sm:$0xff]  }
 0x8fe   :  { %16583 = vmatpush3.bf16.msra.mxu1 %v19122_v34  ;;  %v19139_v34 = vld [vmem:[%s22850_s6 + $0x58] sm:$0xff]  }
 0x8ff   :  { %16584 = vmatprep.subr.bf16.mxu1 %v19123_v36  ;;  %v3398_v50 = vpop.f32.mrf.mxu0  ;;  %v19141_v36 = vld [vmem:[%s22850_s6 + $0x48] sm:$0xff]  }
 0x901   :  { %v17612_v53 = vpop.f32.mrf.mxu0 }
 0x902   :  { %16585 = vmatpush3.bf16.msra.mxu1 %v19124_v37  ;;  %v19142_v37 = vld [vmem:[%s22850_s6 + $0x40] sm:$0xff]  }
 0x903   :  { %16586 = vmatprep.subr.bf16.mxu1 %v19125_v40  ;;  %v3401_v54 = vpop.f32.mrf.mxu0  ;;  %v19150_v40 = vld [vmem:[%s22851_s0 + $0x70] sm:$0xff]  }
 0x904   :  { %v14921_v54 = vld [vmem:[#allocation6 + $0x1] ss:$0 sm:$0xff] }
 0x905   :  { %v17613_v4 = vpop.f32.mrf.mxu0 }
 0x906   :  { %16587 = vmatpush3.bf16.msra.mxu1 %v19126_v42  ;;  %v19154_v42 = vld [vmem:[%s22851_s0 + $0x68] sm:$0xff]  }
 0x907   :  { %17634 = vmatprep.subr.bf16.mxu1 %v20879_v0 }
 0x969   :  { %v21592_v61 = vpop.f32.mrf.mxu1 }
 0x96b   :  { %v17592_v62 = vpop.f32.mrf.mxu1 }
 0x96d   :  { %v2622_v63 = vpop.f32.mrf.mxu1 }
 0x96f   :  { %v17593_v1 = vpop.f32.mrf.mxu1 }
 0x989   :  { %v3317_v9 = vpop.f32.mrf.mxu1 }
 0x98a   :  { %v3318_v10 = vadd.f32 %v3317_v9, %v3277_v7  ;;  %v19147_v9 = vld [vmem:[%s22848_s26 + $0x510] ss:$12 sps:$4 sm:$0xff]  }
 0x98b   :  { %v3319_v11 = vpop.f32.mrf.mxu1 }
 0x98c   :  { %vm3404_vm11 = vcmp.ge.f32.partialorder %v3318_v10, 0.0  ;;  %v3407_v12 = vmul.f32 0.2, %v3318_v10  ;;  %v3320_v14 = vadd.f32 %v3319_v11, %v3279_v8  ;;  %v19149_v8 = vld [vmem:[%s22848_s26 + $0x514] ss:$12 sps:$4 sm:$0xff]  }
 0x98d   :  { %v3321_v15 = vpop.f32.mrf.mxu1  ;;  %v19151_v11 = vld [vmem:[%s22848_s26 + $0x4f8] ss:$12 sps:$4 sm:$0xff]  }
 0x98e   :  { %vm3405_vm12 = vcmp.ge.f32.partialorder %v3320_v14, 0.0  ;;  %v3408_v16 = vmul.f32 0.2, %v3320_v14  ;;  %v3410_v17 = vsel %vm3404_vm11, %v3318_v10, %v3407_v12  ;;  %v19153_v10 = vld [vmem:[%s22848_s26 + $0x4fc] ss:$12 sps:$4 sm:$0xff]  }
 0x98f   :  { %v3322_v51 = vpop.f32.mrf.mxu1  ;;  %v3413_v20 = vpack.c.bf16 %v3410_v17, %v3410_v17  ;;  %v19157_v12 = vld [vmem:[%s22848_s26 + $0x4e4] ss:$12 sps:$4 sm:$0xff]   ;;  %v19161_v15 = vld [vmem:[%s22848_s26 + $0x4cc] ss:$12 sps:$4 sm:$0xff]   ;;  %v19165_v17 = vld [vmem:[%s22848_s26 + $0x4b4] ss:$12 sps:$4 sm:$0xff]  }
 0x990   :  { %v21596_v18 = vsel %vm3405_vm12, %v3320_v14, %v3408_v16  ;;  %v19155_v14 = vld [vmem:[%s22848_s26 + $0x4e0] ss:$12 sps:$4 sm:$0xff]   ;;  %v19159_v16 = vld [vmem:[%s22848_s26 + $0x4c8] ss:$12 sps:$4 sm:$0xff]   ;;  %v19163_v51 = vld [vmem:[%s22848_s26 + $0x4b0] ss:$12 sps:$4 sm:$0xff]  }
 0x991   :  { %v3414_v19 = vpack.c.bf16 %v21596_v18, %v21596_v18 }
 0x993   :  { %3598 = vmatprep.mubr.bf16.mxu1 %v3414_v19  ;;  %v19169_v19 = vld [vmem:[%s22848_s26 + $0x49c] ss:$12 sps:$4 sm:$0xff]  }
 0x994   :  { %3599 = vmatmul.mubr.bf16.vlgmr.msra.gmra.mxu1 %v3413_v20  ;;  %v19167_v20 = vld [vmem:[%s22848_s26 + $0x498] ss:$12 sps:$4 sm:$0xff]  }
 0x995   :  { %17650 = vmatprep.mubr.msk.bf16.mxu1 %vm20880_vm0, %v20879_v0  ;;  %17635 = vmatpush3.bf16.msra.mxu1 %v19135_v31  ;;  %v19195_v31 = vld [vmem:[%s22848_s26 + $0x5a4] ss:$12 sps:$4 sm:$0xff]  }
 0x996   :  { %17636 = vmatprep.subr.bf16.mxu1 %v20879_v0 }
 0x999   :  { %17637 = vmatpush3.bf16.msra.mxu1 %v19136_v32  ;;  %v19193_v32 = vld [vmem:[%s22848_s26 + $0x5a0] ss:$12 sps:$4 sm:$0xff]  }
 0x99a   :  { %17638 = vmatprep.subr.bf16.mxu1 %v20879_v0 }
 0x99d   :  { %17639 = vmatpush3.bf16.msra.mxu1 %v19137_v29  ;;  %v19201_v29 = vld [vmem:[%s22848_s26 + $0x58c] ss:$12 sps:$4 sm:$0xff]  }
 0x99e   :  { %17640 = vmatprep.subr.bf16.mxu1 %v20879_v0 }
 0x9a1   :  { %17641 = vmatpush3.bf16.msra.mxu1 %v19138_v33  ;;  %v19199_v33 = vld [vmem:[%s22848_s26 + $0x588] ss:$12 sps:$4 sm:$0xff]  }
 0x9a2   :  { %17642 = vmatprep.subr.bf16.mxu1 %v20879_v0 }
 0x9a5   :  { %17643 = vmatpush3.bf16.msra.mxu1 %v19139_v34  ;;  %v19207_v34 = vld [vmem:[%s22848_s26 + $0x574] ss:$12 sps:$4 sm:$0xff]  }
 0x9a6   :  { %17644 = vmatprep.subr.bf16.mxu1 %v20879_v0 }
 0x9a9   :  { %v16557_v21 = vpop.f32.mrf.mxu1  ;;  %17645 = vmatpush3.bf16.msra.mxu1 %v19140_v35  ;;  %v19205_v35 = vld [vmem:[%s22848_s26 + $0x570] ss:$12 sps:$4 sm:$0xff]  }
 0x9aa   :  { %17646 = vmatprep.subr.bf16.mxu1 %v20879_v0 }
 0x9ab   :  { %v16558_v23 = vpop.f32.mrf.mxu1 }
 0x9ac   :  { %v16559_v24 = vadd.f32 %v16558_v23, %v16557_v21  ;;  %v19170_v21 = vld [vmem:[%s22851_s0 + $0x48] sm:$0xff]  }
 0x9ad   :  { %v16560_v25 = vpop.f32.mrf.mxu1  ;;  %17647 = vmatpush3.bf16.msra.mxu1 %v19141_v36  ;;  %v19171_v23 = vld [vmem:[%s22848_s26 + $0x480] ss:$12 sps:$4 sm:$0xff]   ;;  %v19213_v36 = vld [vmem:[%s22848_s26 + $0x55c] ss:$12 sps:$4 sm:$0xff]  }
 0x9ae   :  { %v3359_v26 = vadd.f32 %v16559_v24, %v2827_v22  ;;  %17648 = vmatprep.subr.bf16.mxu1 %v20879_v0  ;;  %v19173_v22 = vld [vmem:[%s22848_s26 + $0x484] ss:$12 sps:$4 sm:$0xff]   ;;  %v19177_v25 = vld [vmem:[%s22848_s26 + $0x5ec] ss:$12 sps:$4 sm:$0xff]  }
 0x9af   :  { %v16561_v27 = vpop.f32.mrf.mxu1  ;;  %v19174_v24 = vld [vmem:[%s22851_s0 + $0x40] sm:$0xff]  }
 0x9b0   :  { %v3399_v28 = vadd.f32 %v3398_v50, %v3359_v26  ;;  %v19175_v26 = vld [vmem:[%s22848_s26 + $0x5e8] ss:$12 sps:$4 sm:$0xff]   ;;  %v19180_v27 = vld [vmem:[%s22848_s26 + $0x6ac] ss:$12 sps:$4 sm:$0xff]  }
 0x9b1   :  { %17649 = vmatpush3.bf16.msra.mxu1 %v19142_v37  ;;  %v19211_v37 = vld [vmem:[%s22848_s26 + $0x558] ss:$12 sps:$4 sm:$0xff]  }
 0x9b2   :  { %vm3406_vm13 = vcmp.ge.f32.partialorder %v3399_v28, 0.0  ;;  %v3409_v30 = vmul.f32 0.2, %v3399_v28  ;;  %4460 = vmatprep.subr.bf16.mxu1 %v19145_v38  ;;  %v19219_v38 = vld [vmem:[%s22848_s26 + $0x544] ss:$12 sps:$4 sm:$0xff]  }
 0x9b4   :  { %v3412_v60 = vsel %vm3406_vm13, %v3399_v28, %v3409_v30  ;;  %v19183_v28 = vld [vmem:[%s22848_s26 + $0x5d4] ss:$12 sps:$4 sm:$0xff]   ;;  %v19181_v30 = vld [vmem:[%s22848_s26 + $0x5d0] ss:$12 sps:$4 sm:$0xff]  }
 0x9b5   :  { %v3415_v2 = vpack.c.bf16 %v3412_v60, %v3412_v60  ;;  %v19189_v60 = vld [vmem:[%s22848_s26 + $0x5bc] ss:$12 sps:$4 sm:$0xff]  }
 0x9b7   :  { %17631 = vmatmul.mubr.bf16.vlgmr.msra.gmra.mxu0 %v3415_v2  ;;  %v19187_v2 = vld [vmem:[%s22848_s26 + $0x5b8] ss:$12 sps:$4 sm:$0xff]  }
 0x9b8   :  { %17670 = vmatprep.mubr.msk.bf16.mxu0 %vm20880_vm0, %v20879_v0  ;;  %17655 = vmatpush3.bf16.msra.mxu0 %v19146_v39  ;;  %v15093_v39 = vld.sshfl [vmem:[%s22849_s28 + $0x6] sm:$0x13 pattern:$0x75316420] }
 0x9b9   :  { %17656 = vmatprep.subr.bf16.mxu0 %v20879_v0 }
 0x9bc   :  { %17657 = vmatpush3.bf16.msra.mxu0 %v19150_v40  ;;  %v19217_v40 = vld [vmem:[%s22848_s26 + $0x540] ss:$12 sps:$4 sm:$0xff]  }
 0x9bd   :  { %17658 = vmatprep.subr.bf16.mxu0 %v20879_v0 }
 0x9c0   :  { %17659 = vmatpush3.bf16.msra.mxu0 %v19154_v42  ;;  %v4057_v42 = vcombine.high %v15093_v39, %v15093_v39 }
 0x9c1   :  { %17660 = vmatprep.subr.bf16.mxu0 %v20879_v0 }
 0x9c4   :  { %17661 = vmatpush3.bf16.msra.mxu0 %v19158_v43  ;;  %v21670_v43 = vrot.slane %v4057_v42, %v21335_v55  ;;  %v19249_v42 = vld [vmem:[#allocation4 + $0x1f0] sm:$0xff]  }
 0x9c5   :  { %17662 = vmatprep.subr.bf16.mxu0 %v20879_v0 }
 0x9c8   :  { %17663 = vmatpush3.bf16.msra.mxu0 %v19162_v44  ;;  %v21673_v44 = vrot.slane %v15093_v39, %v21335_v55  ;;  %v19247_v39 = vld [vmem:[#allocation4 + $0x1f8] sm:$0xff]  }
 0x9c9   :  { %17664 = vmatprep.subr.bf16.mxu0 %v20879_v0 }
 0x9cc   :  { %17665 = vmatpush3.bf16.msra.mxu0 %v19166_v46  ;;  %v19225_v46 = vld [vmem:[%s22848_s26 + $0x6b0] ss:$12 sps:$4 sm:$0xff]  }
 0x9cd   :  { %17666 = vmatprep.subr.bf16.mxu0 %v20879_v0 }
 0x9d0   :  { %17667 = vmatpush3.bf16.msra.mxu0 %v19170_v21  ;;  %v19216_v21 = vld [vmem:[%s22848_s26 + $0x61c] ss:$12 sps:$4 sm:$0xff]  }
 0x9d1   :  { %17668 = vmatprep.subr.bf16.mxu0 %v20879_v0 }
 0x9d4   :  { %17669 = vmatpush3.bf16.msra.mxu0 %v19174_v24  ;;  %v19220_v24 = vld [vmem:[%s22848_s26 + $0x600] ss:$12 sps:$4 sm:$0xff]  }
 0x9d5   :  { %4501 = vmatprep.subr.bf16.mxu0 %v19180_v27  ;;  %v19226_v27 = vld [vmem:[%s22848_s26 + $0x5d8] ss:$12 sps:$4 sm:$0xff]  }
 0xa54   :  { %v16588_v48 = vpop.f32.mrf.mxu1 }
 0xa56   :  { %v16589_v49 = vpop.f32.mrf.mxu1 }
 0xa57   :  { %v16590_v53 = vadd.f32 %v16589_v49, %v16588_v48  ;;  %v19228_v48 = vld [vmem:[%s22848_s26 + $0x698] ss:$12 sps:$4 sm:$0xff]   ;;  %v19231_v49 = vld [vmem:[%s22848_s26 + $0x680] ss:$12 sps:$4 sm:$0xff]  }
 0xa58   :  { %v16591_v50 = vpop.f32.mrf.mxu1 }
 0xa59   :  { %v3601_v56 = vadd.f32 %v16590_v53, %v14921_v54  ;;  %v19234_v50 = vld [vmem:[%s22848_s26 + $0x668] ss:$12 sps:$4 sm:$0xff]   ;;  %v19240_v53 = vld [vmem:[%s22848_s26 + $0x638] ss:$12 sps:$4 sm:$0xff]   ;;  %v19243_v54 = vld [vmem:[%s22848_s26 + $0x620] ss:$12 sps:$4 sm:$0xff]  }
 0xa5a   :  { %v16592_v52 = vpop.f32.mrf.mxu1 }
 0xa5b   :  { %v19237_v52 = vld [vmem:[%s22848_s26 + $0x650] ss:$12 sps:$4 sm:$0xff]  }
 0xa77   :  { %v3640_v4 = vpop.f32.mrf.mxu0 }
 0xa78   :  { %v3641_v58 = vadd.f32 %v3640_v4, %v3601_v56  ;;  %v19246_v56 = vld [vmem:[%s22848_s26 + $0x608] ss:$12 sps:$4 sm:$0xff]   ;;  %v4072_v4 = vcombine.high %v21673_v44, %v21673_v44 }
 0xa79   :  { %v17632_v62 = vpop.f32.mrf.mxu0 }
 0xa7a   :  { %vm3646_vm14 = vcmp.ge.f32.partialorder %v3641_v58, 0.0  ;;  %v3647_v63 = vmul.f32 0.2, %v3641_v58 }
 0xa7b   :  { %v3643_v1 = vpop.f32.mrf.mxu0 }
 0xa7c   :  { %v3648_v3 = vsel %vm3646_vm14, %v3641_v58, %v3647_v63  ;;  %v14946_v58 = vld [vmem:[#allocation7 + $0x1] ss:$0 sm:$0xff] }
 0xa7d   :  { %v3649_v57 = vpack.c.bf16 %v3648_v3, %v3648_v3  ;;  %v17633_v7 = vpop.f32.mrf.mxu0 }
 0xa7f   :  { %17651 = vmatmul.mubr.bf16.vlgmr.msra.gmra.mxu1 %v3649_v57 }
 0xa80   :  { %4461 = vmatpush1.bf16.msra.mxu1 %v19143_v5  ;;  %4492 = vmatprep.mubr.bf16.mxu1 %v21670_v43 }
 0xa81   :  { %4462 = vmatprep.subr.bf16.mxu1 %v19149_v8 }
 0xa84   :  { %4463 = vmatpush1.bf16.msra.mxu1 %v19147_v9  ;;  %v19178_v9 = vld [vmem:[%s22848_s26 + $0x6a8] ss:$12 sps:$4 sm:$0xff]  }
 0xa85   :  { %4464 = vmatprep.subr.bf16.mxu1 %v19153_v10 }
 0xa88   :  { %4465 = vmatpush1.bf16.msra.mxu1 %v19151_v11  ;;  %v19186_v11 = vld [vmem:[%s22848_s26 + $0x694] ss:$12 sps:$4 sm:$0xff]  }
 0xa89   :  { %4466 = vmatprep.subr.bf16.mxu1 %v19157_v12  ;;  %v19184_v12 = vld [vmem:[%s22848_s26 + $0x690] ss:$12 sps:$4 sm:$0xff]  }
 0xa8c   :  { %4467 = vmatpush1.bf16.msra.mxu1 %v19155_v14  ;;  %v19192_v14 = vld [vmem:[%s22848_s26 + $0x67c] ss:$12 sps:$4 sm:$0xff]  }
 0xa8d   :  { %4468 = vmatprep.subr.bf16.mxu1 %v19161_v15  ;;  %v19190_v15 = vld [vmem:[%s22848_s26 + $0x678] ss:$12 sps:$4 sm:$0xff]  }
 0xa90   :  { %4469 = vmatpush1.bf16.msra.mxu1 %v19159_v16  ;;  %v19196_v16 = vld [vmem:[%s22848_s26 + $0x660] ss:$12 sps:$4 sm:$0xff]  }
 0xa91   :  { %4470 = vmatprep.subr.bf16.mxu1 %v19165_v17  ;;  %v19204_v17 = vld [vmem:[%s22848_s26 + $0x64c] ss:$12 sps:$4 sm:$0xff]  }
 0xa94   :  { %4471 = vmatpush1.bf16.msra.mxu1 %v19163_v51  ;;  %v19202_v51 = vld [vmem:[%s22848_s26 + $0x648] ss:$12 sps:$4 sm:$0xff]  }
 0xa95   :  { %4472 = vmatprep.subr.bf16.mxu1 %v19169_v19  ;;  %v19210_v19 = vld [vmem:[%s22848_s26 + $0x634] ss:$12 sps:$4 sm:$0xff]  }
 0xa98   :  { %4473 = vmatpush1.bf16.msra.mxu1 %v19167_v20  ;;  %v19208_v20 = vld [vmem:[%s22848_s26 + $0x630] ss:$12 sps:$4 sm:$0xff]  }
 0xa99   :  { %4474 = vmatprep.subr.bf16.mxu1 %v19173_v22  ;;  %v19214_v22 = vld [vmem:[%s22848_s26 + $0x618] ss:$12 sps:$4 sm:$0xff]  }
 0xa9c   :  { %4475 = vmatpush1.bf16.msra.mxu1 %v19171_v23  ;;  %v19222_v23 = vld [vmem:[%s22848_s26 + $0x604] ss:$12 sps:$4 sm:$0xff]  }
 0xa9d   :  { %4476 = vmatprep.subr.bf16.mxu1 %v19177_v25  ;;  %v19223_v25 = vld [vmem:[%s22848_s26 + $0x5f0] ss:$12 sps:$4 sm:$0xff]  }
 0xaa0   :  { %4477 = vmatpush2.bf16.msra.mxu1 %v19175_v26  ;;  %v19224_v26 = vld [vmem:[%s22848_s26 + $0x530] ss:$12 sps:$4 sm:$0xff]  }
 0xaa1   :  { %4478 = vmatprep.subr.bf16.mxu1 %v19183_v28  ;;  %v19227_v28 = vld [vmem:[%s22848_s26 + $0x518] ss:$12 sps:$4 sm:$0xff]  }
 0xaa4   :  { %4479 = vmatpush2.bf16.msra.mxu1 %v19181_v30  ;;  %v19229_v30 = vld [vmem:[%s22848_s26 + $0x5c0] ss:$12 sps:$4 sm:$0xff]  }
 0xaa5   :  { %4480 = vmatprep.subr.bf16.mxu1 %v19189_v60  ;;  %v19230_v60 = vld [vmem:[%s22848_s26 + $0x500] ss:$12 sps:$4 sm:$0xff]  }
 0xaa8   :  { %4481 = vmatpush2.bf16.msra.mxu1 %v19187_v2  ;;  %v19232_v2 = vld [vmem:[%s22848_s26 + $0x5a8] ss:$12 sps:$4 sm:$0xff]  }
 0xaa9   :  { %4482 = vmatprep.subr.bf16.mxu1 %v19195_v31  ;;  %v19233_v31 = vld [vmem:[%s22848_s26 + $0x4e8] ss:$12 sps:$4 sm:$0xff]  }
 0xaac   :  { %4483 = vmatpush2.bf16.msra.mxu1 %v19193_v32  ;;  %v19235_v32 = vld [vmem:[%s22848_s26 + $0x590] ss:$12 sps:$4 sm:$0xff]  }
 0xaad   :  { %4484 = vmatprep.subr.bf16.mxu1 %v19201_v29  ;;  %v19236_v29 = vld [vmem:[%s22848_s26 + $0x4d0] ss:$12 sps:$4 sm:$0xff]  }
 0xab0   :  { %4485 = vmatpush2.bf16.msra.mxu1 %v19199_v33  ;;  %v19238_v33 = vld [vmem:[%s22848_s26 + $0x578] ss:$12 sps:$4 sm:$0xff]  }
 0xab1   :  { %4486 = vmatprep.subr.bf16.mxu1 %v19207_v34  ;;  %v19239_v34 = vld [vmem:[%s22848_s26 + $0x4b8] ss:$12 sps:$4 sm:$0xff]  }
 0xab4   :  { %4487 = vmatpush2.bf16.msra.mxu1 %v19205_v35  ;;  %v19241_v35 = vld [vmem:[%s22848_s26 + $0x560] ss:$12 sps:$4 sm:$0xff]  }
 0xab5   :  { %4488 = vmatprep.subr.bf16.mxu1 %v19213_v36  ;;  %v19242_v36 = vld [vmem:[%s22848_s26 + $0x4a0] ss:$12 sps:$4 sm:$0xff]  }
 0xab8   :  { %4489 = vmatpush2.bf16.msra.mxu1 %v19211_v37  ;;  %v19244_v37 = vld [vmem:[%s22848_s26 + $0x548] ss:$12 sps:$4 sm:$0xff]  }
 0xab9   :  { %4490 = vmatprep.subr.bf16.mxu1 %v19219_v38  ;;  %v19245_v38 = vld [vmem:[%s22848_s26 + $0x488] ss:$12 sps:$4 sm:$0xff]  }
 0xabc   :  { %4491 = vmatpush2.bf16.msra.mxu1 %v19217_v40  ;;  %v19248_v40 = vld [vmem:[#allocation4 + $0x1b8] sm:$0xff]  }
 0xabd   :  { %17674 = vmatprep.subr.bf16.mxu1 %v20879_v0 }
 0xabf   :  { %4493 = vmatmul.mubr.bf16.vlgmr.msra.gmra.mxu1 %v21673_v44 }
 0xac0   :  { %17690 = vmatprep.mubr.msk.bf16.mxu1 %vm20880_vm0, %v20879_v0  ;;  %17675 = vmatpush3.bf16.msra.mxu1 %v19225_v46  ;;  %v19251_v46 = vld [vmem:[#allocation4 + $0x1e8] sm:$0xff]  }
 0xac1   :  { %17676 = vmatprep.subr.bf16.mxu1 %v20879_v0 }
 0xac4   :  { %17677 = vmatpush3.bf16.msra.mxu1 %v19228_v48  ;;  %v19252_v48 = vld [vmem:[#allocation4 + $0x1a8] sm:$0xff]  }
 0xac5   :  { %17678 = vmatprep.subr.bf16.mxu1 %v20879_v0 }
 0xac8   :  { %17679 = vmatpush3.bf16.msra.mxu1 %v19231_v49  ;;  %v19253_v49 = vld [vmem:[#allocation4 + $0x1e0] sm:$0xff]  }
 0xac9   :  { %17680 = vmatprep.subr.bf16.mxu1 %v20879_v0 }
 0xacc   :  { %17681 = vmatpush3.bf16.msra.mxu1 %v19234_v50  ;;  %v19254_v50 = vld [vmem:[#allocation4 + $0x1a0] sm:$0xff]  }
 0xacd   :  { %17682 = vmatprep.subr.bf16.mxu1 %v20879_v0 }
 0xad0   :  { %17683 = vmatpush3.bf16.msra.mxu1 %v19237_v52  ;;  %v19255_v52 = vld [vmem:[#allocation4 + $0x1d8] sm:$0xff]  }
 0xad1   :  { %17684 = vmatprep.subr.bf16.mxu1 %v20879_v0 }
 0xad4   :  { %17685 = vmatpush3.bf16.msra.mxu1 %v19240_v53  ;;  %v19256_v53 = vld [vmem:[#allocation4 + $0x198] sm:$0xff]  }
 0xad5   :  { %17686 = vmatprep.subr.bf16.mxu1 %v20879_v0 }
 0xad8   :  { %17687 = vmatpush3.bf16.msra.mxu1 %v19243_v54 }
 0xad9   :  { %17688 = vmatprep.subr.bf16.mxu1 %v20879_v0 }
 0xadc   :  { %17689 = vmatpush3.bf16.msra.mxu1 %v19246_v56  ;;  %v19258_v56 = vld [vmem:[#allocation4 + $0x190] sm:$0xff]  }
 0xadd   :  { %17694 = vmatprep.subr.bf16.mxu1 %v20879_v0 }
 0xadf   :  { %17691 = vmatmul.mubr.bf16.vlgmr.msra.gmra.mxu1 %v4072_v4 }
 0xae0   :  { %17710 = vmatprep.mubr.msk.bf16.mxu1 %vm20880_vm0, %v20879_v0 }
 0xb3f   :  { %v3738_v62 = vpop.f32.mrf.mxu1 }
 0xb40   :  { %v3739_v63 = vadd.f32 %v14946_v58, %v3738_v62  ;;  %v19259_v58 = vld [vmem:[#allocation4 + $0x1c8] sm:$0xff]  }
 0xb41   :  { %v17652_v1 = vpop.f32.mrf.mxu1  ;;  %v19260_v62 = vld [vmem:[#allocation4 + $0x188] sm:$0xff]  }
 0xb42   :  { %vm3744_vm15 = vcmp.ge.f32.partialorder %v3739_v63, 0.0  ;;  %v3745_v3 = vmul.f32 0.2, %v3739_v63 }
 0xb43   :  { %v3741_v5 = vpop.f32.mrf.mxu1 }
 0xb44   :  { %v3746_v57 = vsel %vm3744_vm15, %v3739_v63, %v3745_v3  ;;  %v19261_v3 = vld [vmem:[#allocation4 + $0x1c0] sm:$0xff]  }
 0xb45   :  { %v3747_v7 = vadd.f32 %v3746_v57, %v21596_v18  ;;  %v17653_v8 = vpop.f32.mrf.mxu1  ;;  %v19198_v18 = vld [vmem:[%s22848_s26 + $0x664] ss:$12 sps:$4 sm:$0xff]   ;;  %v19263_v57 = vld [vmem:[#allocation4 + $0x238] sm:$0xff]  }
 0xb46   :  { %v19262_v5 = vld [vmem:[#allocation4 + $0x180] sm:$0xff]   ;;  %17695 = vmatpush3.bf16.msra.mxu1 %v19263_v57  ;;  %v19265_v8 = vld [vmem:[#allocation4 + $0x228] sm:$0xff]   ;;  %v19290_v57 = vld [vmem:[%s22851_s0 + $0xa8] sm:$0xff]  }
 0xb47   :  { %v3748_v10 = vpack.c.bf16 %v3747_v7, %v3747_v7  ;;  %v19264_v7 = vld [vmem:[#allocation4 + $0x230] sm:$0xff]   ;;  %17696 = vmatprep.subr.bf16.mxu1 %v20879_v0 }
 0xb49   :  { %17671 = vmatmul.mubr.bf16.vlgmr.msra.gmra.mxu0 %v3748_v10  ;;  %v19267_v10 = vld [vmem:[#allocation4 + $0x218] sm:$0xff]  }
 0xb4a   :  { %4502 = vmatpush1.bf16.msra.mxu0 %v19178_v9  ;;  %4533 = vmatprep.mubr.bf16.mxu0 %v20882_v59  ;;  %v19266_v9 = vld [vmem:[#allocation4 + $0x220] sm:$0xff]  }
 0xb4b   :  { %4503 = vmatprep.subr.bf16.mxu0 %v19186_v11  ;;  %17697 = vmatpush3.bf16.msra.mxu1 %v19264_v7  ;;  %v19294_v7 = vld [vmem:[%s22851_s0 + $0xa0] sm:$0xff]  }
 0xb4c   :  { %17698 = vmatprep.subr.bf16.mxu1 %v20879_v0 }
 0xb4e   :  { %4504 = vmatpush1.bf16.msra.mxu0 %v19184_v12  ;;  %v19268_v12 = vld [vmem:[#allocation4 + $0x210] sm:$0xff]  }
 0xb4f   :  { %4505 = vmatprep.subr.bf16.mxu0 %v19192_v14  ;;  %17699 = vmatpush3.bf16.msra.mxu1 %v19265_v8  ;;  %v19298_v8 = vld [vmem:[%s22851_s0 + $0x98] sm:$0xff]  }
 0xb50   :  { %17700 = vmatprep.subr.bf16.mxu1 %v20879_v0 }
 0xb52   :  { %4506 = vmatpush1.bf16.msra.mxu0 %v19190_v15 }
 0xb53   :  { %4507 = vmatprep.subr.bf16.mxu0 %v19198_v18  ;;  %17701 = vmatpush3.bf16.msra.mxu1 %v19266_v9  ;;  %v19269_v18 = vld [vmem:[#allocation4 + $0x208] sm:$0xff]   ;;  %v19302_v9 = vld [vmem:[%s22851_s0 + $0x90] sm:$0xff]  }
 0xb54   :  { %17702 = vmatprep.subr.bf16.mxu1 %v20879_v0 }
 0xb56   :  { %4508 = vmatpush1.bf16.msra.mxu0 %v19196_v16 }
 0xb57   :  { %4509 = vmatprep.subr.bf16.mxu0 %v19204_v17  ;;  %17703 = vmatpush3.bf16.msra.mxu1 %v19267_v10  ;;  %v19270_v17 = vld [vmem:[#allocation4 + $0x200] sm:$0xff]  }
 0xb58   :  { %17704 = vmatprep.subr.bf16.mxu1 %v20879_v0 }
 0xb5a   :  { %4510 = vmatpush1.bf16.msra.mxu0 %v19202_v51 }
 0xb5b   :  { %4511 = vmatprep.subr.bf16.mxu0 %v19210_v19  ;;  %17705 = vmatpush3.bf16.msra.mxu1 %v19268_v12 }
 0xb5c   :  { %17706 = vmatprep.subr.bf16.mxu1 %v20879_v0 }
 0xb5e   :  { %4512 = vmatpush1.bf16.msra.mxu0 %v19208_v20 }
 0xb5f   :  { %4513 = vmatprep.subr.bf16.mxu0 %v19216_v21  ;;  %17707 = vmatpush3.bf16.msra.mxu1 %v19269_v18  ;;  %v15166_v18 = vld [vmem:[#allocation6 + $0x2] ss:$0 sm:$0xff] }
 0xb60   :  { %17708 = vmatprep.subr.bf16.mxu1 %v20879_v0 }
 0xb62   :  { %4514 = vmatpush1.bf16.msra.mxu0 %v19214_v22  ;;  %v4013_v22 = vld [vmem:[#allocation2 + $0x6] sm:$0x7] }
 0xb63   :  { %4515 = vmatprep.subr.bf16.mxu0 %v19222_v23  ;;  %17709 = vmatpush3.bf16.msra.mxu1 %v19270_v17  ;;  %v4037_v23 = vrot.slane %v4013_v22, %v21434_v45 }
 0xb64   :  { %17734 = vmatprep.subr.bf16.mxu1 %v20879_v0 }
 0xb66   :  { %4516 = vmatpush1.bf16.msra.mxu0 %v19220_v24  ;;  %v4041_v24 = vrot.slane %v4013_v22, %v21437_v47 }
 0xb67   :  { %16621 = vmatprep.subr.bf16.mxu0 %v19223_v25 }
 0xb69   :  { %4534 = vmatmul.mubr.bf16.vlgmr.msra.gmra.mxu0 %v4072_v4 }
 0xb6a   :  { %16622 = vmatpush3.bf16.msra.mxu0 %v19224_v26  ;;  %4574 = vmatprep.mubr.bf16.mxu0 %v21670_v43  ;;  %v19250_v43 = vld [vmem:[#allocation4 + $0x1b0] sm:$0xff]  }
 0xb6b   :  { %16623 = vmatprep.subr.bf16.mxu0 %v19226_v27 }
 0xb6e   :  { %16624 = vmatpush3.bf16.msra.mxu0 %v19227_v28 }
 0xb6f   :  { %16625 = vmatprep.subr.bf16.mxu0 %v19229_v30 }
 0xb72   :  { %16626 = vmatpush3.bf16.msra.mxu0 %v19230_v60 }
 0xb73   :  { %16627 = vmatprep.subr.bf16.mxu0 %v19232_v2 }
 0xb76   :  { %16628 = vmatpush3.bf16.msra.mxu0 %v19233_v31 }
 0xb77   :  { %16629 = vmatprep.subr.bf16.mxu0 %v19235_v32 }
 0xb7a   :  { %16630 = vmatpush3.bf16.msra.mxu0 %v19236_v29 }
 0xb7b   :  { %16631 = vmatprep.subr.bf16.mxu0 %v19238_v33 }
 0xb7e   :  { %16632 = vmatpush3.bf16.msra.mxu0 %v19239_v34 }
 0xb7f   :  { %16633 = vmatprep.subr.bf16.mxu0 %v19241_v35  ;;  %v4494_v54 = vpop.f32.mrf.mxu1 }
 0xb80   :  { %v4495_v25 = vadd.f32 %v4494_v54, %v4037_v23  ;;  %v19273_v54 = vld [vmem:[%s22850_s6 + $0xa8] sm:$0xff]  }
 0xb81   :  { %v4496_v4 = vpop.f32.mrf.mxu1 }
 0xb82   :  { %16634 = vmatpush3.bf16.msra.mxu0 %v19242_v36  ;;  %v4497_v26 = vadd.f32 %v4496_v4, %v4041_v24  ;;  %v19275_v4 = vld [vmem:[%s22850_s6 + $0x98] sm:$0xff]   ;;  %v19279_v24 = vld [vmem:[%s22848_s26 + $0x768] ss:$12 sps:$4 sm:$0xff]  }
 0xb83   :  { %16635 = vmatprep.subr.bf16.mxu0 %v19244_v37  ;;  %v4498_v63 = vpop.f32.mrf.mxu1 }
 0xb84   :  { %v19278_v63 = vld [vmem:[%s22850_s6 + $0x80] sm:$0xff]  }
 0xb85   :  { %v4499_v1 = vpop.f32.mrf.mxu1 }
 0xb86   :  { %16636 = vmatpush3.bf16.msra.mxu0 %v19245_v38  ;;  %v4045_v38 = vrot.slane %v4013_v22, %v21448_v6  ;;  %v19281_v1 = vld [vmem:[%s22848_s26 + $0x76c] ss:$12 sps:$4 sm:$0xff]  }
 0xb87   :  { %16652 = vmatprep.subr.bf16.mxu0 %v19247_v39 }
 0xb89   :  { %4575 = vmatmul.mubr.bf16.vlgmr.msra.gmra.mxu0 %v21673_v44  ;;  %v19257_v44 = vld [vmem:[#allocation4 + $0x1d0] sm:$0xff]  }
 0xb8a   :  { %16653 = vmatpush3.bf16.msra.mxu0 %v19248_v40 }
 0xb8b   :  { %16654 = vmatprep.subr.bf16.mxu0 %v19249_v42 }
 0xb8e   :  { %16655 = vmatpush3.bf16.msra.mxu0 %v19250_v43 }
 0xb8f   :  { %16656 = vmatprep.subr.bf16.mxu0 %v19251_v46 }
 0xb92   :  { %16657 = vmatpush3.bf16.msra.mxu0 %v19252_v48 }
 0xb93   :  { %16658 = vmatprep.subr.bf16.mxu0 %v19253_v49 }
 0xb96   :  { %16659 = vmatpush3.bf16.msra.mxu0 %v19254_v50 }
 0xb97   :  { %16660 = vmatprep.subr.bf16.mxu0 %v19255_v52 }
 0xb9a   :  { %16661 = vmatpush3.bf16.msra.mxu0 %v19256_v53  ;;  %v19271_v53 = vld [vmem:[%s22850_s6 + $0xb8] sm:$0xff]  }
 0xb9b   :  { %16662 = vmatprep.subr.bf16.mxu0 %v19257_v44  ;;  %v19272_v44 = vld [vmem:[%s22850_s6 + $0xb0] sm:$0xff]  }
 0xb9e   :  { %16663 = vmatpush3.bf16.msra.mxu0 %v19258_v56  ;;  %v19274_v56 = vld [vmem:[%s22850_s6 + $0xa0] sm:$0xff]  }
 0xb9f   :  { %16664 = vmatprep.subr.bf16.mxu0 %v19259_v58  ;;  %v4616_v11 = vpop.f32.mrf.mxu1  ;;  %v19276_v58 = vld [vmem:[%s22850_s6 + $0x90] sm:$0xff]  }
 0xba1   :  { %v17692_v14 = vpop.f32.mrf.mxu1 }
 0xba2   :  { %16665 = vmatpush3.bf16.msra.mxu0 %v19260_v62  ;;  %v19277_v62 = vld [vmem:[%s22850_s6 + $0x88] sm:$0xff]  }
 0xba3   :  { %16666 = vmatprep.subr.bf16.mxu0 %v19261_v3  ;;  %v4619_v15 = vpop.f32.mrf.mxu1  ;;  %v19282_v3 = vld [vmem:[%s22851_s0 + $0xb8] sm:$0xff]  }
 0xba5   :  { %v17693_v16 = vpop.f32.mrf.mxu1 }
 0xba6   :  { %16667 = vmatpush3.bf16.msra.mxu0 %v19262_v5  ;;  %v19286_v5 = vld [vmem:[%s22851_s0 + $0xb0] sm:$0xff]  }
 0xba7   :  { %17714 = vmatprep.subr.bf16.mxu0 %v20879_v0 }
 0xc09   :  { %v21744_v51 = vpop.f32.mrf.mxu0 }
 0xc0b   :  { %v17672_v19 = vpop.f32.mrf.mxu0 }
 0xc0d   :  { %v3840_v20 = vpop.f32.mrf.mxu0 }
 0xc0f   :  { %v17673_v21 = vpop.f32.mrf.mxu0 }
 0xc29   :  { %v4535_v27 = vpop.f32.mrf.mxu0 }
 0xc2a   :  { %v4536_v28 = vadd.f32 %v4535_v27, %v4495_v25  ;;  %v19285_v27 = vld [vmem:[%s22848_s26 + $0x754] ss:$12 sps:$4 sm:$0xff]  }
 0xc2b   :  { %v4537_v30 = vpop.f32.mrf.mxu0 }
 0xc2c   :  { %vm4622_vm1 = vcmp.ge.f32.partialorder %v4536_v28, 0.0  ;;  %v4625_v60 = vmul.f32 0.2, %v4536_v28  ;;  %v4538_v2 = vadd.f32 %v4537_v30, %v4497_v26  ;;  %v19289_v30 = vld [vmem:[%s22848_s26 + $0x73c] ss:$12 sps:$4 sm:$0xff]  }
 0xc2d   :  { %v4539_v31 = vpop.f32.mrf.mxu0 }
 0xc2e   :  { %vm4623_vm2 = vcmp.ge.f32.partialorder %v4538_v2, 0.0  ;;  %v4626_v32 = vmul.f32 0.2, %v4538_v2  ;;  %v4628_v29 = vsel %vm4622_vm1, %v4536_v28, %v4625_v60  ;;  %v19283_v28 = vld [vmem:[%s22848_s26 + $0x750] ss:$12 sps:$4 sm:$0xff]  }
 0xc2f   :  { %v4540_v33 = vpop.f32.mrf.mxu0  ;;  %v4631_v36 = vpack.c.bf16 %v4628_v29, %v4628_v29  ;;  %v19287_v60 = vld [vmem:[%s22848_s26 + $0x738] ss:$12 sps:$4 sm:$0xff]   ;;  %v19291_v31 = vld [vmem:[%s22848_s26 + $0x720] ss:$12 sps:$4 sm:$0xff]   ;;  %v19295_v29 = vld [vmem:[%s22848_s26 + $0x708] ss:$12 sps:$4 sm:$0xff]  }
 0xc30   :  { %v21748_v34 = vsel %vm4623_vm2, %v4538_v2, %v4626_v32  ;;  %v19293_v2 = vld [vmem:[%s22848_s26 + $0x724] ss:$12 sps:$4 sm:$0xff]   ;;  %v19297_v32 = vld [vmem:[%s22848_s26 + $0x70c] ss:$12 sps:$4 sm:$0xff]   ;;  %v19301_v33 = vld [vmem:[%s22848_s26 + $0x6f4] ss:$12 sps:$4 sm:$0xff]  }
 0xc31   :  { %v4632_v35 = vpack.c.bf16 %v21748_v34, %v21748_v34 }
 0xc33   :  { %4816 = vmatprep.mubr.bf16.mxu0 %v4632_v35  ;;  %v19299_v35 = vld [vmem:[%s22848_s26 + $0x6f0] ss:$12 sps:$4 sm:$0xff]  }
 0xc34   :  { %4817 = vmatmul.mubr.bf16.vlgmr.msra.gmra.mxu0 %v4631_v36  ;;  %v19305_v36 = vld [vmem:[%s22848_s26 + $0x6dc] ss:$12 sps:$4 sm:$0xff]  }
 0xc35   :  { %17730 = vmatprep.mubr.msk.bf16.mxu0 %vm20880_vm0, %v20879_v0  ;;  %17715 = vmatpush3.bf16.msra.mxu0 %v19271_v53  ;;  %v19323_v53 = vld [vmem:[%s22848_s26 + $0x7f8] ss:$12 sps:$4 sm:$0xff]  }
 0xc36   :  { %17716 = vmatprep.subr.bf16.mxu0 %v20879_v0 }
 0xc39   :  { %17717 = vmatpush3.bf16.msra.mxu0 %v19272_v44  ;;  %v19331_v44 = vld [vmem:[%s22848_s26 + $0x7e4] ss:$12 sps:$4 sm:$0xff]  }
 0xc3a   :  { %17718 = vmatprep.subr.bf16.mxu0 %v20879_v0 }
 0xc3d   :  { %17719 = vmatpush3.bf16.msra.mxu0 %v19273_v54  ;;  %v19329_v54 = vld [vmem:[%s22848_s26 + $0x7e0] ss:$12 sps:$4 sm:$0xff]  }
 0xc3e   :  { %17720 = vmatprep.subr.bf16.mxu0 %v20879_v0 }
 0xc41   :  { %17721 = vmatpush3.bf16.msra.mxu0 %v19274_v56  ;;  %v19337_v56 = vld [vmem:[%s22848_s26 + $0x7cc] ss:$12 sps:$4 sm:$0xff]  }
 0xc42   :  { %17722 = vmatprep.subr.bf16.mxu0 %v20879_v0 }
 0xc45   :  { %17723 = vmatpush3.bf16.msra.mxu0 %v19275_v4  ;;  %v19335_v4 = vld [vmem:[%s22848_s26 + $0x7c8] ss:$12 sps:$4 sm:$0xff]  }
 0xc46   :  { %17724 = vmatprep.subr.bf16.mxu0 %v20879_v0 }
 0xc49   :  { %v16637_v37 = vpop.f32.mrf.mxu0  ;;  %17725 = vmatpush3.bf16.msra.mxu0 %v19276_v58  ;;  %v19343_v58 = vld [vmem:[%s22848_s26 + $0x7b4] ss:$12 sps:$4 sm:$0xff]  }
 0xc4a   :  { %17726 = vmatprep.subr.bf16.mxu0 %v20879_v0 }
 0xc4b   :  { %v16638_v39 = vpop.f32.mrf.mxu0 }
 0xc4c   :  { %v16639_v40 = vadd.f32 %v16638_v39, %v16637_v37  ;;  %v19303_v37 = vld [vmem:[%s22848_s26 + $0x6d8] ss:$12 sps:$4 sm:$0xff]  }
 0xc4d   :  { %v16640_v42 = vpop.f32.mrf.mxu0  ;;  %17727 = vmatpush3.bf16.msra.mxu0 %v19277_v62  ;;  %v19309_v39 = vld [vmem:[%s22848_s26 + $0x6c4] ss:$12 sps:$4 sm:$0xff]  }
 0xc4e   :  { %v4577_v43 = vadd.f32 %v16639_v40, %v4045_v38  ;;  %17728 = vmatprep.subr.bf16.mxu0 %v20879_v0  ;;  %v19306_v38 = vld [vmem:[%s22851_s0 + $0x88] sm:$0xff]   ;;  %v19310_v42 = vld [vmem:[%s22851_s0 + $0x80] sm:$0xff]   ;;  %v19341_v62 = vld [vmem:[%s22848_s26 + $0x7b0] ss:$12 sps:$4 sm:$0xff]  }
 0xc4f   :  { %v16641_v46 = vpop.f32.mrf.mxu0  ;;  %v19307_v40 = vld [vmem:[%s22848_s26 + $0x6c0] ss:$12 sps:$4 sm:$0xff]  }
 0xc50   :  { %v4617_v48 = vadd.f32 %v4616_v11, %v4577_v43  ;;  %v19313_v43 = vld [vmem:[%s22848_s26 + $0x82c] ss:$12 sps:$4 sm:$0xff]   ;;  %v19311_v46 = vld [vmem:[%s22848_s26 + $0x828] ss:$12 sps:$4 sm:$0xff]  }
 0xc51   :  { %17729 = vmatpush3.bf16.msra.mxu0 %v19278_v63  ;;  %v19349_v63 = vld [vmem:[%s22848_s26 + $0x79c] ss:$12 sps:$4 sm:$0xff]  }
 0xc52   :  { %vm4624_vm3 = vcmp.ge.f32.partialorder %v4617_v48, 0.0  ;;  %v4627_v49 = vmul.f32 0.2, %v4617_v48  ;;  %5678 = vmatprep.subr.bf16.mxu0 %v19281_v1  ;;  %v19347_v1 = vld [vmem:[%s22848_s26 + $0x798] ss:$12 sps:$4 sm:$0xff]  }
 0xc54   :  { %v4630_v50 = vsel %vm4624_vm3, %v4617_v48, %v4627_v49  ;;  %v19316_v48 = vld [vmem:[%s22848_s26 + $0x8ec] ss:$12 sps:$4 sm:$0xff]   ;;  %v19319_v49 = vld [vmem:[%s22848_s26 + $0x814] ss:$12 sps:$4 sm:$0xff]  }
 0xc55   :  { %v4633_v52 = vpack.c.bf16 %v4630_v50, %v4630_v50  ;;  %v19317_v50 = vld [vmem:[%s22848_s26 + $0x810] ss:$12 sps:$4 sm:$0xff]  }
 0xc57   :  { %17711 = vmatmul.mubr.bf16.vlgmr.msra.gmra.mxu1 %v4633_v52  ;;  %v19325_v52 = vld [vmem:[%s22848_s26 + $0x7fc] ss:$12 sps:$4 sm:$0xff]  }
 0xc58   :  { %17750 = vmatprep.mubr.msk.bf16.mxu1 %vm20880_vm0, %v20879_v0  ;;  %17735 = vmatpush3.bf16.msra.mxu1 %v19282_v3  ;;  %v19355_v3 = vld [vmem:[%s22848_s26 + $0x784] ss:$12 sps:$4 sm:$0xff]  }
 0xc59   :  { %17736 = vmatprep.subr.bf16.mxu1 %v20879_v0 }
 0xc5c   :  { %17737 = vmatpush3.bf16.msra.mxu1 %v19286_v5  ;;  %v15338_v5 = vld.sshfl [vmem:[%s22849_s28 + $0x9] sm:$0x13 pattern:$0x75316420] }
 0xc5d   :  { %17738 = vmatprep.subr.bf16.mxu1 %v20879_v0 }
 0xc60   :  { %17739 = vmatpush3.bf16.msra.mxu1 %v19290_v57  ;;  %v19353_v57 = vld [vmem:[%s22848_s26 + $0x780] ss:$12 sps:$4 sm:$0xff]  }
 0xc61   :  { %17740 = vmatprep.subr.bf16.mxu1 %v20879_v0 }
 0xc64   :  { %17741 = vmatpush3.bf16.msra.mxu1 %v19294_v7  ;;  %v5275_v7 = vcombine.high %v15338_v5, %v15338_v5 }
 0xc65   :  { %17742 = vmatprep.subr.bf16.mxu1 %v20879_v0 }
 0xc68   :  { %17743 = vmatpush3.bf16.msra.mxu1 %v19298_v8  ;;  %v21822_v8 = vrot.slane %v5275_v7, %v21335_v55  ;;  %v19384_v7 = vld [vmem:[#allocation4 + $0x278] sm:$0xff]  }
 0xc69   :  { %17744 = vmatprep.subr.bf16.mxu1 %v20879_v0 }
 0xc6c   :  { %17745 = vmatpush3.bf16.msra.mxu1 %v19302_v9  ;;  %v21825_v9 = vrot.slane %v15338_v5, %v21335_v55  ;;  %v19381_v5 = vld [vmem:[%s22848_s26 + $0x6c8] ss:$12 sps:$4 sm:$0xff]  }
 0xc6d   :  { %17746 = vmatprep.subr.bf16.mxu1 %v20879_v0 }
 0xc70   :  { %17747 = vmatpush3.bf16.msra.mxu1 %v19306_v38  ;;  %v19344_v38 = vld [vmem:[%s22848_s26 + $0x870] ss:$12 sps:$4 sm:$0xff]  }
 0xc71   :  { %17748 = vmatprep.subr.bf16.mxu1 %v20879_v0 }
 0xc74   :  { %17749 = vmatpush3.bf16.msra.mxu1 %v19310_v42  ;;  %v19358_v42 = vld [vmem:[%s22848_s26 + $0x844] ss:$12 sps:$4 sm:$0xff]  }
 0xc75   :  { %5719 = vmatprep.subr.bf16.mxu1 %v19316_v48  ;;  %v19360_v48 = vld [vmem:[%s22848_s26 + $0x770] ss:$12 sps:$4 sm:$0xff]  }
 0xcf4   :  { %v16668_v10 = vpop.f32.mrf.mxu0 }
 0xcf6   :  { %v16669_v11 = vpop.f32.mrf.mxu0 }
 0xcf7   :  { %v16670_v15 = vadd.f32 %v16669_v11, %v16668_v10  ;;  %v19361_v10 = vld [vmem:[%s22848_s26 + $0x8f0] ss:$12 sps:$4 sm:$0xff]   ;;  %v19364_v11 = vld [vmem:[%s22848_s26 + $0x8d8] ss:$12 sps:$4 sm:$0xff]  }
 0xcf8   :  { %v16671_v12 = vpop.f32.mrf.mxu0 }
 0xcf9   :  { %v4819_v16 = vadd.f32 %v16670_v15, %v15166_v18  ;;  %v19367_v12 = vld [vmem:[%s22848_s26 + $0x8c0] ss:$12 sps:$4 sm:$0xff]   ;;  %v19373_v15 = vld [vmem:[%s22848_s26 + $0x890] ss:$12 sps:$4 sm:$0xff]   ;;  %v19376_v18 = vld [vmem:[%s22848_s26 + $0x878] ss:$12 sps:$4 sm:$0xff]  }
 0xcfa   :  { %v16672_v14 = vpop.f32.mrf.mxu0 }
 0xcfb   :  { %v19370_v14 = vld [vmem:[%s22848_s26 + $0x8a8] ss:$12 sps:$4 sm:$0xff]  }
 0xd17   :  { %v4858_v17 = vpop.f32.mrf.mxu1 }
 0xd18   :  { %v4859_v19 = vadd.f32 %v4858_v17, %v4819_v16  ;;  %v19379_v16 = vld [vmem:[%s22848_s26 + $0x860] ss:$12 sps:$4 sm:$0xff]   ;;  %v19382_v17 = vld [vmem:[%s22848_s26 + $0x848] ss:$12 sps:$4 sm:$0xff]  }
 0xd19   :  { %v17712_v20 = vpop.f32.mrf.mxu1 }
 0xd1a   :  { %vm4864_vm4 = vcmp.ge.f32.partialorder %v4859_v19, 0.0  ;;  %v4865_v21 = vmul.f32 0.2, %v4859_v19  ;;  %v15191_v20 = vld [vmem:[#allocation7 + $0x2] ss:$0 sm:$0xff] }
 0xd1b   :  { %v4861_v22 = vpop.f32.mrf.mxu1 }
 0xd1c   :  { %v4866_v23 = vsel %vm4864_vm4, %v4859_v19, %v4865_v21  ;;  %v5290_v19 = vcombine.high %v21825_v9, %v21825_v9 }
 0xd1d   :  { %v4867_v25 = vpack.c.bf16 %v4866_v23, %v4866_v23  ;;  %v17713_v26 = vpop.f32.mrf.mxu1 }
 0xd1f   :  { %17731 = vmatmul.mubr.bf16.vlgmr.msra.gmra.mxu0 %v4867_v25 }
 0xd20   :  { %5679 = vmatpush1.bf16.msra.mxu0 %v19279_v24  ;;  %5710 = vmatprep.mubr.bf16.mxu0 %v21822_v8 }
 0xd21   :  { %5680 = vmatprep.subr.bf16.mxu0 %v19285_v27 }
 0xd24   :  { %5681 = vmatpush1.bf16.msra.mxu0 %v19283_v28 }
 0xd25   :  { %5682 = vmatprep.subr.bf16.mxu0 %v19289_v30  ;;  %v19314_v30 = vld [vmem:[%s22848_s26 + $0x8e8] ss:$12 sps:$4 sm:$0xff]  }
 0xd28   :  { %5683 = vmatpush1.bf16.msra.mxu0 %v19287_v60 }
 0xd29   :  { %5684 = vmatprep.subr.bf16.mxu0 %v19293_v2  ;;  %v19322_v2 = vld [vmem:[%s22848_s26 + $0x8d4] ss:$12 sps:$4 sm:$0xff]  }
 0xd2c   :  { %5685 = vmatpush1.bf16.msra.mxu0 %v19291_v31  ;;  %v19320_v31 = vld [vmem:[%s22848_s26 + $0x8d0] ss:$12 sps:$4 sm:$0xff]  }
 0xd2d   :  { %5686 = vmatprep.subr.bf16.mxu0 %v19297_v32  ;;  %v19328_v32 = vld [vmem:[%s22848_s26 + $0x8bc] ss:$12 sps:$4 sm:$0xff]  }
 0xd30   :  { %5687 = vmatpush1.bf16.msra.mxu0 %v19295_v29  ;;  %v19326_v29 = vld [vmem:[%s22848_s26 + $0x8b8] ss:$12 sps:$4 sm:$0xff]  }
 0xd31   :  { %5688 = vmatprep.subr.bf16.mxu0 %v19301_v33  ;;  %v19332_v33 = vld [vmem:[%s22848_s26 + $0x8a0] ss:$12 sps:$4 sm:$0xff]  }
 0xd34   :  { %5689 = vmatpush1.bf16.msra.mxu0 %v19299_v35  ;;  %v19340_v35 = vld [vmem:[%s22848_s26 + $0x88c] ss:$12 sps:$4 sm:$0xff]  }
 0xd35   :  { %5690 = vmatprep.subr.bf16.mxu0 %v19305_v36  ;;  %v19338_v36 = vld [vmem:[%s22848_s26 + $0x888] ss:$12 sps:$4 sm:$0xff]  }
 0xd38   :  { %5691 = vmatpush1.bf16.msra.mxu0 %v19303_v37  ;;  %v19346_v37 = vld [vmem:[%s22848_s26 + $0x874] ss:$12 sps:$4 sm:$0xff]  }
 0xd39   :  { %5692 = vmatprep.subr.bf16.mxu0 %v19309_v39  ;;  %v19352_v39 = vld [vmem:[%s22848_s26 + $0x85c] ss:$12 sps:$4 sm:$0xff]  }
 0xd3c   :  { %5693 = vmatpush1.bf16.msra.mxu0 %v19307_v40  ;;  %v19350_v40 = vld [vmem:[%s22848_s26 + $0x858] ss:$12 sps:$4 sm:$0xff]  }
 0xd3d   :  { %5694 = vmatprep.subr.bf16.mxu0 %v19313_v43  ;;  %v19356_v43 = vld [vmem:[%s22848_s26 + $0x840] ss:$12 sps:$4 sm:$0xff]  }
 0xd40   :  { %5695 = vmatpush2.bf16.msra.mxu0 %v19311_v46  ;;  %v19359_v46 = vld [vmem:[%s22848_s26 + $0x830] ss:$12 sps:$4 sm:$0xff]  }
 0xd41   :  { %5696 = vmatprep.subr.bf16.mxu0 %v19319_v49  ;;  %v19362_v49 = vld [vmem:[%s22848_s26 + $0x818] ss:$12 sps:$4 sm:$0xff]  }
 0xd44   :  { %5697 = vmatpush2.bf16.msra.mxu0 %v19317_v50  ;;  %v19363_v50 = vld [vmem:[%s22848_s26 + $0x758] ss:$12 sps:$4 sm:$0xff]  }
 0xd45   :  { %5698 = vmatprep.subr.bf16.mxu0 %v19325_v52  ;;  %v19365_v52 = vld [vmem:[%s22848_s26 + $0x800] ss:$12 sps:$4 sm:$0xff]  }
 0xd48   :  { %5699 = vmatpush2.bf16.msra.mxu0 %v19323_v53  ;;  %v19366_v53 = vld [vmem:[%s22848_s26 + $0x740] ss:$12 sps:$4 sm:$0xff]  }
 0xd49   :  { %5700 = vmatprep.subr.bf16.mxu0 %v19331_v44  ;;  %v19368_v44 = vld [vmem:[%s22848_s26 + $0x7e8] ss:$12 sps:$4 sm:$0xff]  }
 0xd4c   :  { %5701 = vmatpush2.bf16.msra.mxu0 %v19329_v54  ;;  %v19369_v54 = vld [vmem:[%s22848_s26 + $0x728] ss:$12 sps:$4 sm:$0xff]  }
 0xd4d   :  { %5702 = vmatprep.subr.bf16.mxu0 %v19337_v56  ;;  %v19371_v56 = vld [vmem:[%s22848_s26 + $0x7d0] ss:$12 sps:$4 sm:$0xff]  }
 0xd50   :  { %5703 = vmatpush2.bf16.msra.mxu0 %v19335_v4  ;;  %v19372_v4 = vld [vmem:[%s22848_s26 + $0x710] ss:$12 sps:$4 sm:$0xff]  }
 0xd51   :  { %5704 = vmatprep.subr.bf16.mxu0 %v19343_v58  ;;  %v19374_v58 = vld [vmem:[%s22848_s26 + $0x7b8] ss:$12 sps:$4 sm:$0xff]  }
 0xd54   :  { %5705 = vmatpush2.bf16.msra.mxu0 %v19341_v62  ;;  %v19375_v62 = vld [vmem:[%s22848_s26 + $0x6f8] ss:$12 sps:$4 sm:$0xff]  }
 0xd55   :  { %5706 = vmatprep.subr.bf16.mxu0 %v19349_v63  ;;  %v19377_v63 = vld [vmem:[%s22848_s26 + $0x7a0] ss:$12 sps:$4 sm:$0xff]  }
 0xd58   :  { %5707 = vmatpush2.bf16.msra.mxu0 %v19347_v1  ;;  %v19378_v1 = vld [vmem:[%s22848_s26 + $0x6e0] ss:$12 sps:$4 sm:$0xff]  }
 0xd59   :  { %5708 = vmatprep.subr.bf16.mxu0 %v19355_v3  ;;  %v19380_v3 = vld [vmem:[%s22848_s26 + $0x788] ss:$12 sps:$4 sm:$0xff]  }
 0xd5c   :  { %5709 = vmatpush2.bf16.msra.mxu0 %v19353_v57  ;;  %v19383_v57 = vld [vmem:[#allocation4 + $0x2b8] sm:$0xff]  }
 0xd5d   :  { %17754 = vmatprep.subr.bf16.mxu0 %v20879_v0 }
 0xd5f   :  { %5711 = vmatmul.mubr.bf16.vlgmr.msra.gmra.mxu0 %v21825_v9 }
 0xd60   :  { %17770 = vmatprep.mubr.msk.bf16.mxu0 %vm20880_vm0, %v20879_v0  ;;  %17755 = vmatpush3.bf16.msra.mxu0 %v19361_v10  ;;  %v19386_v10 = vld [vmem:[#allocation4 + $0x270] sm:$0xff]  }
 0xd61   :  { %17756 = vmatprep.subr.bf16.mxu0 %v20879_v0 }
 0xd64   :  { %17757 = vmatpush3.bf16.msra.mxu0 %v19364_v11  ;;  %v19387_v11 = vld [vmem:[#allocation4 + $0x2a8] sm:$0xff]  }
 0xd65   :  { %17758 = vmatprep.subr.bf16.mxu0 %v20879_v0 }
 0xd68   :  { %17759 = vmatpush3.bf16.msra.mxu0 %v19367_v12  ;;  %v19388_v12 = vld [vmem:[#allocation4 + $0x268] sm:$0xff]  }
 0xd69   :  { %17760 = vmatprep.subr.bf16.mxu0 %v20879_v0 }
 0xd6c   :  { %17761 = vmatpush3.bf16.msra.mxu0 %v19370_v14  ;;  %v19389_v14 = vld [vmem:[#allocation4 + $0x2a0] sm:$0xff]  }
 0xd6d   :  { %17762 = vmatprep.subr.bf16.mxu0 %v20879_v0 }
 0xd70   :  { %17763 = vmatpush3.bf16.msra.mxu0 %v19373_v15  ;;  %v19390_v15 = vld [vmem:[#allocation4 + $0x260] sm:$0xff]  }
 0xd71   :  { %17764 = vmatprep.subr.bf16.mxu0 %v20879_v0 }
 0xd74   :  { %17765 = vmatpush3.bf16.msra.mxu0 %v19376_v18  ;;  %v19391_v18 = vld [vmem:[#allocation4 + $0x298] sm:$0xff]  }
 0xd75   :  { %17766 = vmatprep.subr.bf16.mxu0 %v20879_v0 }
 0xd78   :  { %17767 = vmatpush3.bf16.msra.mxu0 %v19379_v16  ;;  %v19392_v16 = vld [vmem:[#allocation4 + $0x258] sm:$0xff]  }
 0xd79   :  { %17768 = vmatprep.subr.bf16.mxu0 %v20879_v0 }
 0xd7c   :  { %17769 = vmatpush3.bf16.msra.mxu0 %v19382_v17 }
 0xd7d   :  { %17774 = vmatprep.subr.bf16.mxu0 %v20879_v0 }
 0xd7f   :  { %17771 = vmatmul.mubr.bf16.vlgmr.msra.gmra.mxu0 %v5290_v19 }
 0xd80   :  { %17790 = vmatprep.mubr.msk.bf16.mxu0 %vm20880_vm0, %v20879_v0 }
 0xddf   :  { %v4956_v21 = vpop.f32.mrf.mxu0 }
 0xde0   :  { %v4957_v22 = vadd.f32 %v15191_v20, %v4956_v21  ;;  %v19395_v21 = vld [vmem:[#allocation4 + $0x288] sm:$0xff]  }
 0xde1   :  { %v17732_v23 = vpop.f32.mrf.mxu0 }
 0xde2   :  { %vm4962_vm5 = vcmp.ge.f32.partialorder %v4957_v22, 0.0  ;;  %v4963_v24 = vmul.f32 0.2, %v4957_v22 }
 0xde3   :  { %v4959_v25 = vpop.f32.mrf.mxu0 }
 0xde4   :  { %v4964_v26 = vsel %vm4962_vm5, %v4957_v22, %v4963_v24  ;;  %v19396_v22 = vld [vmem:[#allocation4 + $0x248] sm:$0xff]   ;;  %v19397_v25 = vld [vmem:[#allocation4 + $0x280] sm:$0xff]  }
 0xde5   :  { %v4965_v27 = vadd.f32 %v4964_v26, %v21748_v34  ;;  %v17733_v28 = vpop.f32.mrf.mxu0  ;;  %v19334_v34 = vld [vmem:[%s22848_s26 + $0x8a4] ss:$12 sps:$4 sm:$0xff]  }
 0xde6   :  { %v19398_v26 = vld [vmem:[#allocation4 + $0x240] sm:$0xff]   ;;  %v19400_v28 = vld [vmem:[#allocation4 + $0x2f0] sm:$0xff]  }
 0xde7   :  { %v4966_v60 = vpack.c.bf16 %v4965_v27, %v4965_v27  ;;  %v19399_v27 = vld [vmem:[#allocation4 + $0x2f8] sm:$0xff]  }
 0xde8   :  { %17775 = vmatpush3.bf16.msra.mxu0 %v19399_v27  ;;  %v19422_v27 = vld [vmem:[%s22851_s0 + $0xf0] sm:$0xff]  }
 0xde9   :  { %17751 = vmatmul.mubr.bf16.vlgmr.msra.gmra.mxu1 %v4966_v60  ;;  %17776 = vmatprep.subr.bf16.mxu0 %v20879_v0  ;;  %v19402_v60 = vld [vmem:[#allocation4 + $0x2e0] sm:$0xff]  }
 0xdea   :  { %5720 = vmatpush1.bf16.msra.mxu1 %v19314_v30  ;;  %5751 = vmatprep.mubr.bf16.mxu1 %v20882_v59  ;;  %v19401_v30 = vld [vmem:[#allocation4 + $0x2e8] sm:$0xff]  }
 0xdeb   :  { %5721 = vmatprep.subr.bf16.mxu1 %v19322_v2  ;;  %v19403_v2 = vld [vmem:[#allocation4 + $0x2d8] sm:$0xff]  }
 0xdec   :  { %17777 = vmatpush3.bf16.msra.mxu0 %v19400_v28  ;;  %v19426_v28 = vld [vmem:[%s22851_s0 + $0xe8] sm:$0xff]  }
 0xded   :  { %17778 = vmatprep.subr.bf16.mxu0 %v20879_v0 }
 0xdee   :  { %5722 = vmatpush1.bf16.msra.mxu1 %v19320_v31 }
 0xdef   :  { %5723 = vmatprep.subr.bf16.mxu1 %v19328_v32  ;;  %v19404_v32 = vld [vmem:[#allocation4 + $0x2d0] sm:$0xff]  }
 0xdf0   :  { %17779 = vmatpush3.bf16.msra.mxu0 %v19401_v30  ;;  %v19430_v30 = vld [vmem:[%s22851_s0 + $0xe0] sm:$0xff]  }
 0xdf1   :  { %17780 = vmatprep.subr.bf16.mxu0 %v20879_v0 }
 0xdf2   :  { %5724 = vmatpush1.bf16.msra.mxu1 %v19326_v29 }
 0xdf3   :  { %5725 = vmatprep.subr.bf16.mxu1 %v19334_v34 }
 0xdf4   :  { %17781 = vmatpush3.bf16.msra.mxu0 %v19402_v60  ;;  %v19434_v60 = vld [vmem:[%s22851_s0 + $0xd8] sm:$0xff]  }
 0xdf5   :  { %17782 = vmatprep.subr.bf16.mxu0 %v20879_v0 }
 0xdf6   :  { %5726 = vmatpush1.bf16.msra.mxu1 %v19332_v33  ;;  %v19405_v33 = vld [vmem:[#allocation4 + $0x2c8] sm:$0xff]  }
 0xdf7   :  { %5727 = vmatprep.subr.bf16.mxu1 %v19340_v35 }
 0xdf8   :  { %17783 = vmatpush3.bf16.msra.mxu0 %v19403_v2  ;;  %v19438_v2 = vld [vmem:[%s22851_s0 + $0xd0] sm:$0xff]  }
 0xdf9   :  { %17784 = vmatprep.subr.bf16.mxu0 %v20879_v0 }
 0xdfa   :  { %5728 = vmatpush1.bf16.msra.mxu1 %v19338_v36  ;;  %v19406_v36 = vld [vmem:[#allocation4 + $0x2c0] sm:$0xff]  }
 0xdfb   :  { %5729 = vmatprep.subr.bf16.mxu1 %v19346_v37 }
 0xdfc   :  { %17785 = vmatpush3.bf16.msra.mxu0 %v19404_v32 }
 0xdfd   :  { %17786 = vmatprep.subr.bf16.mxu0 %v20879_v0 }
 0xdfe   :  { %5730 = vmatpush1.bf16.msra.mxu1 %v19344_v38 }
 0xdff   :  { %5731 = vmatprep.subr.bf16.mxu1 %v19352_v39 }
 0xe00   :  { %17787 = vmatpush3.bf16.msra.mxu0 %v19405_v33 }
 0xe01   :  { %17788 = vmatprep.subr.bf16.mxu0 %v20879_v0 }
 0xe02   :  { %5732 = vmatpush1.bf16.msra.mxu1 %v19350_v40 }
 0xe03   :  { %5733 = vmatprep.subr.bf16.mxu1 %v19358_v42  ;;  %v5231_v42 = vld [vmem:[#allocation2 + $0x9] sm:$0x7] }
 0xe04   :  { %17789 = vmatpush3.bf16.msra.mxu0 %v19406_v36 }
 0xe05   :  { %17814 = vmatprep.subr.bf16.mxu0 %v20879_v0 }
 0xe06   :  { %5734 = vmatpush1.bf16.msra.mxu1 %v19356_v43  ;;  %v5255_v43 = vrot.slane %v5231_v42, %v21434_v45 }
 0xe07   :  { %16701 = vmatprep.subr.bf16.mxu1 %v19359_v46  ;;  %v5259_v46 = vrot.slane %v5231_v42, %v21437_v47 }
 0xe09   :  { %5752 = vmatmul.mubr.bf16.vlgmr.msra.gmra.mxu1 %v5290_v19  ;;  %v19394_v19 = vld [vmem:[#allocation4 + $0x250] sm:$0xff]  }
 0xe0a   :  { %16702 = vmatpush3.bf16.msra.mxu1 %v19360_v48  ;;  %5792 = vmatprep.mubr.bf16.mxu1 %v21822_v8  ;;  %v19385_v8 = vld [vmem:[#allocation4 + $0x2b0] sm:$0xff]  }
 0xe0b   :  { %16703 = vmatprep.subr.bf16.mxu1 %v19362_v49 }
 0xe0e   :  { %16704 = vmatpush3.bf16.msra.mxu1 %v19363_v50 }
 0xe0f   :  { %16705 = vmatprep.subr.bf16.mxu1 %v19365_v52 }
 0xe12   :  { %16706 = vmatpush3.bf16.msra.mxu1 %v19366_v53 }
 0xe13   :  { %16707 = vmatprep.subr.bf16.mxu1 %v19368_v44 }
 0xe16   :  { %16708 = vmatpush3.bf16.msra.mxu1 %v19369_v54 }
 0xe17   :  { %16709 = vmatprep.subr.bf16.mxu1 %v19371_v56 }
 0xe1a   :  { %16710 = vmatpush3.bf16.msra.mxu1 %v19372_v4 }
 0xe1b   :  { %16711 = vmatprep.subr.bf16.mxu1 %v19374_v58 }
 0xe1e   :  { %16712 = vmatpush3.bf16.msra.mxu1 %v19375_v62 }
 0xe1f   :  { %16713 = vmatprep.subr.bf16.mxu1 %v19377_v63  ;;  %v5712_v17 = vpop.f32.mrf.mxu0 }
 0xe20   :  { %v5713_v48 = vadd.f32 %v5712_v17, %v5255_v43  ;;  %v19408_v17 = vld [vmem:[%s22850_s6 + $0xf0] sm:$0xff]  }
 0xe21   :  { %v5714_v20 = vpop.f32.mrf.mxu0 }
 0xe22   :  { %16714 = vmatpush3.bf16.msra.mxu1 %v19378_v1  ;;  %v5715_v49 = vadd.f32 %v5714_v20, %v5259_v46  ;;  %v19410_v20 = vld [vmem:[%s22850_s6 + $0xe0] sm:$0xff]  }
 0xe23   :  { %16715 = vmatprep.subr.bf16.mxu1 %v19380_v3  ;;  %v5716_v23 = vpop.f32.mrf.mxu0 }
 0xe24   :  { %v19413_v23 = vld [vmem:[%s22850_s6 + $0xc8] sm:$0xff]  }
 0xe25   :  { %v5717_v24 = vpop.f32.mrf.mxu0 }
 0xe26   :  { %16716 = vmatpush3.bf16.msra.mxu1 %v19381_v5  ;;  %v19414_v24 = vld [vmem:[%s22850_s6 + $0xc0] sm:$0xff]  }
 0xe27   :  { %16732 = vmatprep.subr.bf16.mxu1 %v19383_v57  ;;  %v5263_v57 = vrot.slane %v5231_v42, %v21448_v6 }
 0xe29   :  { %5793 = vmatmul.mubr.bf16.vlgmr.msra.gmra.mxu1 %v21825_v9  ;;  %v19393_v9 = vld [vmem:[#allocation4 + $0x290] sm:$0xff]  }
 0xe2a   :  { %16733 = vmatpush3.bf16.msra.mxu1 %v19384_v7 }
 0xe2b   :  { %16734 = vmatprep.subr.bf16.mxu1 %v19385_v8 }
 0xe2e   :  { %16735 = vmatpush3.bf16.msra.mxu1 %v19386_v10 }
 0xe2f   :  { %16736 = vmatprep.subr.bf16.mxu1 %v19387_v11 }
 0xe32   :  { %16737 = vmatpush3.bf16.msra.mxu1 %v19388_v12 }
 0xe33   :  { %16738 = vmatprep.subr.bf16.mxu1 %v19389_v14 }
 0xe36   :  { %16739 = vmatpush3.bf16.msra.mxu1 %v19390_v15 }
 0xe37   :  { %16740 = vmatprep.subr.bf16.mxu1 %v19391_v18 }
 0xe3a   :  { %16741 = vmatpush3.bf16.msra.mxu1 %v19392_v16 }
 0xe3b   :  { %16742 = vmatprep.subr.bf16.mxu1 %v19393_v9  ;;  %v19407_v9 = vld [vmem:[%s22850_s6 + $0xf8] sm:$0xff]  }
 0xe3e   :  { %16743 = vmatpush3.bf16.msra.mxu1 %v19394_v19  ;;  %v19409_v19 = vld [vmem:[%s22850_s6 + $0xe8] sm:$0xff]  }
 0xe3f   :  { %16744 = vmatprep.subr.bf16.mxu1 %v19395_v21  ;;  %v5834_v31 = vpop.f32.mrf.mxu0  ;;  %v19411_v21 = vld [vmem:[%s22850_s6 + $0xd8] sm:$0xff]  }
 0xe41   :  { %v17772_v29 = vpop.f32.mrf.mxu0 }
 0xe42   :  { %16745 = vmatpush3.bf16.msra.mxu1 %v19396_v22  ;;  %v19412_v22 = vld [vmem:[%s22850_s6 + $0xd0] sm:$0xff]  }
 0xe43   :  { %16746 = vmatprep.subr.bf16.mxu1 %v19397_v25  ;;  %v5837_v34 = vpop.f32.mrf.mxu0  ;;  %v19417_v25 = vld [vmem:[%s22848_s26 + $0x9ac] ss:$12 sps:$4 sm:$0xff]  }
 0xe45   :  { %v17773_v35 = vpop.f32.mrf.mxu0 }
 0xe46   :  { %16747 = vmatpush3.bf16.msra.mxu1 %v19398_v26  ;;  %v19418_v26 = vld [vmem:[%s22851_s0 + $0xf8] sm:$0xff]   ;;  %v15411_v35 = vld [vmem:[#allocation6 + $0x3] ss:$0 sm:$0xff] }
 0xe47   :  { %17794 = vmatprep.subr.bf16.mxu1 %v20879_v0 }
 0xea9   :  { %v21896_v37 = vpop.f32.mrf.mxu1 }
 0xeab   :  { %v17752_v38 = vpop.f32.mrf.mxu1 }
 0xead   :  { %v5058_v39 = vpop.f32.mrf.mxu1 }
 0xeaf   :  { %v17753_v40 = vpop.f32.mrf.mxu1 }
 0xec9   :  { %v5753_v50 = vpop.f32.mrf.mxu1 }
 0xeca   :  { %v5754_v52 = vadd.f32 %v5753_v50, %v5713_v48  ;;  %v19415_v48 = vld [vmem:[%s22848_s26 + $0x9a8] ss:$12 sps:$4 sm:$0xff]  }
 0xecb   :  { %v5755_v53 = vpop.f32.mrf.mxu1 }
 0xecc   :  { %vm5840_vm6 = vcmp.ge.f32.partialorder %v5754_v52, 0.0  ;;  %v5843_v44 = vmul.f32 0.2, %v5754_v52  ;;  %v5756_v54 = vadd.f32 %v5755_v53, %v5715_v49  ;;  %v19419_v53 = vld [vmem:[%s22848_s26 + $0x990] ss:$12 sps:$4 sm:$0xff]  }
 0xecd   :  { %v5757_v56 = vpop.f32.mrf.mxu1 }
 0xece   :  { %vm5841_vm7 = vcmp.ge.f32.partialorder %v5756_v54, 0.0  ;;  %v5844_v4 = vmul.f32 0.2, %v5756_v54  ;;  %v5846_v58 = vsel %vm5840_vm6, %v5754_v52, %v5843_v44  ;;  %v19421_v52 = vld [vmem:[%s22848_s26 + $0x994] ss:$12 sps:$4 sm:$0xff]  }
 0xecf   :  { %v5758_v62 = vpop.f32.mrf.mxu1  ;;  %v5849_v3 = vpack.c.bf16 %v5846_v58, %v5846_v58  ;;  %v19425_v44 = vld [vmem:[%s22848_s26 + $0x97c] ss:$12 sps:$4 sm:$0xff]   ;;  %v19429_v56 = vld [vmem:[%s22848_s26 + $0x964] ss:$12 sps:$4 sm:$0xff]   ;;  %v19433_v58 = vld [vmem:[%s22848_s26 + $0x94c] ss:$12 sps:$4 sm:$0xff]  }
 0xed0   :  { %v21900_v63 = vsel %vm5841_vm7, %v5756_v54, %v5844_v4  ;;  %v19423_v54 = vld [vmem:[%s22848_s26 + $0x978] ss:$12 sps:$4 sm:$0xff]   ;;  %v19427_v4 = vld [vmem:[%s22848_s26 + $0x960] ss:$12 sps:$4 sm:$0xff]   ;;  %v19431_v62 = vld [vmem:[%s22848_s26 + $0x948] ss:$12 sps:$4 sm:$0xff]  }
 0xed1   :  { %v5850_v1 = vpack.c.bf16 %v21900_v63, %v21900_v63 }
 0xed3   :  { %6034 = vmatprep.mubr.bf16.mxu1 %v5850_v1  ;;  %v19437_v1 = vld [vmem:[%s22848_s26 + $0x934] ss:$12 sps:$4 sm:$0xff]  }
 0xed4   :  { %6035 = vmatmul.mubr.bf16.vlgmr.msra.gmra.mxu1 %v5849_v3  ;;  %v19435_v3 = vld [vmem:[%s22848_s26 + $0x930] ss:$12 sps:$4 sm:$0xff]  }
 0xed5   :  { %17810 = vmatprep.mubr.msk.bf16.mxu1 %vm20880_vm0, %v20879_v0  ;;  %17795 = vmatpush3.bf16.msra.mxu1 %v19407_v9  ;;  %v19461_v9 = vld [vmem:[%s22848_s26 + $0xa3c] ss:$12 sps:$4 sm:$0xff]  }
 0xed6   :  { %17796 = vmatprep.subr.bf16.mxu1 %v20879_v0 }
 0xed9   :  { %17797 = vmatpush3.bf16.msra.mxu1 %v19408_v17  ;;  %v19459_v17 = vld [vmem:[%s22848_s26 + $0xa38] ss:$12 sps:$4 sm:$0xff]  }
 0xeda   :  { %17798 = vmatprep.subr.bf16.mxu1 %v20879_v0 }
 0xedd   :  { %17799 = vmatpush3.bf16.msra.mxu1 %v19409_v19  ;;  %v19467_v19 = vld [vmem:[%s22848_s26 + $0xa24] ss:$12 sps:$4 sm:$0xff]  }
 0xede   :  { %17800 = vmatprep.subr.bf16.mxu1 %v20879_v0 }
 0xee1   :  { %17801 = vmatpush3.bf16.msra.mxu1 %v19410_v20  ;;  %v19465_v20 = vld [vmem:[%s22848_s26 + $0xa20] ss:$12 sps:$4 sm:$0xff]  }
 0xee2   :  { %17802 = vmatprep.subr.bf16.mxu1 %v20879_v0 }
 0xee5   :  { %17803 = vmatpush3.bf16.msra.mxu1 %v19411_v21  ;;  %v19473_v21 = vld [vmem:[%s22848_s26 + $0xa0c] ss:$12 sps:$4 sm:$0xff]  }
 0xee6   :  { %17804 = vmatprep.subr.bf16.mxu1 %v20879_v0 }
 0xee9   :  { %v16717_v5 = vpop.f32.mrf.mxu1  ;;  %17805 = vmatpush3.bf16.msra.mxu1 %v19412_v22  ;;  %v19471_v22 = vld [vmem:[%s22848_s26 + $0xa08] ss:$12 sps:$4 sm:$0xff]  }
 0xeea   :  { %17806 = vmatprep.subr.bf16.mxu1 %v20879_v0 }
 0xeeb   :  { %v16718_v7 = vpop.f32.mrf.mxu1 }
 0xeec   :  { %v16719_v8 = vadd.f32 %v16718_v7, %v16717_v5  ;;  %v19441_v5 = vld [vmem:[%s22848_s26 + $0x91c] ss:$12 sps:$4 sm:$0xff]  }
 0xeed   :  { %v16720_v10 = vpop.f32.mrf.mxu1  ;;  %17807 = vmatpush3.bf16.msra.mxu1 %v19413_v23  ;;  %v19442_v7 = vld [vmem:[%s22851_s0 + $0xc8] sm:$0xff]   ;;  %v19479_v23 = vld [vmem:[%s22848_s26 + $0x9f4] ss:$12 sps:$4 sm:$0xff]  }
 0xeee   :  { %v5795_v11 = vadd.f32 %v16719_v8, %v5263_v57  ;;  %17808 = vmatprep.subr.bf16.mxu1 %v20879_v0  ;;  %v19439_v57 = vld [vmem:[%s22848_s26 + $0x918] ss:$12 sps:$4 sm:$0xff]   ;;  %v19443_v10 = vld [vmem:[%s22848_s26 + $0x900] ss:$12 sps:$4 sm:$0xff]  }
 0xeef   :  { %v16721_v12 = vpop.f32.mrf.mxu1  ;;  %v19445_v8 = vld [vmem:[%s22848_s26 + $0x904] ss:$12 sps:$4 sm:$0xff]  }
 0xef0   :  { %v5835_v14 = vadd.f32 %v5834_v31, %v5795_v11  ;;  %v19446_v11 = vld [vmem:[%s22851_s0 + $0xc0] sm:$0xff]   ;;  %v19449_v12 = vld [vmem:[%s22848_s26 + $0xa6c] ss:$12 sps:$4 sm:$0xff]  }
 0xef1   :  { %17809 = vmatpush3.bf16.msra.mxu1 %v19414_v24  ;;  %v19477_v24 = vld [vmem:[%s22848_s26 + $0x9f0] ss:$12 sps:$4 sm:$0xff]  }
 0xef2   :  { %vm5842_vm8 = vcmp.ge.f32.partialorder %v5835_v14, 0.0  ;;  %v5845_v15 = vmul.f32 0.2, %v5835_v14  ;;  %6896 = vmatprep.subr.bf16.mxu1 %v19417_v25  ;;  %v19485_v25 = vld [vmem:[%s22848_s26 + $0x9dc] ss:$12 sps:$4 sm:$0xff]  }
 0xef4   :  { %v5848_v18 = vsel %vm5842_vm8, %v5835_v14, %v5845_v15  ;;  %v19447_v14 = vld [vmem:[%s22848_s26 + $0xa68] ss:$12 sps:$4 sm:$0xff]   ;;  %v19452_v15 = vld [vmem:[%s22848_s26 + $0xb2c] ss:$12 sps:$4 sm:$0xff]  }
 0xef5   :  { %v5851_v16 = vpack.c.bf16 %v5848_v18, %v5848_v18  ;;  %v19455_v18 = vld [vmem:[%s22848_s26 + $0xa54] ss:$12 sps:$4 sm:$0xff]  }
 0xef7   :  { %17791 = vmatmul.mubr.bf16.vlgmr.msra.gmra.mxu0 %v5851_v16  ;;  %v19453_v16 = vld [vmem:[%s22848_s26 + $0xa50] ss:$12 sps:$4 sm:$0xff]  }
 0xef8   :  { %17830 = vmatprep.mubr.msk.bf16.mxu0 %vm20880_vm0, %v20879_v0  ;;  %17815 = vmatpush3.bf16.msra.mxu0 %v19418_v26  ;;  %v19483_v26 = vld [vmem:[%s22848_s26 + $0x9d8] ss:$12 sps:$4 sm:$0xff]  }
 0xef9   :  { %17816 = vmatprep.subr.bf16.mxu0 %v20879_v0 }
 0xefc   :  { %17817 = vmatpush3.bf16.msra.mxu0 %v19422_v27  ;;  %v19491_v27 = vld [vmem:[%s22848_s26 + $0x9c4] ss:$12 sps:$4 sm:$0xff]  }
 0xefd   :  { %17818 = vmatprep.subr.bf16.mxu0 %v20879_v0 }
 0xf00   :  { %17819 = vmatpush3.bf16.msra.mxu0 %v19426_v28  ;;  %v15583_v28 = vld.sshfl [vmem:[%s22849_s28 + $0xc] sm:$0x13 pattern:$0x75316420] }
 0xf01   :  { %17820 = vmatprep.subr.bf16.mxu0 %v20879_v0 }
 0xf04   :  { %17821 = vmatpush3.bf16.msra.mxu0 %v19430_v30  ;;  %v19489_v30 = vld [vmem:[%s22848_s26 + $0x9c0] ss:$12 sps:$4 sm:$0xff]  }
 0xf05   :  { %17822 = vmatprep.subr.bf16.mxu0 %v20879_v0 }
 0xf08   :  { %17823 = vmatpush3.bf16.msra.mxu0 %v19434_v60  ;;  %v6493_v60 = vcombine.high %v15583_v28, %v15583_v28 }
 0xf09   :  { %17824 = vmatprep.subr.bf16.mxu0 %v20879_v0 }
 0xf0c   :  { %17825 = vmatpush3.bf16.msra.mxu0 %v19438_v2  ;;  %v21974_v2 = vrot.slane %v6493_v60, %v21335_v55  ;;  %v19520_v60 = vld [vmem:[#allocation4 + $0x338] sm:$0xff]  }
 0xf0d   :  { %17826 = vmatprep.subr.bf16.mxu0 %v20879_v0 }
 0xf10   :  { %17827 = vmatpush3.bf16.msra.mxu0 %v19442_v7  ;;  %v19480_v7 = vld [vmem:[%s22848_s26 + $0xab0] ss:$12 sps:$4 sm:$0xff]  }
 0xf11   :  { %17828 = vmatprep.subr.bf16.mxu0 %v20879_v0 }
 0xf14   :  { %17829 = vmatpush3.bf16.msra.mxu0 %v19446_v11  ;;  %v19494_v11 = vld [vmem:[%s22848_s26 + $0xa84] ss:$12 sps:$4 sm:$0xff]  }
 0xf15   :  { %6937 = vmatprep.subr.bf16.mxu0 %v19452_v15  ;;  %v19496_v15 = vld [vmem:[%s22848_s26 + $0x9b0] ss:$12 sps:$4 sm:$0xff]  }
 0xf94   :  { %v16748_v31 = vpop.f32.mrf.mxu1 }
 0xf96   :  { %v16749_v32 = vpop.f32.mrf.mxu1 }
 0xf97   :  { %v16750_v33 = vadd.f32 %v16749_v32, %v16748_v31  ;;  %v21977_v31 = vrot.slane %v15583_v28, %v21335_v55  ;;  %v19497_v32 = vld [vmem:[%s22848_s26 + $0xb30] ss:$12 sps:$4 sm:$0xff]   ;;  %v19503_v55 = vld [vmem:[%s22848_s26 + $0xb00] ss:$12 sps:$4 sm:$0xff]   ;;  %v19517_v28 = vld [vmem:[%s22848_s26 + $0x908] ss:$12 sps:$4 sm:$0xff]  }
 0xf98   :  { %v16751_v29 = vpop.f32.mrf.mxu1 }
 0xf99   :  { %v6037_v36 = vadd.f32 %v16750_v33, %v15411_v35  ;;  %v19500_v29 = vld [vmem:[%s22848_s26 + $0xb18] ss:$12 sps:$4 sm:$0xff]   ;;  %v19509_v33 = vld [vmem:[%s22848_s26 + $0xad0] ss:$12 sps:$4 sm:$0xff]  }
 0xf9a   :  { %v16752_v34 = vpop.f32.mrf.mxu1  ;;  %v19512_v35 = vld [vmem:[%s22848_s26 + $0xab8] ss:$12 sps:$4 sm:$0xff]  }
 0xf9b   :  { %v19506_v34 = vld [vmem:[%s22848_s26 + $0xae8] ss:$12 sps:$4 sm:$0xff]  }
 0xfb7   :  { %v6076_v38 = vpop.f32.mrf.mxu0 }
 0xfb8   :  { %v6077_v39 = vadd.f32 %v6076_v38, %v6037_v36  ;;  %v19515_v36 = vld [vmem:[%s22848_s26 + $0xaa0] ss:$12 sps:$4 sm:$0xff]   ;;  %v19518_v38 = vld [vmem:[%s22848_s26 + $0xa88] ss:$12 sps:$4 sm:$0xff]  }
 0xfb9   :  { %v17792_v40 = vpop.f32.mrf.mxu0 }
 0xfba   :  { %vm6082_vm9 = vcmp.ge.f32.partialorder %v6077_v39, 0.0  ;;  %v6083_v42 = vmul.f32 0.2, %v6077_v39  ;;  %v15436_v40 = vld [vmem:[#allocation7 + $0x3] ss:$0 sm:$0xff] }
 0xfbb   :  { %v6079_v43 = vpop.f32.mrf.mxu0 }
 0xfbc   :  { %v6084_v46 = vsel %vm6082_vm9, %v6077_v39, %v6083_v42  ;;  %v6508_v39 = vcombine.high %v21977_v31, %v21977_v31 }
 0xfbd   :  { %v6085_v49 = vpack.c.bf16 %v6084_v46, %v6084_v46  ;;  %v17793_v50 = vpop.f32.mrf.mxu0 }
 0xfbf   :  { %17811 = vmatmul.mubr.bf16.vlgmr.msra.gmra.mxu1 %v6085_v49 }
 0xfc0   :  { %6897 = vmatpush1.bf16.msra.mxu1 %v19415_v48  ;;  %6928 = vmatprep.mubr.bf16.mxu1 %v21974_v2 }
 0xfc1   :  { %6898 = vmatprep.subr.bf16.mxu1 %v19421_v52 }
 0xfc4   :  { %6899 = vmatpush1.bf16.msra.mxu1 %v19419_v53 }
 0xfc5   :  { %6900 = vmatprep.subr.bf16.mxu1 %v19425_v44  ;;  %v19450_v44 = vld [vmem:[%s22848_s26 + $0xb28] ss:$12 sps:$4 sm:$0xff]  }
 0xfc8   :  { %6901 = vmatpush1.bf16.msra.mxu1 %v19423_v54 }
 0xfc9   :  { %6902 = vmatprep.subr.bf16.mxu1 %v19429_v56  ;;  %v19458_v56 = vld [vmem:[%s22848_s26 + $0xb14] ss:$12 sps:$4 sm:$0xff]  }
 0xfcc   :  { %6903 = vmatpush1.bf16.msra.mxu1 %v19427_v4  ;;  %v19456_v4 = vld [vmem:[%s22848_s26 + $0xb10] ss:$12 sps:$4 sm:$0xff]  }
 0xfcd   :  { %6904 = vmatprep.subr.bf16.mxu1 %v19433_v58  ;;  %v19464_v58 = vld [vmem:[%s22848_s26 + $0xafc] ss:$12 sps:$4 sm:$0xff]  }
 0xfd0   :  { %6905 = vmatpush1.bf16.msra.mxu1 %v19431_v62  ;;  %v19462_v62 = vld [vmem:[%s22848_s26 + $0xaf8] ss:$12 sps:$4 sm:$0xff]  }
 0xfd1   :  { %6906 = vmatprep.subr.bf16.mxu1 %v19437_v1  ;;  %v19468_v1 = vld [vmem:[%s22848_s26 + $0xae0] ss:$12 sps:$4 sm:$0xff]  }
 0xfd4   :  { %6907 = vmatpush1.bf16.msra.mxu1 %v19435_v3  ;;  %v19476_v3 = vld [vmem:[%s22848_s26 + $0xacc] ss:$12 sps:$4 sm:$0xff]  }
 0xfd5   :  { %6908 = vmatprep.subr.bf16.mxu1 %v19441_v5  ;;  %v19474_v5 = vld [vmem:[%s22848_s26 + $0xac8] ss:$12 sps:$4 sm:$0xff]  }
 0xfd8   :  { %6909 = vmatpush1.bf16.msra.mxu1 %v19439_v57  ;;  %v19482_v57 = vld [vmem:[%s22848_s26 + $0xab4] ss:$12 sps:$4 sm:$0xff]  }
 0xfd9   :  { %6910 = vmatprep.subr.bf16.mxu1 %v19445_v8  ;;  %v19488_v8 = vld [vmem:[%s22848_s26 + $0xa9c] ss:$12 sps:$4 sm:$0xff]  }
 0xfdc   :  { %6911 = vmatpush1.bf16.msra.mxu1 %v19443_v10  ;;  %v19486_v10 = vld [vmem:[%s22848_s26 + $0xa98] ss:$12 sps:$4 sm:$0xff]  }
 0xfdd   :  { %6912 = vmatprep.subr.bf16.mxu1 %v19449_v12  ;;  %v19492_v12 = vld [vmem:[%s22848_s26 + $0xa80] ss:$12 sps:$4 sm:$0xff]  }
 0xfe0   :  { %6913 = vmatpush2.bf16.msra.mxu1 %v19447_v14  ;;  %v19495_v14 = vld [vmem:[%s22848_s26 + $0xa70] ss:$12 sps:$4 sm:$0xff]  }
 0xfe1   :  { %6914 = vmatprep.subr.bf16.mxu1 %v19455_v18  ;;  %v19498_v18 = vld [vmem:[%s22848_s26 + $0xa58] ss:$12 sps:$4 sm:$0xff]  }
 0xfe4   :  { %6915 = vmatpush2.bf16.msra.mxu1 %v19453_v16  ;;  %v19499_v16 = vld [vmem:[%s22848_s26 + $0x998] ss:$12 sps:$4 sm:$0xff]  }
 0xfe5   :  { %6916 = vmatprep.subr.bf16.mxu1 %v19461_v9  ;;  %v19501_v9 = vld [vmem:[%s22848_s26 + $0xa40] ss:$12 sps:$4 sm:$0xff]  }
 0xfe8   :  { %6917 = vmatpush2.bf16.msra.mxu1 %v19459_v17  ;;  %v19502_v17 = vld [vmem:[%s22848_s26 + $0x980] ss:$12 sps:$4 sm:$0xff]  }
 0xfe9   :  { %6918 = vmatprep.subr.bf16.mxu1 %v19467_v19  ;;  %v19504_v19 = vld [vmem:[%s22848_s26 + $0xa28] ss:$12 sps:$4 sm:$0xff]  }
 0xfec   :  { %6919 = vmatpush2.bf16.msra.mxu1 %v19465_v20  ;;  %v19505_v20 = vld [vmem:[%s22848_s26 + $0x968] ss:$12 sps:$4 sm:$0xff]  }
 0xfed   :  { %6920 = vmatprep.subr.bf16.mxu1 %v19473_v21  ;;  %v19507_v21 = vld [vmem:[%s22848_s26 + $0xa10] ss:$12 sps:$4 sm:$0xff]  }
 0xff0   :  { %6921 = vmatpush2.bf16.msra.mxu1 %v19471_v22  ;;  %v19508_v22 = vld [vmem:[%s22848_s26 + $0x950] ss:$12 sps:$4 sm:$0xff]  }
 0xff1   :  { %6922 = vmatprep.subr.bf16.mxu1 %v19479_v23  ;;  %v19510_v23 = vld [vmem:[%s22848_s26 + $0x9f8] ss:$12 sps:$4 sm:$0xff]  }
 0xff4   :  { %6923 = vmatpush2.bf16.msra.mxu1 %v19477_v24  ;;  %v19511_v24 = vld [vmem:[%s22848_s26 + $0x938] ss:$12 sps:$4 sm:$0xff]  }
 0xff5   :  { %6924 = vmatprep.subr.bf16.mxu1 %v19485_v25  ;;  %v19513_v25 = vld [vmem:[%s22848_s26 + $0x9e0] ss:$12 sps:$4 sm:$0xff]  }
 0xff8   :  { %6925 = vmatpush2.bf16.msra.mxu1 %v19483_v26  ;;  %v19514_v26 = vld [vmem:[%s22848_s26 + $0x920] ss:$12 sps:$4 sm:$0xff]  }
 0xff9   :  { %6926 = vmatprep.subr.bf16.mxu1 %v19491_v27  ;;  %v19516_v27 = vld [vmem:[%s22848_s26 + $0x9c8] ss:$12 sps:$4 sm:$0xff]  }
 0xffc   :  { %6927 = vmatpush2.bf16.msra.mxu1 %v19489_v30  ;;  %v19519_v30 = vld [vmem:[#allocation4 + $0x378] sm:$0xff]  }
 0xffd   :  { %17834 = vmatprep.subr.bf16.mxu1 %v20879_v0 }
 0xfff   :  { %6929 = vmatmul.mubr.bf16.vlgmr.msra.gmra.mxu1 %v21977_v31 }
0x1000   :  { %17850 = vmatprep.mubr.msk.bf16.mxu1 %vm20880_vm0, %v20879_v0  ;;  %17835 = vmatpush3.bf16.msra.mxu1 %v19497_v32  ;;  %v19522_v32 = vld [vmem:[#allocation4 + $0x330] sm:$0xff]  }
0x1001   :  { %17836 = vmatprep.subr.bf16.mxu1 %v20879_v0 }
0x1004   :  { %17837 = vmatpush3.bf16.msra.mxu1 %v19500_v29  ;;  %v19523_v29 = vld [vmem:[#allocation4 + $0x368] sm:$0xff]  }
0x1005   :  { %17838 = vmatprep.subr.bf16.mxu1 %v20879_v0 }
0x1008   :  { %17839 = vmatpush3.bf16.msra.mxu1 %v19503_v55  ;;  %v19524_v55 = vld [vmem:[#allocation4 + $0x328] sm:$0xff]  }
0x1009   :  { %17840 = vmatprep.subr.bf16.mxu1 %v20879_v0 }
0x100c   :  { %17841 = vmatpush3.bf16.msra.mxu1 %v19506_v34  ;;  %v19525_v34 = vld [vmem:[#allocation4 + $0x360] sm:$0xff]  }
0x100d   :  { %17842 = vmatprep.subr.bf16.mxu1 %v20879_v0 }
0x1010   :  { %17843 = vmatpush3.bf16.msra.mxu1 %v19509_v33  ;;  %v19526_v33 = vld [vmem:[#allocation4 + $0x320] sm:$0xff]  }
0x1011   :  { %17844 = vmatprep.subr.bf16.mxu1 %v20879_v0 }
0x1014   :  { %17845 = vmatpush3.bf16.msra.mxu1 %v19512_v35  ;;  %v19527_v35 = vld [vmem:[#allocation4 + $0x358] sm:$0xff]  }
0x1015   :  { %17846 = vmatprep.subr.bf16.mxu1 %v20879_v0 }
0x1018   :  { %17847 = vmatpush3.bf16.msra.mxu1 %v19515_v36  ;;  %v19528_v36 = vld [vmem:[#allocation4 + $0x318] sm:$0xff]  }
0x1019   :  { %17848 = vmatprep.subr.bf16.mxu1 %v20879_v0 }
0x101c   :  { %17849 = vmatpush3.bf16.msra.mxu1 %v19518_v38 }
0x101d   :  { %17854 = vmatprep.subr.bf16.mxu1 %v20879_v0 }
0x101f   :  { %17851 = vmatmul.mubr.bf16.vlgmr.msra.gmra.mxu1 %v6508_v39 }
0x1020   :  { %17870 = vmatprep.mubr.msk.bf16.mxu1 %vm20880_vm0, %v20879_v0 }
0x107f   :  { %v6174_v42 = vpop.f32.mrf.mxu1 }
0x1080   :  { %v6175_v43 = vadd.f32 %v15436_v40, %v6174_v42  ;;  %v19531_v42 = vld [vmem:[#allocation4 + $0x348] sm:$0xff]  }
0x1081   :  { %v17812_v46 = vpop.f32.mrf.mxu1 }
0x1082   :  { %vm6180_vm10 = vcmp.ge.f32.partialorder %v6175_v43, 0.0  ;;  %v6181_v48 = vmul.f32 0.2, %v6175_v43 }
0x1083   :  { %v6177_v49 = vpop.f32.mrf.mxu1 }
0x1084   :  { %v6182_v50 = vsel %vm6180_vm10, %v6175_v43, %v6181_v48  ;;  %v19532_v43 = vld [vmem:[#allocation4 + $0x308] sm:$0xff]   ;;  %v19533_v49 = vld [vmem:[#allocation4 + $0x340] sm:$0xff]  }
0x1085   :  { %v6183_v52 = vadd.f32 %v6182_v50, %v21900_v63  ;;  %v17813_v53 = vpop.f32.mrf.mxu1  ;;  %v19470_v63 = vld [vmem:[%s22848_s26 + $0xae4] ss:$12 sps:$4 sm:$0xff]  }
0x1086   :  { %v19534_v50 = vld [vmem:[#allocation4 + $0x300] sm:$0xff]   ;;  %v19536_v53 = vld [vmem:[#allocation4 + $0x3b0] sm:$0xff]  }
0x1087   :  { %v6184_v54 = vpack.c.bf16 %v6183_v52, %v6183_v52  ;;  %v19535_v52 = vld [vmem:[#allocation4 + $0x3b8] sm:$0xff]  }
0x1088   :  { %17855 = vmatpush3.bf16.msra.mxu1 %v19535_v52  ;;  %v19552_v52 = vld [vmem:[%s22851_s0 + $0x130] sm:$0xff]  }
0x1089   :  { %17831 = vmatmul.mubr.bf16.vlgmr.msra.gmra.mxu0 %v6184_v54  ;;  %17856 = vmatprep.subr.bf16.mxu1 %v20879_v0  ;;  %v19538_v54 = vld [vmem:[#allocation4 + $0x3a0] sm:$0xff]  }
0x108a   :  { %6938 = vmatpush1.bf16.msra.mxu0 %v19450_v44  ;;  %6969 = vmatprep.mubr.bf16.mxu0 %v20882_v59  ;;  %v19537_v44 = vld [vmem:[#allocation4 + $0x3a8] sm:$0xff]  }
0x108b   :  { %6939 = vmatprep.subr.bf16.mxu0 %v19458_v56  ;;  %v19539_v56 = vld [vmem:[#allocation4 + $0x398] sm:$0xff]  }
0x108c   :  { %17857 = vmatpush3.bf16.msra.mxu1 %v19536_v53  ;;  %v19553_v53 = vld [vmem:[%s22851_s0 + $0x128] sm:$0xff]  }
0x108d   :  { %17858 = vmatprep.subr.bf16.mxu1 %v20879_v0 }
0x108e   :  { %6940 = vmatpush1.bf16.msra.mxu0 %v19456_v4 }
0x108f   :  { %6941 = vmatprep.subr.bf16.mxu0 %v19464_v58  ;;  %v19540_v58 = vld [vmem:[#allocation4 + $0x390] sm:$0xff]  }
0x1090   :  { %17859 = vmatpush3.bf16.msra.mxu1 %v19537_v44  ;;  %v19557_v44 = vld [vmem:[%s22851_s0 + $0x120] sm:$0xff]  }
0x1091   :  { %17860 = vmatprep.subr.bf16.mxu1 %v20879_v0 }
0x1092   :  { %6942 = vmatpush1.bf16.msra.mxu0 %v19462_v62 }
0x1093   :  { %6943 = vmatprep.subr.bf16.mxu0 %v19470_v63 }
0x1094   :  { %17861 = vmatpush3.bf16.msra.mxu1 %v19538_v54  ;;  %v19561_v54 = vld [vmem:[%s22851_s0 + $0x118] sm:$0xff]  }
0x1095   :  { %17862 = vmatprep.subr.bf16.mxu1 %v20879_v0 }
0x1096   :  { %6944 = vmatpush1.bf16.msra.mxu0 %v19468_v1  ;;  %v19541_v1 = vld [vmem:[#allocation4 + $0x388] sm:$0xff]  }
0x1097   :  { %6945 = vmatprep.subr.bf16.mxu0 %v19476_v3 }
0x1098   :  { %17863 = vmatpush3.bf16.msra.mxu1 %v19539_v56  ;;  %v19565_v56 = vld [vmem:[%s22851_s0 + $0x110] sm:$0xff]  }
0x1099   :  { %17864 = vmatprep.subr.bf16.mxu1 %v20879_v0 }
0x109a   :  { %6946 = vmatpush1.bf16.msra.mxu0 %v19474_v5  ;;  %v19542_v5 = vld [vmem:[#allocation4 + $0x380] sm:$0xff]  }
0x109b   :  { %6947 = vmatprep.subr.bf16.mxu0 %v19482_v57 }
0x109c   :  { %17865 = vmatpush3.bf16.msra.mxu1 %v19540_v58 }
0x109d   :  { %17866 = vmatprep.subr.bf16.mxu1 %v20879_v0 }
0x109e   :  { %6948 = vmatpush1.bf16.msra.mxu0 %v19480_v7 }
0x109f   :  { %6949 = vmatprep.subr.bf16.mxu0 %v19488_v8 }
0x10a0   :  { %17867 = vmatpush3.bf16.msra.mxu1 %v19541_v1 }
0x10a1   :  { %17868 = vmatprep.subr.bf16.mxu1 %v20879_v0 }
0x10a2   :  { %6950 = vmatpush1.bf16.msra.mxu0 %v19486_v10 }
0x10a3   :  { %6951 = vmatprep.subr.bf16.mxu0 %v19494_v11  ;;  %v6449_v11 = vld [vmem:[#allocation2 + $0xc] sm:$0x7] }
0x10a4   :  { %17869 = vmatpush3.bf16.msra.mxu1 %v19542_v5 }
0x10a5   :  { %17894 = vmatprep.subr.bf16.mxu1 %v20879_v0 }
0x10a6   :  { %6952 = vmatpush1.bf16.msra.mxu0 %v19492_v12  ;;  %v6473_v12 = vrot.slane %v6449_v11, %v21434_v45 }
0x10a7   :  { %16781 = vmatprep.subr.bf16.mxu0 %v19495_v14  ;;  %v6477_v14 = vrot.slane %v6449_v11, %v21437_v47 }
0x10a9   :  { %6970 = vmatmul.mubr.bf16.vlgmr.msra.gmra.mxu0 %v6508_v39  ;;  %v19530_v39 = vld [vmem:[#allocation4 + $0x310] sm:$0xff]  }
0x10aa   :  { %16782 = vmatpush3.bf16.msra.mxu0 %v19496_v15  ;;  %7010 = vmatprep.mubr.bf16.mxu0 %v21974_v2  ;;  %v19521_v2 = vld [vmem:[#allocation4 + $0x370] sm:$0xff]  }
0x10ab   :  { %16783 = vmatprep.subr.bf16.mxu0 %v19498_v18 }
0x10ae   :  { %16784 = vmatpush3.bf16.msra.mxu0 %v19499_v16 }
0x10af   :  { %16785 = vmatprep.subr.bf16.mxu0 %v19501_v9 }
0x10b2   :  { %16786 = vmatpush3.bf16.msra.mxu0 %v19502_v17 }
0x10b3   :  { %16787 = vmatprep.subr.bf16.mxu0 %v19504_v19 }
0x10b6   :  { %16788 = vmatpush3.bf16.msra.mxu0 %v19505_v20 }
0x10b7   :  { %16789 = vmatprep.subr.bf16.mxu0 %v19507_v21 }
0x10ba   :  { %16790 = vmatpush3.bf16.msra.mxu0 %v19508_v22 }
0x10bb   :  { %16791 = vmatprep.subr.bf16.mxu0 %v19510_v23 }
0x10be   :  { %16792 = vmatpush3.bf16.msra.mxu0 %v19511_v24 }
0x10bf   :  { %16793 = vmatprep.subr.bf16.mxu0 %v19513_v25  ;;  %v6930_v38 = vpop.f32.mrf.mxu1 }
0x10c0   :  { %v6931_v15 = vadd.f32 %v6930_v38, %v6473_v12  ;;  %v19544_v38 = vld [vmem:[%s22850_s6 + $0x130] sm:$0xff]  }
0x10c1   :  { %v6932_v40 = vpop.f32.mrf.mxu1 }
0x10c2   :  { %16794 = vmatpush3.bf16.msra.mxu0 %v19514_v26  ;;  %v6933_v18 = vadd.f32 %v6932_v40, %v6477_v14  ;;  %v19546_v40 = vld [vmem:[%s22850_s6 + $0x120] sm:$0xff]  }
0x10c3   :  { %16795 = vmatprep.subr.bf16.mxu0 %v19516_v27  ;;  %v6934_v46 = vpop.f32.mrf.mxu1 }
0x10c4   :  { %v19549_v46 = vld [vmem:[%s22850_s6 + $0x108] sm:$0xff]  }
0x10c5   :  { %v6935_v48 = vpop.f32.mrf.mxu1 }
0x10c6   :  { %16796 = vmatpush3.bf16.msra.mxu0 %v19517_v28  ;;  %v19550_v48 = vld [vmem:[%s22850_s6 + $0x100] sm:$0xff]  }
0x10c7   :  { %16812 = vmatprep.subr.bf16.mxu0 %v19519_v30  ;;  %v6481_v30 = vrot.slane %v6449_v11, %v21448_v6 }
0x10c9   :  { %7011 = vmatmul.mubr.bf16.vlgmr.msra.gmra.mxu0 %v21977_v31  ;;  %v19529_v31 = vld [vmem:[#allocation4 + $0x350] sm:$0xff]  }
0x10ca   :  { %16813 = vmatpush3.bf16.msra.mxu0 %v19520_v60 }
0x10cb   :  { %16814 = vmatprep.subr.bf16.mxu0 %v19521_v2 }
0x10ce   :  { %16815 = vmatpush3.bf16.msra.mxu0 %v19522_v32 }
0x10cf   :  { %16816 = vmatprep.subr.bf16.mxu0 %v19523_v29 }
0x10d2   :  { %16817 = vmatpush3.bf16.msra.mxu0 %v19524_v55 }
0x10d3   :  { %16818 = vmatprep.subr.bf16.mxu0 %v19525_v34 }
0x10d6   :  { %16819 = vmatpush3.bf16.msra.mxu0 %v19526_v33 }
0x10d7   :  { %16820 = vmatprep.subr.bf16.mxu0 %v19527_v35 }
0x10da   :  { %16821 = vmatpush3.bf16.msra.mxu0 %v19528_v36 }
0x10db   :  { %16822 = vmatprep.subr.bf16.mxu0 %v19529_v31  ;;  %v19543_v31 = vld [vmem:[%s22850_s6 + $0x138] sm:$0xff]  }
0x10de   :  { %16823 = vmatpush3.bf16.msra.mxu0 %v19530_v39  ;;  %v19545_v39 = vld [vmem:[%s22850_s6 + $0x128] sm:$0xff]  }
0x10df   :  { %16824 = vmatprep.subr.bf16.mxu0 %v19531_v42  ;;  %v7052_v4 = vpop.f32.mrf.mxu1  ;;  %v19547_v42 = vld [vmem:[%s22850_s6 + $0x118] sm:$0xff]  }
0x10e1   :  { %v17852_v62 = vpop.f32.mrf.mxu1 }
0x10e2   :  { %16825 = vmatpush3.bf16.msra.mxu0 %v19532_v43  ;;  %v19548_v43 = vld [vmem:[%s22850_s6 + $0x110] sm:$0xff]  }
0x10e3   :  { %16826 = vmatprep.subr.bf16.mxu0 %v19533_v49  ;;  %v7055_v63 = vpop.f32.mrf.mxu1  ;;  %v19551_v49 = vld [vmem:[%s22851_s0 + $0x138] sm:$0xff]  }
0x10e5   :  { %v17853_v3 = vpop.f32.mrf.mxu1 }
0x10e6   :  { %16827 = vmatpush3.bf16.msra.mxu0 %v19534_v50  ;;  %v19556_v50 = vld [vmem:[#allocation10 + $0xac] ss:$12 sps:$4 sm:$0xff]   ;;  %v15656_v3 = vld [vmem:[#allocation6 + $0x4] ss:$0 sm:$0xff] }
0x10e7   :  { %17874 = vmatprep.subr.bf16.mxu0 %v20879_v0 }
0x1149   :  { %v22048_v57 = vpop.f32.mrf.mxu0 }
0x114b   :  { %v17832_v7 = vpop.f32.mrf.mxu0 }
0x114d   :  { %v6276_v8 = vpop.f32.mrf.mxu0 }
0x114f   :  { %v17833_v10 = vpop.f32.mrf.mxu0 }
0x1169   :  { %v6971_v16 = vpop.f32.mrf.mxu0 }
0x116a   :  { %v6972_v9 = vadd.f32 %v6971_v16, %v6931_v15  ;;  %v19554_v15 = vld [vmem:[#allocation10 + $0xa8] ss:$12 sps:$4 sm:$0xff]  }
0x116b   :  { %v6973_v17 = vpop.f32.mrf.mxu0 }
0x116c   :  { %vm7058_vm11 = vcmp.ge.f32.partialorder %v6972_v9, 0.0  ;;  %v7061_v19 = vmul.f32 0.2, %v6972_v9  ;;  %v6974_v20 = vadd.f32 %v6973_v17, %v6933_v18  ;;  %v19558_v17 = vld [vmem:[#allocation10 + $0x90] ss:$12 sps:$4 sm:$0xff]  }
0x116d   :  { %v6975_v21 = vpop.f32.mrf.mxu0 }
0x116e   :  { %vm7059_vm12 = vcmp.ge.f32.partialorder %v6974_v20, 0.0  ;;  %v7062_v22 = vmul.f32 0.2, %v6974_v20  ;;  %v7064_v23 = vsel %vm7058_vm11, %v6972_v9, %v7061_v19  ;;  %v19560_v9 = vld [vmem:[#allocation10 + $0x94] ss:$12 sps:$4 sm:$0xff]  }
0x116f   :  { %v6976_v24 = vpop.f32.mrf.mxu0  ;;  %v7067_v27 = vpack.c.bf16 %v7064_v23, %v7064_v23  ;;  %v19564_v19 = vld [vmem:[#allocation10 + $0x7c] ss:$12 sps:$4 sm:$0xff]   ;;  %v19568_v21 = vld [vmem:[#allocation10 + $0x64] ss:$12 sps:$4 sm:$0xff]  }
0x1170   :  { %v22052_v25 = vsel %vm7059_vm12, %v6974_v20, %v7062_v22  ;;  %v19562_v20 = vld [vmem:[#allocation10 + $0x78] ss:$12 sps:$4 sm:$0xff]   ;;  %v19566_v22 = vld [vmem:[#allocation10 + $0x60] ss:$12 sps:$4 sm:$0xff]  }
0x1171   :  { %v7068_v26 = vpack.c.bf16 %v22052_v25, %v22052_v25  ;;  %v19569_v23 = vld [vmem:[%s22851_s0 + $0x108] sm:$0xff]  }
0x1172   :  { %v19572_v24 = vld [vmem:[#allocation10 + $0x4c] ss:$12 sps:$4 sm:$0xff]  }
0x1173   :  { %7252 = vmatprep.mubr.bf16.mxu0 %v7068_v26  ;;  %v19570_v26 = vld [vmem:[#allocation10 + $0x48] ss:$12 sps:$4 sm:$0xff]  }
0x1174   :  { %7253 = vmatmul.mubr.bf16.vlgmr.msra.gmra.mxu0 %v7067_v27  ;;  %v19573_v27 = vld [vmem:[%s22851_s0 + $0x100] sm:$0xff]  }
0x1175   :  { %17890 = vmatprep.mubr.msk.bf16.mxu0 %vm20880_vm0, %v20879_v0  ;;  %17875 = vmatpush3.bf16.msra.mxu0 %v19543_v31  ;;  %v19595_v31 = vld [vmem:[#allocation13 + $0x68] sm:$0xff]  }
0x1176   :  { %17876 = vmatprep.subr.bf16.mxu0 %v20879_v0 }
0x1179   :  { %17877 = vmatpush3.bf16.msra.mxu0 %v19544_v38  ;;  %v19596_v38 = vld [vmem:[#allocation13 + $0x28] sm:$0xff]  }
0x117a   :  { %17878 = vmatprep.subr.bf16.mxu0 %v20879_v0 }
0x117d   :  { %17879 = vmatpush3.bf16.msra.mxu0 %v19545_v39  ;;  %v15681_v39 = vld [vmem:[#allocation7 + $0x4] ss:$0 sm:$0xff] }
0x117e   :  { %17880 = vmatprep.subr.bf16.mxu0 %v20879_v0 }
0x1181   :  { %17881 = vmatpush3.bf16.msra.mxu0 %v19546_v40 }
0x1182   :  { %17882 = vmatprep.subr.bf16.mxu0 %v20879_v0 }
0x1185   :  { %17883 = vmatpush3.bf16.msra.mxu0 %v19547_v42 }
0x1186   :  { %17884 = vmatprep.subr.bf16.mxu0 %v20879_v0 }
0x1189   :  { %v16797_v28 = vpop.f32.mrf.mxu0  ;;  %17885 = vmatpush3.bf16.msra.mxu0 %v19548_v43 }
0x118a   :  { %17886 = vmatprep.subr.bf16.mxu0 %v20879_v0 }
0x118b   :  { %v16798_v60 = vpop.f32.mrf.mxu0 }
0x118c   :  { %v16799_v2 = vadd.f32 %v16798_v60, %v16797_v28  ;;  %v19576_v28 = vld [vmem:[#allocation10 + $0x34] ss:$12 sps:$4 sm:$0xff]   ;;  %v19578_v60 = vld [vmem:[#allocation10 + $0x18] ss:$12 sps:$4 sm:$0xff]  }
0x118d   :  { %v16800_v32 = vpop.f32.mrf.mxu0  ;;  %17887 = vmatpush3.bf16.msra.mxu0 %v19549_v46 }
0x118e   :  { %v7013_v29 = vadd.f32 %v16799_v2, %v6481_v30  ;;  %17888 = vmatprep.subr.bf16.mxu0 %v20879_v0  ;;  %v19574_v30 = vld [vmem:[#allocation10 + $0x30] ss:$12 sps:$4 sm:$0xff]   ;;  %v19582_v32 = vld [vmem:[#allocation10] ss:$12 sps:$4 sm:$0xff]  }
0x118f   :  { %v16801_v55 = vpop.f32.mrf.mxu0  ;;  %v19580_v2 = vld [vmem:[#allocation10 + $0x1c] ss:$12 sps:$4 sm:$0xff]  }
0x1190   :  { %v7053_v34 = vadd.f32 %v7052_v4, %v7013_v29  ;;  %v19584_v29 = vld [vmem:[#allocation10 + $0x4] ss:$12 sps:$4 sm:$0xff]   ;;  %v7563_v55 = vld [vmem:[%s22852_s14] sm:$0x1] }
0x1191   :  { %17889 = vmatpush3.bf16.msra.mxu0 %v19550_v48 }
0x1192   :  { %vm7060_vm13 = vcmp.ge.f32.partialorder %v7053_v34, 0.0  ;;  %v7063_v33 = vmul.f32 0.2, %v7053_v34  ;;  %7758 = vmatprep.subr.bf16.mxu0 %v19556_v50 }
0x1194   :  { %v7066_v35 = vsel %vm7060_vm13, %v7053_v34, %v7063_v33  ;;  %v19591_v34 = vld [vmem:[#allocation13 + $0x78] sm:$0xff]  }
0x1195   :  { %v7069_v36 = vpack.c.bf16 %v7066_v35, %v7066_v35  ;;  %v19592_v33 = vld [vmem:[#allocation13 + $0x38] sm:$0xff]   ;;  %v19593_v35 = vld [vmem:[#allocation13 + $0x70] sm:$0xff]  }
0x1197   :  { %17871 = vmatmul.mubr.bf16.vlgmr.msra.gmra.mxu1 %v7069_v36  ;;  %v19594_v36 = vld [vmem:[#allocation13 + $0x30] sm:$0xff]  }
0x1198   :  { %17910 = vmatprep.mubr.msk.bf16.mxu1 %vm20880_vm0, %v20879_v0  ;;  %17895 = vmatpush3.bf16.msra.mxu1 %v19551_v49 }
0x1199   :  { %17896 = vmatprep.subr.bf16.mxu1 %v20879_v0 }
0x119c   :  { %17897 = vmatpush3.bf16.msra.mxu1 %v19552_v52 }
0x119d   :  { %17898 = vmatprep.subr.bf16.mxu1 %v20879_v0 }
0x11a0   :  { %17899 = vmatpush3.bf16.msra.mxu1 %v19553_v53  ;;  %v19577_v53 = vld [vmem:[#allocation10 + $0xb0] ss:$12 sps:$4 sm:$0xff]  }
0x11a1   :  { %17900 = vmatprep.subr.bf16.mxu1 %v20879_v0 }
0x11a4   :  { %17901 = vmatpush3.bf16.msra.mxu1 %v19557_v44 }
0x11a5   :  { %17902 = vmatprep.subr.bf16.mxu1 %v20879_v0 }
0x11a8   :  { %17903 = vmatpush3.bf16.msra.mxu1 %v19561_v54  ;;  %v19581_v54 = vld [vmem:[#allocation10 + $0x98] ss:$12 sps:$4 sm:$0xff]  }
0x11a9   :  { %17904 = vmatprep.subr.bf16.mxu1 %v20879_v0 }
0x11ac   :  { %17905 = vmatpush3.bf16.msra.mxu1 %v19565_v56  ;;  %v19585_v56 = vld [vmem:[#allocation10 + $0x80] ss:$12 sps:$4 sm:$0xff]  }
0x11ad   :  { %17906 = vmatprep.subr.bf16.mxu1 %v20879_v0 }
0x11b0   :  { %17907 = vmatpush3.bf16.msra.mxu1 %v19569_v23 }
0x11b1   :  { %17908 = vmatprep.subr.bf16.mxu1 %v20879_v0 }
0x11b4   :  { %17909 = vmatpush3.bf16.msra.mxu1 %v19573_v27 }
0x11b5   :  { %17914 = vmatprep.subr.bf16.mxu1 %v20879_v0 }
0x1234   :  { %v16828_v4 = vpop.f32.mrf.mxu0 }
0x1236   :  { %v16829_v58 = vpop.f32.mrf.mxu0 }
0x1237   :  { %v16830_v1 = vadd.f32 %v16829_v58, %v16828_v4  ;;  %v19586_v4 = vld [vmem:[#allocation10 + $0x68] ss:$12 sps:$4 sm:$0xff]   ;;  %v19588_v58 = vld [vmem:[#allocation10 + $0x38] ss:$12 sps:$4 sm:$0xff]  }
0x1238   :  { %v16831_v62 = vpop.f32.mrf.mxu0 }
0x1239   :  { %v7255_v5 = vadd.f32 %v16830_v1, %v15656_v3  ;;  %v19589_v62 = vld [vmem:[#allocation10 + $0x20] ss:$12 sps:$4 sm:$0xff]   ;;  %v19597_v1 = vld [vmem:[#allocation13 + $0x60] sm:$0xff]  }
0x123a   :  { %v16832_v63 = vpop.f32.mrf.mxu0  ;;  %v19598_v3 = vld [vmem:[#allocation13 + $0x20] sm:$0xff]  }
0x123b   :  { %v19590_v63 = vld [vmem:[#allocation10 + $0x8] ss:$12 sps:$4 sm:$0xff]  }
0x1257   :  { %v7294_v7 = vpop.f32.mrf.mxu1 }
0x1258   :  { %v7295_v8 = vadd.f32 %v7294_v7, %v7255_v5  ;;  %v19599_v5 = vld [vmem:[#allocation13 + $0x58] sm:$0xff]  }
0x1259   :  { %v17872_v10 = vpop.f32.mrf.mxu1  ;;  %v19600_v7 = vld [vmem:[#allocation13 + $0x18] sm:$0xff]  }
0x125a   :  { %vm7300_vm14 = vcmp.ge.f32.partialorder %v7295_v8, 0.0  ;;  %v7301_v11 = vmul.f32 0.2, %v7295_v8  ;;  %v19602_v10 = vld [vmem:[#allocation13 + $0x50] sm:$0xff]  }
0x125b   :  { %v7297_v12 = vpop.f32.mrf.mxu1 }
0x125c   :  { %v7302_v14 = vsel %vm7300_vm14, %v7295_v8, %v7301_v11  ;;  %v19601_v8 = vld [vmem:[#allocation13 + $0xb8] sm:$0xff]   ;;  %v22107_v11 = vld [vmem:[#allocation12] sm:$0x7] }
0x125d   :  { %v7303_v18 = vpack.c.bf16 %v7302_v14, %v7302_v14  ;;  %v17873_v16 = vpop.f32.mrf.mxu1  ;;  %v7618_v12 = vrot.slane %v22107_v11, %v21434_v45  ;;  %v19603_v14 = vld [vmem:[#allocation13 + $0x10] sm:$0xff]  }
0x125e   :  { %v7622_v16 = vrot.slane %v22107_v11, %v21437_v47 }
0x125f   :  { %17891 = vmatmul.mubr.bf16.vlgmr.msra.gmra.mxu0 %v7303_v18  ;;  %v19605_v18 = vld [vmem:[#allocation13 + $0x48] sm:$0xff]  }
0x1260   :  { %7759 = vmatpush1.bf16.msra.mxu0 %v19554_v15  ;;  %7790 = vmatprep.mubr.bf16.mxu0 %v20882_v59  ;;  %v19604_v15 = vld [vmem:[#allocation13 + $0xb0] sm:$0xff]  }
0x1261   :  { %7760 = vmatprep.subr.bf16.mxu0 %v19560_v9 }
0x1264   :  { %7761 = vmatpush1.bf16.msra.mxu0 %v19558_v17 }
0x1265   :  { %7762 = vmatprep.subr.bf16.mxu0 %v19564_v19  ;;  %v19606_v19 = vld [vmem:[#allocation13 + $0x8] sm:$0xff]  }
0x1268   :  { %7763 = vmatpush1.bf16.msra.mxu0 %v19562_v20  ;;  %v19607_v20 = vld [vmem:[#allocation13 + $0xa8] sm:$0xff]  }
0x1269   :  { %7764 = vmatprep.subr.bf16.mxu0 %v19568_v21 }
0x126c   :  { %7765 = vmatpush1.bf16.msra.mxu0 %v19566_v22  ;;  %v19608_v22 = vld [vmem:[#allocation13 + $0x40] sm:$0xff]  }
0x126d   :  { %7766 = vmatprep.subr.bf16.mxu0 %v19572_v24 }
0x1270   :  { %7767 = vmatpush1.bf16.msra.mxu0 %v19570_v26 }
0x1271   :  { %7768 = vmatprep.subr.bf16.mxu0 %v19576_v28 }
0x1274   :  { %7769 = vmatpush1.bf16.msra.mxu0 %v19574_v30  ;;  %v19609_v30 = vld [vmem:[#allocation13] sm:$0xff]  }
0x1275   :  { %7770 = vmatprep.subr.bf16.mxu0 %v19580_v2 }
0x1278   :  { %7771 = vmatpush1.bf16.msra.mxu0 %v19578_v60  ;;  %v19610_v60 = vld [vmem:[#allocation13 + $0xa0] sm:$0xff]  }
0x1279   :  { %7772 = vmatprep.subr.bf16.mxu0 %v19584_v29 }
0x127c   :  { %7773 = vmatpush1.bf16.msra.mxu0 %v19582_v32 }
0x127d   :  { %16870 = vmatprep.subr.bf16.mxu0 %v19591_v34  ;;  %v19611_v34 = vld [vmem:[#allocation13 + $0x98] sm:$0xff]  }
0x127f   :  { %7791 = vmatmul.mubr.bf16.vlgmr.msra.gmra.mxu0 %v7563_v55 }
0x1280   :  { %16871 = vmatpush3.bf16.msra.mxu0 %v19592_v33  ;;  %v19612_v33 = vld [vmem:[#allocation13 + $0x90] sm:$0xff]  }
0x1281   :  { %16872 = vmatprep.subr.bf16.mxu0 %v19593_v35  ;;  %v19613_v35 = vld [vmem:[#allocation13 + $0x88] sm:$0xff]  }
0x1284   :  { %16873 = vmatpush3.bf16.msra.mxu0 %v19594_v36  ;;  %v19614_v36 = vld [vmem:[#allocation13 + $0x80] sm:$0xff]  }
0x1285   :  { %16874 = vmatprep.subr.bf16.mxu0 %v19595_v31  ;;  %v19615_v31 = vld [vmem:[%s22853_s3 + $0x38] sm:$0xff]  }
0x1288   :  { %16875 = vmatpush3.bf16.msra.mxu0 %v19596_v38  ;;  %v19616_v38 = vld [vmem:[%s22853_s3 + $0x30] sm:$0xff]  }
0x1289   :  { %16876 = vmatprep.subr.bf16.mxu0 %v19597_v1 }
0x128c   :  { %16877 = vmatpush3.bf16.msra.mxu0 %v19598_v3 }
0x128d   :  { %16878 = vmatprep.subr.bf16.mxu0 %v19599_v5 }
0x1290   :  { %16879 = vmatpush3.bf16.msra.mxu0 %v19600_v7 }
0x1291   :  { %16880 = vmatprep.subr.bf16.mxu0 %v19602_v10  ;;  %v19622_v10 = vld [vmem:[%s22853_s3] sm:$0xff]  }
0x1294   :  { %16881 = vmatpush3.bf16.msra.mxu0 %v19603_v14  ;;  %v19624_v14 = vld [vmem:[%s22854_s27 + $0x30] sm:$0xff]  }
0x1295   :  { %16882 = vmatprep.subr.bf16.mxu0 %v19605_v18  ;;  %v19629_v18 = vld [vmem:[%s22854_s27 + $0x20] sm:$0xff]  }
0x1298   :  { %16883 = vmatpush3.bf16.msra.mxu0 %v19606_v19 }
0x1299   :  { %16884 = vmatprep.subr.bf16.mxu0 %v19608_v22 }
0x129c   :  { %16885 = vmatpush3.bf16.msra.mxu0 %v19609_v30 }
0x129d   :  { %17954 = vmatprep.subr.bf16.mxu0 %v20879_v0 }
0x131f   :  { %v7392_v40 = vpop.f32.mrf.mxu0 }
0x1320   :  { %v7393_v42 = vadd.f32 %v15681_v39, %v7392_v40  ;;  %v19617_v39 = vld [vmem:[%s22853_s3 + $0x28] sm:$0xff]   ;;  %v19618_v40 = vld [vmem:[%s22853_s3 + $0x20] sm:$0xff]  }
0x1321   :  { %v17892_v43 = vpop.f32.mrf.mxu0 }
0x1322   :  { %vm7398_vm15 = vcmp.ge.f32.partialorder %v7393_v42, 0.0  ;;  %v7399_v46 = vmul.f32 0.2, %v7393_v42  ;;  %v19620_v43 = vld [vmem:[%s22853_s3 + $0x10] sm:$0xff]  }
0x1323   :  { %v7395_v48 = vpop.f32.mrf.mxu0 }
0x1324   :  { %v7400_v49 = vsel %vm7398_vm15, %v7393_v42, %v7399_v46  ;;  %v19619_v42 = vld [vmem:[%s22853_s3 + $0x18] sm:$0xff]  }
0x1325   :  { %v7401_v50 = vadd.f32 %v7400_v49, %v22052_v25  ;;  %v17893_v52 = vpop.f32.mrf.mxu0  ;;  %v19587_v25 = vld [vmem:[#allocation10 + $0x50] ss:$12 sps:$4 sm:$0xff]  }
0x1326   :  { %v7626_v52 = vrot.slane %v22107_v11, %v21448_v6  ;;  %v19623_v11 = vld [vmem:[%s22854_s27 + $0x38] sm:$0xff]  }
0x1327   :  { %v7402_v44 = vpack.c.bf16 %v7401_v50, %v7401_v50 }
0x1329   :  { %17911 = vmatmul.mubr.bf16.vlgmr.msra.gmra.mxu1 %v7402_v44 }
0x132a   :  { %17915 = vmatpush3.bf16.msra.mxu1 %v19577_v53  ;;  %17930 = vmatprep.mubr.msk.bf16.mxu1 %vm20880_vm0, %v20879_v0 }
0x132b   :  { %17916 = vmatprep.subr.bf16.mxu1 %v20879_v0 }
0x132e   :  { %17917 = vmatpush3.bf16.msra.mxu1 %v19581_v54 }
0x132f   :  { %17918 = vmatprep.subr.bf16.mxu1 %v20879_v0 }
0x1332   :  { %17919 = vmatpush3.bf16.msra.mxu1 %v19585_v56 }
0x1333   :  { %17920 = vmatprep.subr.bf16.mxu1 %v20879_v0 }
0x1336   :  { %17921 = vmatpush3.bf16.msra.mxu1 %v19586_v4 }
0x1337   :  { %17922 = vmatprep.subr.bf16.mxu1 %v20879_v0 }
0x133a   :  { %17923 = vmatpush3.bf16.msra.mxu1 %v19587_v25 }
0x133b   :  { %17924 = vmatprep.subr.bf16.mxu1 %v20879_v0 }
0x133e   :  { %17925 = vmatpush3.bf16.msra.mxu1 %v19588_v58 }
0x133f   :  { %17926 = vmatprep.subr.bf16.mxu1 %v20879_v0  ;;  %v7792_v9 = vpop.f32.mrf.mxu0 }
0x1340   :  { %v7793_v17 = vadd.f32 %v7792_v9, %v7618_v12  ;;  %v19628_v12 = vld [vmem:[#allocation10 + $0x16c] ss:$12 sps:$4 sm:$0xff]  }
0x1341   :  { %v7794_v21 = vpop.f32.mrf.mxu0  ;;  %v19637_v9 = vld [vmem:[%s22854_s27 + $0x10] sm:$0xff]  }
0x1342   :  { %17927 = vmatpush3.bf16.msra.mxu1 %v19589_v62  ;;  %vm7839_vm1 = vcmp.ge.f32.partialorder %v7793_v17, 0.0  ;;  %v7842_v23 = vmul.f32 0.2, %v7793_v17  ;;  %v7795_v24 = vadd.f32 %v7794_v21, %v7622_v16  ;;  %v19633_v16 = vld [vmem:[%s22854_s27 + $0x18] sm:$0xff]  }
0x1343   :  { %17928 = vmatprep.subr.bf16.mxu1 %v20879_v0  ;;  %v7796_v26 = vpop.f32.mrf.mxu0 }
0x1344   :  { %v7845_v27 = vsel %vm7839_vm1, %v7793_v17, %v7842_v23  ;;  %vm7840_vm2 = vcmp.ge.f32.partialorder %v7795_v24, 0.0  ;;  %v7843_v28 = vmul.f32 0.2, %v7795_v24  ;;  %v15723_v17 = vld [vmem:[#allocation15] ss:$0 sm:$0xff] }
0x1345   :  { %v7797_v2 = vpop.f32.mrf.mxu0  ;;  %v7848_v29 = vpack.c.bf16 %v7845_v27, %v7845_v27  ;;  %v19626_v27 = vld [vmem:[#allocation10 + $0x168] ss:$12 sps:$4 sm:$0xff]  }
0x1346   :  { %17929 = vmatpush3.bf16.msra.mxu1 %v19590_v63  ;;  %v22116_v32 = vsel %vm7840_vm2, %v7795_v24, %v7843_v28  ;;  %v19630_v2 = vld [vmem:[#allocation10 + $0x150] ss:$12 sps:$4 sm:$0xff]  }
0x1347   :  { %17934 = vmatprep.subr.bf16.mxu1 %v20879_v0 }
0x1349   :  { %17931 = vmatmul.mubr.bf16.vlgmr.msra.gmra.mxu1 %v7563_v55  ;;  %v7849_v55 = vpack.c.bf16 %v22116_v32, %v22116_v32 }
0x134a   :  { %17950 = vmatprep.mubr.msk.bf16.mxu1 %vm20880_vm0, %v20879_v0  ;;  %17935 = vmatpush3.bf16.msra.mxu1 %v19601_v8  ;;  %v19621_v8 = vld [vmem:[%s22853_s3 + $0x8] sm:$0xff]  }
0x134b   :  { %17936 = vmatprep.subr.bf16.mxu1 %v20879_v0  ;;  %8033 = vmatprep.mubr.bf16.mxu0 %v7849_v55  ;;  %v19634_v55 = vld [vmem:[#allocation10 + $0x138] ss:$12 sps:$4 sm:$0xff]  }
0x134c   :  { %8034 = vmatmul.mubr.bf16.vlgmr.msra.gmra.mxu0 %v7848_v29  ;;  %v19636_v29 = vld [vmem:[#allocation10 + $0x13c] ss:$12 sps:$4 sm:$0xff]  }
0x134d   :  { %17970 = vmatprep.mubr.msk.bf16.mxu0 %vm20880_vm0, %v20879_v0  ;;  %17955 = vmatpush3.bf16.msra.mxu0 %v19615_v31  ;;  %v19642_v31 = vld [vmem:[#allocation10 + $0x108] ss:$12 sps:$4 sm:$0xff]  }
0x134e   :  { %17937 = vmatpush3.bf16.msra.mxu1 %v19604_v15  ;;  %17956 = vmatprep.subr.bf16.mxu0 %v20879_v0  ;;  %v19625_v15 = vld [vmem:[%s22854_s27 + $0x28] sm:$0xff]  }
0x134f   :  { %17938 = vmatprep.subr.bf16.mxu1 %v20879_v0 }
0x1351   :  { %17957 = vmatpush3.bf16.msra.mxu0 %v19616_v38  ;;  %v19645_v38 = vld [vmem:[%s22854_s27] sm:$0xff]  }
0x1352   :  { %17939 = vmatpush3.bf16.msra.mxu1 %v19607_v20  ;;  %17958 = vmatprep.subr.bf16.mxu0 %v20879_v0 }
0x1353   :  { %17940 = vmatprep.subr.bf16.mxu1 %v20879_v0 }
0x1355   :  { %17959 = vmatpush3.bf16.msra.mxu0 %v19617_v39  ;;  %v19648_v39 = vld [vmem:[#allocation10 + $0xf4] ss:$12 sps:$4 sm:$0xff]  }
0x1356   :  { %17941 = vmatpush3.bf16.msra.mxu1 %v19610_v60  ;;  %17960 = vmatprep.subr.bf16.mxu0 %v20879_v0  ;;  %v19632_v60 = vld [vmem:[#allocation10 + $0x154] ss:$12 sps:$4 sm:$0xff]  }
0x1357   :  { %17942 = vmatprep.subr.bf16.mxu1 %v20879_v0 }
0x1359   :  { %17961 = vmatpush3.bf16.msra.mxu0 %v19618_v40  ;;  %v19646_v40 = vld [vmem:[#allocation10 + $0xf0] ss:$12 sps:$4 sm:$0xff]  }
0x135a   :  { %17943 = vmatpush3.bf16.msra.mxu1 %v19611_v34  ;;  %17962 = vmatprep.subr.bf16.mxu0 %v20879_v0  ;;  %v19640_v34 = vld [vmem:[#allocation10 + $0x124] ss:$12 sps:$4 sm:$0xff]  }
0x135b   :  { %17944 = vmatprep.subr.bf16.mxu1 %v20879_v0 }
0x135d   :  { %17963 = vmatpush3.bf16.msra.mxu0 %v19619_v42  ;;  %v19650_v42 = vld [vmem:[#allocation10 + $0xd8] ss:$12 sps:$4 sm:$0xff]  }
0x135e   :  { %17945 = vmatpush3.bf16.msra.mxu1 %v19612_v33  ;;  %17964 = vmatprep.subr.bf16.mxu0 %v20879_v0  ;;  %v19638_v33 = vld [vmem:[#allocation10 + $0x120] ss:$12 sps:$4 sm:$0xff]  }
0x135f   :  { %17946 = vmatprep.subr.bf16.mxu1 %v20879_v0 }
0x1361   :  { %17965 = vmatpush3.bf16.msra.mxu0 %v19620_v43  ;;  %v19652_v43 = vld [vmem:[#allocation10 + $0xdc] ss:$12 sps:$4 sm:$0xff]  }
0x1362   :  { %17947 = vmatpush3.bf16.msra.mxu1 %v19613_v35  ;;  %17966 = vmatprep.subr.bf16.mxu0 %v20879_v0  ;;  %v19641_v35 = vld [vmem:[%s22854_s27 + $0x8] sm:$0xff]  }
0x1363   :  { %17948 = vmatprep.subr.bf16.mxu1 %v20879_v0 }
0x1365   :  { %17967 = vmatpush3.bf16.msra.mxu0 %v19621_v8 }
0x1366   :  { %17949 = vmatpush3.bf16.msra.mxu1 %v19614_v36  ;;  %17968 = vmatprep.subr.bf16.mxu0 %v20879_v0  ;;  %v19644_v36 = vld [vmem:[#allocation10 + $0x10c] ss:$12 sps:$4 sm:$0xff]  }
0x1367   :  { %17974 = vmatprep.subr.bf16.mxu1 %v20879_v0 }
0x1369   :  { %17969 = vmatpush3.bf16.msra.mxu0 %v19622_v10  ;;  %v19649_v10 = vld [vmem:[#allocation10 + $0x170] ss:$12 sps:$4 sm:$0xff]  }
0x136a   :  { %8548 = vmatprep.subr.bf16.mxu0 %v19628_v12  ;;  %v19653_v12 = vld [vmem:[#allocation10 + $0x158] ss:$12 sps:$4 sm:$0xff]  }
0x13e9   :  { %v22140_v46 = vpop.f32.mrf.mxu1 }
0x13eb   :  { %v17912_v48 = vpop.f32.mrf.mxu1 }
0x13ec   :  { %v19654_v48 = vld [vmem:[#allocation10 + $0xc0] ss:$12 sps:$4 sm:$0xff]  }
0x13ed   :  { %v7494_v49 = vpop.f32.mrf.mxu1 }
0x13ee   :  { %v19656_v49 = vld [vmem:[#allocation10 + $0xc4] ss:$12 sps:$4 sm:$0xff]  }
0x13ef   :  { %v17913_v50 = vpop.f32.mrf.mxu1 }
0x13f0   :  { %v15782_v50 = vld [vmem:[%s22852_s14 + $0x1] sm:$0x1] }
0x1409   :  { %v7833_v53 = vpop.f32.mrf.mxu1 }
0x140a   :  { %v7834_v44 = vadd.f32 %v7833_v53, %v7626_v52  ;;  %v19663_v52 = vld [vmem:[#allocation13 + $0x138] sm:$0xff]  }
0x140b   :  { %v17932_v54 = vpop.f32.mrf.mxu1  ;;  %v19664_v53 = vld [vmem:[#allocation13 + $0xf8] sm:$0xff]  }
0x140c   :  { %vm7841_vm3 = vcmp.ge.f32.partialorder %v7834_v44, 0.0  ;;  %v7844_v56 = vmul.f32 0.2, %v7834_v44  ;;  %v16886_v63 = vpop.f32.mrf.mxu0  ;;  %v19666_v54 = vld [vmem:[#allocation13 + $0xf0] sm:$0xff]  }
0x140d   :  { %v7836_v4 = vpop.f32.mrf.mxu1 }
0x140e   :  { %v7847_v25 = vsel %vm7841_vm3, %v7834_v44, %v7844_v56  ;;  %v16887_v1 = vpop.f32.mrf.mxu0  ;;  %v19665_v44 = vld [vmem:[#allocation13 + $0x130] sm:$0xff]   ;;  %v19667_v56 = vld [vmem:[#allocation13 + $0x128] sm:$0xff]  }
0x140f   :  { %v7850_v58 = vpack.c.bf16 %v7847_v25, %v7847_v25  ;;  %v17933_v62 = vpop.f32.mrf.mxu1  ;;  %v16888_v3 = vadd.f32 %v16887_v1, %v16886_v63  ;;  %v19668_v4 = vld [vmem:[#allocation13 + $0xe8] sm:$0xff]   ;;  %v15748_v25 = vld [vmem:[#allocation16] ss:$0 sm:$0xff] }
0x1410   :  { %v16889_v5 = vpop.f32.mrf.mxu0 }
0x1411   :  { %17951 = vmatmul.mubr.bf16.vlgmr.msra.gmra.mxu1 %v7850_v58  ;;  %v8036_v19 = vadd.f32 %v16888_v3, %v15723_v17  ;;  %v19669_v17 = vld [vmem:[#allocation13 + $0x120] sm:$0xff]  }
0x1412   :  { %17990 = vmatprep.mubr.msk.bf16.mxu1 %vm20880_vm0, %v20879_v0  ;;  %v16890_v7 = vpop.f32.mrf.mxu0  ;;  %17975 = vmatpush3.bf16.msra.mxu1 %v19623_v11 }
0x1413   :  { %17976 = vmatprep.subr.bf16.mxu1 %v20879_v0 }
0x1416   :  { %17977 = vmatpush3.bf16.msra.mxu1 %v19624_v14  ;;  %v19657_v14 = vld [vmem:[#allocation10 + $0x140] ss:$12 sps:$4 sm:$0xff]  }
0x1417   :  { %17978 = vmatprep.subr.bf16.mxu1 %v20879_v0 }
0x141a   :  { %17979 = vmatpush3.bf16.msra.mxu1 %v19625_v15  ;;  %v19658_v15 = vld [vmem:[#allocation10 + $0x128] ss:$12 sps:$4 sm:$0xff]  }
0x141b   :  { %17980 = vmatprep.subr.bf16.mxu1 %v20879_v0 }
0x141e   :  { %17981 = vmatpush3.bf16.msra.mxu1 %v19629_v18  ;;  %v19660_v18 = vld [vmem:[#allocation10 + $0xf8] ss:$12 sps:$4 sm:$0xff]  }
0x141f   :  { %17982 = vmatprep.subr.bf16.mxu1 %v20879_v0 }
0x1422   :  { %17983 = vmatpush3.bf16.msra.mxu1 %v19633_v16  ;;  %v19661_v16 = vld [vmem:[#allocation10 + $0xe0] ss:$12 sps:$4 sm:$0xff]  }
0x1423   :  { %17984 = vmatprep.subr.bf16.mxu1 %v20879_v0 }
0x1426   :  { %17985 = vmatpush3.bf16.msra.mxu1 %v19637_v9  ;;  %v19662_v9 = vld [vmem:[#allocation10 + $0xc8] ss:$12 sps:$4 sm:$0xff]  }
0x1427   :  { %17986 = vmatprep.subr.bf16.mxu1 %v20879_v0 }
0x142a   :  { %17987 = vmatpush3.bf16.msra.mxu1 %v19641_v35  ;;  %v19680_v35 = vld [vmem:[#allocation13 + $0x100] sm:$0xff]  }
0x142b   :  { %17988 = vmatprep.subr.bf16.mxu1 %v20879_v0 }
0x142e   :  { %17989 = vmatpush3.bf16.msra.mxu1 %v19645_v38 }
0x142f   :  { %17994 = vmatprep.subr.bf16.mxu1 %v20879_v0 }
0x14d1   :  { %v8075_v20 = vpop.f32.mrf.mxu1 }
0x14d2   :  { %v8076_v21 = vadd.f32 %v8075_v20, %v8036_v19  ;;  %v19670_v19 = vld [vmem:[#allocation13 + $0xe0] sm:$0xff]   ;;  %v19671_v20 = vld [vmem:[#allocation13 + $0x118] sm:$0xff]  }
0x14d3   :  { %v17952_v22 = vpop.f32.mrf.mxu1 }
0x14d4   :  { %vm8081_vm4 = vcmp.ge.f32.partialorder %v8076_v21, 0.0  ;;  %v8082_v23 = vmul.f32 0.2, %v8076_v21  ;;  %v19673_v22 = vld [vmem:[#allocation13 + $0x178] sm:$0xff]  }
0x14d5   :  { %v8078_v24 = vpop.f32.mrf.mxu1 }
0x14d6   :  { %v8083_v26 = vsel %vm8081_vm4, %v8076_v21, %v8082_v23  ;;  %v19672_v21 = vld [vmem:[#allocation13 + $0xd8] sm:$0xff]   ;;  %v19674_v23 = vld [vmem:[#allocation13 + $0x110] sm:$0xff]  }
0x14d7   :  { %v8084_v28 = vpack.c.bf16 %v8083_v26, %v8083_v26  ;;  %v17953_v30 = vpop.f32.mrf.mxu1  ;;  %v22180_v24 = vld [vmem:[#allocation12 + $0x3] sm:$0x7] }
0x14d8   :  { %v8408_v26 = vrot.slane %v22180_v24, %v21434_v45  ;;  %v19677_v30 = vld [vmem:[#allocation13 + $0x108] sm:$0xff]  }
0x14d9   :  { %17971 = vmatmul.mubr.bf16.vlgmr.msra.gmra.mxu0 %v8084_v28  ;;  %v19676_v28 = vld [vmem:[#allocation13 + $0x170] sm:$0xff]  }
0x14da   :  { %8549 = vmatpush1.bf16.msra.mxu0 %v19626_v27  ;;  %8580 = vmatprep.mubr.bf16.mxu0 %v20882_v59  ;;  %v19675_v27 = vld [vmem:[#allocation13 + $0xd0] sm:$0xff]  }
0x14db   :  { %8550 = vmatprep.subr.bf16.mxu0 %v19632_v60  ;;  %v8412_v60 = vrot.slane %v22180_v24, %v21437_v47 }
0x14de   :  { %8551 = vmatpush1.bf16.msra.mxu0 %v19630_v2 }
0x14df   :  { %8552 = vmatprep.subr.bf16.mxu0 %v19636_v29 }
0x14e2   :  { %8553 = vmatpush1.bf16.msra.mxu0 %v19634_v55  ;;  %v19678_v55 = vld [vmem:[#allocation13 + $0xc8] sm:$0xff]  }
0x14e3   :  { %8554 = vmatprep.subr.bf16.mxu0 %v19640_v34  ;;  %v19679_v34 = vld [vmem:[#allocation13 + $0x168] sm:$0xff]  }
0x14e6   :  { %8555 = vmatpush1.bf16.msra.mxu0 %v19638_v33 }
0x14e7   :  { %8556 = vmatprep.subr.bf16.mxu0 %v19644_v36 }
0x14ea   :  { %8557 = vmatpush1.bf16.msra.mxu0 %v19642_v31 }
0x14eb   :  { %8558 = vmatprep.subr.bf16.mxu0 %v19648_v39 }
0x14ee   :  { %8559 = vmatpush1.bf16.msra.mxu0 %v19646_v40 }
0x14ef   :  { %8560 = vmatprep.subr.bf16.mxu0 %v19652_v43  ;;  %v19682_v43 = vld [vmem:[#allocation13 + $0x160] sm:$0xff]  }
0x14f2   :  { %8561 = vmatpush1.bf16.msra.mxu0 %v19650_v42  ;;  %v19681_v42 = vld [vmem:[#allocation13 + $0xc0] sm:$0xff]  }
0x14f3   :  { %8562 = vmatprep.subr.bf16.mxu0 %v19656_v49 }
0x14f6   :  { %8563 = vmatpush1.bf16.msra.mxu0 %v19654_v48 }
0x14f7   :  { %16928 = vmatprep.subr.bf16.mxu0 %v19663_v52 }
0x14f9   :  { %8581 = vmatmul.mubr.bf16.vlgmr.msra.gmra.mxu0 %v15782_v50 }
0x14fa   :  { %16929 = vmatpush3.bf16.msra.mxu0 %v19664_v53  ;;  %v19683_v53 = vld [vmem:[#allocation13 + $0x158] sm:$0xff]  }
0x14fb   :  { %16930 = vmatprep.subr.bf16.mxu0 %v19665_v44  ;;  %v19684_v44 = vld [vmem:[#allocation13 + $0x150] sm:$0xff]  }
0x14fe   :  { %16931 = vmatpush3.bf16.msra.mxu0 %v19666_v54  ;;  %v19685_v54 = vld [vmem:[#allocation13 + $0x148] sm:$0xff]  }
0x14ff   :  { %16932 = vmatprep.subr.bf16.mxu0 %v19667_v56  ;;  %v19686_v56 = vld [vmem:[#allocation13 + $0x140] sm:$0xff]  }
0x1502   :  { %16933 = vmatpush3.bf16.msra.mxu0 %v19668_v4  ;;  %v19687_v4 = vld [vmem:[%s22853_s3 + $0x78] sm:$0xff]  }
0x1503   :  { %16934 = vmatprep.subr.bf16.mxu0 %v19669_v17 }
0x1506   :  { %16935 = vmatpush3.bf16.msra.mxu0 %v19670_v19 }
0x1507   :  { %16936 = vmatprep.subr.bf16.mxu0 %v19671_v20 }
0x150a   :  { %16937 = vmatpush3.bf16.msra.mxu0 %v19672_v21 }
0x150b   :  { %16938 = vmatprep.subr.bf16.mxu0 %v19674_v23  ;;  %v19693_v23 = vld [vmem:[%s22853_s3 + $0x48] sm:$0xff]  }
0x150e   :  { %16939 = vmatpush3.bf16.msra.mxu0 %v19675_v27  ;;  %v19700_v27 = vld [vmem:[#allocation10 + $0x22c] ss:$12 sps:$4 sm:$0xff]  }
0x150f   :  { %16940 = vmatprep.subr.bf16.mxu0 %v19677_v30  ;;  %v19697_v30 = vld [vmem:[%s22854_s27 + $0x68] sm:$0xff]  }
0x1512   :  { %16941 = vmatpush3.bf16.msra.mxu0 %v19678_v55  ;;  %v15823_v55 = vld [vmem:[#allocation15 + $0x1] ss:$0 sm:$0xff] }
0x1513   :  { %16942 = vmatprep.subr.bf16.mxu0 %v19680_v35 }
0x1516   :  { %16943 = vmatpush3.bf16.msra.mxu0 %v19681_v42 }
0x1517   :  { %18034 = vmatprep.subr.bf16.mxu0 %v20879_v0 }
0x1599   :  { %v8173_v58 = vpop.f32.mrf.mxu0 }
0x159a   :  { %v8174_v62 = vadd.f32 %v15748_v25, %v8173_v58  ;;  %v19688_v25 = vld [vmem:[%s22853_s3 + $0x70] sm:$0xff]   ;;  %v19689_v58 = vld [vmem:[%s22853_s3 + $0x68] sm:$0xff]  }
0x159b   :  { %v17972_v63 = vpop.f32.mrf.mxu0 }
0x159c   :  { %vm8179_vm5 = vcmp.ge.f32.partialorder %v8174_v62, 0.0  ;;  %v8180_v1 = vmul.f32 0.2, %v8174_v62  ;;  %v19691_v63 = vld [vmem:[%s22853_s3 + $0x58] sm:$0xff]  }
0x159d   :  { %v8176_v3 = vpop.f32.mrf.mxu0 }
0x159e   :  { %v8181_v5 = vsel %vm8179_vm5, %v8174_v62, %v8180_v1  ;;  %v19690_v62 = vld [vmem:[%s22853_s3 + $0x60] sm:$0xff]   ;;  %v19692_v1 = vld [vmem:[%s22853_s3 + $0x50] sm:$0xff]  }
0x159f   :  { %v8182_v7 = vadd.f32 %v8181_v5, %v22116_v32  ;;  %v17973_v8 = vpop.f32.mrf.mxu0  ;;  %v19659_v32 = vld [vmem:[#allocation10 + $0x110] ss:$12 sps:$4 sm:$0xff]  }
0x15a1   :  { %v8183_v11 = vpack.c.bf16 %v8182_v7, %v8182_v7 }
0x15a3   :  { %17991 = vmatmul.mubr.bf16.vlgmr.msra.gmra.mxu1 %v8183_v11 }
0x15a4   :  { %17995 = vmatpush3.bf16.msra.mxu1 %v19649_v10  ;;  %18010 = vmatprep.mubr.msk.bf16.mxu1 %vm20880_vm0, %v20879_v0  ;;  %v8416_v10 = vrot.slane %v22180_v24, %v21448_v6  ;;  %v19694_v24 = vld [vmem:[%s22853_s3 + $0x40] sm:$0xff]  }
0x15a5   :  { %17996 = vmatprep.subr.bf16.mxu1 %v20879_v0 }
0x15a8   :  { %17997 = vmatpush3.bf16.msra.mxu1 %v19653_v12 }
0x15a9   :  { %17998 = vmatprep.subr.bf16.mxu1 %v20879_v0 }
0x15ac   :  { %17999 = vmatpush3.bf16.msra.mxu1 %v19657_v14 }
0x15ad   :  { %18000 = vmatprep.subr.bf16.mxu1 %v20879_v0 }
0x15b0   :  { %18001 = vmatpush3.bf16.msra.mxu1 %v19658_v15 }
0x15b1   :  { %18002 = vmatprep.subr.bf16.mxu1 %v20879_v0 }
0x15b4   :  { %18003 = vmatpush3.bf16.msra.mxu1 %v19659_v32 }
0x15b5   :  { %18004 = vmatprep.subr.bf16.mxu1 %v20879_v0 }
0x15b8   :  { %18005 = vmatpush3.bf16.msra.mxu1 %v19660_v18 }
0x15b9   :  { %18006 = vmatprep.subr.bf16.mxu1 %v20879_v0  ;;  %v8582_v2 = vpop.f32.mrf.mxu0 }
0x15ba   :  { %v8583_v29 = vadd.f32 %v8582_v2, %v8408_v26  ;;  %v19695_v26 = vld [vmem:[%s22854_s27 + $0x78] sm:$0xff]  }
0x15bb   :  { %v8584_v33 = vpop.f32.mrf.mxu0  ;;  %v19705_v2 = vld [vmem:[%s22854_s27 + $0x58] sm:$0xff]  }
0x15bc   :  { %18007 = vmatpush3.bf16.msra.mxu1 %v19661_v16  ;;  %vm8629_vm6 = vcmp.ge.f32.partialorder %v8583_v29, 0.0  ;;  %v8632_v36 = vmul.f32 0.2, %v8583_v29  ;;  %v8585_v31 = vadd.f32 %v8584_v33, %v8412_v60  ;;  %v19701_v60 = vld [vmem:[%s22854_s27 + $0x60] sm:$0xff]  }
0x15bd   :  { %18008 = vmatprep.subr.bf16.mxu1 %v20879_v0  ;;  %v8586_v38 = vpop.f32.mrf.mxu0 }
0x15be   :  { %v8635_v39 = vsel %vm8629_vm6, %v8583_v29, %v8632_v36  ;;  %vm8630_vm7 = vcmp.ge.f32.partialorder %v8585_v31, 0.0  ;;  %v8633_v40 = vmul.f32 0.2, %v8585_v31  ;;  %v19709_v29 = vld [vmem:[%s22854_s27 + $0x50] sm:$0xff]  }
0x15bf   :  { %v8587_v48 = vpop.f32.mrf.mxu0 }
0x15c0   :  { %18009 = vmatpush3.bf16.msra.mxu1 %v19662_v9  ;;  %v22189_v49 = vsel %vm8630_vm7, %v8585_v31, %v8633_v40  ;;  %v19698_v40 = vld [vmem:[#allocation10 + $0x228] ss:$12 sps:$4 sm:$0xff]  }
0x15c1   :  { %18014 = vmatprep.subr.bf16.mxu1 %v20879_v0  ;;  %v8639_v52 = vpack.c.bf16 %v22189_v49, %v22189_v49  ;;  %v19704_v48 = vld [vmem:[#allocation10 + $0x214] ss:$12 sps:$4 sm:$0xff]  }
0x15c3   :  { %18011 = vmatmul.mubr.bf16.vlgmr.msra.gmra.mxu1 %v15782_v50  ;;  %v8638_v50 = vpack.c.bf16 %v8635_v39, %v8635_v39  ;;  %8823 = vmatprep.mubr.bf16.mxu0 %v8639_v52  ;;  %v19708_v52 = vld [vmem:[#allocation10 + $0x1fc] ss:$12 sps:$4 sm:$0xff]  }
0x15c4   :  { %18030 = vmatprep.mubr.msk.bf16.mxu1 %vm20880_vm0, %v20879_v0  ;;  %18015 = vmatpush3.bf16.msra.mxu1 %v19673_v22 }
0x15c5   :  { %18016 = vmatprep.subr.bf16.mxu1 %v20879_v0  ;;  %8824 = vmatmul.mubr.bf16.vlgmr.msra.gmra.mxu0 %v8638_v50  ;;  %v19702_v50 = vld [vmem:[#allocation10 + $0x210] ss:$12 sps:$4 sm:$0xff]  }
0x15c6   :  { %18050 = vmatprep.mubr.msk.bf16.mxu0 %vm20880_vm0, %v20879_v0  ;;  %18035 = vmatpush3.bf16.msra.mxu0 %v19687_v4  ;;  %v19716_v4 = vld [vmem:[#allocation10 + $0x1cc] ss:$12 sps:$4 sm:$0xff]  }
0x15c7   :  { %18036 = vmatprep.subr.bf16.mxu0 %v20879_v0 }
0x15c8   :  { %18017 = vmatpush3.bf16.msra.mxu1 %v19676_v28  ;;  %v19696_v28 = vld [vmem:[%s22854_s27 + $0x70] sm:$0xff]  }
0x15c9   :  { %18018 = vmatprep.subr.bf16.mxu1 %v20879_v0 }
0x15ca   :  { %18037 = vmatpush3.bf16.msra.mxu0 %v19688_v25  ;;  %v19714_v25 = vld [vmem:[#allocation10 + $0x1c8] ss:$12 sps:$4 sm:$0xff]  }
0x15cb   :  { %18038 = vmatprep.subr.bf16.mxu0 %v20879_v0 }
0x15cc   :  { %18019 = vmatpush3.bf16.msra.mxu1 %v19679_v34 }
0x15cd   :  { %18020 = vmatprep.subr.bf16.mxu1 %v20879_v0 }
0x15ce   :  { %18039 = vmatpush3.bf16.msra.mxu0 %v19689_v58  ;;  %v19717_v58 = vld [vmem:[%s22854_s27 + $0x40] sm:$0xff]  }
0x15cf   :  { %18040 = vmatprep.subr.bf16.mxu0 %v20879_v0 }
0x15d0   :  { %18021 = vmatpush3.bf16.msra.mxu1 %v19682_v43 }
0x15d1   :  { %18022 = vmatprep.subr.bf16.mxu1 %v20879_v0 }
0x15d2   :  { %18041 = vmatpush3.bf16.msra.mxu0 %v19690_v62  ;;  %v19720_v62 = vld [vmem:[#allocation10 + $0x1b4] ss:$12 sps:$4 sm:$0xff]  }
0x15d3   :  { %18042 = vmatprep.subr.bf16.mxu0 %v20879_v0 }
0x15d4   :  { %18023 = vmatpush3.bf16.msra.mxu1 %v19683_v53  ;;  %v19706_v53 = vld [vmem:[#allocation10 + $0x1f8] ss:$12 sps:$4 sm:$0xff]  }
0x15d5   :  { %18024 = vmatprep.subr.bf16.mxu1 %v20879_v0 }
0x15d6   :  { %18043 = vmatpush3.bf16.msra.mxu0 %v19691_v63  ;;  %v19718_v63 = vld [vmem:[#allocation10 + $0x1b0] ss:$12 sps:$4 sm:$0xff]  }
0x15d7   :  { %18044 = vmatprep.subr.bf16.mxu0 %v20879_v0 }
0x15d8   :  { %18025 = vmatpush3.bf16.msra.mxu1 %v19684_v44  ;;  %v19712_v44 = vld [vmem:[#allocation10 + $0x1e4] ss:$12 sps:$4 sm:$0xff]  }
0x15d9   :  { %18026 = vmatprep.subr.bf16.mxu1 %v20879_v0 }
0x15da   :  { %18045 = vmatpush3.bf16.msra.mxu0 %v19692_v1  ;;  %v19722_v1 = vld [vmem:[#allocation10 + $0x198] ss:$12 sps:$4 sm:$0xff]  }
0x15db   :  { %18046 = vmatprep.subr.bf16.mxu0 %v20879_v0 }
0x15dc   :  { %18027 = vmatpush3.bf16.msra.mxu1 %v19685_v54  ;;  %v19710_v54 = vld [vmem:[#allocation10 + $0x1e0] ss:$12 sps:$4 sm:$0xff]  }
0x15dd   :  { %18028 = vmatprep.subr.bf16.mxu1 %v20879_v0 }
0x15de   :  { %18047 = vmatpush3.bf16.msra.mxu0 %v19693_v23 }
0x15df   :  { %18048 = vmatprep.subr.bf16.mxu0 %v20879_v0 }
0x15e0   :  { %18029 = vmatpush3.bf16.msra.mxu1 %v19686_v56  ;;  %v19713_v56 = vld [vmem:[%s22854_s27 + $0x48] sm:$0xff]  }
0x15e1   :  { %18054 = vmatprep.subr.bf16.mxu1 %v20879_v0 }
0x15e2   :  { %18049 = vmatpush3.bf16.msra.mxu0 %v19694_v24 }
0x15e3   :  { %9338 = vmatprep.subr.bf16.mxu0 %v19700_v27 }
0x1663   :  { %v22213_v3 = vpop.f32.mrf.mxu1 }
0x1665   :  { %v17992_v5 = vpop.f32.mrf.mxu1 }
0x1666   :  { %v19724_v5 = vld [vmem:[#allocation10 + $0x19c] ss:$12 sps:$4 sm:$0xff]  }
0x1667   :  { %v8275_v7 = vpop.f32.mrf.mxu1 }
0x1668   :  { %v19726_v7 = vld [vmem:[#allocation10 + $0x180] ss:$12 sps:$4 sm:$0xff]  }
0x1669   :  { %v17993_v8 = vpop.f32.mrf.mxu1 }
0x166a   :  { %v19728_v8 = vld [vmem:[#allocation10 + $0x184] ss:$12 sps:$4 sm:$0xff]  }
0x1683   :  { %v8623_v11 = vpop.f32.mrf.mxu1 }
0x1684   :  { %v8624_v12 = vadd.f32 %v8623_v11, %v8416_v10  ;;  %v15882_v10 = vld [vmem:[%s22852_s14 + $0x2] sm:$0x1]  ;;  %v19735_v11 = vld [vmem:[#allocation13 + $0x1f8] sm:$0xff]  }
0x1685   :  { %v18012_v14 = vpop.f32.mrf.mxu1  ;;  %v16944_v17 = vpop.f32.mrf.mxu0 }
0x1686   :  { %vm8631_vm8 = vcmp.ge.f32.partialorder %v8624_v12, 0.0  ;;  %v8634_v15 = vmul.f32 0.2, %v8624_v12  ;;  %v19737_v14 = vld [vmem:[#allocation13 + $0x1f0] sm:$0xff]  }
0x1687   :  { %v8626_v32 = vpop.f32.mrf.mxu1  ;;  %v16945_v19 = vpop.f32.mrf.mxu0 }
0x1688   :  { %v8637_v18 = vsel %vm8631_vm8, %v8624_v12, %v8634_v15  ;;  %v16946_v20 = vadd.f32 %v16945_v19, %v16944_v17  ;;  %v19736_v12 = vld [vmem:[#allocation13 + $0x1b8] sm:$0xff]   ;;  %v19738_v15 = vld [vmem:[#allocation13 + $0x1b0] sm:$0xff]   ;;  %v19739_v32 = vld [vmem:[#allocation13 + $0x1e8] sm:$0xff]  }
0x1689   :  { %v8640_v16 = vpack.c.bf16 %v8637_v18, %v8637_v18  ;;  %v18013_v9 = vpop.f32.mrf.mxu1  ;;  %v16947_v21 = vpop.f32.mrf.mxu0  ;;  %v19740_v18 = vld [vmem:[#allocation13 + $0x1a8] sm:$0xff]  }
0x168a   :  { %v8826_v34 = vadd.f32 %v16946_v20, %v15823_v55  ;;  %v19734_v55 = vld [vmem:[#allocation10 + $0x188] ss:$12 sps:$4 sm:$0xff]  }
0x168b   :  { %18031 = vmatmul.mubr.bf16.vlgmr.msra.gmra.mxu1 %v8640_v16  ;;  %v16948_v22 = vpop.f32.mrf.mxu0  ;;  %v15848_v16 = vld [vmem:[#allocation16 + $0x1] ss:$0 sm:$0xff] }
0x168c   :  { %18070 = vmatprep.mubr.msk.bf16.mxu1 %vm20880_vm0, %v20879_v0  ;;  %18055 = vmatpush3.bf16.msra.mxu1 %v19695_v26  ;;  %v19721_v26 = vld [vmem:[#allocation10 + $0x230] ss:$12 sps:$4 sm:$0xff]  }
0x168d   :  { %18056 = vmatprep.subr.bf16.mxu1 %v20879_v0 }
0x1690   :  { %18057 = vmatpush3.bf16.msra.mxu1 %v19696_v28  ;;  %v19725_v28 = vld [vmem:[#allocation10 + $0x218] ss:$12 sps:$4 sm:$0xff]  }
0x1691   :  { %18058 = vmatprep.subr.bf16.mxu1 %v20879_v0 }
0x1694   :  { %18059 = vmatpush3.bf16.msra.mxu1 %v19697_v30  ;;  %v19729_v30 = vld [vmem:[#allocation10 + $0x200] ss:$12 sps:$4 sm:$0xff]  }
0x1695   :  { %18060 = vmatprep.subr.bf16.mxu1 %v20879_v0 }
0x1698   :  { %18061 = vmatpush3.bf16.msra.mxu1 %v19701_v60  ;;  %v19730_v60 = vld [vmem:[#allocation10 + $0x1e8] ss:$12 sps:$4 sm:$0xff]  }
0x1699   :  { %18062 = vmatprep.subr.bf16.mxu1 %v20879_v0 }
0x169c   :  { %18063 = vmatpush3.bf16.msra.mxu1 %v19705_v2  ;;  %v19732_v2 = vld [vmem:[#allocation10 + $0x1b8] ss:$12 sps:$4 sm:$0xff]  }
0x169d   :  { %18064 = vmatprep.subr.bf16.mxu1 %v20879_v0 }
0x16a0   :  { %18065 = vmatpush3.bf16.msra.mxu1 %v19709_v29  ;;  %v19733_v29 = vld [vmem:[#allocation10 + $0x1a0] ss:$12 sps:$4 sm:$0xff]  }
0x16a1   :  { %18066 = vmatprep.subr.bf16.mxu1 %v20879_v0 }
0x16a4   :  { %18067 = vmatpush3.bf16.msra.mxu1 %v19713_v56 }
0x16a5   :  { %18068 = vmatprep.subr.bf16.mxu1 %v20879_v0 }
0x16a8   :  { %18069 = vmatpush3.bf16.msra.mxu1 %v19717_v58 }
0x16a9   :  { %18074 = vmatprep.subr.bf16.mxu1 %v20879_v0 }
0x174b   :  { %v8865_v33 = vpop.f32.mrf.mxu1 }
0x174c   :  { %v8866_v35 = vadd.f32 %v8865_v33, %v8826_v34  ;;  %v19741_v34 = vld [vmem:[#allocation13 + $0x1e0] sm:$0xff]  }
0x174d   :  { %v18032_v36 = vpop.f32.mrf.mxu1  ;;  %v19742_v33 = vld [vmem:[#allocation13 + $0x1a0] sm:$0xff]  }
0x174e   :  { %vm8871_vm9 = vcmp.ge.f32.partialorder %v8866_v35, 0.0  ;;  %v8872_v31 = vmul.f32 0.2, %v8866_v35  ;;  %v19744_v36 = vld [vmem:[#allocation13 + $0x198] sm:$0xff]  }
0x174f   :  { %v8868_v38 = vpop.f32.mrf.mxu1 }
0x1750   :  { %v8873_v39 = vsel %vm8871_vm9, %v8866_v35, %v8872_v31  ;;  %v19743_v35 = vld [vmem:[#allocation13 + $0x1d8] sm:$0xff]   ;;  %v19746_v38 = vld [vmem:[#allocation13 + $0x1d0] sm:$0xff]  }
0x1751   :  { %v8874_v42 = vpack.c.bf16 %v8873_v39, %v8873_v39  ;;  %v18033_v43 = vpop.f32.mrf.mxu1  ;;  %v19745_v31 = vld [vmem:[#allocation13 + $0x238] sm:$0xff]  }
0x1752   :  { %v22253_v39 = vld [vmem:[#allocation12 + $0x6] sm:$0x7] }
0x1753   :  { %18051 = vmatmul.mubr.bf16.vlgmr.msra.gmra.mxu0 %v8874_v42  ;;  %v19747_v42 = vld [vmem:[#allocation13 + $0x190] sm:$0xff]  }
0x1754   :  { %9339 = vmatpush1.bf16.msra.mxu0 %v19698_v40  ;;  %9370 = vmatprep.mubr.bf16.mxu0 %v20882_v59  ;;  %v9198_v40 = vrot.slane %v22253_v39, %v21434_v45  ;;  %v19748_v43 = vld [vmem:[#allocation13 + $0x230] sm:$0xff]  }
0x1755   :  { %9340 = vmatprep.subr.bf16.mxu0 %v19704_v48  ;;  %v19749_v48 = vld [vmem:[#allocation13 + $0x1c8] sm:$0xff]  }
0x1758   :  { %9341 = vmatpush1.bf16.msra.mxu0 %v19702_v50  ;;  %v9202_v50 = vrot.slane %v22253_v39, %v21437_v47 }
0x1759   :  { %9342 = vmatprep.subr.bf16.mxu0 %v19708_v52 }
0x175c   :  { %9343 = vmatpush1.bf16.msra.mxu0 %v19706_v53 }
0x175d   :  { %9344 = vmatprep.subr.bf16.mxu0 %v19712_v44  ;;  %v19750_v44 = vld [vmem:[#allocation13 + $0x188] sm:$0xff]  }
0x1760   :  { %9345 = vmatpush1.bf16.msra.mxu0 %v19710_v54  ;;  %v19751_v54 = vld [vmem:[#allocation13 + $0x228] sm:$0xff]  }
0x1761   :  { %9346 = vmatprep.subr.bf16.mxu0 %v19716_v4  ;;  %v19752_v4 = vld [vmem:[#allocation13 + $0x1c0] sm:$0xff]  }
0x1764   :  { %9347 = vmatpush1.bf16.msra.mxu0 %v19714_v25 }
0x1765   :  { %9348 = vmatprep.subr.bf16.mxu0 %v19720_v62 }
0x1768   :  { %9349 = vmatpush1.bf16.msra.mxu0 %v19718_v63 }
0x1769   :  { %9350 = vmatprep.subr.bf16.mxu0 %v19724_v5  ;;  %v19753_v5 = vld [vmem:[#allocation13 + $0x180] sm:$0xff]  }
0x176c   :  { %9351 = vmatpush1.bf16.msra.mxu0 %v19722_v1 }
0x176d   :  { %9352 = vmatprep.subr.bf16.mxu0 %v19728_v8 }
0x1770   :  { %9353 = vmatpush1.bf16.msra.mxu0 %v19726_v7  ;;  %v19754_v7 = vld [vmem:[#allocation13 + $0x220] sm:$0xff]  }
0x1771   :  { %16986 = vmatprep.subr.bf16.mxu0 %v19735_v11 }
0x1773   :  { %9371 = vmatmul.mubr.bf16.vlgmr.msra.gmra.mxu0 %v15882_v10 }
0x1774   :  { %16987 = vmatpush3.bf16.msra.mxu0 %v19736_v12 }
0x1775   :  { %16988 = vmatprep.subr.bf16.mxu0 %v19737_v14  ;;  %v19755_v14 = vld [vmem:[#allocation13 + $0x218] sm:$0xff]  }
0x1778   :  { %16989 = vmatpush3.bf16.msra.mxu0 %v19738_v15  ;;  %v19756_v15 = vld [vmem:[#allocation13 + $0x210] sm:$0xff]  }
0x1779   :  { %16990 = vmatprep.subr.bf16.mxu0 %v19739_v32  ;;  %v19757_v32 = vld [vmem:[#allocation13 + $0x208] sm:$0xff]  }
0x177c   :  { %16991 = vmatpush3.bf16.msra.mxu0 %v19740_v18  ;;  %v19758_v18 = vld [vmem:[#allocation13 + $0x200] sm:$0xff]  }
0x177d   :  { %16992 = vmatprep.subr.bf16.mxu0 %v19741_v34 }
0x1780   :  { %16993 = vmatpush3.bf16.msra.mxu0 %v19742_v33 }
0x1781   :  { %16994 = vmatprep.subr.bf16.mxu0 %v19743_v35 }
0x1784   :  { %16995 = vmatpush3.bf16.msra.mxu0 %v19744_v36 }
0x1785   :  { %16996 = vmatprep.subr.bf16.mxu0 %v19746_v38 }
0x1788   :  { %16997 = vmatpush3.bf16.msra.mxu0 %v19747_v42  ;;  %v19767_v42 = vld [vmem:[%s22854_s27 + $0xb8] sm:$0xff]  }
0x1789   :  { %16998 = vmatprep.subr.bf16.mxu0 %v19749_v48  ;;  %v19768_v48 = vld [vmem:[%s22854_s27 + $0xb0] sm:$0xff]  }
0x178c   :  { %16999 = vmatpush3.bf16.msra.mxu0 %v19750_v44  ;;  %v19781_v44 = vld [vmem:[%s22854_s27 + $0x90] sm:$0xff]  }
0x178d   :  { %17000 = vmatprep.subr.bf16.mxu0 %v19752_v4 }
0x1790   :  { %17001 = vmatpush3.bf16.msra.mxu0 %v19753_v5  ;;  %v19770_v5 = vld [vmem:[#allocation10 + $0x2e8] ss:$12 sps:$4 sm:$0xff]  }
0x1791   :  { %18114 = vmatprep.subr.bf16.mxu0 %v20879_v0 }
0x1813   :  { %v8963_v9 = vpop.f32.mrf.mxu0 }
0x1814   :  { %v8964_v17 = vadd.f32 %v15848_v16, %v8963_v9  ;;  %v19759_v16 = vld [vmem:[%s22853_s3 + $0xb8] sm:$0xff]   ;;  %v19760_v9 = vld [vmem:[%s22853_s3 + $0xb0] sm:$0xff]  }
0x1815   :  { %v18052_v19 = vpop.f32.mrf.mxu0 }
0x1816   :  { %vm8969_vm10 = vcmp.ge.f32.partialorder %v8964_v17, 0.0  ;;  %v8970_v20 = vmul.f32 0.2, %v8964_v17  ;;  %v19762_v19 = vld [vmem:[%s22853_s3 + $0xa0] sm:$0xff]  }
0x1817   :  { %v8966_v21 = vpop.f32.mrf.mxu0 }
0x1818   :  { %v8971_v22 = vsel %vm8969_vm10, %v8964_v17, %v8970_v20  ;;  %v19761_v17 = vld [vmem:[%s22853_s3 + $0xa8] sm:$0xff]   ;;  %v19763_v20 = vld [vmem:[%s22853_s3 + $0x98] sm:$0xff]   ;;  %v19764_v21 = vld [vmem:[%s22853_s3 + $0x90] sm:$0xff]   ;;  %vm11607_vm10 = vcmask 261120  }
0x1819   :  { %v8972_v23 = vadd.f32 %v8971_v22, %v22189_v49  ;;  %v18053_v24 = vpop.f32.mrf.mxu0  ;;  %v19731_v49 = vld [vmem:[#allocation10 + $0x1d0] ss:$12 sps:$4 sm:$0xff]  }
0x181b   :  { %v8973_v27 = vpack.c.bf16 %v8972_v23, %v8972_v23 }
0x181d   :  { %18071 = vmatmul.mubr.bf16.vlgmr.msra.gmra.mxu1 %v8973_v27  ;;  %v9206_v27 = vrot.slane %v22253_v39, %v21448_v6  ;;  %v19765_v39 = vld [vmem:[%s22853_s3 + $0x88] sm:$0xff]  }
0x181e   :  { %18075 = vmatpush3.bf16.msra.mxu1 %v19721_v26  ;;  %18090 = vmatprep.mubr.msk.bf16.mxu1 %vm20880_vm0, %v20879_v0 }
0x181f   :  { %18076 = vmatprep.subr.bf16.mxu1 %v20879_v0 }
0x1822   :  { %18077 = vmatpush3.bf16.msra.mxu1 %v19725_v28 }
0x1823   :  { %18078 = vmatprep.subr.bf16.mxu1 %v20879_v0 }
0x1826   :  { %18079 = vmatpush3.bf16.msra.mxu1 %v19729_v30 }
0x1827   :  { %18080 = vmatprep.subr.bf16.mxu1 %v20879_v0 }
0x182a   :  { %18081 = vmatpush3.bf16.msra.mxu1 %v19730_v60 }
0x182b   :  { %18082 = vmatprep.subr.bf16.mxu1 %v20879_v0 }
0x182e   :  { %18083 = vmatpush3.bf16.msra.mxu1 %v19731_v49 }
0x182f   :  { %18084 = vmatprep.subr.bf16.mxu1 %v20879_v0 }
0x1832   :  { %18085 = vmatpush3.bf16.msra.mxu1 %v19732_v2 }
0x1833   :  { %18086 = vmatprep.subr.bf16.mxu1 %v20879_v0  ;;  %v9372_v52 = vpop.f32.mrf.mxu0 }
0x1834   :  { %v9373_v53 = vadd.f32 %v9372_v52, %v9198_v40  ;;  %v19766_v40 = vld [vmem:[%s22853_s3 + $0x80] sm:$0xff]  }
0x1835   :  { %v9374_v56 = vpop.f32.mrf.mxu0  ;;  %v19773_v52 = vld [vmem:[%s22854_s27 + $0xa0] sm:$0xff]  }
0x1836   :  { %18087 = vmatpush3.bf16.msra.mxu1 %v19733_v29  ;;  %vm9419_vm11 = vcmp.ge.f32.partialorder %v9373_v53, 0.0  ;;  %v9422_v25 = vmul.f32 0.2, %v9373_v53  ;;  %v9375_v58 = vadd.f32 %v9374_v56, %v9202_v50  ;;  %v19769_v50 = vld [vmem:[%s22854_s27 + $0xa8] sm:$0xff]  }
0x1837   :  { %18088 = vmatprep.subr.bf16.mxu1 %v20879_v0  ;;  %v9376_v62 = vpop.f32.mrf.mxu0 }
0x1838   :  { %v9425_v63 = vsel %vm9419_vm11, %v9373_v53, %v9422_v25  ;;  %vm9420_vm12 = vcmp.ge.f32.partialorder %v9375_v58, 0.0  ;;  %v9423_v1 = vmul.f32 0.2, %v9375_v58  ;;  %v19777_v53 = vld [vmem:[%s22854_s27 + $0x98] sm:$0xff]  }
0x1839   :  { %v9377_v8 = vpop.f32.mrf.mxu0  ;;  %v9428_v11 = vpack.c.bf16 %v9425_v63, %v9425_v63 }
0x183a   :  { %18089 = vmatpush3.bf16.msra.mxu1 %v19734_v55 }
0x183b   :  { %18094 = vmatprep.subr.bf16.mxu1 %v20879_v0 }
0x183d   :  { %18091 = vmatmul.mubr.bf16.vlgmr.msra.gmra.mxu1 %v15882_v10  ;;  %v22262_v10 = vsel %vm9420_vm12, %v9375_v58, %v9423_v1  ;;  %vm11479_vm12 = vcmask 523264  }
0x183e   :  { %18110 = vmatprep.mubr.msk.bf16.mxu1 %vm20880_vm0, %v20879_v0  ;;  %18095 = vmatpush3.bf16.msra.mxu1 %v19745_v31  ;;  %v9429_v12 = vpack.c.bf16 %v22262_v10, %v22262_v10 }
0x183f   :  { %18096 = vmatprep.subr.bf16.mxu1 %v20879_v0 }
0x1840   :  { %9613 = vmatprep.mubr.bf16.mxu0 %v9429_v12  ;;  %v19774_v12 = vld [vmem:[#allocation10 + $0x2d0] ss:$12 sps:$4 sm:$0xff]  }
0x1841   :  { %9614 = vmatmul.mubr.bf16.vlgmr.msra.gmra.mxu0 %v9428_v11  ;;  %v19776_v11 = vld [vmem:[#allocation10 + $0x2d4] ss:$12 sps:$4 sm:$0xff]  }
0x1842   :  { %18097 = vmatpush3.bf16.msra.mxu1 %v19748_v43  ;;  %18130 = vmatprep.mubr.msk.bf16.mxu0 %vm20880_vm0, %v20879_v0  ;;  %v19772_v43 = vld [vmem:[#allocation10 + $0x2ec] ss:$12 sps:$4 sm:$0xff]  }
0x1843   :  { %18098 = vmatprep.subr.bf16.mxu1 %v20879_v0  ;;  %18115 = vmatpush3.bf16.msra.mxu0 %v19759_v16  ;;  %v19785_v16 = vld [vmem:[%s22854_s27 + $0x88] sm:$0xff]  }
0x1844   :  { %18116 = vmatprep.subr.bf16.mxu0 %v20879_v0 }
0x1846   :  { %18099 = vmatpush3.bf16.msra.mxu1 %v19751_v54  ;;  %v15923_v54 = vld [vmem:[#allocation15 + $0x2] ss:$0 sm:$0xff] }
0x1847   :  { %18100 = vmatprep.subr.bf16.mxu1 %v20879_v0  ;;  %18117 = vmatpush3.bf16.msra.mxu0 %v19760_v9  ;;  %v19788_v9 = vld [vmem:[#allocation10 + $0x28c] ss:$12 sps:$4 sm:$0xff]  }
0x1848   :  { %18118 = vmatprep.subr.bf16.mxu0 %v20879_v0 }
0x184a   :  { %18101 = vmatpush3.bf16.msra.mxu1 %v19754_v7 }
0x184b   :  { %18102 = vmatprep.subr.bf16.mxu1 %v20879_v0  ;;  %18119 = vmatpush3.bf16.msra.mxu0 %v19761_v17  ;;  %v19786_v17 = vld [vmem:[#allocation10 + $0x288] ss:$12 sps:$4 sm:$0xff]  }
0x184c   :  { %18120 = vmatprep.subr.bf16.mxu0 %v20879_v0 }
0x184e   :  { %18103 = vmatpush3.bf16.msra.mxu1 %v19755_v14  ;;  %v19780_v14 = vld [vmem:[#allocation10 + $0x2bc] ss:$12 sps:$4 sm:$0xff]  }
0x184f   :  { %18104 = vmatprep.subr.bf16.mxu1 %v20879_v0  ;;  %18121 = vmatpush3.bf16.msra.mxu0 %v19762_v19  ;;  %v19789_v19 = vld [vmem:[%s22854_s27 + $0x80] sm:$0xff]  }
0x1850   :  { %18122 = vmatprep.subr.bf16.mxu0 %v20879_v0 }
0x1852   :  { %18105 = vmatpush3.bf16.msra.mxu1 %v19756_v15  ;;  %v19778_v15 = vld [vmem:[#allocation10 + $0x2b8] ss:$12 sps:$4 sm:$0xff]  }
0x1853   :  { %18106 = vmatprep.subr.bf16.mxu1 %v20879_v0  ;;  %18123 = vmatpush3.bf16.msra.mxu0 %v19763_v20  ;;  %v19792_v20 = vld [vmem:[#allocation10 + $0x274] ss:$12 sps:$4 sm:$0xff]  }
0x1854   :  { %18124 = vmatprep.subr.bf16.mxu0 %v20879_v0 }
0x1856   :  { %18107 = vmatpush3.bf16.msra.mxu1 %v19757_v32  ;;  %v19784_v32 = vld [vmem:[#allocation10 + $0x2a4] ss:$12 sps:$4 sm:$0xff]  }
0x1857   :  { %18108 = vmatprep.subr.bf16.mxu1 %v20879_v0  ;;  %18125 = vmatpush3.bf16.msra.mxu0 %v19764_v21  ;;  %v19790_v21 = vld [vmem:[#allocation10 + $0x270] ss:$12 sps:$4 sm:$0xff]  }
0x1858   :  { %18126 = vmatprep.subr.bf16.mxu0 %v20879_v0 }
0x185a   :  { %18109 = vmatpush3.bf16.msra.mxu1 %v19758_v18  ;;  %v19782_v18 = vld [vmem:[#allocation10 + $0x2a0] ss:$12 sps:$4 sm:$0xff]  }
0x185b   :  { %18134 = vmatprep.subr.bf16.mxu1 %v20879_v0  ;;  %18127 = vmatpush3.bf16.msra.mxu0 %v19765_v39 }
0x185c   :  { %18128 = vmatprep.subr.bf16.mxu0 %v20879_v0 }
0x185f   :  { %18129 = vmatpush3.bf16.msra.mxu0 %v19766_v40 }
0x1860   :  { %10128 = vmatprep.subr.bf16.mxu0 %v19772_v43  ;;  %v19793_v43 = vld [vmem:[#allocation10 + $0x2f0] ss:$12 sps:$4 sm:$0xff]  }
0x18dd   :  { %v22286_v22 = vpop.f32.mrf.mxu1 }
0x18df   :  { %v18072_v23 = vpop.f32.mrf.mxu1 }
0x18e0   :  { %v19794_v23 = vld [vmem:[#allocation10 + $0x258] ss:$12 sps:$4 sm:$0xff]  }
0x18e1   :  { %v9065_v24 = vpop.f32.mrf.mxu1 }
0x18e2   :  { %v19796_v24 = vld [vmem:[#allocation10 + $0x25c] ss:$12 sps:$4 sm:$0xff]  }
0x18e3   :  { %v18073_v26 = vpop.f32.mrf.mxu1 }
0x18e4   :  { %v19798_v26 = vld [vmem:[#allocation10 + $0x240] ss:$12 sps:$4 sm:$0xff]  }
0x18fd   :  { %v9413_v28 = vpop.f32.mrf.mxu1 }
0x18fe   :  { %v9414_v30 = vadd.f32 %v9413_v28, %v9206_v27  ;;  %v19800_v27 = vld [vmem:[#allocation10 + $0x244] ss:$12 sps:$4 sm:$0xff]   ;;  %v15982_v28 = vld [vmem:[%s22852_s14 + $0x3] sm:$0x1] }
0x18ff   :  { %v18092_v60 = vpop.f32.mrf.mxu1 }
0x1900   :  { %vm9421_vm13 = vcmp.ge.f32.partialorder %v9414_v30, 0.0  ;;  %v9424_v49 = vmul.f32 0.2, %v9414_v30  ;;  %v19808_v60 = vld [vmem:[#allocation13 + $0x278] sm:$0xff]  }
0x1901   :  { %v9416_v2 = vpop.f32.mrf.mxu1  ;;  %v17002_v33 = vpop.f32.mrf.mxu0 }
0x1902   :  { %v9427_v29 = vsel %vm9421_vm13, %v9414_v30, %v9424_v49  ;;  %v19807_v30 = vld [vmem:[#allocation13 + $0x2b8] sm:$0xff]   ;;  %v19809_v49 = vld [vmem:[#allocation13 + $0x2b0] sm:$0xff]  }
0x1903   :  { %v9430_v55 = vpack.c.bf16 %v9427_v29, %v9427_v29  ;;  %v18093_v34 = vpop.f32.mrf.mxu1  ;;  %v17003_v35 = vpop.f32.mrf.mxu0  ;;  %v19810_v2 = vld [vmem:[#allocation13 + $0x270] sm:$0xff]   ;;  %v19811_v29 = vld [vmem:[#allocation13 + $0x2a8] sm:$0xff]  }
0x1904   :  { %v17004_v36 = vadd.f32 %v17003_v35, %v17002_v33  ;;  %v15948_v34 = vld [vmem:[#allocation16 + $0x2] ss:$0 sm:$0xff] }
0x1905   :  { %18111 = vmatmul.mubr.bf16.vlgmr.msra.gmra.mxu1 %v9430_v55  ;;  %v17005_v31 = vpop.f32.mrf.mxu0  ;;  %v19812_v55 = vld [vmem:[#allocation13 + $0x268] sm:$0xff]  }
0x1906   :  { %18150 = vmatprep.mubr.msk.bf16.mxu1 %vm20880_vm0, %v20879_v0  ;;  %18135 = vmatpush3.bf16.msra.mxu1 %v19767_v42  ;;  %v9616_v56 = vadd.f32 %v17004_v36, %v15923_v54  ;;  %v19805_v54 = vld [vmem:[#allocation10 + $0x260] ss:$12 sps:$4 sm:$0xff]  }
0x1907   :  { %v17006_v38 = vpop.f32.mrf.mxu0  ;;  %18136 = vmatprep.subr.bf16.mxu1 %v20879_v0 }
0x190a   :  { %18137 = vmatpush3.bf16.msra.mxu1 %v19768_v48 }
0x190b   :  { %18138 = vmatprep.subr.bf16.mxu1 %v20879_v0 }
0x190e   :  { %18139 = vmatpush3.bf16.msra.mxu1 %v19769_v50  ;;  %v19797_v50 = vld [vmem:[#allocation10 + $0x2d8] ss:$12 sps:$4 sm:$0xff]  }
0x190f   :  { %18140 = vmatprep.subr.bf16.mxu1 %v20879_v0 }
0x1912   :  { %18141 = vmatpush3.bf16.msra.mxu1 %v19773_v52  ;;  %v19801_v52 = vld [vmem:[#allocation10 + $0x2c0] ss:$12 sps:$4 sm:$0xff]  }
0x1913   :  { %18142 = vmatprep.subr.bf16.mxu1 %v20879_v0 }
0x1916   :  { %18143 = vmatpush3.bf16.msra.mxu1 %v19777_v53  ;;  %v19802_v53 = vld [vmem:[#allocation10 + $0x2a8] ss:$12 sps:$4 sm:$0xff]  }
0x1917   :  { %18144 = vmatprep.subr.bf16.mxu1 %v20879_v0 }
0x191a   :  { %18145 = vmatpush3.bf16.msra.mxu1 %v19781_v44  ;;  %v19804_v44 = vld [vmem:[#allocation10 + $0x278] ss:$12 sps:$4 sm:$0xff]  }
0x191b   :  { %18146 = vmatprep.subr.bf16.mxu1 %v20879_v0 }
0x191e   :  { %18147 = vmatpush3.bf16.msra.mxu1 %v19785_v16  ;;  %v19823_v16 = vld [vmem:[#allocation13 + $0x2e8] sm:$0xff]  }
0x191f   :  { %18148 = vmatprep.subr.bf16.mxu1 %v20879_v0 }
0x1922   :  { %18149 = vmatpush3.bf16.msra.mxu1 %v19789_v19 }
0x1923   :  { %18154 = vmatprep.subr.bf16.mxu1 %v20879_v0 }
0x19c5   :  { %v9655_v4 = vpop.f32.mrf.mxu1 }
0x19c6   :  { %v9656_v25 = vadd.f32 %v9655_v4, %v9616_v56  ;;  %v19806_v56 = vld [vmem:[#allocation10 + $0x248] ss:$12 sps:$4 sm:$0xff]  }
0x19c7   :  { %v18112_v58 = vpop.f32.mrf.mxu1  ;;  %v19813_v4 = vld [vmem:[#allocation13 + $0x2a0] sm:$0xff]  }
0x19c8   :  { %vm9661_vm14 = vcmp.ge.f32.partialorder %v9656_v25, 0.0  ;;  %v9662_v62 = vmul.f32 0.2, %v9656_v25  ;;  %v19815_v58 = vld [vmem:[#allocation13 + $0x298] sm:$0xff]  }
0x19c9   :  { %v9658_v63 = vpop.f32.mrf.mxu1 }
0x19ca   :  { %v9663_v1 = vsel %vm9661_vm14, %v9656_v25, %v9662_v62  ;;  %v19814_v25 = vld [vmem:[#allocation13 + $0x260] sm:$0xff]   ;;  %v19816_v62 = vld [vmem:[#allocation13 + $0x258] sm:$0xff]  }
0x19cb   :  { %v9664_v7 = vpack.c.bf16 %v9663_v1, %v9663_v1  ;;  %v18113_v8 = vpop.f32.mrf.mxu1  ;;  %v19817_v63 = vld [vmem:[#allocation13 + $0x2f8] sm:$0xff]   ;;  %v19818_v1 = vld [vmem:[#allocation13 + $0x290] sm:$0xff]  }
0x19cc   :  { %v19819_v8 = vld [vmem:[#allocation13 + $0x250] sm:$0xff]  }
0x19cd   :  { %18131 = vmatmul.mubr.bf16.vlgmr.msra.gmra.mxu0 %v9664_v7 }
0x19ce   :  { %10129 = vmatpush1.bf16.msra.mxu0 %v19770_v5  ;;  %10160 = vmatprep.mubr.bf16.mxu0 %v20882_v59  ;;  %v22326_v5 = vld [vmem:[#allocation12 + $0x9] sm:$0x7] }
0x19cf   :  { %10130 = vmatprep.subr.bf16.mxu0 %v19776_v11  ;;  %v9988_v7 = vrot.slane %v22326_v5, %v21434_v45  ;;  %v19820_v11 = vld [vmem:[#allocation13 + $0x2f0] sm:$0xff]  }
0x19d2   :  { %10131 = vmatpush1.bf16.msra.mxu0 %v19774_v12  ;;  %v19821_v12 = vld [vmem:[#allocation13 + $0x288] sm:$0xff]  }
0x19d3   :  { %10132 = vmatprep.subr.bf16.mxu0 %v19780_v14  ;;  %v9992_v14 = vrot.slane %v22326_v5, %v21437_v47 }
0x19d6   :  { %10133 = vmatpush1.bf16.msra.mxu0 %v19778_v15 }
0x19d7   :  { %10134 = vmatprep.subr.bf16.mxu0 %v19784_v32 }
0x19da   :  { %10135 = vmatpush1.bf16.msra.mxu0 %v19782_v18  ;;  %v19822_v18 = vld [vmem:[#allocation13 + $0x248] sm:$0xff]  }
0x19db   :  { %10136 = vmatprep.subr.bf16.mxu0 %v19788_v9 }
0x19de   :  { %10137 = vmatpush1.bf16.msra.mxu0 %v19786_v17  ;;  %v19824_v17 = vld [vmem:[#allocation13 + $0x280] sm:$0xff]  }
0x19df   :  { %10138 = vmatprep.subr.bf16.mxu0 %v19792_v20 }
0x19e2   :  { %10139 = vmatpush1.bf16.msra.mxu0 %v19790_v21 }
0x19e3   :  { %10140 = vmatprep.subr.bf16.mxu0 %v19796_v24 }
0x19e6   :  { %10141 = vmatpush1.bf16.msra.mxu0 %v19794_v23 }
0x19e7   :  { %10142 = vmatprep.subr.bf16.mxu0 %v19800_v27  ;;  %v19826_v27 = vld [vmem:[#allocation13 + $0x2e0] sm:$0xff]  }
0x19ea   :  { %10143 = vmatpush1.bf16.msra.mxu0 %v19798_v26  ;;  %v19825_v26 = vld [vmem:[#allocation13 + $0x240] sm:$0xff]  }
0x19eb   :  { %17044 = vmatprep.subr.bf16.mxu0 %v19807_v30 }
0x19ed   :  { %10161 = vmatmul.mubr.bf16.vlgmr.msra.gmra.mxu0 %v15982_v28 }
0x19ee   :  { %17045 = vmatpush3.bf16.msra.mxu0 %v19808_v60 }
0x19ef   :  { %17046 = vmatprep.subr.bf16.mxu0 %v19809_v49 }
0x19f2   :  { %17047 = vmatpush3.bf16.msra.mxu0 %v19810_v2  ;;  %v19827_v2 = vld [vmem:[#allocation13 + $0x2d8] sm:$0xff]  }
0x19f3   :  { %17048 = vmatprep.subr.bf16.mxu0 %v19811_v29  ;;  %v19828_v29 = vld [vmem:[#allocation13 + $0x2d0] sm:$0xff]  }
0x19f6   :  { %17049 = vmatpush3.bf16.msra.mxu0 %v19812_v55  ;;  %v19829_v55 = vld [vmem:[#allocation13 + $0x2c8] sm:$0xff]  }
0x19f7   :  { %17050 = vmatprep.subr.bf16.mxu0 %v19813_v4 }
0x19fa   :  { %17051 = vmatpush3.bf16.msra.mxu0 %v19814_v25 }
0x19fb   :  { %17052 = vmatprep.subr.bf16.mxu0 %v19815_v58 }
0x19fe   :  { %17053 = vmatpush3.bf16.msra.mxu0 %v19816_v62 }
0x19ff   :  { %17054 = vmatprep.subr.bf16.mxu0 %v19818_v1 }
0x1a02   :  { %17055 = vmatpush3.bf16.msra.mxu0 %v19819_v8  ;;  %v19838_v8 = vld [vmem:[%s22853_s3 + $0xc0] sm:$0xff]  }
0x1a03   :  { %17056 = vmatprep.subr.bf16.mxu0 %v19821_v12  ;;  %v19844_v12 = vld [vmem:[#allocation10 + $0x3ac] ss:$12 sps:$4 sm:$0xff]  }
0x1a06   :  { %17057 = vmatpush3.bf16.msra.mxu0 %v19822_v18  ;;  %v19849_v18 = vld [vmem:[%s22854_s27 + $0xd8] sm:$0xff]  }
0x1a07   :  { %17058 = vmatprep.subr.bf16.mxu0 %v19824_v17 }
0x1a0a   :  { %17059 = vmatpush3.bf16.msra.mxu0 %v19825_v26 }
0x1a0b   :  { %18194 = vmatprep.subr.bf16.mxu0 %v20879_v0 }
0x1a8d   :  { %v9753_v33 = vpop.f32.mrf.mxu0 }
0x1a8e   :  { %v9754_v35 = vadd.f32 %v15948_v34, %v9753_v33  ;;  %v19830_v34 = vld [vmem:[#allocation13 + $0x2c0] sm:$0xff]  }
0x1a8f   :  { %v18132_v36 = vpop.f32.mrf.mxu0  ;;  %v19831_v33 = vld [vmem:[%s22853_s3 + $0xf8] sm:$0xff]  }
0x1a90   :  { %vm9759_vm15 = vcmp.ge.f32.partialorder %v9754_v35, 0.0  ;;  %v9760_v31 = vmul.f32 0.2, %v9754_v35  ;;  %v19833_v36 = vld [vmem:[%s22853_s3 + $0xe8] sm:$0xff]  }
0x1a91   :  { %v9756_v38 = vpop.f32.mrf.mxu0 }
0x1a92   :  { %v9761_v39 = vsel %vm9759_vm15, %v9754_v35, %v9760_v31  ;;  %v19832_v35 = vld [vmem:[%s22853_s3 + $0xf0] sm:$0xff]   ;;  %v19834_v31 = vld [vmem:[%s22853_s3 + $0xe0] sm:$0xff]   ;;  %v19835_v38 = vld [vmem:[%s22853_s3 + $0xd8] sm:$0xff]  }
0x1a93   :  { %v9762_v40 = vadd.f32 %v9761_v39, %v22262_v10  ;;  %v18133_v42 = vpop.f32.mrf.mxu0  ;;  %v19803_v10 = vld [vmem:[#allocation10 + $0x290] ss:$12 sps:$4 sm:$0xff]  }
0x1a94   :  { %v19836_v39 = vld [vmem:[%s22853_s3 + $0xd0] sm:$0xff]  }
0x1a95   :  { %v9763_v48 = vpack.c.bf16 %v9762_v40, %v9762_v40 }
0x1a97   :  { %18151 = vmatmul.mubr.bf16.vlgmr.msra.gmra.mxu1 %v9763_v48 }
0x1a98   :  { %18155 = vmatpush3.bf16.msra.mxu1 %v19793_v43  ;;  %18170 = vmatprep.mubr.msk.bf16.mxu1 %vm20880_vm0, %v20879_v0 }
0x1a99   :  { %18156 = vmatprep.subr.bf16.mxu1 %v20879_v0 }
0x1a9c   :  { %18157 = vmatpush3.bf16.msra.mxu1 %v19797_v50  ;;  %v9996_v50 = vrot.slane %v22326_v5, %v21448_v6 }
0x1a9d   :  { %18158 = vmatprep.subr.bf16.mxu1 %v20879_v0 }
0x1aa0   :  { %18159 = vmatpush3.bf16.msra.mxu1 %v19801_v52 }
0x1aa1   :  { %18160 = vmatprep.subr.bf16.mxu1 %v20879_v0 }
0x1aa4   :  { %18161 = vmatpush3.bf16.msra.mxu1 %v19802_v53 }
0x1aa5   :  { %18162 = vmatprep.subr.bf16.mxu1 %v20879_v0 }
0x1aa8   :  { %18163 = vmatpush3.bf16.msra.mxu1 %v19803_v10 }
0x1aa9   :  { %18164 = vmatprep.subr.bf16.mxu1 %v20879_v0 }
0x1aac   :  { %18165 = vmatpush3.bf16.msra.mxu1 %v19804_v44 }
0x1aad   :  { %18166 = vmatprep.subr.bf16.mxu1 %v20879_v0  ;;  %v10162_v15 = vpop.f32.mrf.mxu0 }
0x1aae   :  { %v10163_v32 = vadd.f32 %v10162_v15, %v9988_v7  ;;  %v19837_v7 = vld [vmem:[%s22853_s3 + $0xc8] sm:$0xff]  }
0x1aaf   :  { %v10164_v9 = vpop.f32.mrf.mxu0  ;;  %v19841_v15 = vld [vmem:[%s22854_s27 + $0xe8] sm:$0xff]  }
0x1ab0   :  { %18167 = vmatpush3.bf16.msra.mxu1 %v19805_v54  ;;  %vm10209_vm1 = vcmp.ge.f32.partialorder %v10163_v32, 0.0  ;;  %v10212_v19 = vmul.f32 0.2, %v10163_v32  ;;  %v10165_v20 = vadd.f32 %v10164_v9, %v9992_v14  ;;  %v19840_v14 = vld [vmem:[%s22854_s27 + $0xf0] sm:$0xff]  }
0x1ab1   :  { %18168 = vmatprep.subr.bf16.mxu1 %v20879_v0  ;;  %v10166_v21 = vpop.f32.mrf.mxu0  ;;  %v16023_v9 = vld [vmem:[#allocation15 + $0x3] ss:$0 sm:$0xff] }
0x1ab2   :  { %v10215_v23 = vsel %vm10209_vm1, %v10163_v32, %v10212_v19  ;;  %vm10210_vm2 = vcmp.ge.f32.partialorder %v10165_v20, 0.0  ;;  %v10213_v24 = vmul.f32 0.2, %v10165_v20  ;;  %v19845_v32 = vld [vmem:[%s22854_s27 + $0xe0] sm:$0xff]  }
0x1ab3   :  { %v10218_v60 = vpack.c.bf16 %v10215_v23, %v10215_v23 }
0x1ab4   :  { %18169 = vmatpush3.bf16.msra.mxu1 %v19806_v56  ;;  %v22335_v30 = vsel %vm10210_vm2, %v10165_v20, %v10213_v24 }
0x1ab5   :  { %18174 = vmatprep.subr.bf16.mxu1 %v20879_v0  ;;  %v10219_v49 = vpack.c.bf16 %v22335_v30, %v22335_v30 }
0x1ab7   :  { %18171 = vmatmul.mubr.bf16.vlgmr.msra.gmra.mxu1 %v15982_v28  ;;  %v10167_v28 = vpop.f32.mrf.mxu0  ;;  %10403 = vmatprep.mubr.bf16.mxu0 %v10219_v49  ;;  %v19848_v49 = vld [vmem:[#allocation10 + $0x394] ss:$12 sps:$4 sm:$0xff]  }
0x1ab8   :  { %18190 = vmatprep.mubr.msk.bf16.mxu1 %vm20880_vm0, %v20879_v0  ;;  %18175 = vmatpush3.bf16.msra.mxu1 %v19817_v63 }
0x1ab9   :  { %18176 = vmatprep.subr.bf16.mxu1 %v20879_v0  ;;  %10404 = vmatmul.mubr.bf16.vlgmr.msra.gmra.mxu0 %v10218_v60 }
0x1aba   :  { %18210 = vmatprep.mubr.msk.bf16.mxu0 %vm20880_vm0, %v20879_v0  ;;  %18195 = vmatpush3.bf16.msra.mxu0 %v19831_v33  ;;  %v19854_v33 = vld [vmem:[#allocation10 + $0x360] ss:$12 sps:$4 sm:$0xff]  }
0x1abb   :  { %18196 = vmatprep.subr.bf16.mxu0 %v20879_v0 }
0x1abc   :  { %18177 = vmatpush3.bf16.msra.mxu1 %v19820_v11  ;;  %v19839_v11 = vld [vmem:[%s22854_s27 + $0xf8] sm:$0xff]  }
0x1abd   :  { %18178 = vmatprep.subr.bf16.mxu1 %v20879_v0 }
0x1abe   :  { %18197 = vmatpush3.bf16.msra.mxu0 %v19832_v35  ;;  %v19857_v35 = vld [vmem:[%s22854_s27 + $0xc8] sm:$0xff]  }
0x1abf   :  { %18198 = vmatprep.subr.bf16.mxu0 %v20879_v0 }
0x1ac0   :  { %18179 = vmatpush3.bf16.msra.mxu1 %v19823_v16  ;;  %v19853_v16 = vld [vmem:[%s22854_s27 + $0xd0] sm:$0xff]  }
0x1ac1   :  { %18180 = vmatprep.subr.bf16.mxu1 %v20879_v0 }
0x1ac2   :  { %18199 = vmatpush3.bf16.msra.mxu0 %v19833_v36  ;;  %v19860_v36 = vld [vmem:[#allocation10 + $0x34c] ss:$12 sps:$4 sm:$0xff]  }
0x1ac3   :  { %18200 = vmatprep.subr.bf16.mxu0 %v20879_v0 }
0x1ac4   :  { %18181 = vmatpush3.bf16.msra.mxu1 %v19826_v27  ;;  %v19842_v27 = vld [vmem:[#allocation10 + $0x3a8] ss:$12 sps:$4 sm:$0xff]  }
0x1ac5   :  { %18182 = vmatprep.subr.bf16.mxu1 %v20879_v0 }
0x1ac6   :  { %18201 = vmatpush3.bf16.msra.mxu0 %v19834_v31  ;;  %v19858_v31 = vld [vmem:[#allocation10 + $0x348] ss:$12 sps:$4 sm:$0xff]  }
0x1ac7   :  { %18202 = vmatprep.subr.bf16.mxu0 %v20879_v0 }
0x1ac8   :  { %18183 = vmatpush3.bf16.msra.mxu1 %v19827_v2  ;;  %v19846_v2 = vld [vmem:[#allocation10 + $0x390] ss:$12 sps:$4 sm:$0xff]  }
0x1ac9   :  { %18184 = vmatprep.subr.bf16.mxu1 %v20879_v0 }
0x1aca   :  { %18203 = vmatpush3.bf16.msra.mxu0 %v19835_v38  ;;  %v19861_v38 = vld [vmem:[%s22854_s27 + $0xc0] sm:$0xff]  }
0x1acb   :  { %18204 = vmatprep.subr.bf16.mxu0 %v20879_v0 }
0x1acc   :  { %18185 = vmatpush3.bf16.msra.mxu1 %v19828_v29  ;;  %v19852_v29 = vld [vmem:[#allocation10 + $0x37c] ss:$12 sps:$4 sm:$0xff]  }
0x1acd   :  { %18186 = vmatprep.subr.bf16.mxu1 %v20879_v0 }
0x1ace   :  { %18205 = vmatpush3.bf16.msra.mxu0 %v19836_v39  ;;  %v19862_v39 = vld [vmem:[#allocation10 + $0x330] ss:$12 sps:$4 sm:$0xff]  }
0x1acf   :  { %18206 = vmatprep.subr.bf16.mxu0 %v20879_v0 }
0x1ad0   :  { %18187 = vmatpush3.bf16.msra.mxu1 %v19829_v55  ;;  %v19850_v55 = vld [vmem:[#allocation10 + $0x378] ss:$12 sps:$4 sm:$0xff]  }
0x1ad1   :  { %18188 = vmatprep.subr.bf16.mxu1 %v20879_v0 }
0x1ad2   :  { %18207 = vmatpush3.bf16.msra.mxu0 %v19837_v7 }
0x1ad3   :  { %18208 = vmatprep.subr.bf16.mxu0 %v20879_v0 }
0x1ad4   :  { %18189 = vmatpush3.bf16.msra.mxu1 %v19830_v34  ;;  %v19856_v34 = vld [vmem:[#allocation10 + $0x364] ss:$12 sps:$4 sm:$0xff]  }
0x1ad5   :  { %18214 = vmatprep.subr.bf16.mxu1 %v20879_v0 }
0x1ad6   :  { %18209 = vmatpush3.bf16.msra.mxu0 %v19838_v8 }
0x1ad7   :  { %10918 = vmatprep.subr.bf16.mxu0 %v19844_v12  ;;  %v19865_v12 = vld [vmem:[#allocation10 + $0x3b0] ss:$12 sps:$4 sm:$0xff]  }
0x1b57   :  { %v22359_v40 = vpop.f32.mrf.mxu1 }
0x1b59   :  { %v18152_v42 = vpop.f32.mrf.mxu1 }
0x1b5a   :  { %v19866_v42 = vld [vmem:[#allocation10 + $0x318] ss:$12 sps:$4 sm:$0xff]  }
0x1b5b   :  { %v9855_v43 = vpop.f32.mrf.mxu1 }
0x1b5c   :  { %v19868_v43 = vld [vmem:[#allocation10 + $0x31c] ss:$12 sps:$4 sm:$0xff]  }
0x1b5d   :  { %v18153_v48 = vpop.f32.mrf.mxu1 }
0x1b5e   :  { %v19870_v48 = vld [vmem:[#allocation10 + $0x300] ss:$12 sps:$4 sm:$0xff]  }
0x1b77   :  { %v10203_v52 = vpop.f32.mrf.mxu1 }
0x1b78   :  { %v10204_v53 = vadd.f32 %v10203_v52, %v9996_v50  ;;  %v19872_v50 = vld [vmem:[#allocation10 + $0x304] ss:$12 sps:$4 sm:$0xff]   ;;  %v16082_v52 = vld [vmem:[%s22852_s14 + $0x4] sm:$0x1] }
0x1b79   :  { %v18172_v10 = vpop.f32.mrf.mxu1  ;;  %v17060_v58 = vpop.f32.mrf.mxu0 }
0x1b7a   :  { %vm10211_vm3 = vcmp.ge.f32.partialorder %v10204_v53, 0.0  ;;  %v10214_v44 = vmul.f32 0.2, %v10204_v53  ;;  %v19880_v10 = vld [vmem:[#allocation13 + $0x338] sm:$0xff]  }
0x1b7b   :  { %v10206_v54 = vpop.f32.mrf.mxu1  ;;  %v17061_v62 = vpop.f32.mrf.mxu0 }
0x1b7c   :  { %v10217_v56 = vsel %vm10211_vm3, %v10204_v53, %v10214_v44  ;;  %v17062_v63 = vadd.f32 %v17061_v62, %v17060_v58  ;;  %v19879_v53 = vld [vmem:[#allocation13 + $0x378] sm:$0xff]   ;;  %v19881_v44 = vld [vmem:[#allocation13 + $0x370] sm:$0xff]  }
0x1b7d   :  { %v10220_v4 = vpack.c.bf16 %v10217_v56, %v10217_v56  ;;  %v18173_v25 = vpop.f32.mrf.mxu1  ;;  %v17063_v1 = vpop.f32.mrf.mxu0  ;;  %v19882_v54 = vld [vmem:[#allocation13 + $0x330] sm:$0xff]   ;;  %v19883_v56 = vld [vmem:[#allocation13 + $0x368] sm:$0xff]  }
0x1b7e   :  { %v10406_v17 = vadd.f32 %v17062_v63, %v16023_v9  ;;  %v16048_v25 = vld [vmem:[#allocation16 + $0x3] ss:$0 sm:$0xff]  ;;  %v19877_v9 = vld [vmem:[#allocation10 + $0x320] ss:$12 sps:$4 sm:$0xff]  }
0x1b7f   :  { %18191 = vmatmul.mubr.bf16.vlgmr.msra.gmra.mxu1 %v10220_v4  ;;  %v17064_v5 = vpop.f32.mrf.mxu0  ;;  %v19884_v4 = vld [vmem:[#allocation13 + $0x328] sm:$0xff]  }
0x1b80   :  { %18230 = vmatprep.mubr.msk.bf16.mxu1 %vm20880_vm0, %v20879_v0  ;;  %18215 = vmatpush3.bf16.msra.mxu1 %v19839_v11 }
0x1b81   :  { %18216 = vmatprep.subr.bf16.mxu1 %v20879_v0 }
0x1b84   :  { %18217 = vmatpush3.bf16.msra.mxu1 %v19840_v14 }
0x1b85   :  { %18218 = vmatprep.subr.bf16.mxu1 %v20879_v0 }
0x1b88   :  { %18219 = vmatpush3.bf16.msra.mxu1 %v19841_v15  ;;  %v19869_v15 = vld [vmem:[#allocation10 + $0x398] ss:$12 sps:$4 sm:$0xff]  }
0x1b89   :  { %18220 = vmatprep.subr.bf16.mxu1 %v20879_v0 }
0x1b8c   :  { %18221 = vmatpush3.bf16.msra.mxu1 %v19845_v32  ;;  %v19873_v32 = vld [vmem:[#allocation10 + $0x380] ss:$12 sps:$4 sm:$0xff]  }
0x1b8d   :  { %18222 = vmatprep.subr.bf16.mxu1 %v20879_v0 }
0x1b90   :  { %18223 = vmatpush3.bf16.msra.mxu1 %v19849_v18  ;;  %v19874_v18 = vld [vmem:[#allocation10 + $0x368] ss:$12 sps:$4 sm:$0xff]  }
0x1b91   :  { %18224 = vmatprep.subr.bf16.mxu1 %v20879_v0 }
0x1b94   :  { %18225 = vmatpush3.bf16.msra.mxu1 %v19853_v16  ;;  %v19876_v16 = vld [vmem:[#allocation10 + $0x338] ss:$12 sps:$4 sm:$0xff]  }
0x1b95   :  { %18226 = vmatprep.subr.bf16.mxu1 %v20879_v0 }
0x1b98   :  { %18227 = vmatpush3.bf16.msra.mxu1 %v19857_v35  ;;  %v19895_v35 = vld [vmem:[#allocation13 + $0x3a8] sm:$0xff]  }
0x1b99   :  { %18228 = vmatprep.subr.bf16.mxu1 %v20879_v0 }
0x1b9c   :  { %18229 = vmatpush3.bf16.msra.mxu1 %v19861_v38 }
0x1b9d   :  { %18234 = vmatprep.subr.bf16.mxu1 %v20879_v0 }
0x1c3f   :  { %v10445_v19 = vpop.f32.mrf.mxu1 }
0x1c40   :  { %v10446_v20 = vadd.f32 %v10445_v19, %v10406_v17  ;;  %v19878_v17 = vld [vmem:[#allocation10 + $0x308] ss:$12 sps:$4 sm:$0xff]  }
0x1c41   :  { %v18192_v21 = vpop.f32.mrf.mxu1  ;;  %v19885_v19 = vld [vmem:[#allocation13 + $0x360] sm:$0xff]  }
0x1c42   :  { %vm10451_vm4 = vcmp.ge.f32.partialorder %v10446_v20, 0.0  ;;  %v10452_v23 = vmul.f32 0.2, %v10446_v20  ;;  %v19887_v21 = vld [vmem:[#allocation13 + $0x358] sm:$0xff]  }
0x1c43   :  { %v10448_v24 = vpop.f32.mrf.mxu1 }
0x1c44   :  { %v10453_v26 = vsel %vm10451_vm4, %v10446_v20, %v10452_v23  ;;  %v19886_v20 = vld [vmem:[#allocation13 + $0x320] sm:$0xff]   ;;  %v19888_v23 = vld [vmem:[#allocation13 + $0x318] sm:$0xff]  }
0x1c45   :  { %v10454_v28 = vpack.c.bf16 %v10453_v26, %v10453_v26  ;;  %v18193_v60 = vpop.f32.mrf.mxu1  ;;  %v19889_v24 = vld [vmem:[#allocation13 + $0x3b8] sm:$0xff]   ;;  %v19890_v26 = vld [vmem:[#allocation13 + $0x350] sm:$0xff]  }
0x1c46   :  { %v19891_v60 = vld [vmem:[#allocation13 + $0x310] sm:$0xff]  }
0x1c47   :  { %18211 = vmatmul.mubr.bf16.vlgmr.msra.gmra.mxu0 %v10454_v28 }
0x1c48   :  { %10919 = vmatpush1.bf16.msra.mxu0 %v19842_v27  ;;  %10950 = vmatprep.mubr.bf16.mxu0 %v20882_v59  ;;  %v19864_v59 = vld [vmem:[#allocation10 + $0x334] ss:$12 sps:$4 sm:$0xff]   ;;  %v22399_v27 = vld [vmem:[#allocation12 + $0xc] sm:$0x7] }
0x1c49   :  { %10920 = vmatprep.subr.bf16.mxu0 %v19848_v49  ;;  %v10778_v28 = vrot.slane %v22399_v27, %v21434_v45  ;;  %v19892_v49 = vld [vmem:[#allocation13 + $0x3b0] sm:$0xff]   ;;  %v19896_v45 = vld [vmem:[#allocation13 + $0x340] sm:$0xff]  }
0x1c4c   :  { %10921 = vmatpush1.bf16.msra.mxu0 %v19846_v2  ;;  %v19893_v2 = vld [vmem:[#allocation13 + $0x348] sm:$0xff]  }
0x1c4d   :  { %10922 = vmatprep.subr.bf16.mxu0 %v19852_v29  ;;  %v10782_v29 = vrot.slane %v22399_v27, %v21437_v47  ;;  %v19897_v47 = vld [vmem:[#allocation13 + $0x300] sm:$0xff]  }
0x1c50   :  { %10923 = vmatpush1.bf16.msra.mxu0 %v19850_v55 }
0x1c51   :  { %10924 = vmatprep.subr.bf16.mxu0 %v19856_v34 }
0x1c54   :  { %10925 = vmatpush1.bf16.msra.mxu0 %v19854_v33  ;;  %v19894_v33 = vld [vmem:[#allocation13 + $0x308] sm:$0xff]  }
0x1c55   :  { %10926 = vmatprep.subr.bf16.mxu0 %v19860_v36 }
0x1c58   :  { %10927 = vmatpush1.bf16.msra.mxu0 %v19858_v31 }
0x1c59   :  { %10928 = vmatprep.subr.bf16.mxu0 %v19864_v59 }
0x1c5c   :  { %10929 = vmatpush1.bf16.msra.mxu0 %v19862_v39 }
0x1c5d   :  { %10930 = vmatprep.subr.bf16.mxu0 %v19868_v43  ;;  %v19898_v43 = vld [vmem:[#allocation13 + $0x3a0] sm:$0xff]  }
0x1c60   :  { %10931 = vmatpush1.bf16.msra.mxu0 %v19866_v42 }
0x1c61   :  { %10932 = vmatprep.subr.bf16.mxu0 %v19872_v50 }
0x1c64   :  { %10933 = vmatpush1.bf16.msra.mxu0 %v19870_v48 }
0x1c65   :  { %17102 = vmatprep.subr.bf16.mxu0 %v19879_v53 }
0x1c67   :  { %10951 = vmatmul.mubr.bf16.vlgmr.msra.gmra.mxu0 %v16082_v52 }
0x1c68   :  { %17103 = vmatpush3.bf16.msra.mxu0 %v19880_v10  ;;  %v19899_v10 = vld [vmem:[#allocation13 + $0x398] sm:$0xff]  }
0x1c69   :  { %17104 = vmatprep.subr.bf16.mxu0 %v19881_v44  ;;  %v19900_v44 = vld [vmem:[#allocation13 + $0x390] sm:$0xff]  }
0x1c6c   :  { %17105 = vmatpush3.bf16.msra.mxu0 %v19882_v54  ;;  %v19901_v54 = vld [vmem:[#allocation13 + $0x388] sm:$0xff]  }
0x1c6d   :  { %17106 = vmatprep.subr.bf16.mxu0 %v19883_v56  ;;  %v19902_v56 = vld [vmem:[#allocation13 + $0x380] sm:$0xff]  }
0x1c70   :  { %17107 = vmatpush3.bf16.msra.mxu0 %v19884_v4  ;;  %v19903_v4 = vld [vmem:[%s22853_s3 + $0x138] sm:$0xff]  }
0x1c71   :  { %17108 = vmatprep.subr.bf16.mxu0 %v19885_v19 }
0x1c74   :  { %17109 = vmatpush3.bf16.msra.mxu0 %v19886_v20 }
0x1c75   :  { %17110 = vmatprep.subr.bf16.mxu0 %v19887_v21 }
0x1c78   :  { %17111 = vmatpush3.bf16.msra.mxu0 %v19888_v23 }
0x1c79   :  { %17112 = vmatprep.subr.bf16.mxu0 %v19890_v26  ;;  %v19910_v26 = vld [vmem:[%s22853_s3 + $0x100] sm:$0xff]  }
0x1c7c   :  { %17113 = vmatpush3.bf16.msra.mxu0 %v19891_v60  ;;  %v19915_v60 = vld [vmem:[%s22854_s27 + $0x128] sm:$0xff]  }
0x1c7d   :  { %17114 = vmatprep.subr.bf16.mxu0 %v19893_v2  ;;  %v19917_v2 = vld [vmem:[%s22854_s27 + $0x118] sm:$0xff]  }
0x1c80   :  { %17115 = vmatpush3.bf16.msra.mxu0 %v19894_v33 }
0x1c81   :  { %17116 = vmatprep.subr.bf16.mxu0 %v19896_v45 }
0x1c84   :  { %17117 = vmatpush3.bf16.msra.mxu0 %v19897_v47  ;;  %v15757_v47 = vld [vmem:[#allocation18] ss:$0 sm:$0xff] }
0x1c85   :  { %18274 = vmatprep.subr.bf16.mxu0 %v20879_v0 }
0x1d07   :  { %v10543_v58 = vpop.f32.mrf.mxu0 }
0x1d08   :  { %v10544_v62 = vadd.f32 %v16048_v25, %v10543_v58  ;;  %v19904_v25 = vld [vmem:[%s22853_s3 + $0x130] sm:$0xff]   ;;  %v19905_v58 = vld [vmem:[%s22853_s3 + $0x128] sm:$0xff]  }
0x1d09   :  { %v18212_v63 = vpop.f32.mrf.mxu0 }
0x1d0a   :  { %vm10549_vm5 = vcmp.ge.f32.partialorder %v10544_v62, 0.0  ;;  %v10550_v1 = vmul.f32 0.2, %v10544_v62  ;;  %v19907_v63 = vld [vmem:[%s22853_s3 + $0x118] sm:$0xff]  }
0x1d0b   :  { %v10546_v5 = vpop.f32.mrf.mxu0 }
0x1d0c   :  { %v10551_v7 = vsel %vm10549_vm5, %v10544_v62, %v10550_v1  ;;  %v19906_v62 = vld [vmem:[%s22853_s3 + $0x120] sm:$0xff]   ;;  %v19908_v1 = vld [vmem:[%s22853_s3 + $0x110] sm:$0xff]  }
0x1d0d   :  { %v10552_v8 = vadd.f32 %v10551_v7, %v22335_v30  ;;  %v18213_v11 = vpop.f32.mrf.mxu0  ;;  %v19875_v30 = vld [vmem:[#allocation10 + $0x350] ss:$12 sps:$4 sm:$0xff]  }
0x1d0f   :  { %v10553_v14 = vpack.c.bf16 %v10552_v8, %v10552_v8 }
0x1d11   :  { %18231 = vmatmul.mubr.bf16.vlgmr.msra.gmra.mxu1 %v10553_v14 }
0x1d12   :  { %18235 = vmatpush3.bf16.msra.mxu1 %v19865_v12  ;;  %18250 = vmatprep.mubr.msk.bf16.mxu1 %vm20880_vm0, %v20879_v0  ;;  %v10786_v12 = vrot.slane %v22399_v27, %v21448_v6  ;;  %v19913_v27 = vld [vmem:[%s22854_s27 + $0x138] sm:$0xff]  }
0x1d13   :  { %18236 = vmatprep.subr.bf16.mxu1 %v20879_v0 }
0x1d16   :  { %18237 = vmatpush3.bf16.msra.mxu1 %v19869_v15 }
0x1d17   :  { %18238 = vmatprep.subr.bf16.mxu1 %v20879_v0 }
0x1d1a   :  { %18239 = vmatpush3.bf16.msra.mxu1 %v19873_v32 }
0x1d1b   :  { %18240 = vmatprep.subr.bf16.mxu1 %v20879_v0 }
0x1d1e   :  { %18241 = vmatpush3.bf16.msra.mxu1 %v19874_v18 }
0x1d1f   :  { %18242 = vmatprep.subr.bf16.mxu1 %v20879_v0 }
0x1d22   :  { %18243 = vmatpush3.bf16.msra.mxu1 %v19875_v30 }
0x1d23   :  { %18244 = vmatprep.subr.bf16.mxu1 %v20879_v0 }
0x1d26   :  { %18245 = vmatpush3.bf16.msra.mxu1 %v19876_v16 }
0x1d27   :  { %18246 = vmatprep.subr.bf16.mxu1 %v20879_v0  ;;  %v10952_v55 = vpop.f32.mrf.mxu0 }
0x1d28   :  { %v10953_v34 = vadd.f32 %v10952_v55, %v10778_v28  ;;  %v19914_v28 = vld [vmem:[%s22854_s27 + $0x130] sm:$0xff]  }
0x1d29   :  { %v10954_v36 = vpop.f32.mrf.mxu0  ;;  %v16123_v55 = vld [vmem:[#allocation15 + $0x4] ss:$0 sm:$0xff] }
0x1d2a   :  { %18247 = vmatpush3.bf16.msra.mxu1 %v19877_v9  ;;  %vm10999_vm6 = vcmp.ge.f32.partialorder %v10953_v34, 0.0  ;;  %v11002_v31 = vmul.f32 0.2, %v10953_v34  ;;  %v10955_v38 = vadd.f32 %v10954_v36, %v10782_v29  ;;  %v19918_v29 = vld [vmem:[%s22854_s27 + $0x110] sm:$0xff]  }
0x1d2b   :  { %18248 = vmatprep.subr.bf16.mxu1 %v20879_v0  ;;  %v10956_v59 = vpop.f32.mrf.mxu0 }
0x1d2c   :  { %v11005_v39 = vsel %vm10999_vm6, %v10953_v34, %v11002_v31  ;;  %vm11000_vm7 = vcmp.ge.f32.partialorder %v10955_v38, 0.0  ;;  %v11003_v42 = vmul.f32 0.2, %v10955_v38  ;;  %v19911_v59 = vld [vmem:[%s22855_s1 + $0x8] sm:$0xff]  }
0x1d2d   :  { %v10957_v48 = vpop.f32.mrf.mxu0 }
0x1d2e   :  { %18249 = vmatpush3.bf16.msra.mxu1 %v19878_v17  ;;  %v22408_v50 = vsel %vm11000_vm7, %v10955_v38, %v11003_v42  ;;  %v8273_v48 = vadd.f32 %v15757_v47, %v22213_v3  ;;  %v16148_v3 = vld [vmem:[#allocation16 + $0x4] ss:$0 sm:$0xff] }
0x1d2f   :  { %18254 = vmatprep.subr.bf16.mxu1 %v20879_v0  ;;  %v11009_v53 = vpack.c.bf16 %v22408_v50, %v22408_v50 }
0x1d31   :  { %18251 = vmatmul.mubr.bf16.vlgmr.msra.gmra.mxu1 %v16082_v52  ;;  %v11008_v52 = vpack.c.bf16 %v11005_v39, %v11005_v39  ;;  %11193 = vmatprep.mubr.bf16.mxu0 %v11009_v53  ;;  %v19919_v53 = vld [vmem:[%s22854_s27 + $0x108] sm:$0xff]  }
0x1d32   :  { %18270 = vmatprep.mubr.msk.bf16.mxu1 %vm20880_vm0, %v20879_v0  ;;  %18255 = vmatpush3.bf16.msra.mxu1 %v19889_v24  ;;  %v19909_v24 = vld [vmem:[%s22853_s3 + $0x108] sm:$0xff]  }
0x1d33   :  { %18256 = vmatprep.subr.bf16.mxu1 %v20879_v0  ;;  %11194 = vmatmul.mubr.bf16.vlgmr.msra.gmra.mxu0 %v11008_v52  ;;  %v11590_v52 = vpack.c.bf16 %v8273_v48, %v8273_v48 }
0x1d34   :  { %18290 = vmatprep.mubr.msk.bf16.mxu0 %vm20880_vm0, %v20879_v0  ;;  %18275 = vmatpush3.bf16.msra.mxu0 %v19903_v4 }
0x1d35   :  { %18276 = vmatprep.subr.bf16.mxu0 %v20879_v0 }
0x1d36   :  { %18257 = vmatpush3.bf16.msra.mxu1 %v19892_v49  ;;  %v19916_v49 = vld [vmem:[%s22854_s27 + $0x120] sm:$0xff]  }
0x1d37   :  { %18258 = vmatprep.subr.bf16.mxu1 %v20879_v0 }
0x1d38   :  { %18277 = vmatpush3.bf16.msra.mxu0 %v19904_v25 }
0x1d39   :  { %18278 = vmatprep.subr.bf16.mxu0 %v20879_v0 }
0x1d3a   :  { %18259 = vmatpush3.bf16.msra.mxu1 %v19895_v35 }
0x1d3b   :  { %18260 = vmatprep.subr.bf16.mxu1 %v20879_v0 }
0x1d3c   :  { %18279 = vmatpush3.bf16.msra.mxu0 %v19905_v58 }
0x1d3d   :  { %18280 = vmatprep.subr.bf16.mxu0 %v20879_v0 }
0x1d3e   :  { %18261 = vmatpush3.bf16.msra.mxu1 %v19898_v43  ;;  %v19912_v43 = vld [vmem:[%s22855_s1] sm:$0xff]  }
0x1d3f   :  { %18262 = vmatprep.subr.bf16.mxu1 %v20879_v0 }
0x1d40   :  { %18281 = vmatpush3.bf16.msra.mxu0 %v19906_v62 }
0x1d41   :  { %18282 = vmatprep.subr.bf16.mxu0 %v20879_v0 }
0x1d42   :  { %18263 = vmatpush3.bf16.msra.mxu1 %v19899_v10  ;;  %v19920_v10 = vld [vmem:[%s22854_s27 + $0x100] sm:$0xff]  }
0x1d43   :  { %18264 = vmatprep.subr.bf16.mxu1 %v20879_v0 }
0x1d44   :  { %18283 = vmatpush3.bf16.msra.mxu0 %v19907_v63 }
0x1d45   :  { %18284 = vmatprep.subr.bf16.mxu0 %v20879_v0 }
0x1d46   :  { %18265 = vmatpush3.bf16.msra.mxu1 %v19900_v44 }
0x1d47   :  { %18266 = vmatprep.subr.bf16.mxu1 %v20879_v0 }
0x1d48   :  { %18285 = vmatpush3.bf16.msra.mxu0 %v19908_v1  ;;  %v19921_v1 = vld [vmem:[#allocation39 + $0x18] sm:$0xff]  }
0x1d49   :  { %18286 = vmatprep.subr.bf16.mxu0 %v20879_v0 }
0x1d4a   :  { %18267 = vmatpush3.bf16.msra.mxu1 %v19901_v54 }
0x1d4b   :  { %18268 = vmatprep.subr.bf16.mxu1 %v20879_v0 }
0x1d4c   :  { %18287 = vmatpush3.bf16.msra.mxu0 %v19909_v24 }
0x1d4d   :  { %18288 = vmatprep.subr.bf16.mxu0 %v20879_v0 }
0x1d4e   :  { %18269 = vmatpush3.bf16.msra.mxu1 %v19902_v56 }
0x1d4f   :  { %18294 = vmatprep.subr.bf16.mxu1 %v20879_v0 }
0x1d50   :  { %18289 = vmatpush3.bf16.msra.mxu0 %v19910_v26 }
0x1d51   :  { %18338 = vmatprep.subr.bf16.mxu0 %v20879_v0 }
0x1dd1   :  { %v22432_v5 = vpop.f32.mrf.mxu1 }
0x1dd3   :  { %v18232_v7 = vpop.f32.mrf.mxu1 }
0x1dd5   :  { %v10645_v8 = vpop.f32.mrf.mxu1 }
0x1dd7   :  { %v18233_v11 = vpop.f32.mrf.mxu1 }
0x1df1   :  { %v10993_v14 = vpop.f32.mrf.mxu1 }
0x1df2   :  { %v10994_v15 = vadd.f32 %v10993_v14, %v10786_v12  ;;  %v19922_v12 = vld [vmem:[#allocation39 + $0x10] sm:$0xff]  }
0x1df3   :  { %v18252_v32 = vpop.f32.mrf.mxu1  ;;  %v17118_v19 = vpop.f32.mrf.mxu0 }
0x1df4   :  { %vm11001_vm8 = vcmp.ge.f32.partialorder %v10994_v15, 0.0  ;;  %v11004_v18 = vmul.f32 0.2, %v10994_v15  ;;  %v19923_v32 = vld [vmem:[#allocation39 + $0x8] sm:$0xff]  }
0x1df5   :  { %v10996_v30 = vpop.f32.mrf.mxu1  ;;  %v17119_v6 = vpop.f32.mrf.mxu0 }
0x1df6   :  { %v11007_v16 = vsel %vm11001_vm8, %v10994_v15, %v11004_v18  ;;  %v17120_v20 = vadd.f32 %v17119_v6, %v17118_v19  ;;  %v19924_v18 = vld [vmem:[#allocation39] sm:$0xff]   ;;  %v14710_v19 = vld [vmem:[#allocation9] ss:$0 sm:$0xff] }
0x1df7   :  { %v11010_v9 = vpack.c.bf16 %v11007_v16, %v11007_v16  ;;  %v18253_v17 = vpop.f32.mrf.mxu1  ;;  %v17121_v21 = vpop.f32.mrf.mxu0  ;;  %v19925_v16 = vld [vmem:[#allocation37 + $0x18] sm:$0xff]   ;;  %v19928_v6 = vld [vmem:[#allocation37] sm:$0xff]  }
0x1df8   :  { %v11196_v34 = vadd.f32 %v17120_v20, %v16123_v55  ;;  %v19926_v17 = vld [vmem:[#allocation37 + $0x10] sm:$0xff]   ;;  %v2620_v20 = vadd.f32 %v14710_v19, %v21592_v61  ;;  %v14594_v21 = vld [vmem:[#allocation36] ss:$0 sm:$0xff]  ;;  %v19936_v55 = vld [vmem:[#allocation43 + $0x10] sm:$0xff]  }
0x1df9   :  { %18271 = vmatmul.mubr.bf16.vlgmr.msra.gmra.mxu1 %v11010_v9  ;;  %v17122_v23 = vpop.f32.mrf.mxu0  ;;  %v1409_v24 = vadd.f32 %v14594_v21, %v21412_v13  ;;  %v19931_v13 = vld [vmem:[#allocation43 + $0x38] sm:$0xff]   ;;  %v19952_v21 = vld [vmem:[#allocation46] sm:$0xff]  }
0x1dfa   :  { %18310 = vmatprep.mubr.msk.bf16.mxu1 %vm20880_vm0, %v20879_v0  ;;  %18295 = vmatpush3.bf16.msra.mxu1 %v19913_v27  ;;  %v19929_v23 = vld [vmem:[#allocation40 + $0x8] sm:$0xff]   ;;  %v11438_v26 = vpack.c.bf16 %v2620_v20, %v2620_v20  ;;  %v19930_v27 = vld [vmem:[#allocation40] sm:$0xff]  }
0x1dfb   :  { %18296 = vmatprep.subr.bf16.mxu1 %v20879_v0  ;;  %v19951_v20 = vld [vmem:[#allocation46 + $0x8] sm:$0xff]  }
0x1dfe   :  { %18297 = vmatpush3.bf16.msra.mxu1 %v19914_v28  ;;  %v1414_v28 = vmax.f32 %v1409_v24, 0.0 }
0x1dff   :  { %18298 = vmatprep.subr.bf16.mxu1 %v20879_v0 }
0x1e00   :  { %v22494_v61 = vpack.c.bf16 %v1414_v28, %v1414_v28 }
0x1e02   :  { %18299 = vmatpush3.bf16.msra.mxu1 %v19915_v60  ;;  %v19932_v60 = vld [vmem:[#allocation43 + $0x30] sm:$0xff]  }
0x1e03   :  { %18300 = vmatprep.subr.bf16.mxu1 %v20879_v0 }
0x1e06   :  { %18301 = vmatpush3.bf16.msra.mxu1 %v19916_v49  ;;  %v19933_v49 = vld [vmem:[#allocation43 + $0x28] sm:$0xff]  }
0x1e07   :  { %18302 = vmatprep.subr.bf16.mxu1 %v20879_v0 }
0x1e0a   :  { %18303 = vmatpush3.bf16.msra.mxu1 %v19917_v2  ;;  %v19934_v2 = vld [vmem:[#allocation43 + $0x20] sm:$0xff]  }
0x1e0b   :  { %18304 = vmatprep.subr.bf16.mxu1 %v20879_v0 }
0x1e0e   :  { %18305 = vmatpush3.bf16.msra.mxu1 %v19918_v29  ;;  %v19935_v29 = vld [vmem:[#allocation43 + $0x18] sm:$0xff]  }
0x1e0f   :  { %18306 = vmatprep.subr.bf16.mxu1 %v20879_v0 }
0x1e12   :  { %18307 = vmatpush3.bf16.msra.mxu1 %v19919_v53 }
0x1e13   :  { %18308 = vmatprep.subr.bf16.mxu1 %v20879_v0 }
0x1e16   :  { %18309 = vmatpush3.bf16.msra.mxu1 %v19920_v10 }
0x1e17   :  { %18314 = vmatprep.subr.bf16.mxu1 %v20879_v0 }
0x1eb9   :  { %v11235_v33 = vpop.f32.mrf.mxu1 }
0x1eba   :  { %v11236_v35 = vadd.f32 %v11235_v33, %v11196_v34  ;;  %v19937_v34 = vld [vmem:[#allocation43 + $0x8] sm:$0xff]   ;;  %v19938_v33 = vld [vmem:[#allocation43] sm:$0xff]  }
0x1ebb   :  { %v18272_v36 = vpop.f32.mrf.mxu1 }
0x1ebc   :  { %vm11241_vm9 = vcmp.ge.f32.partialorder %v11236_v35, 0.0  ;;  %v11242_v45 = vmul.f32 0.2, %v11236_v35  ;;  %v19946_v36 = vld [vmem:[#allocation46 + $0x30] sm:$0xff]  }
0x1ebd   :  { %v11238_v31 = vpop.f32.mrf.mxu1 }
0x1ebe   :  { %v11243_v38 = vsel %vm11241_vm9, %v11236_v35, %v11242_v45  ;;  %v19945_v35 = vld [vmem:[#allocation46 + $0x38] sm:$0xff]   ;;  %v19947_v45 = vld [vmem:[#allocation46 + $0x28] sm:$0xff]   ;;  %v19948_v31 = vld [vmem:[#allocation46 + $0x20] sm:$0xff]  }
0x1ebf   :  { %v11244_v39 = vpack.c.bf16 %v11243_v38, %v11243_v38  ;;  %v18273_v42 = vpop.f32.mrf.mxu1  ;;  %v19949_v38 = vld [vmem:[#allocation46 + $0x18] sm:$0xff]  }
0x1ec1   :  { %18291 = vmatmul.mubr.bf16.vlgmr.msra.gmra.mxu0 %v11244_v39 }
0x1ec2   :  { %18339 = vmatpush3.bf16.msra.mxu0 %v19911_v59  ;;  %18342 = vmatprep.mubr.msk.bf16.mxu0 %vm20880_vm0, %v20879_v0  ;;  %v19950_v59 = vld [vmem:[#allocation46 + $0x10] sm:$0xff]  }
0x1ec3   :  { %18340 = vmatprep.subr.bf16.mxu0 %v20879_v0 }
0x1ec6   :  { %18341 = vmatpush3.bf16.msra.mxu0 %v19912_v43 }
0x1ec7   :  { %18354 = vmatprep.subr.bf16.mxu0 %v20879_v0 }
0x1ec9   :  { %18343 = vmatmul.mubr.msk.bf16.vlgmr.msra.gmra.mxu0 %vm11607_vm10, %v11590_v52 }
0x1eca   :  { %18370 = vmatprep.mubr.msk.bf16.mxu0 %vm20880_vm0, %v20879_v0  ;;  %18355 = vmatpush3.bf16.msra.mxu0 %v19931_v13 }
0x1ecb   :  { %18356 = vmatprep.subr.bf16.mxu0 %v20879_v0 }
0x1ece   :  { %18357 = vmatpush3.bf16.msra.mxu0 %v19932_v60  ;;  %v19953_v60 = vld [vmem:[#allocation37 + $0x38] sm:$0xff]  }
0x1ecf   :  { %18358 = vmatprep.subr.bf16.mxu0 %v20879_v0 }
0x1ed2   :  { %18359 = vmatpush3.bf16.msra.mxu0 %v19933_v49 }
0x1ed3   :  { %18360 = vmatprep.subr.bf16.mxu0 %v20879_v0 }
0x1ed6   :  { %18361 = vmatpush3.bf16.msra.mxu0 %v19934_v2 }
0x1ed7   :  { %18362 = vmatprep.subr.bf16.mxu0 %v20879_v0 }
0x1eda   :  { %18363 = vmatpush3.bf16.msra.mxu0 %v19935_v29  ;;  %v19954_v29 = vld [vmem:[#allocation37 + $0x30] sm:$0xff]  }
0x1edb   :  { %18364 = vmatprep.subr.bf16.mxu0 %v20879_v0 }
0x1ede   :  { %18365 = vmatpush3.bf16.msra.mxu0 %v19936_v55  ;;  %v19955_v55 = vld [vmem:[#allocation37 + $0x28] sm:$0xff]  }
0x1edf   :  { %18366 = vmatprep.subr.bf16.mxu0 %v20879_v0 }
0x1ee2   :  { %18367 = vmatpush3.bf16.msra.mxu0 %v19937_v34  ;;  %v14955_v34 = vld [vmem:[#allocation9 + $0x1] ss:$0 sm:$0xff] }
0x1ee3   :  { %18368 = vmatprep.subr.bf16.mxu0 %v20879_v0 }
0x1ee6   :  { %18369 = vmatpush3.bf16.msra.mxu0 %v19938_v33 }
0x1ee7   :  { %18394 = vmatprep.subr.bf16.mxu0 %v20879_v0 }
0x1f81   :  { %v11333_v44 = vpop.f32.mrf.mxu0 }
0x1f82   :  { %v11334_v54 = vadd.f32 %v16148_v3, %v11333_v44 }
0x1f83   :  { %v18292_v56 = vpop.f32.mrf.mxu0 }
0x1f84   :  { %vm11339_vm11 = vcmp.ge.f32.partialorder %v11334_v54, 0.0  ;;  %v11340_v4 = vmul.f32 0.2, %v11334_v54 }
0x1f85   :  { %v11336_v25 = vpop.f32.mrf.mxu0 }
0x1f86   :  { %v11341_v58 = vsel %vm11339_vm11, %v11334_v54, %v11340_v4 }
0x1f87   :  { %v11342_v62 = vadd.f32 %v11341_v58, %v22408_v50  ;;  %v18293_v63 = vpop.f32.mrf.mxu0  ;;  %v14585_v50 = vld [vmem:[#allocation34] ss:$0 sm:$0xff] }
0x1f88   :  { %v1297_v30 = vadd.f32 %v14585_v50, %v21431_v41  ;;  %v19927_v41 = vld [vmem:[#allocation37 + $0x8] sm:$0xff]  }
0x1f89   :  { %v11343_v7 = vpack.c.bf16 %v11342_v62, %v11342_v62  ;;  %v22469_v8 = vpop.f32.mrf.mxu0  ;;  %v16182_v62 = vld [vmem:[#allocation42] ss:$0 sm:$0xff] }
0x1f8a   :  { %v22477_v9 = vpack.c.bf16 %v1297_v30, %v1297_v30  ;;  %v19942_v30 = vld [vmem:[#allocation39 + $0x20] sm:$0xff]  }
0x1f8b   :  { %18311 = vmatmul.mubr.bf16.vlgmr.msra.gmra.mxu1 %v11343_v7  ;;  %v18344_v11 = vpop.f32.mrf.mxu0 }
0x1f8c   :  { %18315 = vmatpush3.bf16.msra.mxu1 %v19921_v1  ;;  %18322 = vmatprep.mubr.msk.bf16.mxu1 %vm20880_vm0, %v20879_v0 }
0x1f8d   :  { %v11648_v14 = vpop.f32.mrf.mxu0  ;;  %18316 = vmatprep.subr.bf16.mxu1 %v20879_v0 }
0x1f8f   :  { %v18345_v15 = vpop.f32.mrf.mxu0 }
0x1f90   :  { %18317 = vmatpush3.bf16.msra.mxu1 %v19922_v12 }
0x1f91   :  { %18318 = vmatprep.subr.bf16.mxu1 %v20879_v0 }
0x1f94   :  { %18319 = vmatpush3.bf16.msra.mxu1 %v19923_v32  ;;  %v19939_v32 = vld [vmem:[#allocation39 + $0x38] sm:$0xff]  }
0x1f95   :  { %18320 = vmatprep.subr.bf16.mxu1 %v20879_v0 }
0x1f98   :  { %18321 = vmatpush3.bf16.msra.mxu1 %v19924_v18  ;;  %v19941_v18 = vld [vmem:[#allocation39 + $0x28] sm:$0xff]  }
0x1f99   :  { %18326 = vmatprep.subr.bf16.mxu1 %v20879_v0 }
0x1f9b   :  { %18323 = vmatmul.mubr.msk.bf16.vlgmr.msra.gmra.mxu1 %vm11479_vm12, %v22477_v9 }
0x1f9c   :  { %18327 = vmatpush3.bf16.msra.mxu1 %v19925_v16  ;;  %18334 = vmatprep.mubr.msk.bf16.mxu1 %vm20880_vm0, %v20879_v0  ;;  %v19943_v16 = vld [vmem:[%s22855_s1 + $0x18] sm:$0xff]  }
0x1f9d   :  { %18328 = vmatprep.subr.bf16.mxu1 %v20879_v0 }
0x1fa0   :  { %18329 = vmatpush3.bf16.msra.mxu1 %v19926_v17  ;;  %v15857_v17 = vld [vmem:[#allocation18 + $0x1] ss:$0 sm:$0xff] }
0x1fa1   :  { %18330 = vmatprep.subr.bf16.mxu1 %v20879_v0  ;;  %v9063_v19 = vadd.f32 %v15857_v17, %v22286_v22  ;;  %v16183_v22 = vld [vmem:[#allocation45] ss:$0 sm:$0xff] }
0x1fa4   :  { %18331 = vmatpush3.bf16.msra.mxu1 %v19927_v41  ;;  %v19944_v41 = vld [vmem:[%s22855_s1 + $0x10] sm:$0xff]  }
0x1fa5   :  { %18332 = vmatprep.subr.bf16.mxu1 %v20879_v0 }
0x1fa8   :  { %18333 = vmatpush3.bf16.msra.mxu1 %v19928_v6  ;;  %v12105_v6 = vpack.c.bf16 %v9063_v19, %v9063_v19 }
0x1fa9   :  { %18346 = vmatprep.subr.bf16.mxu1 %v20879_v0 }
0x1fab   :  { %18335 = vmatmul.mubr.msk.bf16.vlgmr.msra.gmra.mxu1 %vm11479_vm12, %v11438_v26 }
0x1fac   :  { %18347 = vmatpush3.bf16.msra.mxu1 %v19929_v23  ;;  %18350 = vmatprep.mubr.msk.bf16.mxu1 %vm20880_vm0, %v20879_v0 }
0x1fad   :  { %18348 = vmatprep.subr.bf16.mxu1 %v20879_v0 }
0x1fb0   :  { %18349 = vmatpush3.bf16.msra.mxu1 %v19930_v27 }
0x1fb1   :  { %18374 = vmatprep.subr.bf16.mxu1 %v20879_v0 }
0x1fb3   :  { %18351 = vmatmul.mubr.msk.bf16.vlgmr.msra.gmra.mxu1 %vm11607_vm10, %v22494_v61 }
0x1fb4   :  { %18390 = vmatprep.mubr.msk.bf16.mxu1 %vm20880_vm0, %v20879_v0  ;;  %18375 = vmatpush3.bf16.msra.mxu1 %v19945_v35  ;;  %v19956_v35 = vld [vmem:[#allocation37 + $0x20] sm:$0xff]  }
0x1fb5   :  { %18376 = vmatprep.subr.bf16.mxu1 %v20879_v0 }
0x1fb8   :  { %18377 = vmatpush3.bf16.msra.mxu1 %v19946_v36  ;;  %v3838_v36 = vadd.f32 %v14955_v34, %v21744_v51  ;;  %v19972_v34 = vld [vmem:[%s22855_s1 + $0x20] sm:$0xff]  }
0x1fb9   :  { %18378 = vmatprep.subr.bf16.mxu1 %v20879_v0 }
0x1fbc   :  { %18379 = vmatpush3.bf16.msra.mxu1 %v19947_v45 }
0x1fbd   :  { %18380 = vmatprep.subr.bf16.mxu1 %v20879_v0 }
0x1fc0   :  { %18381 = vmatpush3.bf16.msra.mxu1 %v19948_v31 }
0x1fc1   :  { %18382 = vmatprep.subr.bf16.mxu1 %v20879_v0 }
0x1fc4   :  { %18383 = vmatpush3.bf16.msra.mxu1 %v19949_v38  ;;  %v19957_v38 = vld [vmem:[#allocation40 + $0x18] sm:$0xff]  }
0x1fc5   :  { %18384 = vmatprep.subr.bf16.mxu1 %v20879_v0 }
0x1fc8   :  { %18385 = vmatpush3.bf16.msra.mxu1 %v19950_v59  ;;  %v11955_v59 = vpack.c.bf16 %v3838_v36, %v3838_v36  ;;  %v19979_v36 = vld [vmem:[#allocation46 + $0x48] sm:$0xff]  }
0x1fc9   :  { %18386 = vmatprep.subr.bf16.mxu1 %v20879_v0 }
0x1fcc   :  { %18387 = vmatpush3.bf16.msra.mxu1 %v19951_v20 }
0x1fcd   :  { %18388 = vmatprep.subr.bf16.mxu1 %v20879_v0 }
0x1fd0   :  { %18389 = vmatpush3.bf16.msra.mxu1 %v19952_v21 }
0x1fd1   :  { %18406 = vmatprep.subr.bf16.mxu1 %v20879_v0 }
0x204b   :  { %v22515_v39 = vpop.f32.mrf.mxu1 }
0x204d   :  { %v18312_v42 = vpop.f32.mrf.mxu1 }
0x204f   :  { %v11435_v47 = vpop.f32.mrf.mxu1 }
0x2051   :  { %v18313_v43 = vpop.f32.mrf.mxu1 }
0x2052   :  { %v19958_v43 = vld [vmem:[#allocation40 + $0x10] sm:$0xff]  }
0x205b   :  { %v11517_v48 = vpop.f32.mrf.mxu1 }
0x205d   :  { %v18324_v52 = vpop.f32.mrf.mxu1 }
0x205f   :  { %v11520_v53 = vpop.f32.mrf.mxu1 }
0x2060   :  { %v19959_v53 = vld [vmem:[#allocation43 + $0x78] sm:$0xff]  }
0x2061   :  { %v18325_v10 = vpop.f32.mrf.mxu1 }
0x2062   :  { %v19960_v10 = vld [vmem:[#allocation43 + $0x70] sm:$0xff]  }
0x206b   :  { %v11584_v3 = vpop.f32.mrf.mxu1 }
0x206c   :  { %v11585_v54 = vadd.f32 %v11584_v3, %v11517_v48  ;;  %v19961_v3 = vld [vmem:[#allocation43 + $0x68] sm:$0xff]  }
0x206d   :  { %v18336_v44 = vpop.f32.mrf.mxu1 }
0x206e   :  { %v11651_v25 = vadd.f32 %v22469_v8, %v11585_v54  ;;  %v19940_v8 = vld [vmem:[#allocation39 + $0x30] sm:$0xff]  }
0x206f   :  { %v11587_v56 = vpop.f32.mrf.mxu1  ;;  %v19962_v44 = vld [vmem:[#allocation43 + $0x60] sm:$0xff]   ;;  %v19963_v54 = vld [vmem:[#allocation43 + $0x58] sm:$0xff]  }
0x2070   :  { %v19964_v56 = vld [vmem:[#allocation43 + $0x50] sm:$0xff]  }
0x2071   :  { %v18337_v4 = vpop.f32.mrf.mxu1 }
0x2072   :  { %v19965_v4 = vld [vmem:[#allocation43 + $0x48] sm:$0xff]  }
0x2073   :  { %v11705_v58 = vpop.f32.mrf.mxu1 }
0x2074   :  { %v11711_v63 = vadd.f32 %v11705_v58, %v11651_v25  ;;  %v19966_v25 = vld [vmem:[#allocation43 + $0x40] sm:$0xff]  }
0x2075   :  { %v18352_v1 = vpop.f32.mrf.mxu1  ;;  %v19973_v58 = vld [vmem:[#allocation46 + $0x78] sm:$0xff]  }
0x2076   :  { %v11719_v7 = vadd.f32 %v16182_v62, %v11711_v63  ;;  %v19974_v62 = vld [vmem:[#allocation46 + $0x70] sm:$0xff]   ;;  %v19975_v63 = vld [vmem:[#allocation46 + $0x68] sm:$0xff]   ;;  %v19976_v1 = vld [vmem:[#allocation46 + $0x60] sm:$0xff]  }
0x2077   :  { %v11708_v11 = vpop.f32.mrf.mxu1 }
0x2078   :  { %vm11720_vm13 = vcmp.ge.f32.partialorder %v11719_v7, 0.0  ;;  %v11721_v12 = vmul.f32 0.2, %v11719_v7  ;;  %v19978_v11 = vld [vmem:[#allocation46 + $0x50] sm:$0xff]  }
0x2079   :  { %v18353_v14 = vpop.f32.mrf.mxu1 }
0x207a   :  { %v22518_v15 = vsel %vm11720_vm13, %v11719_v7, %v11721_v12  ;;  %v19977_v7 = vld [vmem:[#allocation46 + $0x58] sm:$0xff]  }
0x207b   :  { %v11723_v50 = vpack.c.bf16 %v22518_v15, %v22518_v15 }
0x207d   :  { %18371 = vmatmul.mubr.bf16.vlgmr.msra.gmra.mxu0 %v11723_v50 }
0x207e   :  { %18395 = vmatpush3.bf16.msra.mxu0 %v19939_v32  ;;  %18402 = vmatprep.mubr.msk.bf16.mxu0 %vm20880_vm0, %v20879_v0 }
0x207f   :  { %18396 = vmatprep.subr.bf16.mxu0 %v20879_v0 }
0x2082   :  { %18397 = vmatpush3.bf16.msra.mxu0 %v19940_v8 }
0x2083   :  { %18398 = vmatprep.subr.bf16.mxu0 %v20879_v0 }
0x2086   :  { %18399 = vmatpush3.bf16.msra.mxu0 %v19941_v18 }
0x2087   :  { %18400 = vmatprep.subr.bf16.mxu0 %v20879_v0 }
0x208a   :  { %18401 = vmatpush3.bf16.msra.mxu0 %v19942_v30 }
0x208b   :  { %18418 = vmatprep.subr.bf16.mxu0 %v20879_v0 }
0x208d   :  { %18403 = vmatmul.mubr.msk.bf16.vlgmr.msra.gmra.mxu0 %vm11479_vm12, %v22477_v9 }
0x208e   :  { %18419 = vmatpush3.bf16.msra.mxu0 %v19943_v16  ;;  %18422 = vmatprep.mubr.msk.bf16.mxu0 %vm20880_vm0, %v20879_v0 }
0x208f   :  { %18420 = vmatprep.subr.bf16.mxu0 %v20879_v0 }
0x2092   :  { %18421 = vmatpush3.bf16.msra.mxu0 %v19944_v41 }
0x2093   :  { %18434 = vmatprep.subr.bf16.mxu0 %v20879_v0 }
0x2095   :  { %18423 = vmatmul.mubr.msk.bf16.vlgmr.msra.gmra.mxu0 %vm11607_vm10, %v12105_v6  ;;  %v16221_v6 = vld [vmem:[#allocation42 + $0x1] ss:$0 sm:$0xff] }
0x2096   :  { %18450 = vmatprep.mubr.msk.bf16.mxu0 %vm20880_vm0, %v20879_v0  ;;  %18435 = vmatpush3.bf16.msra.mxu0 %v19959_v53  ;;  %v19982_v53 = vld [vmem:[#allocation37 + $0x50] sm:$0xff]  }
0x2097   :  { %18436 = vmatprep.subr.bf16.mxu0 %v20879_v0 }
0x209a   :  { %18437 = vmatpush3.bf16.msra.mxu0 %v19960_v10  ;;  %v19983_v10 = vld [vmem:[#allocation37 + $0x48] sm:$0xff]  }
0x209b   :  { %18438 = vmatprep.subr.bf16.mxu0 %v20879_v0 }
0x209e   :  { %18439 = vmatpush3.bf16.msra.mxu0 %v19961_v3  ;;  %v15200_v3 = vld [vmem:[#allocation9 + $0x2] ss:$0 sm:$0xff] }
0x209f   :  { %18440 = vmatprep.subr.bf16.mxu0 %v20879_v0 }
0x20a2   :  { %18441 = vmatpush3.bf16.msra.mxu0 %v19962_v44 }
0x20a3   :  { %18442 = vmatprep.subr.bf16.mxu0 %v20879_v0 }
0x20a6   :  { %18443 = vmatpush3.bf16.msra.mxu0 %v19963_v54  ;;  %v19984_v54 = vld [vmem:[#allocation37 + $0x40] sm:$0xff]  }
0x20a7   :  { %18444 = vmatprep.subr.bf16.mxu0 %v20879_v0 }
0x20aa   :  { %18445 = vmatpush3.bf16.msra.mxu0 %v19964_v56  ;;  %v5056_v56 = vadd.f32 %v15200_v3, %v21896_v37  ;;  %v20000_v3 = vld [vmem:[%s22855_s1 + $0x30] sm:$0xff]  }
0x20ab   :  { %18446 = vmatprep.subr.bf16.mxu0 %v20879_v0 }
0x20ae   :  { %18447 = vmatpush3.bf16.msra.mxu0 %v19965_v4 }
0x20af   :  { %18448 = vmatprep.subr.bf16.mxu0 %v20879_v0 }
0x20b2   :  { %18449 = vmatpush3.bf16.msra.mxu0 %v19966_v25 }
0x20b3   :  { %18474 = vmatprep.subr.bf16.mxu0 %v20879_v0 }
0x213d   :  { %v11829_v23 = vpop.f32.mrf.mxu0 }
0x213e   :  { %v11830_v24 = vadd.f32 %v16183_v22, %v11829_v23 }
0x213f   :  { %v18372_v26 = vpop.f32.mrf.mxu0 }
0x2140   :  { %vm11835_vm14 = vcmp.ge.f32.partialorder %v11830_v24, 0.0  ;;  %v11836_v27 = vmul.f32 0.2, %v11830_v24 }
0x2141   :  { %v11832_v28 = vpop.f32.mrf.mxu0 }
0x2142   :  { %v11837_v13 = vsel %vm11835_vm14, %v11830_v24, %v11836_v27  ;;  %v19967_v28 = vld [vmem:[#allocation39 + $0x58] sm:$0xff]  }
0x2143   :  { %v11838_v49 = vpack.c.bf16 %v11837_v13, %v11837_v13  ;;  %v18373_v2 = vpop.f32.mrf.mxu0 }
0x2144   :  { %v19970_v2 = vld [vmem:[#allocation39 + $0x40] sm:$0xff]  }
0x2145   :  { %18391 = vmatmul.mubr.bf16.vlgmr.msra.gmra.mxu1 %v11838_v49  ;;  %v19969_v49 = vld [vmem:[#allocation39 + $0x48] sm:$0xff]  }
0x2146   :  { %18407 = vmatpush3.bf16.msra.mxu1 %v19953_v60  ;;  %18414 = vmatprep.mubr.msk.bf16.mxu1 %vm20880_vm0, %v20879_v0  ;;  %v19968_v60 = vld [vmem:[#allocation39 + $0x50] sm:$0xff]  }
0x2147   :  { %18408 = vmatprep.subr.bf16.mxu1 %v20879_v0 }
0x214a   :  { %18409 = vmatpush3.bf16.msra.mxu1 %v19954_v29  ;;  %v19971_v29 = vld [vmem:[%s22855_s1 + $0x28] sm:$0xff]  }
0x214b   :  { %18410 = vmatprep.subr.bf16.mxu1 %v20879_v0 }
0x214d   :  { %v22546_v33 = vpop.f32.mrf.mxu0 }
0x214e   :  { %18411 = vmatpush3.bf16.msra.mxu1 %v19955_v55  ;;  %v15957_v55 = vld [vmem:[#allocation18 + $0x2] ss:$0 sm:$0xff] }
0x214f   :  { %v18404_v45 = vpop.f32.mrf.mxu0  ;;  %18412 = vmatprep.subr.bf16.mxu1 %v20879_v0 }
0x2150   :  { %v19980_v45 = vld [vmem:[#allocation46 + $0x40] sm:$0xff]  }
0x2151   :  { %v12035_v31 = vpop.f32.mrf.mxu0 }
0x2152   :  { %18413 = vmatpush3.bf16.msra.mxu1 %v19956_v35 }
0x2153   :  { %v18405_v42 = vpop.f32.mrf.mxu0  ;;  %18426 = vmatprep.subr.bf16.mxu1 %v20879_v0 }
0x2155   :  { %18415 = vmatmul.mubr.msk.bf16.vlgmr.msra.gmra.mxu1 %vm11479_vm12, %v11955_v59  ;;  %v22552_v47 = vpop.f32.mrf.mxu0 }
0x2156   :  { %18427 = vmatpush3.bf16.msra.mxu1 %v19957_v38  ;;  %18430 = vmatprep.mubr.msk.bf16.mxu1 %vm20880_vm0, %v20879_v0 }
0x2157   :  { %v18424_v51 = vpop.f32.mrf.mxu0  ;;  %18428 = vmatprep.subr.bf16.mxu1 %v20879_v0 }
0x2158   :  { %v19981_v51 = vld [vmem:[#allocation37 + $0x58] sm:$0xff]  }
0x2159   :  { %v12163_v48 = vpop.f32.mrf.mxu0 }
0x215a   :  { %18429 = vmatpush3.bf16.msra.mxu1 %v19958_v43 }
0x215b   :  { %v18425_v52 = vpop.f32.mrf.mxu0  ;;  %18454 = vmatprep.subr.bf16.mxu1 %v20879_v0 }
0x215d   :  { %18431 = vmatmul.mubr.msk.bf16.vlgmr.msra.gmra.mxu1 %vm11607_vm10, %v22494_v61 }
0x215e   :  { %18470 = vmatprep.mubr.msk.bf16.mxu1 %vm20880_vm0, %v20879_v0  ;;  %18455 = vmatpush3.bf16.msra.mxu1 %v19973_v58  ;;  %v19985_v58 = vld [vmem:[#allocation40 + $0x28] sm:$0xff]  }
0x215f   :  { %18456 = vmatprep.subr.bf16.mxu1 %v20879_v0 }
0x2162   :  { %18457 = vmatpush3.bf16.msra.mxu1 %v19974_v62  ;;  %v12473_v62 = vpack.c.bf16 %v5056_v56, %v5056_v56  ;;  %v20007_v56 = vld [vmem:[#allocation46 + $0x88] sm:$0xff]  }
0x2163   :  { %18458 = vmatprep.subr.bf16.mxu1 %v20879_v0 }
0x2166   :  { %18459 = vmatpush3.bf16.msra.mxu1 %v19975_v63 }
0x2167   :  { %18460 = vmatprep.subr.bf16.mxu1 %v20879_v0 }
0x216a   :  { %18461 = vmatpush3.bf16.msra.mxu1 %v19976_v1 }
0x216b   :  { %18462 = vmatprep.subr.bf16.mxu1 %v20879_v0 }
0x216e   :  { %18463 = vmatpush3.bf16.msra.mxu1 %v19977_v7  ;;  %v19986_v7 = vld [vmem:[#allocation40 + $0x20] sm:$0xff]  }
0x216f   :  { %18464 = vmatprep.subr.bf16.mxu1 %v20879_v0 }
0x2172   :  { %18465 = vmatpush3.bf16.msra.mxu1 %v19978_v11 }
0x2173   :  { %18466 = vmatprep.subr.bf16.mxu1 %v20879_v0 }
0x2176   :  { %18467 = vmatpush3.bf16.msra.mxu1 %v19979_v36 }
0x2177   :  { %18468 = vmatprep.subr.bf16.mxu1 %v20879_v0 }
0x217a   :  { %18469 = vmatpush3.bf16.msra.mxu1 %v19980_v45 }
0x217b   :  { %18486 = vmatprep.subr.bf16.mxu1 %v20879_v0 }
0x2205   :  { %v22576_v12 = vpop.f32.mrf.mxu1 }
0x2207   :  { %v18392_v14 = vpop.f32.mrf.mxu1 }
0x2209   :  { %v11947_v32 = vpop.f32.mrf.mxu1 }
0x220a   :  { %v19987_v32 = vld [vmem:[#allocation43 + $0xb8] sm:$0xff]  }
0x220b   :  { %v18393_v50 = vpop.f32.mrf.mxu1 }
0x220c   :  { %v19988_v50 = vld [vmem:[#allocation43 + $0xb0] sm:$0xff]  }
0x2215   :  { %v12099_v8 = vpop.f32.mrf.mxu1 }
0x2216   :  { %v12100_v30 = vadd.f32 %v12099_v8, %v22546_v33  ;;  %v9853_v33 = vadd.f32 %v15957_v55, %v22359_v40  ;;  %v16222_v40 = vld [vmem:[#allocation45 + $0x1] ss:$0 sm:$0xff]  ;;  %v19989_v8 = vld [vmem:[#allocation43 + $0xa8] sm:$0xff]  }
0x2217   :  { %v18416_v18 = vpop.f32.mrf.mxu1 }
0x2218   :  { %v12166_v41 = vadd.f32 %v22552_v47, %v12100_v30  ;;  %v12623_v35 = vpack.c.bf16 %v9853_v33, %v9853_v33  ;;  %v19990_v18 = vld [vmem:[#allocation43 + $0xa0] sm:$0xff]   ;;  %v19991_v30 = vld [vmem:[#allocation43 + $0x98] sm:$0xff]  }
0x2219   :  { %v12102_v16 = vpop.f32.mrf.mxu1 }
0x221a   :  { %v19992_v16 = vld [vmem:[#allocation43 + $0x90] sm:$0xff]  }
0x221b   :  { %v18417_v17 = vpop.f32.mrf.mxu1 }
0x221c   :  { %v19993_v17 = vld [vmem:[#allocation43 + $0x88] sm:$0xff]  }
0x221d   :  { %v12218_v19 = vpop.f32.mrf.mxu1 }
0x221e   :  { %v12224_v20 = vadd.f32 %v12218_v19, %v12166_v41  ;;  %v19994_v41 = vld [vmem:[#allocation43 + $0x80] sm:$0xff]  }
0x221f   :  { %v18432_v21 = vpop.f32.mrf.mxu1  ;;  %v20001_v19 = vld [vmem:[#allocation46 + $0xb8] sm:$0xff]  }
0x2220   :  { %v12233_v22 = vadd.f32 %v16221_v6, %v12224_v20  ;;  %v20002_v6 = vld [vmem:[#allocation46 + $0xb0] sm:$0xff]   ;;  %v20003_v20 = vld [vmem:[#allocation46 + $0xa8] sm:$0xff]   ;;  %v20004_v21 = vld [vmem:[#allocation46 + $0xa0] sm:$0xff]  }
0x2221   :  { %v12221_v23 = vpop.f32.mrf.mxu1 }
0x2222   :  { %vm12234_vm15 = vcmp.ge.f32.partialorder %v12233_v22, 0.0  ;;  %v12235_v24 = vmul.f32 0.2, %v12233_v22  ;;  %v20006_v23 = vld [vmem:[#allocation46 + $0x90] sm:$0xff]  }
0x2223   :  { %v18433_v26 = vpop.f32.mrf.mxu1 }
0x2224   :  { %v22580_v27 = vsel %vm12234_vm15, %v12233_v22, %v12235_v24  ;;  %v20005_v22 = vld [vmem:[#allocation46 + $0x98] sm:$0xff]  }
0x2225   :  { %v12237_v13 = vpack.c.bf16 %v22580_v27, %v22580_v27 }
0x2227   :  { %18451 = vmatmul.mubr.bf16.vlgmr.msra.gmra.mxu0 %v12237_v13 }
0x2228   :  { %18475 = vmatpush3.bf16.msra.mxu0 %v19967_v28  ;;  %18482 = vmatprep.mubr.msk.bf16.mxu0 %vm20880_vm0, %v20879_v0 }
0x2229   :  { %18476 = vmatprep.subr.bf16.mxu0 %v20879_v0 }
0x222c   :  { %18477 = vmatpush3.bf16.msra.mxu0 %v19968_v60 }
0x222d   :  { %18478 = vmatprep.subr.bf16.mxu0 %v20879_v0 }
0x2230   :  { %18479 = vmatpush3.bf16.msra.mxu0 %v19969_v49 }
0x2231   :  { %18480 = vmatprep.subr.bf16.mxu0 %v20879_v0 }
0x2234   :  { %18481 = vmatpush3.bf16.msra.mxu0 %v19970_v2 }
0x2235   :  { %18498 = vmatprep.subr.bf16.mxu0 %v20879_v0 }
0x2237   :  { %18483 = vmatmul.mubr.msk.bf16.vlgmr.msra.gmra.mxu0 %vm11479_vm12, %v22477_v9 }
0x2238   :  { %18499 = vmatpush3.bf16.msra.mxu0 %v19971_v29  ;;  %18502 = vmatprep.mubr.msk.bf16.mxu0 %vm20880_vm0, %v20879_v0 }
0x2239   :  { %18500 = vmatprep.subr.bf16.mxu0 %v20879_v0 }
0x223c   :  { %18501 = vmatpush3.bf16.msra.mxu0 %v19972_v34 }
0x223d   :  { %18514 = vmatprep.subr.bf16.mxu0 %v20879_v0 }
0x223f   :  { %18503 = vmatmul.mubr.msk.bf16.vlgmr.msra.gmra.mxu0 %vm11607_vm10, %v12623_v35  ;;  %v16260_v35 = vld [vmem:[#allocation42 + $0x2] ss:$0 sm:$0xff] }
0x2240   :  { %18530 = vmatprep.mubr.msk.bf16.mxu0 %vm20880_vm0, %v20879_v0  ;;  %18515 = vmatpush3.bf16.msra.mxu0 %v19987_v32  ;;  %v20010_v32 = vld [vmem:[#allocation37 + $0x70] sm:$0xff]  }
0x2241   :  { %18516 = vmatprep.subr.bf16.mxu0 %v20879_v0 }
0x2244   :  { %18517 = vmatpush3.bf16.msra.mxu0 %v19988_v50  ;;  %v20011_v50 = vld [vmem:[#allocation37 + $0x68] sm:$0xff]  }
0x2245   :  { %18518 = vmatprep.subr.bf16.mxu0 %v20879_v0 }
0x2248   :  { %18519 = vmatpush3.bf16.msra.mxu0 %v19989_v8  ;;  %v15445_v8 = vld [vmem:[#allocation9 + $0x3] ss:$0 sm:$0xff] }
0x2249   :  { %18520 = vmatprep.subr.bf16.mxu0 %v20879_v0 }
0x224c   :  { %18521 = vmatpush3.bf16.msra.mxu0 %v19990_v18 }
0x224d   :  { %18522 = vmatprep.subr.bf16.mxu0 %v20879_v0 }
0x2250   :  { %18523 = vmatpush3.bf16.msra.mxu0 %v19991_v30  ;;  %v20012_v30 = vld [vmem:[#allocation37 + $0x60] sm:$0xff]  }
0x2251   :  { %18524 = vmatprep.subr.bf16.mxu0 %v20879_v0 }
0x2254   :  { %18525 = vmatpush3.bf16.msra.mxu0 %v19992_v16  ;;  %v6274_v16 = vadd.f32 %v15445_v8, %v22048_v57  ;;  %v20028_v8 = vld [vmem:[%s22855_s1 + $0x40] sm:$0xff]  }
0x2255   :  { %18526 = vmatprep.subr.bf16.mxu0 %v20879_v0 }
0x2258   :  { %18527 = vmatpush3.bf16.msra.mxu0 %v19993_v17 }
0x2259   :  { %18528 = vmatprep.subr.bf16.mxu0 %v20879_v0 }
0x225c   :  { %18529 = vmatpush3.bf16.msra.mxu0 %v19994_v41 }
0x225d   :  { %18554 = vmatprep.subr.bf16.mxu0 %v20879_v0 }
0x22e7   :  { %v12345_v31 = vpop.f32.mrf.mxu0 }
0x22e8   :  { %v12346_v38 = vadd.f32 %v16222_v40, %v12345_v31 }
0x22e9   :  { %v18452_v59 = vpop.f32.mrf.mxu0 }
0x22ea   :  { %vm12351_vm1 = vcmp.ge.f32.partialorder %v12346_v38, 0.0  ;;  %v12352_v42 = vmul.f32 0.2, %v12346_v38 }
0x22eb   :  { %v12348_v47 = vpop.f32.mrf.mxu0 }
0x22ec   :  { %v12353_v43 = vsel %vm12351_vm1, %v12346_v38, %v12352_v42  ;;  %v19995_v47 = vld [vmem:[#allocation39 + $0x78] sm:$0xff]  }
0x22ed   :  { %v12354_v48 = vpack.c.bf16 %v12353_v43, %v12353_v43  ;;  %v18453_v52 = vpop.f32.mrf.mxu0 }
0x22ee   :  { %v19998_v52 = vld [vmem:[#allocation39 + $0x60] sm:$0xff]  }
0x22ef   :  { %18471 = vmatmul.mubr.bf16.vlgmr.msra.gmra.mxu1 %v12354_v48  ;;  %v19997_v48 = vld [vmem:[#allocation39 + $0x68] sm:$0xff]  }
0x22f0   :  { %18487 = vmatpush3.bf16.msra.mxu1 %v19981_v51  ;;  %18494 = vmatprep.mubr.msk.bf16.mxu1 %vm20880_vm0, %v20879_v0  ;;  %v19996_v51 = vld [vmem:[#allocation39 + $0x70] sm:$0xff]  }
0x22f1   :  { %18488 = vmatprep.subr.bf16.mxu1 %v20879_v0 }
0x22f4   :  { %18489 = vmatpush3.bf16.msra.mxu1 %v19982_v53  ;;  %v19999_v53 = vld [vmem:[%s22855_s1 + $0x38] sm:$0xff]  }
0x22f5   :  { %18490 = vmatprep.subr.bf16.mxu1 %v20879_v0 }
0x22f7   :  { %v22608_v44 = vpop.f32.mrf.mxu0 }
0x22f8   :  { %18491 = vmatpush3.bf16.msra.mxu1 %v19983_v10  ;;  %v16057_v10 = vld [vmem:[#allocation18 + $0x3] ss:$0 sm:$0xff] }
0x22f9   :  { %v18484_v4 = vpop.f32.mrf.mxu0  ;;  %18492 = vmatprep.subr.bf16.mxu1 %v20879_v0 }
0x22fa   :  { %v20008_v4 = vld [vmem:[#allocation46 + $0x80] sm:$0xff]  }
0x22fb   :  { %v12553_v25 = vpop.f32.mrf.mxu0 }
0x22fc   :  { %18493 = vmatpush3.bf16.msra.mxu1 %v19984_v54 }
0x22fd   :  { %v18485_v63 = vpop.f32.mrf.mxu0  ;;  %18506 = vmatprep.subr.bf16.mxu1 %v20879_v0 }
0x22ff   :  { %18495 = vmatmul.mubr.msk.bf16.vlgmr.msra.gmra.mxu1 %vm11479_vm12, %v12473_v62  ;;  %v22614_v1 = vpop.f32.mrf.mxu0 }
0x2300   :  { %18507 = vmatpush3.bf16.msra.mxu1 %v19985_v58  ;;  %18510 = vmatprep.mubr.msk.bf16.mxu1 %vm20880_vm0, %v20879_v0 }
0x2301   :  { %v18504_v37 = vpop.f32.mrf.mxu0  ;;  %18508 = vmatprep.subr.bf16.mxu1 %v20879_v0 }
0x2302   :  { %v20009_v37 = vld [vmem:[#allocation37 + $0x78] sm:$0xff]  }
0x2303   :  { %v12681_v11 = vpop.f32.mrf.mxu0 }
0x2304   :  { %18509 = vmatpush3.bf16.msra.mxu1 %v19986_v7 }
0x2305   :  { %v18505_v14 = vpop.f32.mrf.mxu0  ;;  %18534 = vmatprep.subr.bf16.mxu1 %v20879_v0 }
0x2307   :  { %18511 = vmatmul.mubr.msk.bf16.vlgmr.msra.gmra.mxu1 %vm11607_vm10, %v22494_v61 }
0x2308   :  { %18550 = vmatprep.mubr.msk.bf16.mxu1 %vm20880_vm0, %v20879_v0  ;;  %18535 = vmatpush3.bf16.msra.mxu1 %v20001_v19  ;;  %v20013_v19 = vld [vmem:[#allocation40 + $0x38] sm:$0xff]  }
0x2309   :  { %18536 = vmatprep.subr.bf16.mxu1 %v20879_v0 }
0x230c   :  { %18537 = vmatpush3.bf16.msra.mxu1 %v20002_v6  ;;  %v12991_v6 = vpack.c.bf16 %v6274_v16, %v6274_v16  ;;  %v20035_v16 = vld [vmem:[#allocation46 + $0xc8] sm:$0xff]  }
0x230d   :  { %18538 = vmatprep.subr.bf16.mxu1 %v20879_v0 }
0x2310   :  { %18539 = vmatpush3.bf16.msra.mxu1 %v20003_v20 }
0x2311   :  { %18540 = vmatprep.subr.bf16.mxu1 %v20879_v0 }
0x2314   :  { %18541 = vmatpush3.bf16.msra.mxu1 %v20004_v21 }
0x2315   :  { %18542 = vmatprep.subr.bf16.mxu1 %v20879_v0 }
0x2318   :  { %18543 = vmatpush3.bf16.msra.mxu1 %v20005_v22  ;;  %v20014_v22 = vld [vmem:[#allocation40 + $0x30] sm:$0xff]  }
0x2319   :  { %18544 = vmatprep.subr.bf16.mxu1 %v20879_v0 }
0x231c   :  { %18545 = vmatpush3.bf16.msra.mxu1 %v20006_v23 }
0x231d   :  { %18546 = vmatprep.subr.bf16.mxu1 %v20879_v0 }
0x2320   :  { %18547 = vmatpush3.bf16.msra.mxu1 %v20007_v56 }
0x2321   :  { %18548 = vmatprep.subr.bf16.mxu1 %v20879_v0 }
0x2324   :  { %18549 = vmatpush3.bf16.msra.mxu1 %v20008_v4 }
0x2325   :  { %18566 = vmatprep.subr.bf16.mxu1 %v20879_v0 }
0x23af   :  { %v22638_v24 = vpop.f32.mrf.mxu1 }
0x23b1   :  { %v18472_v26 = vpop.f32.mrf.mxu1 }
0x23b3   :  { %v12465_v28 = vpop.f32.mrf.mxu1 }
0x23b4   :  { %v20015_v28 = vld [vmem:[#allocation43 + $0xf8] sm:$0xff]  }
0x23b5   :  { %v18473_v13 = vpop.f32.mrf.mxu1 }
0x23b6   :  { %v20016_v13 = vld [vmem:[#allocation43 + $0xf0] sm:$0xff]  }
0x23bf   :  { %v12617_v60 = vpop.f32.mrf.mxu1 }
0x23c0   :  { %v12618_v2 = vadd.f32 %v12617_v60, %v22608_v44  ;;  %v10643_v44 = vadd.f32 %v16057_v10, %v22432_v5  ;;  %v16261_v5 = vld [vmem:[#allocation45 + $0x2] ss:$0 sm:$0xff]  ;;  %v20017_v60 = vld [vmem:[#allocation43 + $0xe8] sm:$0xff]  }
0x23c1   :  { %v18496_v49 = vpop.f32.mrf.mxu1 }
0x23c2   :  { %v12684_v34 = vadd.f32 %v22614_v1, %v12618_v2  ;;  %v13141_v54 = vpack.c.bf16 %v10643_v44, %v10643_v44  ;;  %v20018_v49 = vld [vmem:[#allocation43 + $0xe0] sm:$0xff]   ;;  %v20019_v2 = vld [vmem:[#allocation43 + $0xd8] sm:$0xff]  }
0x23c3   :  { %v12620_v29 = vpop.f32.mrf.mxu1 }
0x23c4   :  { %v20020_v29 = vld [vmem:[#allocation43 + $0xd0] sm:$0xff]  }
0x23c5   :  { %v18497_v55 = vpop.f32.mrf.mxu1 }
0x23c6   :  { %v20021_v55 = vld [vmem:[#allocation43 + $0xc8] sm:$0xff]  }
0x23c7   :  { %v12736_v33 = vpop.f32.mrf.mxu1 }
0x23c8   :  { %v12742_v36 = vadd.f32 %v12736_v33, %v12684_v34  ;;  %v20022_v34 = vld [vmem:[#allocation43 + $0xc0] sm:$0xff]  }
0x23c9   :  { %v18512_v45 = vpop.f32.mrf.mxu1  ;;  %v20029_v33 = vld [vmem:[#allocation46 + $0xf8] sm:$0xff]  }
0x23ca   :  { %v12751_v40 = vadd.f32 %v16260_v35, %v12742_v36  ;;  %v20030_v35 = vld [vmem:[#allocation46 + $0xf0] sm:$0xff]   ;;  %v20031_v36 = vld [vmem:[#allocation46 + $0xe8] sm:$0xff]   ;;  %v20032_v45 = vld [vmem:[#allocation46 + $0xe0] sm:$0xff]  }
0x23cb   :  { %v12739_v31 = vpop.f32.mrf.mxu1 }
0x23cc   :  { %vm12752_vm2 = vcmp.ge.f32.partialorder %v12751_v40, 0.0  ;;  %v12753_v38 = vmul.f32 0.2, %v12751_v40  ;;  %v20034_v31 = vld [vmem:[#allocation46 + $0xd0] sm:$0xff]  }
0x23cd   :  { %v18513_v59 = vpop.f32.mrf.mxu1 }
0x23ce   :  { %v22642_v42 = vsel %vm12752_vm2, %v12751_v40, %v12753_v38  ;;  %v20033_v40 = vld [vmem:[#allocation46 + $0xd8] sm:$0xff]  }
0x23cf   :  { %v12755_v43 = vpack.c.bf16 %v22642_v42, %v22642_v42 }
0x23d1   :  { %18531 = vmatmul.mubr.bf16.vlgmr.msra.gmra.mxu0 %v12755_v43 }
0x23d2   :  { %18555 = vmatpush3.bf16.msra.mxu0 %v19995_v47  ;;  %18562 = vmatprep.mubr.msk.bf16.mxu0 %vm20880_vm0, %v20879_v0 }
0x23d3   :  { %18556 = vmatprep.subr.bf16.mxu0 %v20879_v0 }
0x23d6   :  { %18557 = vmatpush3.bf16.msra.mxu0 %v19996_v51 }
0x23d7   :  { %18558 = vmatprep.subr.bf16.mxu0 %v20879_v0 }
0x23da   :  { %18559 = vmatpush3.bf16.msra.mxu0 %v19997_v48 }
0x23db   :  { %18560 = vmatprep.subr.bf16.mxu0 %v20879_v0 }
0x23de   :  { %18561 = vmatpush3.bf16.msra.mxu0 %v19998_v52 }
0x23df   :  { %18578 = vmatprep.subr.bf16.mxu0 %v20879_v0 }
0x23e1   :  { %18563 = vmatmul.mubr.msk.bf16.vlgmr.msra.gmra.mxu0 %vm11479_vm12, %v22477_v9 }
0x23e2   :  { %18579 = vmatpush3.bf16.msra.mxu0 %v19999_v53  ;;  %18582 = vmatprep.mubr.msk.bf16.mxu0 %vm20880_vm0, %v20879_v0 }
0x23e3   :  { %18580 = vmatprep.subr.bf16.mxu0 %v20879_v0 }
0x23e6   :  { %18581 = vmatpush3.bf16.msra.mxu0 %v20000_v3 }
0x23e7   :  { %18594 = vmatprep.subr.bf16.mxu0 %v20879_v0 }
0x23e9   :  { %18583 = vmatmul.mubr.msk.bf16.vlgmr.msra.gmra.mxu0 %vm11607_vm10, %v13141_v54  ;;  %v16299_v54 = vld [vmem:[#allocation42 + $0x3] ss:$0 sm:$0xff] }
0x23ea   :  { %18610 = vmatprep.mubr.msk.bf16.mxu0 %vm20880_vm0, %v20879_v0  ;;  %18595 = vmatpush3.bf16.msra.mxu0 %v20015_v28  ;;  %v20039_v28 = vld [vmem:[#allocation37 + $0x88] sm:$0xff]  }
0x23eb   :  { %18596 = vmatprep.subr.bf16.mxu0 %v20879_v0 }
0x23ee   :  { %18597 = vmatpush3.bf16.msra.mxu0 %v20016_v13  ;;  %v15690_v13 = vld [vmem:[#allocation9 + $0x4] ss:$0 sm:$0xff] }
0x23ef   :  { %18598 = vmatprep.subr.bf16.mxu0 %v20879_v0 }
0x23f2   :  { %18599 = vmatpush3.bf16.msra.mxu0 %v20017_v60 }
0x23f3   :  { %18600 = vmatprep.subr.bf16.mxu0 %v20879_v0 }
0x23f6   :  { %18601 = vmatpush3.bf16.msra.mxu0 %v20018_v49  ;;  %v20040_v49 = vld [vmem:[#allocation37 + $0x80] sm:$0xff]  }
0x23f7   :  { %18602 = vmatprep.subr.bf16.mxu0 %v20879_v0 }
0x23fa   :  { %18603 = vmatpush3.bf16.msra.mxu0 %v20019_v2  ;;  %v7492_v2 = vadd.f32 %v15690_v13, %v22140_v46  ;;  %v20054_v13 = vld [vmem:[#allocation49 + $0x30] sm:$0xff]  }
0x23fb   :  { %18604 = vmatprep.subr.bf16.mxu0 %v20879_v0 }
0x23fe   :  { %18605 = vmatpush3.bf16.msra.mxu0 %v20020_v29 }
0x23ff   :  { %18606 = vmatprep.subr.bf16.mxu0 %v20879_v0 }
0x2402   :  { %18607 = vmatpush3.bf16.msra.mxu0 %v20021_v55 }
0x2403   :  { %18608 = vmatprep.subr.bf16.mxu0 %v20879_v0 }
0x2406   :  { %18609 = vmatpush3.bf16.msra.mxu0 %v20022_v34  ;;  %v20041_v34 = vld [vmem:[#allocation40 + $0x48] sm:$0xff]  }
0x2407   :  { %18634 = vmatprep.subr.bf16.mxu0 %v20879_v0 }
0x2491   :  { %v12863_v25 = vpop.f32.mrf.mxu0 }
0x2492   :  { %v12864_v58 = vadd.f32 %v16261_v5, %v12863_v25 }
0x2493   :  { %v18532_v62 = vpop.f32.mrf.mxu0 }
0x2494   :  { %vm12869_vm3 = vcmp.ge.f32.partialorder %v12864_v58, 0.0  ;;  %v12870_v63 = vmul.f32 0.2, %v12864_v58 }
0x2495   :  { %v12866_v1 = vpop.f32.mrf.mxu0 }
0x2496   :  { %v12871_v7 = vsel %vm12869_vm3, %v12864_v58, %v12870_v63  ;;  %v20023_v1 = vld [vmem:[#allocation39 + $0x98] sm:$0xff]  }
0x2497   :  { %v12872_v11 = vpack.c.bf16 %v12871_v7, %v12871_v7  ;;  %v18533_v14 = vpop.f32.mrf.mxu0 }
0x2498   :  { %v20026_v14 = vld [vmem:[#allocation39 + $0x80] sm:$0xff]  }
0x2499   :  { %18551 = vmatmul.mubr.bf16.vlgmr.msra.gmra.mxu1 %v12872_v11  ;;  %v20025_v11 = vld [vmem:[#allocation39 + $0x88] sm:$0xff]  }
0x249a   :  { %18567 = vmatpush3.bf16.msra.mxu1 %v20009_v37  ;;  %18574 = vmatprep.mubr.msk.bf16.mxu1 %vm20880_vm0, %v20879_v0  ;;  %v20024_v37 = vld [vmem:[#allocation39 + $0x90] sm:$0xff]  }
0x249b   :  { %18568 = vmatprep.subr.bf16.mxu1 %v20879_v0 }
0x249e   :  { %18569 = vmatpush3.bf16.msra.mxu1 %v20010_v32  ;;  %v20027_v32 = vld [vmem:[%s22855_s1 + $0x48] sm:$0xff]  }
0x249f   :  { %18570 = vmatprep.subr.bf16.mxu1 %v20879_v0 }
0x24a1   :  { %v22670_v18 = vpop.f32.mrf.mxu0 }
0x24a2   :  { %18571 = vmatpush3.bf16.msra.mxu1 %v20011_v50  ;;  %v16157_v50 = vld [vmem:[#allocation18 + $0x4] ss:$0 sm:$0xff] }
0x24a3   :  { %v18564_v17 = vpop.f32.mrf.mxu0  ;;  %18572 = vmatprep.subr.bf16.mxu1 %v20879_v0 }
0x24a5   :  { %v13071_v41 = vpop.f32.mrf.mxu0 }
0x24a6   :  { %18573 = vmatpush3.bf16.msra.mxu1 %v20012_v30 }
0x24a7   :  { %v18565_v20 = vpop.f32.mrf.mxu0  ;;  %18586 = vmatprep.subr.bf16.mxu1 %v20879_v0 }
0x24a9   :  { %18575 = vmatmul.mubr.msk.bf16.vlgmr.msra.gmra.mxu1 %vm11479_vm12, %v12991_v6  ;;  %v22676_v21 = vpop.f32.mrf.mxu0 }
0x24aa   :  { %18587 = vmatpush3.bf16.msra.mxu1 %v20013_v19  ;;  %18590 = vmatprep.mubr.msk.bf16.mxu1 %vm20880_vm0, %v20879_v0 }
0x24ab   :  { %v18584_v57 = vpop.f32.mrf.mxu0  ;;  %18588 = vmatprep.subr.bf16.mxu1 %v20879_v0 }
0x24ad   :  { %v13199_v23 = vpop.f32.mrf.mxu0 }
0x24ae   :  { %18589 = vmatpush3.bf16.msra.mxu1 %v20014_v22  ;;  %v20037_v22 = vld [vmem:[#allocation37 + $0x98] sm:$0xff]  }
0x24af   :  { %v18585_v26 = vpop.f32.mrf.mxu0  ;;  %18614 = vmatprep.subr.bf16.mxu1 %v20879_v0 }
0x24b0   :  { %v20038_v26 = vld [vmem:[#allocation37 + $0x90] sm:$0xff]  }
0x24b1   :  { %18591 = vmatmul.mubr.msk.bf16.vlgmr.msra.gmra.mxu1 %vm11607_vm10, %v22494_v61 }
0x24b2   :  { %18630 = vmatprep.mubr.msk.bf16.mxu1 %vm20880_vm0, %v20879_v0  ;;  %18615 = vmatpush3.bf16.msra.mxu1 %v20029_v33  ;;  %v13509_v33 = vpack.c.bf16 %v7492_v2, %v7492_v2  ;;  %v20057_v2 = vld [vmem:[#allocation49 + $0x60] sm:$0xff]  }
0x24b3   :  { %18616 = vmatprep.subr.bf16.mxu1 %v20879_v0 }
0x24b6   :  { %18617 = vmatpush3.bf16.msra.mxu1 %v20030_v35 }
0x24b7   :  { %18618 = vmatprep.subr.bf16.mxu1 %v20879_v0 }
0x24ba   :  { %18619 = vmatpush3.bf16.msra.mxu1 %v20031_v36 }
0x24bb   :  { %18620 = vmatprep.subr.bf16.mxu1 %v20879_v0 }
0x24be   :  { %18621 = vmatpush3.bf16.msra.mxu1 %v20032_v45  ;;  %v20042_v45 = vld [vmem:[#allocation40 + $0x40] sm:$0xff]  }
0x24bf   :  { %18622 = vmatprep.subr.bf16.mxu1 %v20879_v0 }
0x24c2   :  { %18623 = vmatpush3.bf16.msra.mxu1 %v20033_v40 }
0x24c3   :  { %18624 = vmatprep.subr.bf16.mxu1 %v20879_v0 }
0x24c6   :  { %18625 = vmatpush3.bf16.msra.mxu1 %v20034_v31 }
0x24c7   :  { %18626 = vmatprep.subr.bf16.mxu1 %v20879_v0 }
0x24ca   :  { %18627 = vmatpush3.bf16.msra.mxu1 %v20035_v16 }
0x24cb   :  { %18628 = vmatprep.subr.bf16.mxu1 %v20879_v0 }
0x2559   :  { %v22700_v38 = vpop.f32.mrf.mxu1 }
0x255b   :  { %v18552_v59 = vpop.f32.mrf.mxu1 }
0x255c   :  { %v20043_v59 = vld [vmem:[#allocation43 + $0x138] sm:$0xff]  }
0x255d   :  { %v12983_v47 = vpop.f32.mrf.mxu1 }
0x255e   :  { %v20044_v47 = vld [vmem:[#allocation43 + $0x130] sm:$0xff]  }
0x255f   :  { %v18553_v43 = vpop.f32.mrf.mxu1 }
0x2560   :  { %v20045_v43 = vld [vmem:[#allocation43 + $0x128] sm:$0xff]  }
0x2569   :  { %v13135_v51 = vpop.f32.mrf.mxu1 }
0x256a   :  { %v13136_v52 = vadd.f32 %v13135_v51, %v22670_v18  ;;  %v11433_v18 = vadd.f32 %v16157_v50, %v22515_v39  ;;  %v16300_v39 = vld [vmem:[#allocation45 + $0x3] ss:$0 sm:$0xff] }
0x256b   :  { %v18576_v48 = vpop.f32.mrf.mxu1  ;;  %v20046_v51 = vld [vmem:[#allocation43 + $0x120] sm:$0xff]  }
0x256c   :  { %v13202_v3 = vadd.f32 %v22676_v21, %v13136_v52  ;;  %v13659_v30 = vpack.c.bf16 %v11433_v18, %v11433_v18  ;;  %v20048_v48 = vld [vmem:[#allocation43 + $0x110] sm:$0xff]   ;;  %v20049_v52 = vld [vmem:[#allocation43 + $0x108] sm:$0xff]  }
0x256d   :  { %v13138_v53 = vpop.f32.mrf.mxu1 }
0x256e   :  { %v20050_v53 = vld [vmem:[#allocation43 + $0x100] sm:$0xff]  }
0x256f   :  { %v18577_v10 = vpop.f32.mrf.mxu1 }
0x2570   :  { %v20051_v10 = vld [vmem:[#allocation49 + $0x78] sm:$0xff]  }
0x2571   :  { %v13254_v44 = vpop.f32.mrf.mxu1 }
0x2572   :  { %v13260_v56 = vadd.f32 %v13254_v44, %v13202_v3  ;;  %v20067_v3 = vld [vmem:[#allocation46 + $0x138] sm:$0xff]   ;;  %v20068_v44 = vld [vmem:[#allocation46 + $0x130] sm:$0xff]  }
0x2573   :  { %v18592_v4 = vpop.f32.mrf.mxu1 }
0x2574   :  { %v13269_v5 = vadd.f32 %v16299_v54, %v13260_v56  ;;  %v20069_v54 = vld [vmem:[#allocation46 + $0x128] sm:$0xff]   ;;  %v20070_v56 = vld [vmem:[#allocation46 + $0x120] sm:$0xff]   ;;  %v20071_v4 = vld [vmem:[#allocation46 + $0x118] sm:$0xff]  }
0x2575   :  { %v13257_v25 = vpop.f32.mrf.mxu1 }
0x2576   :  { %vm13270_vm4 = vcmp.ge.f32.partialorder %v13269_v5, 0.0  ;;  %v13271_v58 = vmul.f32 0.2, %v13269_v5 }
0x2577   :  { %v18593_v62 = vpop.f32.mrf.mxu1 }
0x2578   :  { %v22704_v63 = vsel %vm13270_vm4, %v13269_v5, %v13271_v58  ;;  %v20072_v5 = vld [vmem:[#allocation46 + $0x110] sm:$0xff]  }
0x2579   :  { %v13273_v7 = vpack.c.bf16 %v22704_v63, %v22704_v63 }
0x257b   :  { %18611 = vmatmul.mubr.bf16.vlgmr.msra.gmra.mxu0 %v13273_v7  ;;  %v16231_v7 = vld [vmem:[#allocation48 + $0x1] ss:$0 sm:$0xff] }
0x257c   :  { %18635 = vmatpush3.bf16.msra.mxu0 %v20023_v1  ;;  %18642 = vmatprep.mubr.msk.bf16.mxu0 %vm20880_vm0, %v20879_v0 }
0x257d   :  { %18636 = vmatprep.subr.bf16.mxu0 %v20879_v0 }
0x2580   :  { %18637 = vmatpush3.bf16.msra.mxu0 %v20024_v37 }
0x2581   :  { %18638 = vmatprep.subr.bf16.mxu0 %v20879_v0 }
0x2584   :  { %18639 = vmatpush3.bf16.msra.mxu0 %v20025_v11  ;;  %v12463_v11 = vadd.f32 %v16231_v7, %v22638_v24 }
0x2585   :  { %18640 = vmatprep.subr.bf16.mxu0 %v20879_v0 }
0x2586   :  { %vm12468_vm6 = vcmp.ge.f32.partialorder %v12463_v11, 0.0 }
0x2588   :  { %18641 = vmatpush3.bf16.msra.mxu0 %v20026_v14 }
0x2589   :  { %18658 = vmatprep.subr.bf16.mxu0 %v20879_v0 }
0x258b   :  { %18643 = vmatmul.mubr.msk.bf16.vlgmr.msra.gmra.mxu0 %vm11479_vm12, %v22477_v9  ;;  %v20036_v9 = vld [vmem:[#allocation46 + $0xc0] sm:$0xff]  }
0x258c   :  { %18659 = vmatpush3.bf16.msra.mxu0 %v20027_v32  ;;  %18662 = vmatprep.mubr.msk.bf16.mxu0 %vm20880_vm0, %v20879_v0 }
0x258d   :  { %18660 = vmatprep.subr.bf16.mxu0 %v20879_v0  ;;  %18629 = vmatpush3.bf16.msra.mxu1 %v20036_v9  ;;  %v16338_v9 = vld [vmem:[#allocation42 + $0x4] ss:$0 sm:$0xff] }
0x258e   :  { %18646 = vmatprep.subr.bf16.mxu1 %v20879_v0 }
0x2590   :  { %18661 = vmatpush3.bf16.msra.mxu0 %v20028_v8  ;;  %v12469_v8 = vmul.f32 0.2, %v12463_v11 }
0x2591   :  { %18674 = vmatprep.subr.bf16.mxu0 %v20879_v0 }
0x2593   :  { %18663 = vmatmul.mubr.msk.bf16.vlgmr.msra.gmra.mxu0 %vm11607_vm10, %v13659_v30 }
0x2594   :  { %18690 = vmatprep.mubr.msk.bf16.mxu0 %vm20880_vm0, %v20879_v0  ;;  %18675 = vmatpush3.bf16.msra.mxu0 %v20043_v59 }
0x2595   :  { %18676 = vmatprep.subr.bf16.mxu0 %v20879_v0 }
0x2598   :  { %18677 = vmatpush3.bf16.msra.mxu0 %v20044_v47  ;;  %v20066_v47 = vld [vmem:[#allocation49] sm:$0xff]  }
0x2599   :  { %18678 = vmatprep.subr.bf16.mxu0 %v20879_v0 }
0x259c   :  { %18679 = vmatpush3.bf16.msra.mxu0 %v20045_v43 }
0x259d   :  { %18680 = vmatprep.subr.bf16.mxu0 %v20879_v0 }
0x25a0   :  { %18681 = vmatpush3.bf16.msra.mxu0 %v20046_v51 }
0x25a1   :  { %18682 = vmatprep.subr.bf16.mxu0 %v20879_v0 }
0x263b   :  { %v13381_v17 = vpop.f32.mrf.mxu0 }
0x263c   :  { %v13382_v41 = vadd.f32 %v16300_v39, %v13381_v17  ;;  %v12470_v17 = vsel %vm12468_vm6, %v12463_v11, %v12469_v8 }
0x263d   :  { %v18612_v19 = vpop.f32.mrf.mxu0  ;;  %v12471_v24 = vadd.f32 %v12470_v17, %v22580_v27  ;;  %v20058_v27 = vld [vmem:[#allocation49 + $0x20] sm:$0xff]  }
0x263e   :  { %vm13387_vm5 = vcmp.ge.f32.partialorder %v13382_v41, 0.0  ;;  %v13388_v6 = vmul.f32 0.2, %v13382_v41  ;;  %v20081_v17 = vld [vmem:[#allocation49 + $0xe0] sm:$0xff]  }
0x263f   :  { %v13384_v20 = vpop.f32.mrf.mxu0 }
0x2640   :  { %v13389_v21 = vsel %vm13387_vm5, %v13382_v41, %v13388_v6 }
0x2641   :  { %v13390_v57 = vpack.c.bf16 %v13389_v21, %v13389_v21  ;;  %v18613_v23 = vpop.f32.mrf.mxu0 }
0x2643   :  { %18631 = vmatmul.mubr.bf16.vlgmr.msra.gmra.mxu1 %v13390_v57  ;;  %v20052_v57 = vld [vmem:[#allocation49 + $0x38] sm:$0xff]  }
0x2644   :  { %18647 = vmatpush3.bf16.msra.mxu1 %v20037_v22  ;;  %18654 = vmatprep.mubr.msk.bf16.mxu1 %vm20880_vm0, %v20879_v0 }
0x2645   :  { %18648 = vmatprep.subr.bf16.mxu1 %v20879_v0 }
0x2648   :  { %18649 = vmatpush3.bf16.msra.mxu1 %v20038_v26  ;;  %v20053_v26 = vld [vmem:[#allocation49 + $0x70] sm:$0xff]  }
0x2649   :  { %18650 = vmatprep.subr.bf16.mxu1 %v20879_v0 }
0x264b   :  { %v22732_v60 = vpop.f32.mrf.mxu0 }
0x264c   :  { %18651 = vmatpush3.bf16.msra.mxu1 %v20039_v28  ;;  %v12472_v28 = vpack.c.bf16 %v12471_v24, %v12471_v24 }
0x264d   :  { %v18644_v29 = vpop.f32.mrf.mxu0  ;;  %18652 = vmatprep.subr.bf16.mxu1 %v20879_v0 }
0x264e   :  { %v20059_v29 = vld [vmem:[#allocation49 + $0x58] sm:$0xff]  }
0x264f   :  { %v13589_v55 = vpop.f32.mrf.mxu0 }
0x2650   :  { %18653 = vmatpush3.bf16.msra.mxu1 %v20040_v49  ;;  %v20056_v49 = vld [vmem:[#allocation49 + $0x28] sm:$0xff]   ;;  %v16192_v55 = vld [vmem:[#allocation48] ss:$0 sm:$0xff] }
0x2651   :  { %v18645_v35 = vpop.f32.mrf.mxu0  ;;  %18666 = vmatprep.subr.bf16.mxu1 %v20879_v0 }
0x2652   :  { %v11945_v35 = vadd.f32 %v16192_v55, %v22576_v12  ;;  %v20073_v12 = vld [vmem:[#allocation46 + $0x108] sm:$0xff]  }
0x2653   :  { %18655 = vmatmul.mubr.msk.bf16.vlgmr.msra.gmra.mxu1 %vm11479_vm12, %v13509_v33  ;;  %v22738_v36 = vpop.f32.mrf.mxu0  ;;  %v20061_v33 = vld [vmem:[#allocation49 + $0x50] sm:$0xff]  }
0x2654   :  { %18667 = vmatpush3.bf16.msra.mxu1 %v20041_v34  ;;  %18670 = vmatprep.mubr.msk.bf16.mxu1 %vm20880_vm0, %v20879_v0  ;;  %v20060_v34 = vld [vmem:[#allocation49 + $0x18] sm:$0xff]   ;;  %vm11950_vm8 = vcmp.ge.f32.partialorder %v11945_v35, 0.0 }
0x2655   :  { %v18664_v46 = vpop.f32.mrf.mxu0  ;;  %18668 = vmatprep.subr.bf16.mxu1 %v20879_v0 }
0x2656   :  { %v11951_v46 = vmul.f32 0.2, %v11945_v35 }
0x2657   :  { %v13717_v40 = vpop.f32.mrf.mxu0 }
0x2658   :  { %18669 = vmatpush3.bf16.msra.mxu1 %v20042_v45  ;;  %v20063_v45 = vld [vmem:[#allocation49 + $0x48] sm:$0xff]   ;;  %v11952_v59 = vsel %vm11950_vm8, %v11945_v35, %v11951_v46  ;;  %v20098_v35 = vld [vmem:[#allocation49 + $0x100] sm:$0xff]  }
0x2659   :  { %v18665_v31 = vpop.f32.mrf.mxu0  ;;  %18694 = vmatprep.subr.bf16.mxu1 %v20879_v0  ;;  %v20064_v40 = vld [vmem:[#allocation49 + $0x8] sm:$0xff]   ;;  %v11953_v43 = vadd.f32 %v11952_v59, %v22518_v15  ;;  %v20092_v15 = vld [vmem:[#allocation49 + $0x130] sm:$0xff]  }
0x265a   :  { %v20065_v31 = vld [vmem:[#allocation49 + $0x40] sm:$0xff]  }
0x265b   :  { %18671 = vmatmul.mubr.msk.bf16.vlgmr.msra.gmra.mxu1 %vm11607_vm10, %v22494_v61  ;;  %v20047_v61 = vld [vmem:[#allocation43 + $0x118] sm:$0xff]   ;;  %v11954_v51 = vpack.c.bf16 %v11953_v43, %v11953_v43 }
0x265c   :  { %18710 = vmatprep.mubr.msk.bf16.mxu1 %vm20880_vm0, %v20879_v0  ;;  %18683 = vmatpush3.bf16.msra.mxu0 %v20047_v61  ;;  %v20074_v61 = vld [vmem:[#allocation46 + $0x100] sm:$0xff]  }
0x265d   :  { %18684 = vmatprep.subr.bf16.mxu0 %v20879_v0  ;;  %18695 = vmatpush3.bf16.msra.mxu1 %v20067_v3  ;;  %v20095_v3 = vld [vmem:[#allocation49 + $0x118] sm:$0xff]  }
0x265e   :  { %18696 = vmatprep.subr.bf16.mxu1 %v20879_v0 }
0x2660   :  { %18685 = vmatpush3.bf16.msra.mxu0 %v20048_v48  ;;  %v20075_v48 = vld [vmem:[#allocation49 + $0xf8] sm:$0xff]  }
0x2661   :  { %18686 = vmatprep.subr.bf16.mxu0 %v20879_v0  ;;  %18697 = vmatpush3.bf16.msra.mxu1 %v20068_v44  ;;  %v20096_v44 = vld [vmem:[#allocation49 + $0x110] sm:$0xff]  }
0x2662   :  { %18698 = vmatprep.subr.bf16.mxu1 %v20879_v0 }
0x2664   :  { %18687 = vmatpush3.bf16.msra.mxu0 %v20049_v52  ;;  %v20091_v52 = vld [vmem:[#allocation49 + $0x138] sm:$0xff]  }
0x2665   :  { %18688 = vmatprep.subr.bf16.mxu0 %v20879_v0  ;;  %18699 = vmatpush3.bf16.msra.mxu1 %v20069_v54  ;;  %v16309_v54 = vld [vmem:[#allocation48 + $0x3] ss:$0 sm:$0xff] }
0x2666   :  { %18700 = vmatprep.subr.bf16.mxu1 %v20879_v0 }
0x2668   :  { %18689 = vmatpush3.bf16.msra.mxu0 %v20050_v53  ;;  %v20093_v53 = vld [vmem:[#allocation49 + $0x128] sm:$0xff]  }
0x2669   :  { %17321 = vmatprep.subr.bf16.mxu0 %v20051_v10  ;;  %18701 = vmatpush3.bf16.msra.mxu1 %v20070_v56  ;;  %v20094_v10 = vld [vmem:[#allocation49 + $0x120] sm:$0xff]  }
0x266a   :  { %18702 = vmatprep.subr.bf16.mxu1 %v20879_v0 }
0x266d   :  { %18703 = vmatpush3.bf16.msra.mxu1 %v20071_v4 }
0x266e   :  { %18704 = vmatprep.subr.bf16.mxu1 %v20879_v0 }
0x2671   :  { %18705 = vmatpush3.bf16.msra.mxu1 %v20072_v5  ;;  %v16339_v5 = vld [vmem:[#allocation45 + $0x4] ss:$0 sm:$0xff] }
0x2672   :  { %18706 = vmatprep.subr.bf16.mxu1 %v20879_v0 }
0x2675   :  { %18707 = vmatpush3.bf16.msra.mxu1 %v20073_v12  ;;  %v16357_v12 = vld [vmem:[#allocation51] ss:$0 sm:$0xff] }
0x2676   :  { %18708 = vmatprep.subr.bf16.mxu1 %v20879_v0 }
0x2679   :  { %18709 = vmatpush3.bf16.msra.mxu1 %v20074_v61 }
0x267a   :  { %17343 = vmatprep.subr.bf16.mxu1 %v20075_v48 }
0x2703   :  { %v22761_v25 = vpop.f32.mrf.mxu1 }
0x2704   :  { %v13499_v56 = vadd.f32 %v16309_v54, %v22761_v25  ;;  %v20078_v25 = vld [vmem:[#allocation49 + $0xb0] sm:$0xff]  }
0x2705   :  { %v18632_v58 = vpop.f32.mrf.mxu1 }
0x2706   :  { %v13505_v4 = vmul.f32 0.2, %v13499_v56 }
0x2707   :  { %v13501_v62 = vpop.f32.mrf.mxu1 }
0x2709   :  { %v18633_v1 = vpop.f32.mrf.mxu1 }
0x2713   :  { %v13653_v37 = vpop.f32.mrf.mxu1 }
0x2714   :  { %v13654_v32 = vadd.f32 %v13653_v37, %v22732_v60  ;;  %v20055_v60 = vld [vmem:[#allocation49 + $0x68] sm:$0xff]  }
0x2715   :  { %v18656_v14 = vpop.f32.mrf.mxu1 }
0x2716   :  { %v13720_v30 = vadd.f32 %v22738_v36, %v13654_v32  ;;  %v20062_v36 = vld [vmem:[#allocation49 + $0x10] sm:$0xff]  }
0x2717   :  { %v13656_v50 = vpop.f32.mrf.mxu1 }
0x2718   :  { %v20076_v50 = vld [vmem:[#allocation49 + $0xb8] sm:$0xff]  }
0x2719   :  { %v18657_v18 = vpop.f32.mrf.mxu1 }
0x271b   :  { %v13772_v16 = vpop.f32.mrf.mxu1 }
0x271c   :  { %v13778_v39 = vadd.f32 %v13772_v16, %v13720_v30  ;;  %v20077_v30 = vld [vmem:[#allocation49 + $0xf0] sm:$0xff]  }
0x271d   :  { %v18672_v41 = vpop.f32.mrf.mxu1 }
0x271e   :  { %v13787_v19 = vadd.f32 %v16338_v9, %v13778_v39  ;;  %v20079_v9 = vld [vmem:[#allocation49 + $0xe8] sm:$0xff]   ;;  %v20082_v41 = vld [vmem:[#allocation49 + $0xa0] sm:$0xff]  }
0x271f   :  { %v13775_v6 = vpop.f32.mrf.mxu1  ;;  %v20080_v39 = vld [vmem:[#allocation49 + $0xa8] sm:$0xff]  }
0x2720   :  { %vm13788_vm7 = vcmp.ge.f32.partialorder %v13787_v19, 0.0  ;;  %v13789_v20 = vmul.f32 0.2, %v13787_v19  ;;  %v20084_v6 = vld [vmem:[#allocation49 + $0x98] sm:$0xff]  }
0x2721   :  { %v18673_v21 = vpop.f32.mrf.mxu1 }
0x2722   :  { %v22767_v22 = vsel %vm13788_vm7, %v13787_v19, %v13789_v20  ;;  %v16270_v19 = vld [vmem:[#allocation48 + $0x2] ss:$0 sm:$0xff]  ;;  %v20085_v20 = vld [vmem:[#allocation49 + $0xd0] sm:$0xff]  }
0x2723   :  { %v13791_v23 = vpack.c.bf16 %v22767_v22, %v22767_v22  ;;  %v12981_v24 = vadd.f32 %v16270_v19, %v22700_v38  ;;  %v20086_v21 = vld [vmem:[#allocation49 + $0x90] sm:$0xff]  }
0x2725   :  { %18691 = vmatmul.mubr.bf16.vlgmr.msra.gmra.mxu0 %v13791_v23  ;;  %v12987_v23 = vmul.f32 0.2, %v12981_v24  ;;  %vm12986_vm10 = vcmp.ge.f32.partialorder %v12981_v24, 0.0 }
0x2726   :  { %17322 = vmatpush3.bf16.msra.mxu0 %v20052_v57  ;;  %14386 = vmatprep.mubr.bf16.mxu0 %v12472_v28  ;;  %v20087_v57 = vld [vmem:[#allocation49 + $0xc8] sm:$0xff]   ;;  %v20089_v28 = vld [vmem:[#allocation49 + $0xc0] sm:$0xff]  }
0x2727   :  { %17323 = vmatprep.subr.bf16.mxu0 %v20053_v26  ;;  %v20088_v26 = vld [vmem:[#allocation49 + $0x88] sm:$0xff]  }
0x272a   :  { %17324 = vmatpush3.bf16.msra.mxu0 %v20054_v13  ;;  %v12988_v13 = vsel %vm12986_vm10, %v12981_v24, %v12987_v23 }
0x272b   :  { %17325 = vmatprep.subr.bf16.mxu0 %v20055_v60 }
0x272e   :  { %17326 = vmatpush3.bf16.msra.mxu0 %v20056_v49  ;;  %v20090_v49 = vld [vmem:[#allocation49 + $0x80] sm:$0xff]  }
0x272f   :  { %17327 = vmatprep.subr.bf16.mxu0 %v20057_v2  ;;  %v12989_v2 = vadd.f32 %v12988_v13, %v22642_v42 }
0x2731   :  { %v12990_v55 = vpack.c.bf16 %v12989_v2, %v12989_v2 }
0x2732   :  { %17328 = vmatpush3.bf16.msra.mxu0 %v20058_v27 }
0x2733   :  { %17329 = vmatprep.subr.bf16.mxu0 %v20059_v29 }
0x2736   :  { %17330 = vmatpush3.bf16.msra.mxu0 %v20060_v34 }
0x2737   :  { %17331 = vmatprep.subr.bf16.mxu0 %v20061_v33  ;;  %v20097_v33 = vld [vmem:[#allocation49 + $0x108] sm:$0xff]  }
0x273a   :  { %17332 = vmatpush3.bf16.msra.mxu0 %v20062_v36  ;;  %v16348_v36 = vld [vmem:[#allocation48 + $0x4] ss:$0 sm:$0xff] }
0x273b   :  { %17333 = vmatprep.subr.bf16.mxu0 %v20063_v45 }
0x273e   :  { %17334 = vmatpush3.bf16.msra.mxu0 %v20064_v40 }
0x273f   :  { %17335 = vmatprep.subr.bf16.mxu0 %v20065_v31 }
0x2742   :  { %17336 = vmatpush3.bf16.msra.mxu0 %v20066_v47 }
0x2743   :  { %18714 = vmatprep.subr.bf16.mxu0 %v20879_v0 }
0x2745   :  { %14387 = vmatmul.mubr.bf16.vlgmr.msra.gmra.mxu0 %v11954_v51 }
0x2746   :  { %18730 = vmatprep.mubr.msk.bf16.mxu0 %vm20880_vm0, %v20879_v0  ;;  %18715 = vmatpush3.bf16.msra.mxu0 %v20091_v52  ;;  %vm13504_vm0 = vcmp.ge.f32.partialorder %v13499_v56, 0.0 }
0x2747   :  { %18716 = vmatprep.subr.bf16.mxu0 %v20879_v0  ;;  %v13506_v58 = vsel %vm13504_vm0, %v13499_v56, %v13505_v4 }
0x2748   :  { %v13507_v11 = vadd.f32 %v13506_v58, %v22704_v63  ;;  %v20083_v63 = vld [vmem:[#allocation49 + $0xd8] sm:$0xff]  }
0x274a   :  { %18717 = vmatpush3.bf16.msra.mxu0 %v20092_v15  ;;  %v13508_v16 = vpack.c.bf16 %v13507_v11, %v13507_v11 }
0x274b   :  { %18718 = vmatprep.subr.bf16.mxu0 %v20879_v0 }
0x274e   :  { %18719 = vmatpush3.bf16.msra.mxu0 %v20093_v53 }
0x274f   :  { %18720 = vmatprep.subr.bf16.mxu0 %v20879_v0 }
0x2752   :  { %18721 = vmatpush3.bf16.msra.mxu0 %v20094_v10 }
0x2753   :  { %18722 = vmatprep.subr.bf16.mxu0 %v20879_v0 }
0x2756   :  { %18723 = vmatpush3.bf16.msra.mxu0 %v20095_v3 }
0x2757   :  { %18724 = vmatprep.subr.bf16.mxu0 %v20879_v0 }
0x275a   :  { %18725 = vmatpush3.bf16.msra.mxu0 %v20096_v44 }
0x275b   :  { %18726 = vmatprep.subr.bf16.mxu0 %v20879_v0 }
0x275e   :  { %18727 = vmatpush3.bf16.msra.mxu0 %v20097_v33 }
0x275f   :  { %18728 = vmatprep.subr.bf16.mxu0 %v20879_v0 }
0x2762   :  { %18729 = vmatpush3.bf16.msra.mxu0 %v20098_v35 }
0x27e5   :  { %v13899_v62 = vpop.f32.mrf.mxu0 }
0x27e6   :  { %v13900_v1 = vadd.f32 %v16339_v5, %v13899_v62 }
0x27e7   :  { %v18692_v7 = vpop.f32.mrf.mxu0 }
0x27e8   :  { %vm13905_vm9 = vcmp.ge.f32.partialorder %v13900_v1, 0.0  ;;  %v13906_v37 = vmul.f32 0.2, %v13900_v1 }
0x27e9   :  { %v13902_v14 = vpop.f32.mrf.mxu0 }
0x27ea   :  { %v13907_v32 = vsel %vm13905_vm9, %v13900_v1, %v13906_v37 }
0x27eb   :  { %v13908_v8 = vpack.c.bf16 %v13907_v32, %v13907_v32  ;;  %v18693_v18 = vpop.f32.mrf.mxu0 }
0x27ed   :  { %18711 = vmatmul.mubr.bf16.vlgmr.msra.gmra.mxu1 %v13908_v8 }
0x27ee   :  { %17344 = vmatpush3.bf16.msra.mxu1 %v20076_v50  ;;  %14426 = vmatprep.mubr.bf16.mxu1 %v13508_v16 }
0x27ef   :  { %17345 = vmatprep.subr.bf16.mxu1 %v20077_v30 }
0x27f2   :  { %17346 = vmatpush3.bf16.msra.mxu1 %v20078_v25 }
0x27f3   :  { %17347 = vmatprep.subr.bf16.mxu1 %v20079_v9 }
0x27f6   :  { %17348 = vmatpush3.bf16.msra.mxu1 %v20080_v39 }
0x27f7   :  { %17349 = vmatprep.subr.bf16.mxu1 %v20081_v17 }
0x27fa   :  { %17350 = vmatpush3.bf16.msra.mxu1 %v20082_v41 }
0x27fb   :  { %17351 = vmatprep.subr.bf16.mxu1 %v20083_v63 }
0x27fe   :  { %17352 = vmatpush3.bf16.msra.mxu1 %v20084_v6 }
0x27ff   :  { %17353 = vmatprep.subr.bf16.mxu1 %v20085_v20 }
0x2802   :  { %17354 = vmatpush3.bf16.msra.mxu1 %v20086_v21 }
0x2803   :  { %17355 = vmatprep.subr.bf16.mxu1 %v20087_v57 }
0x2805   :  { %v17337_v60 = vpop.f32.mrf.mxu0 }
0x2806   :  { %17356 = vmatpush3.bf16.msra.mxu1 %v20088_v26 }
0x2807   :  { %v17338_v27 = vpop.f32.mrf.mxu0  ;;  %17357 = vmatprep.subr.bf16.mxu1 %v20089_v28 }
0x2808   :  { %v17339_v29 = vadd.f32 %v17338_v27, %v17337_v60 }
0x2809   :  { %v17340_v38 = vpop.f32.mrf.mxu0 }
0x280a   :  { %17358 = vmatpush3.bf16.msra.mxu1 %v20090_v49  ;;  %v14389_v0 = vadd.f32 %v17339_v29, %v16357_v12 }
0x280b   :  { %v17341_v34 = vpop.f32.mrf.mxu0 }
0x280d   :  { %14427 = vmatmul.mubr.bf16.vlgmr.msra.gmra.mxu1 %v12990_v55 }
0x28ad   :  { %v14016_v45 = vpop.f32.mrf.mxu1 }
0x28ae   :  { %v14017_v46 = vadd.f32 %v16348_v36, %v14016_v45 }
0x28af   :  { %v18712_v40 = vpop.f32.mrf.mxu1 }
0x28b0   :  { %vm14022_vm11 = vcmp.ge.f32.partialorder %v14017_v46, 0.0  ;;  %v14023_v42 = vmul.f32 0.2, %v14017_v46 }
0x28b1   :  { %v14019_v31 = vpop.f32.mrf.mxu1 }
0x28b2   :  { %v14024_v59 = vsel %vm14022_vm11, %v14017_v46, %v14023_v42 }
0x28b3   :  { %v14025_v47 = vadd.f32 %v14024_v59, %v22767_v22  ;;  %v18713_v43 = vpop.f32.mrf.mxu1 }
0x28b5   :  { %v14026_v51 = vpack.c.bf16 %v14025_v47, %v14025_v47 }
0x28b7   :  { %18731 = vmatmul.mubr.bf16.vlgmr.msra.gmra.mxu0 %v14026_v51 }
0x28cd   :  { %v17359_v61 = vpop.f32.mrf.mxu1 }
0x28cf   :  { %v17360_v48 = vpop.f32.mrf.mxu1 }
0x28d0   :  { %v17361_v52 = vadd.f32 %v17360_v48, %v17359_v61 }
0x28d1   :  { %v17362_v15 = vpop.f32.mrf.mxu1 }
0x28d2   :  { %v14429_v53 = vadd.f32 %v17361_v52, %v14389_v0 }
0x28d3   :  { %v17363_v10 = vpop.f32.mrf.mxu1 }
0x2977   :  { %v14468_v3 = vpop.f32.mrf.mxu0 }
0x2978   :  { %v14469_v44 = vadd.f32 %v14468_v3, %v14429_v53 }
0x2979   :  { %v18732_v54 = vpop.f32.mrf.mxu0 }
0x297a   :  { %14474 = vst [vmem:[%s21111_s29] sm:$0x3] %v14469_v44 }
0x297b   :  { %v14471_v56 = vpop.f32.mrf.mxu0 }
0x297d   :  { %v18733_v4 = vpop.f32.mrf.mxu0 }
0x297e   :  { %14479 = vsyncpa [#allocation3], 1 }
0x297f   :  { %14480 = vsyncpa [#allocation5], 1 }
0x2980   :  { %14481 = vsyncpa [#allocation8], 1 }
0x2981   :  { %14482 = vsyncpa [#allocation11], 1 }
0x2982   :  { %14483 = vsyncpa [#allocation14], 1 }
0x2983   :  { %14484 = vsyncpa [#allocation17], 1 }
0x2984   :  { %14485 = vsyncpa [#allocation20], 1 }
0x2985   :  { %14486 = vsyncpa [#allocation23], 1 }
0x2986   :  { %14487 = vsyncpa [#allocation26], 1 }
0x2987   :  { %14488 = vsyncpa [#allocation29], 1 }
0x2988   :  { %14489 = vsyncpa [#allocation32], 1 }
0x2989   :  { %14490 = vsyncpa [#allocation35], 1 }
0x298a   :  { %14491 = vsyncpa [#allocation38], 1 }
0x298b   :  { %14492 = vsyncpa [#allocation41], 1 }
0x298c   :  { %14493 = vsyncpa [#allocation44], 1 }
0x298d   :  { %14494 = vsyncpa [#allocation47], 1 }
0x298e   :  { %14495 = vsyncpa [#allocation50], 1 }

</bundles_post_ra>
